<compile_context>
chip_gen: v5e
topology: v5e:2x2
jax: 0.10.0
libtpu: 0.0.40
codegen_flags: <defaults>
</compile_context>

<pallas_src>
import functools
import math

import jax
import jax.numpy as jnp
from jax import lax
from jax.experimental import pallas as pl
from jax.experimental.pallas import tpu as pltpu

LANE = 128  # channel / feature padding for lane-dense vregs and stores


def _round_up(x, m):
    return (x + m - 1) // m * m


def _pick_batch_tile(B, max_tb=8):
    """Largest TB in {1,2,4,8} dividing B while keeping >=4 grid steps
    (so each v7x TensorCore still gets >=2 steps of DMA/compute overlap)."""
    tb = 1
    for cand in (2, 4, 8):
        if cand <= max_tb and B % cand == 0 and B // cand >= 4:
            tb = cand
    return tb


# ---------------------------------------------------------------------------
# Kernel 1: conv1 (im2col matmul) + bias + ReLU + maxpool 2x2
# ---------------------------------------------------------------------------
def _conv1_kernel(p_ref, w_ref, b_ref, o_ref, st_ref, *, TB, Ho, Wo):
    """p_ref:(TB,Ho*Wo,K) bf16 patches; w_ref:(K,C) bf16; b_ref:(1,C) f32;
    o_ref:(TB,(Ho//2)*(Wo//2),C) bf16; st_ref:((Ho//2)*Wo,C) f32 staging.

    For pooled row `po` the two conv rows (2po, 2po+1) are one contiguous
    2*Wo-row patch slab -> a single MXU matmul; the (2Wo,C) f32 result stays
    in registers, only the per-row max is staged.  The final column subsample
    is ONE stride-2 load, then ReLU and ONE full lane-dense store per image.
    """
    Po, Qo = Ho // 2, Wo // 2
    w = w_ref[...]
    bias = b_ref[...]
    for t in range(TB):
        for po in range(Po):
            v = jnp.dot(p_ref[t, pl.ds(2 * po * Wo, 2 * Wo), :], w,
                        preferred_element_type=jnp.float32) + bias       # (2Wo,C)
            rm = jnp.maximum(v[:Wo], v[Wo:])                             # row-pair max
            sh = jnp.concatenate([rm[1:], rm[:1]], axis=0)               # col j+1 (filler lands at odd j, unused)
            st_ref[pl.ds(po * Wo, Wo), :] = jnp.maximum(rm, sh)
        pooled = jnp.maximum(st_ref[pl.ds(0, Po * Qo, stride=2), :], 0.0)
        o_ref[t] = pooled.astype(o_ref.dtype)


def conv1_relu_pool(patches, w, b, *, Ho, Wo):
    """patches:(B,Ho*Wo,K) bf16; w:(K,C) bf16; b:(1,C) f32 -> (B,(Ho//2)*(Wo//2),C) bf16."""
    B, M, K = patches.shape
    C = w.shape[1]
    Po, Qo = Ho // 2, Wo // 2
    TB = _pick_batch_tile(B)
    kern = functools.partial(_conv1_kernel, TB=TB, Ho=Ho, Wo=Wo)
    return pl.pallas_call(
        kern,
        out_shape=jax.ShapeDtypeStruct((B, Po * Qo, C), jnp.bfloat16),
        grid=(B // TB,),
        in_specs=[
            pl.BlockSpec((TB, M, K), lambda i: (i, 0, 0)),
            pl.BlockSpec((K, C), lambda i: (0, 0)),
            pl.BlockSpec((1, C), lambda i: (0, 0)),
        ],
        out_specs=pl.BlockSpec((TB, Po * Qo, C), lambda i: (i, 0, 0)),
        scratch_shapes=[pltpu.VMEM((Po * Wo, C), jnp.float32)],
        compiler_params=pltpu.CompilerParams(
            dimension_semantics=("parallel",),
            vmem_limit_bytes=32 * 1024 * 1024),
    )(patches, w, b)


# ---------------------------------------------------------------------------
# Kernel 2: conv2 (25 shifted-slice taps, chunked f32 acc) + bias + ReLU + pool
# ---------------------------------------------------------------------------
def _conv2_kernel(x_ref, w_ref, b_ref, o_ref, wide_ref, st_ref, *,
                  TB, H, W, KH, KW, chunks):
    """x_ref:(TB,H*W,Cin) bf16; w_ref:(KH*KW,Cin,C) bf16; b_ref:(1,C) f32;
    o_ref:(TB,Po*Qo,C) bf16; wide_ref:(Mwide+8,C) f32; st_ref:(Po*Wo,C) f32.

    With the image flattened to (H*W,Cin), the rows feeding output pixel
    m = ho*W + wo for tap (kh,kw) are ONE contiguous slice at offset kh*W+kw,
    so each tap is a single MXU matmul.  The f32 accumulation is strip-mined
    over `chunks` (<=72 rows) so it stays vreg-resident; each chunk is stored
    to the wide scratch exactly once.  Rows with wo >= Wo are never read by
    the pooling epilogue.
    """
    Ho, Wo = H - KH + 1, W - KW + 1
    Po, Qo = Ho // 2, Wo // 2
    bias = b_ref[...]
    for t in range(TB):
        for (m0, cm) in chunks:
            acc = None
            for kh in range(KH):
                for kw in range(KW):
                    lhs = x_ref[t, pl.ds(kh * W + kw + m0, cm), :]
                    d = jnp.dot(lhs, w_ref[kh * KW + kw],
                                preferred_element_type=jnp.float32)
                    acc = d if acc is None else acc + d
            wide_ref[pl.ds(m0, cm), :] = acc + bias
        # Fused 2x2/stride-2 max-pool + ReLU: contiguous loads, one max tree
        # per pool row, one strided read + one lane-dense store per image.
        for po in range(Po):
            r0 = 2 * po * W
            top = wide_ref[pl.ds(r0, Wo + 1), :]
            bot = wide_ref[pl.ds(r0 + W, Wo + 1), :]
            rm = jnp.maximum(top, bot)
            st_ref[pl.ds(po * Wo, Wo), :] = jnp.maximum(rm[:Wo], rm[1:])
        pooled = jnp.maximum(st_ref[pl.ds(0, Po * Qo, stride=2), :], 0.0)
        o_ref[t] = pooled.astype(o_ref.dtype)


def conv2_relu_pool(x, w, b, *, H, W, KH=5, KW=5):
    """x:(B,H*W,Cin) bf16; w:(KH*KW,Cin,C) bf16; b:(1,C) f32 -> (B,Po*Qo,C) bf16."""
    B, HW, Cin = x.shape
    assert HW == H * W and w.shape[1] == Cin
    C = w.shape[2]
    Ho, Wo = H - KH + 1, W - KW + 1
    Po, Qo = Ho // 2, Wo // 2
    Mwide = (Ho - 1) * W + Wo
    n_ch = max(1, math.ceil(Mwide / 96))                 # chunks of ~<=96..128 rows
    CM = _round_up(math.ceil(Mwide / n_ch), 8)           # 8-aligned chunk starts
    chunks = tuple((m0, min(CM, Mwide - m0)) for m0 in range(0, Mwide, CM))
    TB = _pick_batch_tile(B)
    kern = functools.partial(_conv2_kernel, TB=TB, H=H, W=W, KH=KH, KW=KW,
                             chunks=chunks)
    return pl.pallas_call(
        kern,
        out_shape=jax.ShapeDtypeStruct((B, Po * Qo, C), jnp.bfloat16),
        grid=(B // TB,),
        in_specs=[
            pl.BlockSpec((TB, HW, Cin), lambda i: (i, 0, 0)),
            pl.BlockSpec((KH * KW, Cin, C), lambda i: (0, 0, 0)),
            pl.BlockSpec((1, C), lambda i: (0, 0)),
        ],
        out_specs=pl.BlockSpec((TB, Po * Qo, C), lambda i: (i, 0, 0)),
        scratch_shapes=[pltpu.VMEM((Mwide + 8, C), jnp.float32),
                        pltpu.VMEM((Po * Wo, C), jnp.float32)],
        compiler_params=pltpu.CompilerParams(
            dimension_semantics=("parallel",),
            vmem_limit_bytes=32 * 1024 * 1024),
    )(x, w, b)


# ---------------------------------------------------------------------------
# Kernel 3: fused FC stack  fc1+ReLU -> fc2+ReLU -> fc3
# ---------------------------------------------------------------------------
def _fc_stack_kernel(x_ref, w1_ref, b1_ref, w2_ref, b2_ref, w3_ref, b3_ref, o_ref):
    h = jnp.dot(x_ref[...], w1_ref[...], preferred_element_type=jnp.float32)
    h = jnp.maximum(h + b1_ref[...], 0.0)
    h = jnp.dot(h.astype(jnp.bfloat16), w2_ref[...],
                preferred_element_type=jnp.float32)
    h = jnp.maximum(h + b2_ref[...], 0.0)
    h = jnp.dot(h.astype(jnp.bfloat16), w3_ref[...],
                preferred_element_type=jnp.float32)
    o_ref[...] = (h + b3_ref[...]).astype(o_ref.dtype)


def fc_stack(x, w1, b1, w2, b2, w3, b3):
    """x:(B,K) bf16, B a multiple of 8; weights bf16; biases (1,128) f32."""
    B, K = x.shape
    N1, N2, N3 = w1.shape[1], w2.shape[1], w3.shape[1]
    TM = min(128, B)                              # multiple of 8 by construction
    return pl.pallas_call(
        _fc_stack_kernel,
        out_shape=jax.ShapeDtypeStruct((B, N3), jnp.float32),
        grid=(pl.cdiv(B, TM),),
        in_specs=[
            pl.BlockSpec((TM, K), lambda i: (i, 0)),
            pl.BlockSpec((K, N1), lambda i: (0, 0)),
            pl.BlockSpec((1, N1), lambda i: (0, 0)),
            pl.BlockSpec((N1, N2), lambda i: (0, 0)),
            pl.BlockSpec((1, N2), lambda i: (0, 0)),
            pl.BlockSpec((N2, N3), lambda i: (0, 0)),
            pl.BlockSpec((1, N3), lambda i: (0, 0)),
        ],
        out_specs=pl.BlockSpec((TM, N3), lambda i: (i, 0)),
        compiler_params=pltpu.CompilerParams(
            dimension_semantics=("parallel",),
            vmem_limit_bytes=32 * 1024 * 1024),
    )(x, w1, b1, w2, b2, w3, b3)


# ---------------------------------------------------------------------------
# Parameters: PyTorch-layout init + one-time re-layout into kernel format
# ---------------------------------------------------------------------------
def init_params(key):
    """PyTorch-style U(-1/sqrt(fan_in), 1/sqrt(fan_in)) init, PyTorch layouts."""
    def uinit(k, shape, fan_in):
        bound = 1.0 / float(fan_in) ** 0.5
        return jax.random.uniform(k, shape, jnp.float32, -bound, bound)

    ks = jax.random.split(key, 10)
    p = {}
    p["w1"], p["b1"] = uinit(ks[0], (32, 3, 5, 5), 75), uinit(ks[1], (32,), 75)
    p["w2"], p["b2"] = uinit(ks[2], (64, 32, 5, 5), 800), uinit(ks[3], (64,), 800)
    p["fw1"], p["fb1"] = uinit(ks[4], (1600, 120), 1600), uinit(ks[5], (120,), 1600)
    p["fw2"], p["fb2"] = uinit(ks[6], (120, 84), 120), uinit(ks[7], (84,), 120)
    p["fw3"], p["fb3"] = uinit(ks[8], (84, 2), 84), uinit(ks[9], (2,), 84)
    return p


def _prep_conv_w(w, cin_pad, cout_pad):
    O, Cin, KH, KW = w.shape
    wk = jnp.transpose(w, (2, 3, 1, 0)).reshape(KH * KW, Cin, O)  # (tap, cin, cout)
    wk = jnp.pad(wk, ((0, 0), (0, cin_pad - Cin), (0, cout_pad - O)))
    return wk.astype(jnp.bfloat16)


def _prep_bias(b, n_pad):
    return jnp.pad(b, (0, n_pad - b.shape[0])).reshape(1, n_pad).astype(jnp.float32)


def prepare_params(p):
    """Zero-pad to 128 lanes, cast MXU operands to bf16, absorb layout permutes."""
    kp = {}
    # conv1 as an im2col matmul: rows ordered (kh, kw, cin) to match the patch
    # extraction, cols = output channels; padded (75->128, 32->128).
    w1 = jnp.transpose(p["w1"], (2, 3, 1, 0)).reshape(5 * 5 * 3, 32)
    kp["w1"] = jnp.pad(w1, ((0, LANE - 75), (0, LANE - 32))).astype(jnp.bfloat16)
    kp["b1"] = _prep_bias(p["b1"], LANE)
    kp["w2"] = _prep_conv_w(p["w2"], LANE, LANE)          # (25, 128, 128)
    kp["b2"] = _prep_bias(p["b2"], LANE)
    # fc1: absorb PyTorch's NCHW flatten order (c*25 + s) into the weight rows,
    # matching the kernels' (s*128 + c) flatten of the padded NHWC conv output.
    fw1 = p["fw1"].reshape(64, 25, 120).transpose(1, 0, 2)          # (s, c, n)
    fw1 = jnp.pad(fw1, ((0, 0), (0, LANE - 64), (0, LANE - 120)))
    kp["fw1"] = fw1.reshape(25 * LANE, LANE).astype(jnp.bfloat16)
    kp["fb1"] = _prep_bias(p["fb1"], LANE)
    kp["fw2"] = jnp.pad(p["fw2"], ((0, LANE - 120), (0, LANE - 84))).astype(jnp.bfloat16)
    kp["fb2"] = _prep_bias(p["fb2"], LANE)
    kp["fw3"] = jnp.pad(p["fw3"], ((0, LANE - 84), (0, LANE - 2))).astype(jnp.bfloat16)
    kp["fb3"] = _prep_bias(p["fb3"], LANE)
    return kp


# ---------------------------------------------------------------------------
# Forward pass (matches CNN_Cifar.forward)
# ---------------------------------------------------------------------------
def _im2col_nhwc(x_nhwc, KH, KW):
    B, H, W, C = x_nhwc.shape
    Ho, Wo = H - KH + 1, W - KW + 1
    cols = [x_nhwc[:, kh:kh + Ho, kw:kw + Wo, :]
            for kh in range(KH) for kw in range(KW)]
    p = jnp.stack(cols, axis=3)                   # (B, Ho, Wo, KH*KW, C)
    return p.reshape(B, Ho * Wo, KH * KW * C)     # feature index = tap*C + c


def cnn_cifar_forward(x_nchw, kp):
    B = x_nchw.shape[0]
    x = jnp.transpose(x_nchw, (0, 2, 3, 1))                          # NHWC
    patches = _im2col_nhwc(x, 5, 5)                                  # (B, 784, 75)
    patches = jnp.pad(patches, ((0, 0), (0, 0), (0, LANE - patches.shape[-1])))
    patches = patches.astype(jnp.bfloat16)
    h = conv1_relu_pool(patches, kp["w1"], kp["b1"], Ho=28, Wo=28)   # (B, 196, 128)
    h = conv2_relu_pool(h, kp["w2"], kp["b2"], H=14, W=14)           # (B,  25, 128)
    flat = h.reshape(B, 25 * LANE)                                   # free reshape
    B_pad = _round_up(B, 8)                  # sublane-packed LHS rows for the FC
    if B_pad != B:
        flat = jnp.pad(flat, ((0, B_pad - B), (0, 0)))
    logits = fc_stack(flat, kp["fw1"], kp["fb1"], kp["fw2"], kp["fb2"],
                      kp["fw3"], kp["fb3"])                          # (B_pad, 128)
    return logits[:B, :2]                                            # drop padding


# ---------------------------------------------------------------------------
# Pure-JAX f32 reference (for a loose-tolerance self-check)
# ---------------------------------------------------------------------------
def _reference_forward(x_nchw, p):
    dn = ("NCHW", "OIHW", "NCHW")
    hi = lax.Precision.HIGHEST
    y = lax.conv_general_dilated(x_nchw, p["w1"], (1, 1), "VALID",
                                 dimension_numbers=dn, precision=hi)
    y = jax.nn.relu(y + p["b1"][None, :, None, None])
    y = lax.reduce_window(y, -jnp.inf, lax.max, (1, 1, 2, 2), (1, 1, 2, 2), "VALID")
    y = lax.conv_general_dilated(y, p["w2"], (1, 1), "VALID",
                                 dimension_numbers=dn, precision=hi)
    y = jax.nn.relu(y + p["b2"][None, :, None, None])
    y = lax.reduce_window(y, -jnp.inf, lax.max, (1, 1, 2, 2), (1, 1, 2, 2), "VALID")
    y = y.reshape(y.shape[0], -1)
    y = jax.nn.relu(jnp.dot(y, p["fw1"], precision=hi) + p["fb1"])
    y = jax.nn.relu(jnp.dot(y, p["fw2"], precision=hi) + p["fb2"])
    return jnp.dot(y, p["fw3"], precision=hi) + p["fb3"]


if __name__ == "__main__":
    key = jax.random.PRNGKey(0)
    pkey, xkey = jax.random.split(key)
    raw_params = init_params(pkey)
    kparams = prepare_params(raw_params)
    # fc1 = Linear(64*5*5, ...) forces 3x32x32 inputs; batch = 2.
    x = jax.random.normal(xkey, (2, 3, 32, 32), dtype=jnp.float32)

    out = jax.block_until_ready(jax.jit(cnn_cifar_forward)(x, kparams))
    assert out.shape == (2, 2) and out.dtype == jnp.float32
    assert bool(jnp.all(jnp.isfinite(out)))

    # Loose tolerance: kernel uses bf16 MXU operands with f32 accumulation.
    ref = _reference_forward(x, raw_params)
    max_err = float(jnp.max(jnp.abs(out - ref)))
    assert max_err < 2e-2, f"max |kernel - reference| = {max_err}"
    print("KERNEL_OK")
</pallas_src>

<mosaic_0001>
module attributes {stable_mosaic.version = 11 : i64} {
  func.func @_conv1_kernel(%arg0: i32, %arg1: memref<1x784x128xbf16, #tpu.memory_space<vmem>>, %arg2: memref<128x128xbf16, #tpu.memory_space<vmem>>, %arg3: memref<1x128xf32, #tpu.memory_space<vmem>>, %arg4: memref<1x196x128xbf16, #tpu.memory_space<vmem>>, %arg5: memref<392x128xf32, #tpu.memory_space<vmem>>) attributes {dimension_semantics = [#tpu.dimension_semantics<parallel>], iteration_bounds = array<i64: 2>, scalar_prefetch = 0 : i64, scratch_operands = 1 : i64, tpu.core_type = #tpu.core_type<tc>, window_params = [{transform_indices = @transform_0, window_bounds = array<i64: 1, 784, 128>}, {pipeline_mode = #tpu.pipeline_mode<synchronous>, transform_indices = @transform_1, window_bounds = array<i64: 128, 128>}, {pipeline_mode = #tpu.pipeline_mode<synchronous>, transform_indices = @transform_2, window_bounds = array<i64: 1, 128>}, {transform_indices = @transform_3, window_bounds = array<i64: 1, 196, 128>}]} {
    %c0 = arith.constant 0 : index
    %c0_0 = arith.constant 0 : index
    %0 = vector.load %arg2[%c0, %c0_0] : memref<128x128xbf16, #tpu.memory_space<vmem>>, vector<128x128xbf16>
    %c0_1 = arith.constant 0 : index
    %c0_2 = arith.constant 0 : index
    %1 = vector.load %arg3[%c0_1, %c0_2] : memref<1x128xf32, #tpu.memory_space<vmem>>, vector<1x128xf32>
    %c0_3 = arith.constant 0 : index
    %c0_4 = arith.constant 0 : index
    %c0_5 = arith.constant 0 : index
    %2 = vector.load %arg1[%c0_3, %c0_4, %c0_5] : memref<1x784x128xbf16, #tpu.memory_space<vmem>>, vector<1x56x128xbf16>
    %3 = vector.shape_cast %2 : vector<1x56x128xbf16> to vector<56x128xbf16>
    %cst = arith.constant dense<0.000000e+00> : vector<56x128xf32>
    %4 = tpu.matmul %3, %0, %cst {dimension_numbers = #tpu.dot_dimension_numbers<[1], [0], [0], [1], [0, 0, 1, 1], [], []>} : vector<56x128xbf16>, vector<128x128xbf16>, vector<56x128xf32> -> vector<56x128xf32>
    %5 = vector.broadcast %1 : vector<1x128xf32> to vector<56x128xf32>
    %6 = arith.addf %4, %5 : vector<56x128xf32>
    %7 = vector.extract_strided_slice %6 {offsets = [0, 0], sizes = [28, 128], strides = [1, 1]} : vector<56x128xf32> to vector<28x128xf32>
    %8 = vector.extract_strided_slice %6 {offsets = [28, 0], sizes = [28, 128], strides = [1, 1]} : vector<56x128xf32> to vector<28x128xf32>
    %9 = arith.maximumf %7, %8 : vector<28x128xf32>
    %10 = vector.extract_strided_slice %9 {offsets = [1, 0], sizes = [27, 128], strides = [1, 1]} : vector<28x128xf32> to vector<27x128xf32>
    %11 = vector.extract_strided_slice %9 {offsets = [0, 0], sizes = [1, 128], strides = [1, 1]} : vector<28x128xf32> to vector<1x128xf32>
    %12 = tpu.concatenate %10, %11 in 0 : vector<27x128xf32>, vector<1x128xf32> -> vector<28x128xf32>
    %13 = arith.maximumf %9, %12 : vector<28x128xf32>
    %c0_6 = arith.constant 0 : index
    %c0_7 = arith.constant 0 : index
    %14 = vector.load %arg5[%c0_6, %c0_7] : memref<392x128xf32, #tpu.memory_space<vmem>>, vector<28x128xf32>
    tpu.vector_store %arg5[%c0_6, %c0_7], %13 {strides = array<i32>} : memref<392x128xf32, #tpu.memory_space<vmem>>, vector<28x128xf32>,
    %c0_8 = arith.constant 0 : index
    %c56 = arith.constant 56 : index
    %c0_9 = arith.constant 0 : index
    %15 = vector.load %arg1[%c0_8, %c56, %c0_9] : memref<1x784x128xbf16, #tpu.memory_space<vmem>>, vector<1x56x128xbf16>
    %16 = vector.shape_cast %15 : vector<1x56x128xbf16> to vector<56x128xbf16>
    %cst_10 = arith.constant dense<0.000000e+00> : vector<56x128xf32>
    %17 = tpu.matmul %16, %0, %cst_10 {dimension_numbers = #tpu.dot_dimension_numbers<[1], [0], [0], [1], [0, 0, 1, 1], [], []>} : vector<56x128xbf16>, vector<128x128xbf16>, vector<56x128xf32> -> vector<56x128xf32>
    %18 = vector.broadcast %1 : vector<1x128xf32> to vector<56x128xf32>
    %19 = arith.addf %17, %18 : vector<56x128xf32>
    %20 = vector.extract_strided_slice %19 {offsets = [0, 0], sizes = [28, 128], strides = [1, 1]} : vector<56x128xf32> to vector<28x128xf32>
    %21 = vector.extract_strided_slice %19 {offsets = [28, 0], sizes = [28, 128], strides = [1, 1]} : vector<56x128xf32> to vector<28x128xf32>
    %22 = arith.maximumf %20, %21 : vector<28x128xf32>
    %23 = vector.extract_strided_slice %22 {offsets = [1, 0], sizes = [27, 128], strides = [1, 1]} : vector<28x128xf32> to vector<27x128xf32>
    %24 = vector.extract_strided_slice %22 {offsets = [0, 0], sizes = [1, 128], strides = [1, 1]} : vector<28x128xf32> to vector<1x128xf32>
    %25 = tpu.concatenate %23, %24 in 0 : vector<27x128xf32>, vector<1x128xf32> -> vector<28x128xf32>
    %26 = arith.maximumf %22, %25 : vector<28x128xf32>
    %c28 = arith.constant 28 : index
    %c0_11 = arith.constant 0 : index
    %27 = vector.load %arg5[%c28, %c0_11] : memref<392x128xf32, #tpu.memory_space<vmem>>, vector<28x128xf32>
    tpu.vector_store %arg5[%c28, %c0_11], %26 {strides = array<i32>} : memref<392x128xf32, #tpu.memory_space<vmem>>, vector<28x128xf32>,
    %c0_12 = arith.constant 0 : index
    %c112 = arith.constant 112 : index
    %c0_13 = arith.constant 0 : index
    %28 = vector.load %arg1[%c0_12, %c112, %c0_13] : memref<1x784x128xbf16, #tpu.memory_space<vmem>>, vector<1x56x128xbf16>
    %29 = vector.shape_cast %28 : vector<1x56x128xbf16> to vector<56x128xbf16>
    %cst_14 = arith.constant dense<0.000000e+00> : vector<56x128xf32>
    %30 = tpu.matmul %29, %0, %cst_14 {dimension_numbers = #tpu.dot_dimension_numbers<[1], [0], [0], [1], [0, 0, 1, 1], [], []>} : vector<56x128xbf16>, vector<128x128xbf16>, vector<56x128xf32> -> vector<56x128xf32>
    %31 = vector.broadcast %1 : vector<1x128xf32> to vector<56x128xf32>
    %32 = arith.addf %30, %31 : vector<56x128xf32>
    %33 = vector.extract_strided_slice %32 {offsets = [0, 0], sizes = [28, 128], strides = [1, 1]} : vector<56x128xf32> to vector<28x128xf32>
    %34 = vector.extract_strided_slice %32 {offsets = [28, 0], sizes = [28, 128], strides = [1, 1]} : vector<56x128xf32> to vector<28x128xf32>
    %35 = arith.maximumf %33, %34 : vector<28x128xf32>
    %36 = vector.extract_strided_slice %35 {offsets = [1, 0], sizes = [27, 128], strides = [1, 1]} : vector<28x128xf32> to vector<27x128xf32>
    %37 = vector.extract_strided_slice %35 {offsets = [0, 0], sizes = [1, 128], strides = [1, 1]} : vector<28x128xf32> to vector<1x128xf32>
    %38 = tpu.concatenate %36, %37 in 0 : vector<27x128xf32>, vector<1x128xf32> -> vector<28x128xf32>
    %39 = arith.maximumf %35, %38 : vector<28x128xf32>
    %c56_15 = arith.constant 56 : index
    %c0_16 = arith.constant 0 : index
    %40 = vector.load %arg5[%c56_15, %c0_16] : memref<392x128xf32, #tpu.memory_space<vmem>>, vector<28x128xf32>
    tpu.vector_store %arg5[%c56_15, %c0_16], %39 {strides = array<i32>} : memref<392x128xf32, #tpu.memory_space<vmem>>, vector<28x128xf32>,
    %c0_17 = arith.constant 0 : index
    %c168 = arith.constant 168 : index
    %c0_18 = arith.constant 0 : index
    %41 = vector.load %arg1[%c0_17, %c168, %c0_18] : memref<1x784x128xbf16, #tpu.memory_space<vmem>>, vector<1x56x128xbf16>
    %42 = vector.shape_cast %41 : vector<1x56x128xbf16> to vector<56x128xbf16>
    %cst_19 = arith.constant dense<0.000000e+00> : vector<56x128xf32>
    %43 = tpu.matmul %42, %0, %cst_19 {dimension_numbers = #tpu.dot_dimension_numbers<[1], [0], [0], [1], [0, 0, 1, 1], [], []>} : vector<56x128xbf16>, vector<128x128xbf16>, vector<56x128xf32> -> vector<56x128xf32>
    %44 = vector.broadcast %1 : vector<1x128xf32> to vector<56x128xf32>
    %45 = arith.addf %43, %44 : vector<56x128xf32>
    %46 = vector.extract_strided_slice %45 {offsets = [0, 0], sizes = [28, 128], strides = [1, 1]} : vector<56x128xf32> to vector<28x128xf32>
    %47 = vector.extract_strided_slice %45 {offsets = [28, 0], sizes = [28, 128], strides = [1, 1]} : vector<56x128xf32> to vector<28x128xf32>
    %48 = arith.maximumf %46, %47 : vector<28x128xf32>
    %49 = vector.extract_strided_slice %48 {offsets = [1, 0], sizes = [27, 128], strides = [1, 1]} : vector<28x128xf32> to vector<27x128xf32>
    %50 = vector.extract_strided_slice %48 {offsets = [0, 0], sizes = [1, 128], strides = [1, 1]} : vector<28x128xf32> to vector<1x128xf32>
    %51 = tpu.concatenate %49, %50 in 0 : vector<27x128xf32>, vector<1x128xf32> -> vector<28x128xf32>
    %52 = arith.maximumf %48, %51 : vector<28x128xf32>
    %c84 = arith.constant 84 : index
    %c0_20 = arith.constant 0 : index
    %53 = vector.load %arg5[%c84, %c0_20] : memref<392x128xf32, #tpu.memory_space<vmem>>, vector<28x128xf32>
    tpu.vector_store %arg5[%c84, %c0_20], %52 {strides = array<i32>} : memref<392x128xf32, #tpu.memory_space<vmem>>, vector<28x128xf32>,
    %c0_21 = arith.constant 0 : index
    %c224 = arith.constant 224 : index
    %c0_22 = arith.constant 0 : index
    %54 = vector.load %arg1[%c0_21, %c224, %c0_22] : memref<1x784x128xbf16, #tpu.memory_space<vmem>>, vector<1x56x128xbf16>
    %55 = vector.shape_cast %54 : vector<1x56x128xbf16> to vector<56x128xbf16>
    %cst_23 = arith.constant dense<0.000000e+00> : vector<56x128xf32>
    %56 = tpu.matmul %55, %0, %cst_23 {dimension_numbers = #tpu.dot_dimension_numbers<[1], [0], [0], [1], [0, 0, 1, 1], [], []>} : vector<56x128xbf16>, vector<128x128xbf16>, vector<56x128xf32> -> vector<56x128xf32>
    %57 = vector.broadcast %1 : vector<1x128xf32> to vector<56x128xf32>
    %58 = arith.addf %56, %57 : vector<56x128xf32>
    %59 = vector.extract_strided_slice %58 {offsets = [0, 0], sizes = [28, 128], strides = [1, 1]} : vector<56x128xf32> to vector<28x128xf32>
    %60 = vector.extract_strided_slice %58 {offsets = [28, 0], sizes = [28, 128], strides = [1, 1]} : vector<56x128xf32> to vector<28x128xf32>
    %61 = arith.maximumf %59, %60 : vector<28x128xf32>
    %62 = vector.extract_strided_slice %61 {offsets = [1, 0], sizes = [27, 128], strides = [1, 1]} : vector<28x128xf32> to vector<27x128xf32>
    %63 = vector.extract_strided_slice %61 {offsets = [0, 0], sizes = [1, 128], strides = [1, 1]} : vector<28x128xf32> to vector<1x128xf32>
    %64 = tpu.concatenate %62, %63 in 0 : vector<27x128xf32>, vector<1x128xf32> -> vector<28x128xf32>
    %65 = arith.maximumf %61, %64 : vector<28x128xf32>
    %c112_24 = arith.constant 112 : index
    %c0_25 = arith.constant 0 : index
    %66 = vector.load %arg5[%c112_24, %c0_25] : memref<392x128xf32, #tpu.memory_space<vmem>>, vector<28x128xf32>
    tpu.vector_store %arg5[%c112_24, %c0_25], %65 {strides = array<i32>} : memref<392x128xf32, #tpu.memory_space<vmem>>, vector<28x128xf32>,
    %c0_26 = arith.constant 0 : index
    %c280 = arith.constant 280 : index
    %c0_27 = arith.constant 0 : index
    %67 = vector.load %arg1[%c0_26, %c280, %c0_27] : memref<1x784x128xbf16, #tpu.memory_space<vmem>>, vector<1x56x128xbf16>
    %68 = vector.shape_cast %67 : vector<1x56x128xbf16> to vector<56x128xbf16>
    %cst_28 = arith.constant dense<0.000000e+00> : vector<56x128xf32>
    %69 = tpu.matmul %68, %0, %cst_28 {dimension_numbers = #tpu.dot_dimension_numbers<[1], [0], [0], [1], [0, 0, 1, 1], [], []>} : vector<56x128xbf16>, vector<128x128xbf16>, vector<56x128xf32> -> vector<56x128xf32>
    %70 = vector.broadcast %1 : vector<1x128xf32> to vector<56x128xf32>
    %71 = arith.addf %69, %70 : vector<56x128xf32>
    %72 = vector.extract_strided_slice %71 {offsets = [0, 0], sizes = [28, 128], strides = [1, 1]} : vector<56x128xf32> to vector<28x128xf32>
    %73 = vector.extract_strided_slice %71 {offsets = [28, 0], sizes = [28, 128], strides = [1, 1]} : vector<56x128xf32> to vector<28x128xf32>
    %74 = arith.maximumf %72, %73 : vector<28x128xf32>
    %75 = vector.extract_strided_slice %74 {offsets = [1, 0], sizes = [27, 128], strides = [1, 1]} : vector<28x128xf32> to vector<27x128xf32>
    %76 = vector.extract_strided_slice %74 {offsets = [0, 0], sizes = [1, 128], strides = [1, 1]} : vector<28x128xf32> to vector<1x128xf32>
    %77 = tpu.concatenate %75, %76 in 0 : vector<27x128xf32>, vector<1x128xf32> -> vector<28x128xf32>
    %78 = arith.maximumf %74, %77 : vector<28x128xf32>
    %c140 = arith.constant 140 : index
    %c0_29 = arith.constant 0 : index
    %79 = vector.load %arg5[%c140, %c0_29] : memref<392x128xf32, #tpu.memory_space<vmem>>, vector<28x128xf32>
    tpu.vector_store %arg5[%c140, %c0_29], %78 {strides = array<i32>} : memref<392x128xf32, #tpu.memory_space<vmem>>, vector<28x128xf32>,
    %c0_30 = arith.constant 0 : index
    %c336 = arith.constant 336 : index
    %c0_31 = arith.constant 0 : index
    %80 = vector.load %arg1[%c0_30, %c336, %c0_31] : memref<1x784x128xbf16, #tpu.memory_space<vmem>>, vector<1x56x128xbf16>
    %81 = vector.shape_cast %80 : vector<1x56x128xbf16> to vector<56x128xbf16>
    %cst_32 = arith.constant dense<0.000000e+00> : vector<56x128xf32>
    %82 = tpu.matmul %81, %0, %cst_32 {dimension_numbers = #tpu.dot_dimension_numbers<[1], [0], [0], [1], [0, 0, 1, 1], [], []>} : vector<56x128xbf16>, vector<128x128xbf16>, vector<56x128xf32> -> vector<56x128xf32>
    %83 = vector.broadcast %1 : vector<1x128xf32> to vector<56x128xf32>
    %84 = arith.addf %82, %83 : vector<56x128xf32>
    %85 = vector.extract_strided_slice %84 {offsets = [0, 0], sizes = [28, 128], strides = [1, 1]} : vector<56x128xf32> to vector<28x128xf32>
    %86 = vector.extract_strided_slice %84 {offsets = [28, 0], sizes = [28, 128], strides = [1, 1]} : vector<56x128xf32> to vector<28x128xf32>
    %87 = arith.maximumf %85, %86 : vector<28x128xf32>
    %88 = vector.extract_strided_slice %87 {offsets = [1, 0], sizes = [27, 128], strides = [1, 1]} : vector<28x128xf32> to vector<27x128xf32>
    %89 = vector.extract_strided_slice %87 {offsets = [0, 0], sizes = [1, 128], strides = [1, 1]} : vector<28x128xf32> to vector<1x128xf32>
    %90 = tpu.concatenate %88, %89 in 0 : vector<27x128xf32>, vector<1x128xf32> -> vector<28x128xf32>
    %91 = arith.maximumf %87, %90 : vector<28x128xf32>
    %c168_33 = arith.constant 168 : index
    %c0_34 = arith.constant 0 : index
    %92 = vector.load %arg5[%c168_33, %c0_34] : memref<392x128xf32, #tpu.memory_space<vmem>>, vector<28x128xf32>
    tpu.vector_store %arg5[%c168_33, %c0_34], %91 {strides = array<i32>} : memref<392x128xf32, #tpu.memory_space<vmem>>, vector<28x128xf32>,
    %c0_35 = arith.constant 0 : index
    %c392 = arith.constant 392 : index
    %c0_36 = arith.constant 0 : index
    %93 = vector.load %arg1[%c0_35, %c392, %c0_36] : memref<1x784x128xbf16, #tpu.memory_space<vmem>>, vector<1x56x128xbf16>
    %94 = vector.shape_cast %93 : vector<1x56x128xbf16> to vector<56x128xbf16>
    %cst_37 = arith.constant dense<0.000000e+00> : vector<56x128xf32>
    %95 = tpu.matmul %94, %0, %cst_37 {dimension_numbers = #tpu.dot_dimension_numbers<[1], [0], [0], [1], [0, 0, 1, 1], [], []>} : vector<56x128xbf16>, vector<128x128xbf16>, vector<56x128xf32> -> vector<56x128xf32>
    %96 = vector.broadcast %1 : vector<1x128xf32> to vector<56x128xf32>
    %97 = arith.addf %95, %96 : vector<56x128xf32>
    %98 = vector.extract_strided_slice %97 {offsets = [0, 0], sizes = [28, 128], strides = [1, 1]} : vector<56x128xf32> to vector<28x128xf32>
    %99 = vector.extract_strided_slice %97 {offsets = [28, 0], sizes = [28, 128], strides = [1, 1]} : vector<56x128xf32> to vector<28x128xf32>
    %100 = arith.maximumf %98, %99 : vector<28x128xf32>
    %101 = vector.extract_strided_slice %100 {offsets = [1, 0], sizes = [27, 128], strides = [1, 1]} : vector<28x128xf32> to vector<27x128xf32>
    %102 = vector.extract_strided_slice %100 {offsets = [0, 0], sizes = [1, 128], strides = [1, 1]} : vector<28x128xf32> to vector<1x128xf32>
    %103 = tpu.concatenate %101, %102 in 0 : vector<27x128xf32>, vector<1x128xf32> -> vector<28x128xf32>
    %104 = arith.maximumf %100, %103 : vector<28x128xf32>
    %c196 = arith.constant 196 : index
    %c0_38 = arith.constant 0 : index
    %105 = vector.load %arg5[%c196, %c0_38] : memref<392x128xf32, #tpu.memory_space<vmem>>, vector<28x128xf32>
    tpu.vector_store %arg5[%c196, %c0_38], %104 {strides = array<i32>} : memref<392x128xf32, #tpu.memory_space<vmem>>, vector<28x128xf32>,
    %c0_39 = arith.constant 0 : index
    %c448 = arith.constant 448 : index
    %c0_40 = arith.constant 0 : index
    %106 = vector.load %arg1[%c0_39, %c448, %c0_40] : memref<1x784x128xbf16, #tpu.memory_space<vmem>>, vector<1x56x128xbf16>
    %107 = vector.shape_cast %106 : vector<1x56x128xbf16> to vector<56x128xbf16>
    %cst_41 = arith.constant dense<0.000000e+00> : vector<56x128xf32>
    %108 = tpu.matmul %107, %0, %cst_41 {dimension_numbers = #tpu.dot_dimension_numbers<[1], [0], [0], [1], [0, 0, 1, 1], [], []>} : vector<56x128xbf16>, vector<128x128xbf16>, vector<56x128xf32> -> vector<56x128xf32>
    %109 = vector.broadcast %1 : vector<1x128xf32> to vector<56x128xf32>
    %110 = arith.addf %108, %109 : vector<56x128xf32>
    %111 = vector.extract_strided_slice %110 {offsets = [0, 0], sizes = [28, 128], strides = [1, 1]} : vector<56x128xf32> to vector<28x128xf32>
    %112 = vector.extract_strided_slice %110 {offsets = [28, 0], sizes = [28, 128], strides = [1, 1]} : vector<56x128xf32> to vector<28x128xf32>
    %113 = arith.maximumf %111, %112 : vector<28x128xf32>
    %114 = vector.extract_strided_slice %113 {offsets = [1, 0], sizes = [27, 128], strides = [1, 1]} : vector<28x128xf32> to vector<27x128xf32>
    %115 = vector.extract_strided_slice %113 {offsets = [0, 0], sizes = [1, 128], strides = [1, 1]} : vector<28x128xf32> to vector<1x128xf32>
    %116 = tpu.concatenate %114, %115 in 0 : vector<27x128xf32>, vector<1x128xf32> -> vector<28x128xf32>
    %117 = arith.maximumf %113, %116 : vector<28x128xf32>
    %c224_42 = arith.constant 224 : index
    %c0_43 = arith.constant 0 : index
    %118 = vector.load %arg5[%c224_42, %c0_43] : memref<392x128xf32, #tpu.memory_space<vmem>>, vector<28x128xf32>
    tpu.vector_store %arg5[%c224_42, %c0_43], %117 {strides = array<i32>} : memref<392x128xf32, #tpu.memory_space<vmem>>, vector<28x128xf32>,
    %c0_44 = arith.constant 0 : index
    %c504 = arith.constant 504 : index
    %c0_45 = arith.constant 0 : index
    %119 = vector.load %arg1[%c0_44, %c504, %c0_45] : memref<1x784x128xbf16, #tpu.memory_space<vmem>>, vector<1x56x128xbf16>
    %120 = vector.shape_cast %119 : vector<1x56x128xbf16> to vector<56x128xbf16>
    %cst_46 = arith.constant dense<0.000000e+00> : vector<56x128xf32>
    %121 = tpu.matmul %120, %0, %cst_46 {dimension_numbers = #tpu.dot_dimension_numbers<[1], [0], [0], [1], [0, 0, 1, 1], [], []>} : vector<56x128xbf16>, vector<128x128xbf16>, vector<56x128xf32> -> vector<56x128xf32>
    %122 = vector.broadcast %1 : vector<1x128xf32> to vector<56x128xf32>
    %123 = arith.addf %121, %122 : vector<56x128xf32>
    %124 = vector.extract_strided_slice %123 {offsets = [0, 0], sizes = [28, 128], strides = [1, 1]} : vector<56x128xf32> to vector<28x128xf32>
    %125 = vector.extract_strided_slice %123 {offsets = [28, 0], sizes = [28, 128], strides = [1, 1]} : vector<56x128xf32> to vector<28x128xf32>
    %126 = arith.maximumf %124, %125 : vector<28x128xf32>
    %127 = vector.extract_strided_slice %126 {offsets = [1, 0], sizes = [27, 128], strides = [1, 1]} : vector<28x128xf32> to vector<27x128xf32>
    %128 = vector.extract_strided_slice %126 {offsets = [0, 0], sizes = [1, 128], strides = [1, 1]} : vector<28x128xf32> to vector<1x128xf32>
    %129 = tpu.concatenate %127, %128 in 0 : vector<27x128xf32>, vector<1x128xf32> -> vector<28x128xf32>
    %130 = arith.maximumf %126, %129 : vector<28x128xf32>
    %c252 = arith.constant 252 : index
    %c0_47 = arith.constant 0 : index
    %131 = vector.load %arg5[%c252, %c0_47] : memref<392x128xf32, #tpu.memory_space<vmem>>, vector<28x128xf32>
    tpu.vector_store %arg5[%c252, %c0_47], %130 {strides = array<i32>} : memref<392x128xf32, #tpu.memory_space<vmem>>, vector<28x128xf32>,
    %c0_48 = arith.constant 0 : index
    %c560 = arith.constant 560 : index
    %c0_49 = arith.constant 0 : index
    %132 = vector.load %arg1[%c0_48, %c560, %c0_49] : memref<1x784x128xbf16, #tpu.memory_space<vmem>>, vector<1x56x128xbf16>
    %133 = vector.shape_cast %132 : vector<1x56x128xbf16> to vector<56x128xbf16>
    %cst_50 = arith.constant dense<0.000000e+00> : vector<56x128xf32>
    %134 = tpu.matmul %133, %0, %cst_50 {dimension_numbers = #tpu.dot_dimension_numbers<[1], [0], [0], [1], [0, 0, 1, 1], [], []>} : vector<56x128xbf16>, vector<128x128xbf16>, vector<56x128xf32> -> vector<56x128xf32>
    %135 = vector.broadcast %1 : vector<1x128xf32> to vector<56x128xf32>
    %136 = arith.addf %134, %135 : vector<56x128xf32>
    %137 = vector.extract_strided_slice %136 {offsets = [0, 0], sizes = [28, 128], strides = [1, 1]} : vector<56x128xf32> to vector<28x128xf32>
    %138 = vector.extract_strided_slice %136 {offsets = [28, 0], sizes = [28, 128], strides = [1, 1]} : vector<56x128xf32> to vector<28x128xf32>
    %139 = arith.maximumf %137, %138 : vector<28x128xf32>
    %140 = vector.extract_strided_slice %139 {offsets = [1, 0], sizes = [27, 128], strides = [1, 1]} : vector<28x128xf32> to vector<27x128xf32>
    %141 = vector.extract_strided_slice %139 {offsets = [0, 0], sizes = [1, 128], strides = [1, 1]} : vector<28x128xf32> to vector<1x128xf32>
    %142 = tpu.concatenate %140, %141 in 0 : vector<27x128xf32>, vector<1x128xf32> -> vector<28x128xf32>
    %143 = arith.maximumf %139, %142 : vector<28x128xf32>
    %c280_51 = arith.constant 280 : index
    %c0_52 = arith.constant 0 : index
    %144 = vector.load %arg5[%c280_51, %c0_52] : memref<392x128xf32, #tpu.memory_space<vmem>>, vector<28x128xf32>
    tpu.vector_store %arg5[%c280_51, %c0_52], %143 {strides = array<i32>} : memref<392x128xf32, #tpu.memory_space<vmem>>, vector<28x128xf32>,
    %c0_53 = arith.constant 0 : index
    %c616 = arith.constant 616 : index
    %c0_54 = arith.constant 0 : index
    %145 = vector.load %arg1[%c0_53, %c616, %c0_54] : memref<1x784x128xbf16, #tpu.memory_space<vmem>>, vector<1x56x128xbf16>
    %146 = vector.shape_cast %145 : vector<1x56x128xbf16> to vector<56x128xbf16>
    %cst_55 = arith.constant dense<0.000000e+00> : vector<56x128xf32>
    %147 = tpu.matmul %146, %0, %cst_55 {dimension_numbers = #tpu.dot_dimension_numbers<[1], [0], [0], [1], [0, 0, 1, 1], [], []>} : vector<56x128xbf16>, vector<128x128xbf16>, vector<56x128xf32> -> vector<56x128xf32>
    %148 = vector.broadcast %1 : vector<1x128xf32> to vector<56x128xf32>
    %149 = arith.addf %147, %148 : vector<56x128xf32>
    %150 = vector.extract_strided_slice %149 {offsets = [0, 0], sizes = [28, 128], strides = [1, 1]} : vector<56x128xf32> to vector<28x128xf32>
    %151 = vector.extract_strided_slice %149 {offsets = [28, 0], sizes = [28, 128], strides = [1, 1]} : vector<56x128xf32> to vector<28x128xf32>
    %152 = arith.maximumf %150, %151 : vector<28x128xf32>
    %153 = vector.extract_strided_slice %152 {offsets = [1, 0], sizes = [27, 128], strides = [1, 1]} : vector<28x128xf32> to vector<27x128xf32>
    %154 = vector.extract_strided_slice %152 {offsets = [0, 0], sizes = [1, 128], strides = [1, 1]} : vector<28x128xf32> to vector<1x128xf32>
    %155 = tpu.concatenate %153, %154 in 0 : vector<27x128xf32>, vector<1x128xf32> -> vector<28x128xf32>
    %156 = arith.maximumf %152, %155 : vector<28x128xf32>
    %c308 = arith.constant 308 : index
    %c0_56 = arith.constant 0 : index
    %157 = vector.load %arg5[%c308, %c0_56] : memref<392x128xf32, #tpu.memory_space<vmem>>, vector<28x128xf32>
    tpu.vector_store %arg5[%c308, %c0_56], %156 {strides = array<i32>} : memref<392x128xf32, #tpu.memory_space<vmem>>, vector<28x128xf32>,
    %c0_57 = arith.constant 0 : index
    %c672 = arith.constant 672 : index
    %c0_58 = arith.constant 0 : index
    %158 = vector.load %arg1[%c0_57, %c672, %c0_58] : memref<1x784x128xbf16, #tpu.memory_space<vmem>>, vector<1x56x128xbf16>
    %159 = vector.shape_cast %158 : vector<1x56x128xbf16> to vector<56x128xbf16>
    %cst_59 = arith.constant dense<0.000000e+00> : vector<56x128xf32>
    %160 = tpu.matmul %159, %0, %cst_59 {dimension_numbers = #tpu.dot_dimension_numbers<[1], [0], [0], [1], [0, 0, 1, 1], [], []>} : vector<56x128xbf16>, vector<128x128xbf16>, vector<56x128xf32> -> vector<56x128xf32>
    %161 = vector.broadcast %1 : vector<1x128xf32> to vector<56x128xf32>
    %162 = arith.addf %160, %161 : vector<56x128xf32>
    %163 = vector.extract_strided_slice %162 {offsets = [0, 0], sizes = [28, 128], strides = [1, 1]} : vector<56x128xf32> to vector<28x128xf32>
    %164 = vector.extract_strided_slice %162 {offsets = [28, 0], sizes = [28, 128], strides = [1, 1]} : vector<56x128xf32> to vector<28x128xf32>
    %165 = arith.maximumf %163, %164 : vector<28x128xf32>
    %166 = vector.extract_strided_slice %165 {offsets = [1, 0], sizes = [27, 128], strides = [1, 1]} : vector<28x128xf32> to vector<27x128xf32>
    %167 = vector.extract_strided_slice %165 {offsets = [0, 0], sizes = [1, 128], strides = [1, 1]} : vector<28x128xf32> to vector<1x128xf32>
    %168 = tpu.concatenate %166, %167 in 0 : vector<27x128xf32>, vector<1x128xf32> -> vector<28x128xf32>
    %169 = arith.maximumf %165, %168 : vector<28x128xf32>
    %c336_60 = arith.constant 336 : index
    %c0_61 = arith.constant 0 : index
    %170 = vector.load %arg5[%c336_60, %c0_61] : memref<392x128xf32, #tpu.memory_space<vmem>>, vector<28x128xf32>
    tpu.vector_store %arg5[%c336_60, %c0_61], %169 {strides = array<i32>} : memref<392x128xf32, #tpu.memory_space<vmem>>, vector<28x128xf32>,
    %c0_62 = arith.constant 0 : index
    %c728 = arith.constant 728 : index
    %c0_63 = arith.constant 0 : index
    %171 = vector.load %arg1[%c0_62, %c728, %c0_63] : memref<1x784x128xbf16, #tpu.memory_space<vmem>>, vector<1x56x128xbf16>
    %172 = vector.shape_cast %171 : vector<1x56x128xbf16> to vector<56x128xbf16>
    %cst_64 = arith.constant dense<0.000000e+00> : vector<56x128xf32>
    %173 = tpu.matmul %172, %0, %cst_64 {dimension_numbers = #tpu.dot_dimension_numbers<[1], [0], [0], [1], [0, 0, 1, 1], [], []>} : vector<56x128xbf16>, vector<128x128xbf16>, vector<56x128xf32> -> vector<56x128xf32>
    %174 = vector.broadcast %1 : vector<1x128xf32> to vector<56x128xf32>
    %175 = arith.addf %173, %174 : vector<56x128xf32>
    %176 = vector.extract_strided_slice %175 {offsets = [0, 0], sizes = [28, 128], strides = [1, 1]} : vector<56x128xf32> to vector<28x128xf32>
    %177 = vector.extract_strided_slice %175 {offsets = [28, 0], sizes = [28, 128], strides = [1, 1]} : vector<56x128xf32> to vector<28x128xf32>
    %178 = arith.maximumf %176, %177 : vector<28x128xf32>
    %179 = vector.extract_strided_slice %178 {offsets = [1, 0], sizes = [27, 128], strides = [1, 1]} : vector<28x128xf32> to vector<27x128xf32>
    %180 = vector.extract_strided_slice %178 {offsets = [0, 0], sizes = [1, 128], strides = [1, 1]} : vector<28x128xf32> to vector<1x128xf32>
    %181 = tpu.concatenate %179, %180 in 0 : vector<27x128xf32>, vector<1x128xf32> -> vector<28x128xf32>
    %182 = arith.maximumf %178, %181 : vector<28x128xf32>
    %c364 = arith.constant 364 : index
    %c0_65 = arith.constant 0 : index
    %183 = vector.load %arg5[%c364, %c0_65] : memref<392x128xf32, #tpu.memory_space<vmem>>, vector<28x128xf32>
    tpu.vector_store %arg5[%c364, %c0_65], %182 {strides = array<i32>} : memref<392x128xf32, #tpu.memory_space<vmem>>, vector<28x128xf32>,
    %c0_66 = arith.constant 0 : index
    %c0_67 = arith.constant 0 : index
    %184 = tpu.strided_load %arg5[%c0_66, %c0_67] {strides = array<i32: 2, 1>} : memref<392x128xf32, #tpu.memory_space<vmem>>, vector<196x128xf32>
    %cst_68 = arith.constant 0.000000e+00 : f32
    %185 = vector.broadcast %cst_68 : f32 to vector<196x128xf32>
    %186 = arith.maximumf %184, %185 : vector<196x128xf32>
    %187 = arith.truncf %186 : vector<196x128xf32> to vector<196x128xbf16>
    %c0_69 = arith.constant 0 : index
    %c0_70 = arith.constant 0 : index
    %c0_71 = arith.constant 0 : index
    %188 = vector.load %arg4[%c0_69, %c0_70, %c0_71] : memref<1x196x128xbf16, #tpu.memory_space<vmem>>, vector<1x196x128xbf16>
    %189 = vector.shape_cast %188 : vector<1x196x128xbf16> to vector<196x128xbf16>
    %190 = vector.shape_cast %187 : vector<196x128xbf16> to vector<1x196x128xbf16>
    tpu.vector_store %arg4[%c0_69, %c0_70, %c0_71], %190 {strides = array<i32>} : memref<1x196x128xbf16, #tpu.memory_space<vmem>>, vector<1x196x128xbf16>,
    return
  }
  func.func @transform_0(%arg0: i32) -> (i32, i32, i32) {
    %c0_i32 = arith.constant 0 : i32
    %c0_i32_0 = arith.constant 0 : i32
    %c0_i32_1 = arith.constant 0 : i32
    return %arg0, %c0_i32, %c0_i32_0 : i32, i32, i32
  }
  func.func @transform_1(%arg0: i32) -> (i32, i32) {
    %c0_i32 = arith.constant 0 : i32
    %c0_i32_0 = arith.constant 0 : i32
    %c0_i32_1 = arith.constant 0 : i32
    return %c0_i32, %c0_i32_0 : i32, i32
  }
  func.func @transform_2(%arg0: i32) -> (i32, i32) {
    %c0_i32 = arith.constant 0 : i32
    %c0_i32_0 = arith.constant 0 : i32
    %c0_i32_1 = arith.constant 0 : i32
    return %c0_i32, %c0_i32_0 : i32, i32
  }
  func.func @transform_3(%arg0: i32) -> (i32, i32, i32) {
    %c0_i32 = arith.constant 0 : i32
    %c0_i32_0 = arith.constant 0 : i32
    %c0_i32_1 = arith.constant 0 : i32
    return %arg0, %c0_i32, %c0_i32_0 : i32, i32, i32
  }
}

module attributes {stable_mosaic.version = 11 : i64} {
  func.func @_conv2_kernel(%arg0: i32, %arg1: memref<1x196x128xbf16, #tpu.memory_space<vmem>>, %arg2: memref<25x128x128xbf16, #tpu.memory_space<vmem>>, %arg3: memref<1x128xf32, #tpu.memory_space<vmem>>, %arg4: memref<1x25x128xbf16, #tpu.memory_space<vmem>>, %arg5: memref<144x128xf32, #tpu.memory_space<vmem>>, %arg6: memref<50x128xf32, #tpu.memory_space<vmem>>) attributes {dimension_semantics = [#tpu.dimension_semantics<parallel>], iteration_bounds = array<i64: 2>, scalar_prefetch = 0 : i64, scratch_operands = 2 : i64, tpu.core_type = #tpu.core_type<tc>, window_params = [{transform_indices = @transform_0, window_bounds = array<i64: 1, 196, 128>}, {pipeline_mode = #tpu.pipeline_mode<synchronous>, transform_indices = @transform_1, window_bounds = array<i64: 25, 128, 128>}, {pipeline_mode = #tpu.pipeline_mode<synchronous>, transform_indices = @transform_2, window_bounds = array<i64: 1, 128>}, {transform_indices = @transform_3, window_bounds = array<i64: 1, 25, 128>}]} {
    %c0 = arith.constant 0 : index
    %c0_0 = arith.constant 0 : index
    %0 = vector.load %arg3[%c0, %c0_0] : memref<1x128xf32, #tpu.memory_space<vmem>>, vector<1x128xf32>
    %c0_1 = arith.constant 0 : index
    %c0_2 = arith.constant 0 : index
    %c0_3 = arith.constant 0 : index
    %1 = vector.load %arg1[%c0_1, %c0_2, %c0_3] : memref<1x196x128xbf16, #tpu.memory_space<vmem>>, vector<1x72x128xbf16>
    %2 = vector.shape_cast %1 : vector<1x72x128xbf16> to vector<72x128xbf16>
    %c0_4 = arith.constant 0 : index
    %c0_5 = arith.constant 0 : index
    %c0_6 = arith.constant 0 : index
    %3 = vector.load %arg2[%c0_4, %c0_5, %c0_6] : memref<25x128x128xbf16, #tpu.memory_space<vmem>>, vector<1x128x128xbf16>
    %4 = vector.shape_cast %3 : vector<1x128x128xbf16> to vector<128x128xbf16>
    %cst = arith.constant dense<0.000000e+00> : vector<72x128xf32>
    %5 = tpu.matmul %2, %4, %cst {dimension_numbers = #tpu.dot_dimension_numbers<[1], [0], [0], [1], [0, 0, 1, 1], [], []>} : vector<72x128xbf16>, vector<128x128xbf16>, vector<72x128xf32> -> vector<72x128xf32>
    %c0_7 = arith.constant 0 : index
    %c1 = arith.constant 1 : index
    %c0_8 = arith.constant 0 : index
    %6 = vector.load %arg1[%c0_7, %c1, %c0_8] : memref<1x196x128xbf16, #tpu.memory_space<vmem>>, vector<1x72x128xbf16>
    %7 = vector.shape_cast %6 : vector<1x72x128xbf16> to vector<72x128xbf16>
    %c1_9 = arith.constant 1 : index
    %c0_10 = arith.constant 0 : index
    %c0_11 = arith.constant 0 : index
    %8 = vector.load %arg2[%c1_9, %c0_10, %c0_11] : memref<25x128x128xbf16, #tpu.memory_space<vmem>>, vector<1x128x128xbf16>
    %9 = vector.shape_cast %8 : vector<1x128x128xbf16> to vector<128x128xbf16>
    %cst_12 = arith.constant dense<0.000000e+00> : vector<72x128xf32>
    %10 = tpu.matmul %7, %9, %cst_12 {dimension_numbers = #tpu.dot_dimension_numbers<[1], [0], [0], [1], [0, 0, 1, 1], [], []>} : vector<72x128xbf16>, vector<128x128xbf16>, vector<72x128xf32> -> vector<72x128xf32>
    %11 = arith.addf %5, %10 : vector<72x128xf32>
    %c0_13 = arith.constant 0 : index
    %c2 = arith.constant 2 : index
    %c0_14 = arith.constant 0 : index
    %12 = vector.load %arg1[%c0_13, %c2, %c0_14] : memref<1x196x128xbf16, #tpu.memory_space<vmem>>, vector<1x72x128xbf16>
    %13 = vector.shape_cast %12 : vector<1x72x128xbf16> to vector<72x128xbf16>
    %c2_15 = arith.constant 2 : index
    %c0_16 = arith.constant 0 : index
    %c0_17 = arith.constant 0 : index
    %14 = vector.load %arg2[%c2_15, %c0_16, %c0_17] : memref<25x128x128xbf16, #tpu.memory_space<vmem>>, vector<1x128x128xbf16>
    %15 = vector.shape_cast %14 : vector<1x128x128xbf16> to vector<128x128xbf16>
    %cst_18 = arith.constant dense<0.000000e+00> : vector<72x128xf32>
    %16 = tpu.matmul %13, %15, %cst_18 {dimension_numbers = #tpu.dot_dimension_numbers<[1], [0], [0], [1], [0, 0, 1, 1], [], []>} : vector<72x128xbf16>, vector<128x128xbf16>, vector<72x128xf32> -> vector<72x128xf32>
    %17 = arith.addf %11, %16 : vector<72x128xf32>
    %c0_19 = arith.constant 0 : index
    %c3 = arith.constant 3 : index
    %c0_20 = arith.constant 0 : index
    %18 = vector.load %arg1[%c0_19, %c3, %c0_20] : memref<1x196x128xbf16, #tpu.memory_space<vmem>>, vector<1x72x128xbf16>
    %19 = vector.shape_cast %18 : vector<1x72x128xbf16> to vector<72x128xbf16>
    %c3_21 = arith.constant 3 : index
    %c0_22 = arith.constant 0 : index
    %c0_23 = arith.constant 0 : index
    %20 = vector.load %arg2[%c3_21, %c0_22, %c0_23] : memref<25x128x128xbf16, #tpu.memory_space<vmem>>, vector<1x128x128xbf16>
    %21 = vector.shape_cast %20 : vector<1x128x128xbf16> to vector<128x128xbf16>
    %cst_24 = arith.constant dense<0.000000e+00> : vector<72x128xf32>
    %22 = tpu.matmul %19, %21, %cst_24 {dimension_numbers = #tpu.dot_dimension_numbers<[1], [0], [0], [1], [0, 0, 1, 1], [], []>} : vector<72x128xbf16>, vector<128x128xbf16>, vector<72x128xf32> -> vector<72x128xf32>
    %23 = arith.addf %17, %22 : vector<72x128xf32>
    %c0_25 = arith.constant 0 : index
    %c4 = arith.constant 4 : index
    %c0_26 = arith.constant 0 : index
    %24 = vector.load %arg1[%c0_25, %c4, %c0_26] : memref<1x196x128xbf16, #tpu.memory_space<vmem>>, vector<1x72x128xbf16>
    %25 = vector.shape_cast %24 : vector<1x72x128xbf16> to vector<72x128xbf16>
    %c4_27 = arith.constant 4 : index
    %c0_28 = arith.constant 0 : index
    %c0_29 = arith.constant 0 : index
    %26 = vector.load %arg2[%c4_27, %c0_28, %c0_29] : memref<25x128x128xbf16, #tpu.memory_space<vmem>>, vector<1x128x128xbf16>
    %27 = vector.shape_cast %26 : vector<1x128x128xbf16> to vector<128x128xbf16>
    %cst_30 = arith.constant dense<0.000000e+00> : vector<72x128xf32>
    %28 = tpu.matmul %25, %27, %cst_30 {dimension_numbers = #tpu.dot_dimension_numbers<[1], [0], [0], [1], [0, 0, 1, 1], [], []>} : vector<72x128xbf16>, vector<128x128xbf16>, vector<72x128xf32> -> vector<72x128xf32>
    %29 = arith.addf %23, %28 : vector<72x128xf32>
    %c0_31 = arith.constant 0 : index
    %c14 = arith.constant 14 : index
    %c0_32 = arith.constant 0 : index
    %30 = vector.load %arg1[%c0_31, %c14, %c0_32] : memref<1x196x128xbf16, #tpu.memory_space<vmem>>, vector<1x72x128xbf16>
    %31 = vector.shape_cast %30 : vector<1x72x128xbf16> to vector<72x128xbf16>
    %c5 = arith.constant 5 : index
    %c0_33 = arith.constant 0 : index
    %c0_34 = arith.constant 0 : index
    %32 = vector.load %arg2[%c5, %c0_33, %c0_34] : memref<25x128x128xbf16, #tpu.memory_space<vmem>>, vector<1x128x128xbf16>
    %33 = vector.shape_cast %32 : vector<1x128x128xbf16> to vector<128x128xbf16>
    %cst_35 = arith.constant dense<0.000000e+00> : vector<72x128xf32>
    %34 = tpu.matmul %31, %33, %cst_35 {dimension_numbers = #tpu.dot_dimension_numbers<[1], [0], [0], [1], [0, 0, 1, 1], [], []>} : vector<72x128xbf16>, vector<128x128xbf16>, vector<72x128xf32> -> vector<72x128xf32>
    %35 = arith.addf %29, %34 : vector<72x128xf32>
    %c0_36 = arith.constant 0 : index
    %c15 = arith.constant 15 : index
    %c0_37 = arith.constant 0 : index
    %36 = vector.load %arg1[%c0_36, %c15, %c0_37] : memref<1x196x128xbf16, #tpu.memory_space<vmem>>, vector<1x72x128xbf16>
    %37 = vector.shape_cast %36 : vector<1x72x128xbf16> to vector<72x128xbf16>
    %c6 = arith.constant 6 : index
    %c0_38 = arith.constant 0 : index
    %c0_39 = arith.constant 0 : index
    %38 = vector.load %arg2[%c6, %c0_38, %c0_39] : memref<25x128x128xbf16, #tpu.memory_space<vmem>>, vector<1x128x128xbf16>
    %39 = vector.shape_cast %38 : vector<1x128x128xbf16> to vector<128x128xbf16>
    %cst_40 = arith.constant dense<0.000000e+00> : vector<72x128xf32>
    %40 = tpu.matmul %37, %39, %cst_40 {dimension_numbers = #tpu.dot_dimension_numbers<[1], [0], [0], [1], [0, 0, 1, 1], [], []>} : vector<72x128xbf16>, vector<128x128xbf16>, vector<72x128xf32> -> vector<72x128xf32>
    %41 = arith.addf %35, %40 : vector<72x128xf32>
    %c0_41 = arith.constant 0 : index
    %c16 = arith.constant 16 : index
    %c0_42 = arith.constant 0 : index
    %42 = vector.load %arg1[%c0_41, %c16, %c0_42] : memref<1x196x128xbf16, #tpu.memory_space<vmem>>, vector<1x72x128xbf16>
    %43 = vector.shape_cast %42 : vector<1x72x128xbf16> to vector<72x128xbf16>
    %c7 = arith.constant 7 : index
    %c0_43 = arith.constant 0 : index
    %c0_44 = arith.constant 0 : index
    %44 = vector.load %arg2[%c7, %c0_43, %c0_44] : memref<25x128x128xbf16, #tpu.memory_space<vmem>>, vector<1x128x128xbf16>
    %45 = vector.shape_cast %44 : vector<1x128x128xbf16> to vector<128x128xbf16>
    %cst_45 = arith.constant dense<0.000000e+00> : vector<72x128xf32>
    %46 = tpu.matmul %43, %45, %cst_45 {dimension_numbers = #tpu.dot_dimension_numbers<[1], [0], [0], [1], [0, 0, 1, 1], [], []>} : vector<72x128xbf16>, vector<128x128xbf16>, vector<72x128xf32> -> vector<72x128xf32>
    %47 = arith.addf %41, %46 : vector<72x128xf32>
    %c0_46 = arith.constant 0 : index
    %c17 = arith.constant 17 : index
    %c0_47 = arith.constant 0 : index
    %48 = vector.load %arg1[%c0_46, %c17, %c0_47] : memref<1x196x128xbf16, #tpu.memory_space<vmem>>, vector<1x72x128xbf16>
    %49 = vector.shape_cast %48 : vector<1x72x128xbf16> to vector<72x128xbf16>
    %c8 = arith.constant 8 : index
    %c0_48 = arith.constant 0 : index
    %c0_49 = arith.constant 0 : index
    %50 = vector.load %arg2[%c8, %c0_48, %c0_49] : memref<25x128x128xbf16, #tpu.memory_space<vmem>>, vector<1x128x128xbf16>
    %51 = vector.shape_cast %50 : vector<1x128x128xbf16> to vector<128x128xbf16>
    %cst_50 = arith.constant dense<0.000000e+00> : vector<72x128xf32>
    %52 = tpu.matmul %49, %51, %cst_50 {dimension_numbers = #tpu.dot_dimension_numbers<[1], [0], [0], [1], [0, 0, 1, 1], [], []>} : vector<72x128xbf16>, vector<128x128xbf16>, vector<72x128xf32> -> vector<72x128xf32>
    %53 = arith.addf %47, %52 : vector<72x128xf32>
    %c0_51 = arith.constant 0 : index
    %c18 = arith.constant 18 : index
    %c0_52 = arith.constant 0 : index
    %54 = vector.load %arg1[%c0_51, %c18, %c0_52] : memref<1x196x128xbf16, #tpu.memory_space<vmem>>, vector<1x72x128xbf16>
    %55 = vector.shape_cast %54 : vector<1x72x128xbf16> to vector<72x128xbf16>
    %c9 = arith.constant 9 : index
    %c0_53 = arith.constant 0 : index
    %c0_54 = arith.constant 0 : index
    %56 = vector.load %arg2[%c9, %c0_53, %c0_54] : memref<25x128x128xbf16, #tpu.memory_space<vmem>>, vector<1x128x128xbf16>
    %57 = vector.shape_cast %56 : vector<1x128x128xbf16> to vector<128x128xbf16>
    %cst_55 = arith.constant dense<0.000000e+00> : vector<72x128xf32>
    %58 = tpu.matmul %55, %57, %cst_55 {dimension_numbers = #tpu.dot_dimension_numbers<[1], [0], [0], [1], [0, 0, 1, 1], [], []>} : vector<72x128xbf16>, vector<128x128xbf16>, vector<72x128xf32> -> vector<72x128xf32>
    %59 = arith.addf %53, %58 : vector<72x128xf32>
    %c0_56 = arith.constant 0 : index
    %c28 = arith.constant 28 : index
    %c0_57 = arith.constant 0 : index
    %60 = vector.load %arg1[%c0_56, %c28, %c0_57] : memref<1x196x128xbf16, #tpu.memory_space<vmem>>, vector<1x72x128xbf16>
    %61 = vector.shape_cast %60 : vector<1x72x128xbf16> to vector<72x128xbf16>
    %c10 = arith.constant 10 : index
    %c0_58 = arith.constant 0 : index
    %c0_59 = arith.constant 0 : index
    %62 = vector.load %arg2[%c10, %c0_58, %c0_59] : memref<25x128x128xbf16, #tpu.memory_space<vmem>>, vector<1x128x128xbf16>
    %63 = vector.shape_cast %62 : vector<1x128x128xbf16> to vector<128x128xbf16>
    %cst_60 = arith.constant dense<0.000000e+00> : vector<72x128xf32>
    %64 = tpu.matmul %61, %63, %cst_60 {dimension_numbers = #tpu.dot_dimension_numbers<[1], [0], [0], [1], [0, 0, 1, 1], [], []>} : vector<72x128xbf16>, vector<128x128xbf16>, vector<72x128xf32> -> vector<72x128xf32>
    %65 = arith.addf %59, %64 : vector<72x128xf32>
    %c0_61 = arith.constant 0 : index
    %c29 = arith.constant 29 : index
    %c0_62 = arith.constant 0 : index
    %66 = vector.load %arg1[%c0_61, %c29, %c0_62] : memref<1x196x128xbf16, #tpu.memory_space<vmem>>, vector<1x72x128xbf16>
    %67 = vector.shape_cast %66 : vector<1x72x128xbf16> to vector<72x128xbf16>
    %c11 = arith.constant 11 : index
    %c0_63 = arith.constant 0 : index
    %c0_64 = arith.constant 0 : index
    %68 = vector.load %arg2[%c11, %c0_63, %c0_64] : memref<25x128x128xbf16, #tpu.memory_space<vmem>>, vector<1x128x128xbf16>
    %69 = vector.shape_cast %68 : vector<1x128x128xbf16> to vector<128x128xbf16>
    %cst_65 = arith.constant dense<0.000000e+00> : vector<72x128xf32>
    %70 = tpu.matmul %67, %69, %cst_65 {dimension_numbers = #tpu.dot_dimension_numbers<[1], [0], [0], [1], [0, 0, 1, 1], [], []>} : vector<72x128xbf16>, vector<128x128xbf16>, vector<72x128xf32> -> vector<72x128xf32>
    %71 = arith.addf %65, %70 : vector<72x128xf32>
    %c0_66 = arith.constant 0 : index
    %c30 = arith.constant 30 : index
    %c0_67 = arith.constant 0 : index
    %72 = vector.load %arg1[%c0_66, %c30, %c0_67] : memref<1x196x128xbf16, #tpu.memory_space<vmem>>, vector<1x72x128xbf16>
    %73 = vector.shape_cast %72 : vector<1x72x128xbf16> to vector<72x128xbf16>
    %c12 = arith.constant 12 : index
    %c0_68 = arith.constant 0 : index
    %c0_69 = arith.constant 0 : index
    %74 = vector.load %arg2[%c12, %c0_68, %c0_69] : memref<25x128x128xbf16, #tpu.memory_space<vmem>>, vector<1x128x128xbf16>
    %75 = vector.shape_cast %74 : vector<1x128x128xbf16> to vector<128x128xbf16>
    %cst_70 = arith.constant dense<0.000000e+00> : vector<72x128xf32>
    %76 = tpu.matmul %73, %75, %cst_70 {dimension_numbers = #tpu.dot_dimension_numbers<[1], [0], [0], [1], [0, 0, 1, 1], [], []>} : vector<72x128xbf16>, vector<128x128xbf16>, vector<72x128xf32> -> vector<72x128xf32>
    %77 = arith.addf %71, %76 : vector<72x128xf32>
    %c0_71 = arith.constant 0 : index
    %c31 = arith.constant 31 : index
    %c0_72 = arith.constant 0 : index
    %78 = vector.load %arg1[%c0_71, %c31, %c0_72] : memref<1x196x128xbf16, #tpu.memory_space<vmem>>, vector<1x72x128xbf16>
    %79 = vector.shape_cast %78 : vector<1x72x128xbf16> to vector<72x128xbf16>
    %c13 = arith.constant 13 : index
    %c0_73 = arith.constant 0 : index
    %c0_74 = arith.constant 0 : index
    %80 = vector.load %arg2[%c13, %c0_73, %c0_74] : memref<25x128x128xbf16, #tpu.memory_space<vmem>>, vector<1x128x128xbf16>
    %81 = vector.shape_cast %80 : vector<1x128x128xbf16> to vector<128x128xbf16>
    %cst_75 = arith.constant dense<0.000000e+00> : vector<72x128xf32>
    %82 = tpu.matmul %79, %81, %cst_75 {dimension_numbers = #tpu.dot_dimension_numbers<[1], [0], [0], [1], [0, 0, 1, 1], [], []>} : vector<72x128xbf16>, vector<128x128xbf16>, vector<72x128xf32> -> vector<72x128xf32>
    %83 = arith.addf %77, %82 : vector<72x128xf32>
    %c0_76 = arith.constant 0 : index
    %c32 = arith.constant 32 : index
    %c0_77 = arith.constant 0 : index
    %84 = vector.load %arg1[%c0_76, %c32, %c0_77] : memref<1x196x128xbf16, #tpu.memory_space<vmem>>, vector<1x72x128xbf16>
    %85 = vector.shape_cast %84 : vector<1x72x128xbf16> to vector<72x128xbf16>
    %c14_78 = arith.constant 14 : index
    %c0_79 = arith.constant 0 : index
    %c0_80 = arith.constant 0 : index
    %86 = vector.load %arg2[%c14_78, %c0_79, %c0_80] : memref<25x128x128xbf16, #tpu.memory_space<vmem>>, vector<1x128x128xbf16>
    %87 = vector.shape_cast %86 : vector<1x128x128xbf16> to vector<128x128xbf16>
    %cst_81 = arith.constant dense<0.000000e+00> : vector<72x128xf32>
    %88 = tpu.matmul %85, %87, %cst_81 {dimension_numbers = #tpu.dot_dimension_numbers<[1], [0], [0], [1], [0, 0, 1, 1], [], []>} : vector<72x128xbf16>, vector<128x128xbf16>, vector<72x128xf32> -> vector<72x128xf32>
    %89 = arith.addf %83, %88 : vector<72x128xf32>
    %c0_82 = arith.constant 0 : index
    %c42 = arith.constant 42 : index
    %c0_83 = arith.constant 0 : index
    %90 = vector.load %arg1[%c0_82, %c42, %c0_83] : memref<1x196x128xbf16, #tpu.memory_space<vmem>>, vector<1x72x128xbf16>
    %91 = vector.shape_cast %90 : vector<1x72x128xbf16> to vector<72x128xbf16>
    %c15_84 = arith.constant 15 : index
    %c0_85 = arith.constant 0 : index
    %c0_86 = arith.constant 0 : index
    %92 = vector.load %arg2[%c15_84, %c0_85, %c0_86] : memref<25x128x128xbf16, #tpu.memory_space<vmem>>, vector<1x128x128xbf16>
    %93 = vector.shape_cast %92 : vector<1x128x128xbf16> to vector<128x128xbf16>
    %cst_87 = arith.constant dense<0.000000e+00> : vector<72x128xf32>
    %94 = tpu.matmul %91, %93, %cst_87 {dimension_numbers = #tpu.dot_dimension_numbers<[1], [0], [0], [1], [0, 0, 1, 1], [], []>} : vector<72x128xbf16>, vector<128x128xbf16>, vector<72x128xf32> -> vector<72x128xf32>
    %95 = arith.addf %89, %94 : vector<72x128xf32>
    %c0_88 = arith.constant 0 : index
    %c43 = arith.constant 43 : index
    %c0_89 = arith.constant 0 : index
    %96 = vector.load %arg1[%c0_88, %c43, %c0_89] : memref<1x196x128xbf16, #tpu.memory_space<vmem>>, vector<1x72x128xbf16>
    %97 = vector.shape_cast %96 : vector<1x72x128xbf16> to vector<72x128xbf16>
    %c16_90 = arith.constant 16 : index
    %c0_91 = arith.constant 0 : index
    %c0_92 = arith.constant 0 : index
    %98 = vector.load %arg2[%c16_90, %c0_91, %c0_92] : memref<25x128x128xbf16, #tpu.memory_space<vmem>>, vector<1x128x128xbf16>
    %99 = vector.shape_cast %98 : vector<1x128x128xbf16> to vector<128x128xbf16>
    %cst_93 = arith.constant dense<0.000000e+00> : vector<72x128xf32>
    %100 = tpu.matmul %97, %99, %cst_93 {dimension_numbers = #tpu.dot_dimension_numbers<[1], [0], [0], [1], [0, 0, 1, 1], [], []>} : vector<72x128xbf16>, vector<128x128xbf16>, vector<72x128xf32> -> vector<72x128xf32>
    %101 = arith.addf %95, %100 : vector<72x128xf32>
    %c0_94 = arith.constant 0 : index
    %c44 = arith.constant 44 : index
    %c0_95 = arith.constant 0 : index
    %102 = vector.load %arg1[%c0_94, %c44, %c0_95] : memref<1x196x128xbf16, #tpu.memory_space<vmem>>, vector<1x72x128xbf16>
    %103 = vector.shape_cast %102 : vector<1x72x128xbf16> to vector<72x128xbf16>
    %c17_96 = arith.constant 17 : index
    %c0_97 = arith.constant 0 : index
    %c0_98 = arith.constant 0 : index
    %104 = vector.load %arg2[%c17_96, %c0_97, %c0_98] : memref<25x128x128xbf16, #tpu.memory_space<vmem>>, vector<1x128x128xbf16>
    %105 = vector.shape_cast %104 : vector<1x128x128xbf16> to vector<128x128xbf16>
    %cst_99 = arith.constant dense<0.000000e+00> : vector<72x128xf32>
    %106 = tpu.matmul %103, %105, %cst_99 {dimension_numbers = #tpu.dot_dimension_numbers<[1], [0], [0], [1], [0, 0, 1, 1], [], []>} : vector<72x128xbf16>, vector<128x128xbf16>, vector<72x128xf32> -> vector<72x128xf32>
    %107 = arith.addf %101, %106 : vector<72x128xf32>
    %c0_100 = arith.constant 0 : index
    %c45 = arith.constant 45 : index
    %c0_101 = arith.constant 0 : index
    %108 = vector.load %arg1[%c0_100, %c45, %c0_101] : memref<1x196x128xbf16, #tpu.memory_space<vmem>>, vector<1x72x128xbf16>
    %109 = vector.shape_cast %108 : vector<1x72x128xbf16> to vector<72x128xbf16>
    %c18_102 = arith.constant 18 : index
    %c0_103 = arith.constant 0 : index
    %c0_104 = arith.constant 0 : index
    %110 = vector.load %arg2[%c18_102, %c0_103, %c0_104] : memref<25x128x128xbf16, #tpu.memory_space<vmem>>, vector<1x128x128xbf16>
    %111 = vector.shape_cast %110 : vector<1x128x128xbf16> to vector<128x128xbf16>
    %cst_105 = arith.constant dense<0.000000e+00> : vector<72x128xf32>
    %112 = tpu.matmul %109, %111, %cst_105 {dimension_numbers = #tpu.dot_dimension_numbers<[1], [0], [0], [1], [0, 0, 1, 1], [], []>} : vector<72x128xbf16>, vector<128x128xbf16>, vector<72x128xf32> -> vector<72x128xf32>
    %113 = arith.addf %107, %112 : vector<72x128xf32>
    %c0_106 = arith.constant 0 : index
    %c46 = arith.constant 46 : index
    %c0_107 = arith.constant 0 : index
    %114 = vector.load %arg1[%c0_106, %c46, %c0_107] : memref<1x196x128xbf16, #tpu.memory_space<vmem>>, vector<1x72x128xbf16>
    %115 = vector.shape_cast %114 : vector<1x72x128xbf16> to vector<72x128xbf16>
    %c19 = arith.constant 19 : index
    %c0_108 = arith.constant 0 : index
    %c0_109 = arith.constant 0 : index
    %116 = vector.load %arg2[%c19, %c0_108, %c0_109] : memref<25x128x128xbf16, #tpu.memory_space<vmem>>, vector<1x128x128xbf16>
    %117 = vector.shape_cast %116 : vector<1x128x128xbf16> to vector<128x128xbf16>
    %cst_110 = arith.constant dense<0.000000e+00> : vector<72x128xf32>
    %118 = tpu.matmul %115, %117, %cst_110 {dimension_numbers = #tpu.dot_dimension_numbers<[1], [0], [0], [1], [0, 0, 1, 1], [], []>} : vector<72x128xbf16>, vector<128x128xbf16>, vector<72x128xf32> -> vector<72x128xf32>
    %119 = arith.addf %113, %118 : vector<72x128xf32>
    %c0_111 = arith.constant 0 : index
    %c56 = arith.constant 56 : index
    %c0_112 = arith.constant 0 : index
    %120 = vector.load %arg1[%c0_111, %c56, %c0_112] : memref<1x196x128xbf16, #tpu.memory_space<vmem>>, vector<1x72x128xbf16>
    %121 = vector.shape_cast %120 : vector<1x72x128xbf16> to vector<72x128xbf16>
    %c20 = arith.constant 20 : index
    %c0_113 = arith.constant 0 : index
    %c0_114 = arith.constant 0 : index
    %122 = vector.load %arg2[%c20, %c0_113, %c0_114] : memref<25x128x128xbf16, #tpu.memory_space<vmem>>, vector<1x128x128xbf16>
    %123 = vector.shape_cast %122 : vector<1x128x128xbf16> to vector<128x128xbf16>
    %cst_115 = arith.constant dense<0.000000e+00> : vector<72x128xf32>
    %124 = tpu.matmul %121, %123, %cst_115 {dimension_numbers = #tpu.dot_dimension_numbers<[1], [0], [0], [1], [0, 0, 1, 1], [], []>} : vector<72x128xbf16>, vector<128x128xbf16>, vector<72x128xf32> -> vector<72x128xf32>
    %125 = arith.addf %119, %124 : vector<72x128xf32>
    %c0_116 = arith.constant 0 : index
    %c57 = arith.constant 57 : index
    %c0_117 = arith.constant 0 : index
    %126 = vector.load %arg1[%c0_116, %c57, %c0_117] : memref<1x196x128xbf16, #tpu.memory_space<vmem>>, vector<1x72x128xbf16>
    %127 = vector.shape_cast %126 : vector<1x72x128xbf16> to vector<72x128xbf16>
    %c21 = arith.constant 21 : index
    %c0_118 = arith.constant 0 : index
    %c0_119 = arith.constant 0 : index
    %128 = vector.load %arg2[%c21, %c0_118, %c0_119] : memref<25x128x128xbf16, #tpu.memory_space<vmem>>, vector<1x128x128xbf16>
    %129 = vector.shape_cast %128 : vector<1x128x128xbf16> to vector<128x128xbf16>
    %cst_120 = arith.constant dense<0.000000e+00> : vector<72x128xf32>
    %130 = tpu.matmul %127, %129, %cst_120 {dimension_numbers = #tpu.dot_dimension_numbers<[1], [0], [0], [1], [0, 0, 1, 1], [], []>} : vector<72x128xbf16>, vector<128x128xbf16>, vector<72x128xf32> -> vector<72x128xf32>
    %131 = arith.addf %125, %130 : vector<72x128xf32>
    %c0_121 = arith.constant 0 : index
    %c58 = arith.constant 58 : index
    %c0_122 = arith.constant 0 : index
    %132 = vector.load %arg1[%c0_121, %c58, %c0_122] : memref<1x196x128xbf16, #tpu.memory_space<vmem>>, vector<1x72x128xbf16>
    %133 = vector.shape_cast %132 : vector<1x72x128xbf16> to vector<72x128xbf16>
    %c22 = arith.constant 22 : index
    %c0_123 = arith.constant 0 : index
    %c0_124 = arith.constant 0 : index
    %134 = vector.load %arg2[%c22, %c0_123, %c0_124] : memref<25x128x128xbf16, #tpu.memory_space<vmem>>, vector<1x128x128xbf16>
    %135 = vector.shape_cast %134 : vector<1x128x128xbf16> to vector<128x128xbf16>
    %cst_125 = arith.constant dense<0.000000e+00> : vector<72x128xf32>
    %136 = tpu.matmul %133, %135, %cst_125 {dimension_numbers = #tpu.dot_dimension_numbers<[1], [0], [0], [1], [0, 0, 1, 1], [], []>} : vector<72x128xbf16>, vector<128x128xbf16>, vector<72x128xf32> -> vector<72x128xf32>
    %137 = arith.addf %131, %136 : vector<72x128xf32>
    %c0_126 = arith.constant 0 : index
    %c59 = arith.constant 59 : index
    %c0_127 = arith.constant 0 : index
    %138 = vector.load %arg1[%c0_126, %c59, %c0_127] : memref<1x196x128xbf16, #tpu.memory_space<vmem>>, vector<1x72x128xbf16>
    %139 = vector.shape_cast %138 : vector<1x72x128xbf16> to vector<72x128xbf16>
    %c23 = arith.constant 23 : index
    %c0_128 = arith.constant 0 : index
    %c0_129 = arith.constant 0 : index
    %140 = vector.load %arg2[%c23, %c0_128, %c0_129] : memref<25x128x128xbf16, #tpu.memory_space<vmem>>, vector<1x128x128xbf16>
    %141 = vector.shape_cast %140 : vector<1x128x128xbf16> to vector<128x128xbf16>
    %cst_130 = arith.constant dense<0.000000e+00> : vector<72x128xf32>
    %142 = tpu.matmul %139, %141, %cst_130 {dimension_numbers = #tpu.dot_dimension_numbers<[1], [0], [0], [1], [0, 0, 1, 1], [], []>} : vector<72x128xbf16>, vector<128x128xbf16>, vector<72x128xf32> -> vector<72x128xf32>
    %143 = arith.addf %137, %142 : vector<72x128xf32>
    %c0_131 = arith.constant 0 : index
    %c60 = arith.constant 60 : index
    %c0_132 = arith.constant 0 : index
    %144 = vector.load %arg1[%c0_131, %c60, %c0_132] : memref<1x196x128xbf16, #tpu.memory_space<vmem>>, vector<1x72x128xbf16>
    %145 = vector.shape_cast %144 : vector<1x72x128xbf16> to vector<72x128xbf16>
    %c24 = arith.constant 24 : index
    %c0_133 = arith.constant 0 : index
    %c0_134 = arith.constant 0 : index
    %146 = vector.load %arg2[%c24, %c0_133, %c0_134] : memref<25x128x128xbf16, #tpu.memory_space<vmem>>, vector<1x128x128xbf16>
    %147 = vector.shape_cast %146 : vector<1x128x128xbf16> to vector<128x128xbf16>
    %cst_135 = arith.constant dense<0.000000e+00> : vector<72x128xf32>
    %148 = tpu.matmul %145, %147, %cst_135 {dimension_numbers = #tpu.dot_dimension_numbers<[1], [0], [0], [1], [0, 0, 1, 1], [], []>} : vector<72x128xbf16>, vector<128x128xbf16>, vector<72x128xf32> -> vector<72x128xf32>
    %149 = arith.addf %143, %148 : vector<72x128xf32>
    %150 = vector.broadcast %0 : vector<1x128xf32> to vector<72x128xf32>
    %151 = arith.addf %149, %150 : vector<72x128xf32>
    %c0_136 = arith.constant 0 : index
    %c0_137 = arith.constant 0 : index
    %152 = vector.load %arg5[%c0_136, %c0_137] : memref<144x128xf32, #tpu.memory_space<vmem>>, vector<72x128xf32>
    tpu.vector_store %arg5[%c0_136, %c0_137], %151 {strides = array<i32>} : memref<144x128xf32, #tpu.memory_space<vmem>>, vector<72x128xf32>,
    %c0_138 = arith.constant 0 : index
    %c72 = arith.constant 72 : index
    %c0_139 = arith.constant 0 : index
    %153 = vector.load %arg1[%c0_138, %c72, %c0_139] : memref<1x196x128xbf16, #tpu.memory_space<vmem>>, vector<1x64x128xbf16>
    %154 = vector.shape_cast %153 : vector<1x64x128xbf16> to vector<64x128xbf16>
    %c0_140 = arith.constant 0 : index
    %c0_141 = arith.constant 0 : index
    %c0_142 = arith.constant 0 : index
    %155 = vector.load %arg2[%c0_140, %c0_141, %c0_142] : memref<25x128x128xbf16, #tpu.memory_space<vmem>>, vector<1x128x128xbf16>
    %156 = vector.shape_cast %155 : vector<1x128x128xbf16> to vector<128x128xbf16>
    %cst_143 = arith.constant dense<0.000000e+00> : vector<64x128xf32>
    %157 = tpu.matmul %154, %156, %cst_143 {dimension_numbers = #tpu.dot_dimension_numbers<[1], [0], [0], [1], [0, 0, 1, 1], [], []>} : vector<64x128xbf16>, vector<128x128xbf16>, vector<64x128xf32> -> vector<64x128xf32>
    %c0_144 = arith.constant 0 : index
    %c73 = arith.constant 73 : index
    %c0_145 = arith.constant 0 : index
    %158 = vector.load %arg1[%c0_144, %c73, %c0_145] : memref<1x196x128xbf16, #tpu.memory_space<vmem>>, vector<1x64x128xbf16>
    %159 = vector.shape_cast %158 : vector<1x64x128xbf16> to vector<64x128xbf16>
    %c1_146 = arith.constant 1 : index
    %c0_147 = arith.constant 0 : index
    %c0_148 = arith.constant 0 : index
    %160 = vector.load %arg2[%c1_146, %c0_147, %c0_148] : memref<25x128x128xbf16, #tpu.memory_space<vmem>>, vector<1x128x128xbf16>
    %161 = vector.shape_cast %160 : vector<1x128x128xbf16> to vector<128x128xbf16>
    %cst_149 = arith.constant dense<0.000000e+00> : vector<64x128xf32>
    %162 = tpu.matmul %159, %161, %cst_149 {dimension_numbers = #tpu.dot_dimension_numbers<[1], [0], [0], [1], [0, 0, 1, 1], [], []>} : vector<64x128xbf16>, vector<128x128xbf16>, vector<64x128xf32> -> vector<64x128xf32>
    %163 = arith.addf %157, %162 : vector<64x128xf32>
    %c0_150 = arith.constant 0 : index
    %c74 = arith.constant 74 : index
    %c0_151 = arith.constant 0 : index
    %164 = vector.load %arg1[%c0_150, %c74, %c0_151] : memref<1x196x128xbf16, #tpu.memory_space<vmem>>, vector<1x64x128xbf16>
    %165 = vector.shape_cast %164 : vector<1x64x128xbf16> to vector<64x128xbf16>
    %c2_152 = arith.constant 2 : index
    %c0_153 = arith.constant 0 : index
    %c0_154 = arith.constant 0 : index
    %166 = vector.load %arg2[%c2_152, %c0_153, %c0_154] : memref<25x128x128xbf16, #tpu.memory_space<vmem>>, vector<1x128x128xbf16>
    %167 = vector.shape_cast %166 : vector<1x128x128xbf16> to vector<128x128xbf16>
    %cst_155 = arith.constant dense<0.000000e+00> : vector<64x128xf32>
    %168 = tpu.matmul %165, %167, %cst_155 {dimension_numbers = #tpu.dot_dimension_numbers<[1], [0], [0], [1], [0, 0, 1, 1], [], []>} : vector<64x128xbf16>, vector<128x128xbf16>, vector<64x128xf32> -> vector<64x128xf32>
    %169 = arith.addf %163, %168 : vector<64x128xf32>
    %c0_156 = arith.constant 0 : index
    %c75 = arith.constant 75 : index
    %c0_157 = arith.constant 0 : index
    %170 = vector.load %arg1[%c0_156, %c75, %c0_157] : memref<1x196x128xbf16, #tpu.memory_space<vmem>>, vector<1x64x128xbf16>
    %171 = vector.shape_cast %170 : vector<1x64x128xbf16> to vector<64x128xbf16>
    %c3_158 = arith.constant 3 : index
    %c0_159 = arith.constant 0 : index
    %c0_160 = arith.constant 0 : index
    %172 = vector.load %arg2[%c3_158, %c0_159, %c0_160] : memref<25x128x128xbf16, #tpu.memory_space<vmem>>, vector<1x128x128xbf16>
    %173 = vector.shape_cast %172 : vector<1x128x128xbf16> to vector<128x128xbf16>
    %cst_161 = arith.constant dense<0.000000e+00> : vector<64x128xf32>
    %174 = tpu.matmul %171, %173, %cst_161 {dimension_numbers = #tpu.dot_dimension_numbers<[1], [0], [0], [1], [0, 0, 1, 1], [], []>} : vector<64x128xbf16>, vector<128x128xbf16>, vector<64x128xf32> -> vector<64x128xf32>
    %175 = arith.addf %169, %174 : vector<64x128xf32>
    %c0_162 = arith.constant 0 : index
    %c76 = arith.constant 76 : index
    %c0_163 = arith.constant 0 : index
    %176 = vector.load %arg1[%c0_162, %c76, %c0_163] : memref<1x196x128xbf16, #tpu.memory_space<vmem>>, vector<1x64x128xbf16>
    %177 = vector.shape_cast %176 : vector<1x64x128xbf16> to vector<64x128xbf16>
    %c4_164 = arith.constant 4 : index
    %c0_165 = arith.constant 0 : index
    %c0_166 = arith.constant 0 : index
    %178 = vector.load %arg2[%c4_164, %c0_165, %c0_166] : memref<25x128x128xbf16, #tpu.memory_space<vmem>>, vector<1x128x128xbf16>
    %179 = vector.shape_cast %178 : vector<1x128x128xbf16> to vector<128x128xbf16>
    %cst_167 = arith.constant dense<0.000000e+00> : vector<64x128xf32>
    %180 = tpu.matmul %177, %179, %cst_167 {dimension_numbers = #tpu.dot_dimension_numbers<[1], [0], [0], [1], [0, 0, 1, 1], [], []>} : vector<64x128xbf16>, vector<128x128xbf16>, vector<64x128xf32> -> vector<64x128xf32>
    %181 = arith.addf %175, %180 : vector<64x128xf32>
    %c0_168 = arith.constant 0 : index
    %c86 = arith.constant 86 : index
    %c0_169 = arith.constant 0 : index
    %182 = vector.load %arg1[%c0_168, %c86, %c0_169] : memref<1x196x128xbf16, #tpu.memory_space<vmem>>, vector<1x64x128xbf16>
    %183 = vector.shape_cast %182 : vector<1x64x128xbf16> to vector<64x128xbf16>
    %c5_170 = arith.constant 5 : index
    %c0_171 = arith.constant 0 : index
    %c0_172 = arith.constant 0 : index
    %184 = vector.load %arg2[%c5_170, %c0_171, %c0_172] : memref<25x128x128xbf16, #tpu.memory_space<vmem>>, vector<1x128x128xbf16>
    %185 = vector.shape_cast %184 : vector<1x128x128xbf16> to vector<128x128xbf16>
    %cst_173 = arith.constant dense<0.000000e+00> : vector<64x128xf32>
    %186 = tpu.matmul %183, %185, %cst_173 {dimension_numbers = #tpu.dot_dimension_numbers<[1], [0], [0], [1], [0, 0, 1, 1], [], []>} : vector<64x128xbf16>, vector<128x128xbf16>, vector<64x128xf32> -> vector<64x128xf32>
    %187 = arith.addf %181, %186 : vector<64x128xf32>
    %c0_174 = arith.constant 0 : index
    %c87 = arith.constant 87 : index
    %c0_175 = arith.constant 0 : index
    %188 = vector.load %arg1[%c0_174, %c87, %c0_175] : memref<1x196x128xbf16, #tpu.memory_space<vmem>>, vector<1x64x128xbf16>
    %189 = vector.shape_cast %188 : vector<1x64x128xbf16> to vector<64x128xbf16>
    %c6_176 = arith.constant 6 : index
    %c0_177 = arith.constant 0 : index
    %c0_178 = arith.constant 0 : index
    %190 = vector.load %arg2[%c6_176, %c0_177, %c0_178] : memref<25x128x128xbf16, #tpu.memory_space<vmem>>, vector<1x128x128xbf16>
    %191 = vector.shape_cast %190 : vector<1x128x128xbf16> to vector<128x128xbf16>
    %cst_179 = arith.constant dense<0.000000e+00> : vector<64x128xf32>
    %192 = tpu.matmul %189, %191, %cst_179 {dimension_numbers = #tpu.dot_dimension_numbers<[1], [0], [0], [1], [0, 0, 1, 1], [], []>} : vector<64x128xbf16>, vector<128x128xbf16>, vector<64x128xf32> -> vector<64x128xf32>
    %193 = arith.addf %187, %192 : vector<64x128xf32>
    %c0_180 = arith.constant 0 : index
    %c88 = arith.constant 88 : index
    %c0_181 = arith.constant 0 : index
    %194 = vector.load %arg1[%c0_180, %c88, %c0_181] : memref<1x196x128xbf16, #tpu.memory_space<vmem>>, vector<1x64x128xbf16>
    %195 = vector.shape_cast %194 : vector<1x64x128xbf16> to vector<64x128xbf16>
    %c7_182 = arith.constant 7 : index
    %c0_183 = arith.constant 0 : index
    %c0_184 = arith.constant 0 : index
    %196 = vector.load %arg2[%c7_182, %c0_183, %c0_184] : memref<25x128x128xbf16, #tpu.memory_space<vmem>>, vector<1x128x128xbf16>
    %197 = vector.shape_cast %196 : vector<1x128x128xbf16> to vector<128x128xbf16>
    %cst_185 = arith.constant dense<0.000000e+00> : vector<64x128xf32>
    %198 = tpu.matmul %195, %197, %cst_185 {dimension_numbers = #tpu.dot_dimension_numbers<[1], [0], [0], [1], [0, 0, 1, 1], [], []>} : vector<64x128xbf16>, vector<128x128xbf16>, vector<64x128xf32> -> vector<64x128xf32>
    %199 = arith.addf %193, %198 : vector<64x128xf32>
    %c0_186 = arith.constant 0 : index
    %c89 = arith.constant 89 : index
    %c0_187 = arith.constant 0 : index
    %200 = vector.load %arg1[%c0_186, %c89, %c0_187] : memref<1x196x128xbf16, #tpu.memory_space<vmem>>, vector<1x64x128xbf16>
    %201 = vector.shape_cast %200 : vector<1x64x128xbf16> to vector<64x128xbf16>
    %c8_188 = arith.constant 8 : index
    %c0_189 = arith.constant 0 : index
    %c0_190 = arith.constant 0 : index
    %202 = vector.load %arg2[%c8_188, %c0_189, %c0_190] : memref<25x128x128xbf16, #tpu.memory_space<vmem>>, vector<1x128x128xbf16>
    %203 = vector.shape_cast %202 : vector<1x128x128xbf16> to vector<128x128xbf16>
    %cst_191 = arith.constant dense<0.000000e+00> : vector<64x128xf32>
    %204 = tpu.matmul %201, %203, %cst_191 {dimension_numbers = #tpu.dot_dimension_numbers<[1], [0], [0], [1], [0, 0, 1, 1], [], []>} : vector<64x128xbf16>, vector<128x128xbf16>, vector<64x128xf32> -> vector<64x128xf32>
    %205 = arith.addf %199, %204 : vector<64x128xf32>
    %c0_192 = arith.constant 0 : index
    %c90 = arith.constant 90 : index
    %c0_193 = arith.constant 0 : index
    %206 = vector.load %arg1[%c0_192, %c90, %c0_193] : memref<1x196x128xbf16, #tpu.memory_space<vmem>>, vector<1x64x128xbf16>
    %207 = vector.shape_cast %206 : vector<1x64x128xbf16> to vector<64x128xbf16>
    %c9_194 = arith.constant 9 : index
    %c0_195 = arith.constant 0 : index
    %c0_196 = arith.constant 0 : index
    %208 = vector.load %arg2[%c9_194, %c0_195, %c0_196] : memref<25x128x128xbf16, #tpu.memory_space<vmem>>, vector<1x128x128xbf16>
    %209 = vector.shape_cast %208 : vector<1x128x128xbf16> to vector<128x128xbf16>
    %cst_197 = arith.constant dense<0.000000e+00> : vector<64x128xf32>
    %210 = tpu.matmul %207, %209, %cst_197 {dimension_numbers = #tpu.dot_dimension_numbers<[1], [0], [0], [1], [0, 0, 1, 1], [], []>} : vector<64x128xbf16>, vector<128x128xbf16>, vector<64x128xf32> -> vector<64x128xf32>
    %211 = arith.addf %205, %210 : vector<64x128xf32>
    %c0_198 = arith.constant 0 : index
    %c100 = arith.constant 100 : index
    %c0_199 = arith.constant 0 : index
    %212 = vector.load %arg1[%c0_198, %c100, %c0_199] : memref<1x196x128xbf16, #tpu.memory_space<vmem>>, vector<1x64x128xbf16>
    %213 = vector.shape_cast %212 : vector<1x64x128xbf16> to vector<64x128xbf16>
    %c10_200 = arith.constant 10 : index
    %c0_201 = arith.constant 0 : index
    %c0_202 = arith.constant 0 : index
    %214 = vector.load %arg2[%c10_200, %c0_201, %c0_202] : memref<25x128x128xbf16, #tpu.memory_space<vmem>>, vector<1x128x128xbf16>
    %215 = vector.shape_cast %214 : vector<1x128x128xbf16> to vector<128x128xbf16>
    %cst_203 = arith.constant dense<0.000000e+00> : vector<64x128xf32>
    %216 = tpu.matmul %213, %215, %cst_203 {dimension_numbers = #tpu.dot_dimension_numbers<[1], [0], [0], [1], [0, 0, 1, 1], [], []>} : vector<64x128xbf16>, vector<128x128xbf16>, vector<64x128xf32> -> vector<64x128xf32>
    %217 = arith.addf %211, %216 : vector<64x128xf32>
    %c0_204 = arith.constant 0 : index
    %c101 = arith.constant 101 : index
    %c0_205 = arith.constant 0 : index
    %218 = vector.load %arg1[%c0_204, %c101, %c0_205] : memref<1x196x128xbf16, #tpu.memory_space<vmem>>, vector<1x64x128xbf16>
    %219 = vector.shape_cast %218 : vector<1x64x128xbf16> to vector<64x128xbf16>
    %c11_206 = arith.constant 11 : index
    %c0_207 = arith.constant 0 : index
    %c0_208 = arith.constant 0 : index
    %220 = vector.load %arg2[%c11_206, %c0_207, %c0_208] : memref<25x128x128xbf16, #tpu.memory_space<vmem>>, vector<1x128x128xbf16>
    %221 = vector.shape_cast %220 : vector<1x128x128xbf16> to vector<128x128xbf16>
    %cst_209 = arith.constant dense<0.000000e+00> : vector<64x128xf32>
    %222 = tpu.matmul %219, %221, %cst_209 {dimension_numbers = #tpu.dot_dimension_numbers<[1], [0], [0], [1], [0, 0, 1, 1], [], []>} : vector<64x128xbf16>, vector<128x128xbf16>, vector<64x128xf32> -> vector<64x128xf32>
    %223 = arith.addf %217, %222 : vector<64x128xf32>
    %c0_210 = arith.constant 0 : index
    %c102 = arith.constant 102 : index
    %c0_211 = arith.constant 0 : index
    %224 = vector.load %arg1[%c0_210, %c102, %c0_211] : memref<1x196x128xbf16, #tpu.memory_space<vmem>>, vector<1x64x128xbf16>
    %225 = vector.shape_cast %224 : vector<1x64x128xbf16> to vector<64x128xbf16>
    %c12_212 = arith.constant 12 : index
    %c0_213 = arith.constant 0 : index
    %c0_214 = arith.constant 0 : index
    %226 = vector.load %arg2[%c12_212, %c0_213, %c0_214] : memref<25x128x128xbf16, #tpu.memory_space<vmem>>, vector<1x128x128xbf16>
    %227 = vector.shape_cast %226 : vector<1x128x128xbf16> to vector<128x128xbf16>
    %cst_215 = arith.constant dense<0.000000e+00> : vector<64x128xf32>
    %228 = tpu.matmul %225, %227, %cst_215 {dimension_numbers = #tpu.dot_dimension_numbers<[1], [0], [0], [1], [0, 0, 1, 1], [], []>} : vector<64x128xbf16>, vector<128x128xbf16>, vector<64x128xf32> -> vector<64x128xf32>
    %229 = arith.addf %223, %228 : vector<64x128xf32>
    %c0_216 = arith.constant 0 : index
    %c103 = arith.constant 103 : index
    %c0_217 = arith.constant 0 : index
    %230 = vector.load %arg1[%c0_216, %c103, %c0_217] : memref<1x196x128xbf16, #tpu.memory_space<vmem>>, vector<1x64x128xbf16>
    %231 = vector.shape_cast %230 : vector<1x64x128xbf16> to vector<64x128xbf16>
    %c13_218 = arith.constant 13 : index
    %c0_219 = arith.constant 0 : index
    %c0_220 = arith.constant 0 : index
    %232 = vector.load %arg2[%c13_218, %c0_219, %c0_220] : memref<25x128x128xbf16, #tpu.memory_space<vmem>>, vector<1x128x128xbf16>
    %233 = vector.shape_cast %232 : vector<1x128x128xbf16> to vector<128x128xbf16>
    %cst_221 = arith.constant dense<0.000000e+00> : vector<64x128xf32>
    %234 = tpu.matmul %231, %233, %cst_221 {dimension_numbers = #tpu.dot_dimension_numbers<[1], [0], [0], [1], [0, 0, 1, 1], [], []>} : vector<64x128xbf16>, vector<128x128xbf16>, vector<64x128xf32> -> vector<64x128xf32>
    %235 = arith.addf %229, %234 : vector<64x128xf32>
    %c0_222 = arith.constant 0 : index
    %c104 = arith.constant 104 : index
    %c0_223 = arith.constant 0 : index
    %236 = vector.load %arg1[%c0_222, %c104, %c0_223] : memref<1x196x128xbf16, #tpu.memory_space<vmem>>, vector<1x64x128xbf16>
    %237 = vector.shape_cast %236 : vector<1x64x128xbf16> to vector<64x128xbf16>
    %c14_224 = arith.constant 14 : index
    %c0_225 = arith.constant 0 : index
    %c0_226 = arith.constant 0 : index
    %238 = vector.load %arg2[%c14_224, %c0_225, %c0_226] : memref<25x128x128xbf16, #tpu.memory_space<vmem>>, vector<1x128x128xbf16>
    %239 = vector.shape_cast %238 : vector<1x128x128xbf16> to vector<128x128xbf16>
    %cst_227 = arith.constant dense<0.000000e+00> : vector<64x128xf32>
    %240 = tpu.matmul %237, %239, %cst_227 {dimension_numbers = #tpu.dot_dimension_numbers<[1], [0], [0], [1], [0, 0, 1, 1], [], []>} : vector<64x128xbf16>, vector<128x128xbf16>, vector<64x128xf32> -> vector<64x128xf32>
    %241 = arith.addf %235, %240 : vector<64x128xf32>
    %c0_228 = arith.constant 0 : index
    %c114 = arith.constant 114 : index
    %c0_229 = arith.constant 0 : index
    %242 = vector.load %arg1[%c0_228, %c114, %c0_229] : memref<1x196x128xbf16, #tpu.memory_space<vmem>>, vector<1x64x128xbf16>
    %243 = vector.shape_cast %242 : vector<1x64x128xbf16> to vector<64x128xbf16>
    %c15_230 = arith.constant 15 : index
    %c0_231 = arith.constant 0 : index
    %c0_232 = arith.constant 0 : index
    %244 = vector.load %arg2[%c15_230, %c0_231, %c0_232] : memref<25x128x128xbf16, #tpu.memory_space<vmem>>, vector<1x128x128xbf16>
    %245 = vector.shape_cast %244 : vector<1x128x128xbf16> to vector<128x128xbf16>
    %cst_233 = arith.constant dense<0.000000e+00> : vector<64x128xf32>
    %246 = tpu.matmul %243, %245, %cst_233 {dimension_numbers = #tpu.dot_dimension_numbers<[1], [0], [0], [1], [0, 0, 1, 1], [], []>} : vector<64x128xbf16>, vector<128x128xbf16>, vector<64x128xf32> -> vector<64x128xf32>
    %247 = arith.addf %241, %246 : vector<64x128xf32>
    %c0_234 = arith.constant 0 : index
    %c115 = arith.constant 115 : index
    %c0_235 = arith.constant 0 : index
    %248 = vector.load %arg1[%c0_234, %c115, %c0_235] : memref<1x196x128xbf16, #tpu.memory_space<vmem>>, vector<1x64x128xbf16>
    %249 = vector.shape_cast %248 : vector<1x64x128xbf16> to vector<64x128xbf16>
    %c16_236 = arith.constant 16 : index
    %c0_237 = arith.constant 0 : index
    %c0_238 = arith.constant 0 : index
    %250 = vector.load %arg2[%c16_236, %c0_237, %c0_238] : memref<25x128x128xbf16, #tpu.memory_space<vmem>>, vector<1x128x128xbf16>
    %251 = vector.shape_cast %250 : vector<1x128x128xbf16> to vector<128x128xbf16>
    %cst_239 = arith.constant dense<0.000000e+00> : vector<64x128xf32>
    %252 = tpu.matmul %249, %251, %cst_239 {dimension_numbers = #tpu.dot_dimension_numbers<[1], [0], [0], [1], [0, 0, 1, 1], [], []>} : vector<64x128xbf16>, vector<128x128xbf16>, vector<64x128xf32> -> vector<64x128xf32>
    %253 = arith.addf %247, %252 : vector<64x128xf32>
    %c0_240 = arith.constant 0 : index
    %c116 = arith.constant 116 : index
    %c0_241 = arith.constant 0 : index
    %254 = vector.load %arg1[%c0_240, %c116, %c0_241] : memref<1x196x128xbf16, #tpu.memory_space<vmem>>, vector<1x64x128xbf16>
    %255 = vector.shape_cast %254 : vector<1x64x128xbf16> to vector<64x128xbf16>
    %c17_242 = arith.constant 17 : index
    %c0_243 = arith.constant 0 : index
    %c0_244 = arith.constant 0 : index
    %256 = vector.load %arg2[%c17_242, %c0_243, %c0_244] : memref<25x128x128xbf16, #tpu.memory_space<vmem>>, vector<1x128x128xbf16>
    %257 = vector.shape_cast %256 : vector<1x128x128xbf16> to vector<128x128xbf16>
    %cst_245 = arith.constant dense<0.000000e+00> : vector<64x128xf32>
    %258 = tpu.matmul %255, %257, %cst_245 {dimension_numbers = #tpu.dot_dimension_numbers<[1], [0], [0], [1], [0, 0, 1, 1], [], []>} : vector<64x128xbf16>, vector<128x128xbf16>, vector<64x128xf32> -> vector<64x128xf32>
    %259 = arith.addf %253, %258 : vector<64x128xf32>
    %c0_246 = arith.constant 0 : index
    %c117 = arith.constant 117 : index
    %c0_247 = arith.constant 0 : index
    %260 = vector.load %arg1[%c0_246, %c117, %c0_247] : memref<1x196x128xbf16, #tpu.memory_space<vmem>>, vector<1x64x128xbf16>
    %261 = vector.shape_cast %260 : vector<1x64x128xbf16> to vector<64x128xbf16>
    %c18_248 = arith.constant 18 : index
    %c0_249 = arith.constant 0 : index
    %c0_250 = arith.constant 0 : index
    %262 = vector.load %arg2[%c18_248, %c0_249, %c0_250] : memref<25x128x128xbf16, #tpu.memory_space<vmem>>, vector<1x128x128xbf16>
    %263 = vector.shape_cast %262 : vector<1x128x128xbf16> to vector<128x128xbf16>
    %cst_251 = arith.constant dense<0.000000e+00> : vector<64x128xf32>
    %264 = tpu.matmul %261, %263, %cst_251 {dimension_numbers = #tpu.dot_dimension_numbers<[1], [0], [0], [1], [0, 0, 1, 1], [], []>} : vector<64x128xbf16>, vector<128x128xbf16>, vector<64x128xf32> -> vector<64x128xf32>
    %265 = arith.addf %259, %264 : vector<64x128xf32>
    %c0_252 = arith.constant 0 : index
    %c118 = arith.constant 118 : index
    %c0_253 = arith.constant 0 : index
    %266 = vector.load %arg1[%c0_252, %c118, %c0_253] : memref<1x196x128xbf16, #tpu.memory_space<vmem>>, vector<1x64x128xbf16>
    %267 = vector.shape_cast %266 : vector<1x64x128xbf16> to vector<64x128xbf16>
    %c19_254 = arith.constant 19 : index
    %c0_255 = arith.constant 0 : index
    %c0_256 = arith.constant 0 : index
    %268 = vector.load %arg2[%c19_254, %c0_255, %c0_256] : memref<25x128x128xbf16, #tpu.memory_space<vmem>>, vector<1x128x128xbf16>
    %269 = vector.shape_cast %268 : vector<1x128x128xbf16> to vector<128x128xbf16>
    %cst_257 = arith.constant dense<0.000000e+00> : vector<64x128xf32>
    %270 = tpu.matmul %267, %269, %cst_257 {dimension_numbers = #tpu.dot_dimension_numbers<[1], [0], [0], [1], [0, 0, 1, 1], [], []>} : vector<64x128xbf16>, vector<128x128xbf16>, vector<64x128xf32> -> vector<64x128xf32>
    %271 = arith.addf %265, %270 : vector<64x128xf32>
    %c0_258 = arith.constant 0 : index
    %c128 = arith.constant 128 : index
    %c0_259 = arith.constant 0 : index
    %272 = vector.load %arg1[%c0_258, %c128, %c0_259] : memref<1x196x128xbf16, #tpu.memory_space<vmem>>, vector<1x64x128xbf16>
    %273 = vector.shape_cast %272 : vector<1x64x128xbf16> to vector<64x128xbf16>
    %c20_260 = arith.constant 20 : index
    %c0_261 = arith.constant 0 : index
    %c0_262 = arith.constant 0 : index
    %274 = vector.load %arg2[%c20_260, %c0_261, %c0_262] : memref<25x128x128xbf16, #tpu.memory_space<vmem>>, vector<1x128x128xbf16>
    %275 = vector.shape_cast %274 : vector<1x128x128xbf16> to vector<128x128xbf16>
    %cst_263 = arith.constant dense<0.000000e+00> : vector<64x128xf32>
    %276 = tpu.matmul %273, %275, %cst_263 {dimension_numbers = #tpu.dot_dimension_numbers<[1], [0], [0], [1], [0, 0, 1, 1], [], []>} : vector<64x128xbf16>, vector<128x128xbf16>, vector<64x128xf32> -> vector<64x128xf32>
    %277 = arith.addf %271, %276 : vector<64x128xf32>
    %c0_264 = arith.constant 0 : index
    %c129 = arith.constant 129 : index
    %c0_265 = arith.constant 0 : index
    %278 = vector.load %arg1[%c0_264, %c129, %c0_265] : memref<1x196x128xbf16, #tpu.memory_space<vmem>>, vector<1x64x128xbf16>
    %279 = vector.shape_cast %278 : vector<1x64x128xbf16> to vector<64x128xbf16>
    %c21_266 = arith.constant 21 : index
    %c0_267 = arith.constant 0 : index
    %c0_268 = arith.constant 0 : index
    %280 = vector.load %arg2[%c21_266, %c0_267, %c0_268] : memref<25x128x128xbf16, #tpu.memory_space<vmem>>, vector<1x128x128xbf16>
    %281 = vector.shape_cast %280 : vector<1x128x128xbf16> to vector<128x128xbf16>
    %cst_269 = arith.constant dense<0.000000e+00> : vector<64x128xf32>
    %282 = tpu.matmul %279, %281, %cst_269 {dimension_numbers = #tpu.dot_dimension_numbers<[1], [0], [0], [1], [0, 0, 1, 1], [], []>} : vector<64x128xbf16>, vector<128x128xbf16>, vector<64x128xf32> -> vector<64x128xf32>
    %283 = arith.addf %277, %282 : vector<64x128xf32>
    %c0_270 = arith.constant 0 : index
    %c130 = arith.constant 130 : index
    %c0_271 = arith.constant 0 : index
    %284 = vector.load %arg1[%c0_270, %c130, %c0_271] : memref<1x196x128xbf16, #tpu.memory_space<vmem>>, vector<1x64x128xbf16>
    %285 = vector.shape_cast %284 : vector<1x64x128xbf16> to vector<64x128xbf16>
    %c22_272 = arith.constant 22 : index
    %c0_273 = arith.constant 0 : index
    %c0_274 = arith.constant 0 : index
    %286 = vector.load %arg2[%c22_272, %c0_273, %c0_274] : memref<25x128x128xbf16, #tpu.memory_space<vmem>>, vector<1x128x128xbf16>
    %287 = vector.shape_cast %286 : vector<1x128x128xbf16> to vector<128x128xbf16>
    %cst_275 = arith.constant dense<0.000000e+00> : vector<64x128xf32>
    %288 = tpu.matmul %285, %287, %cst_275 {dimension_numbers = #tpu.dot_dimension_numbers<[1], [0], [0], [1], [0, 0, 1, 1], [], []>} : vector<64x128xbf16>, vector<128x128xbf16>, vector<64x128xf32> -> vector<64x128xf32>
    %289 = arith.addf %283, %288 : vector<64x128xf32>
    %c0_276 = arith.constant 0 : index
    %c131 = arith.constant 131 : index
    %c0_277 = arith.constant 0 : index
    %290 = vector.load %arg1[%c0_276, %c131, %c0_277] : memref<1x196x128xbf16, #tpu.memory_space<vmem>>, vector<1x64x128xbf16>
    %291 = vector.shape_cast %290 : vector<1x64x128xbf16> to vector<64x128xbf16>
    %c23_278 = arith.constant 23 : index
    %c0_279 = arith.constant 0 : index
    %c0_280 = arith.constant 0 : index
    %292 = vector.load %arg2[%c23_278, %c0_279, %c0_280] : memref<25x128x128xbf16, #tpu.memory_space<vmem>>, vector<1x128x128xbf16>
    %293 = vector.shape_cast %292 : vector<1x128x128xbf16> to vector<128x128xbf16>
    %cst_281 = arith.constant dense<0.000000e+00> : vector<64x128xf32>
    %294 = tpu.matmul %291, %293, %cst_281 {dimension_numbers = #tpu.dot_dimension_numbers<[1], [0], [0], [1], [0, 0, 1, 1], [], []>} : vector<64x128xbf16>, vector<128x128xbf16>, vector<64x128xf32> -> vector<64x128xf32>
    %295 = arith.addf %289, %294 : vector<64x128xf32>
    %c0_282 = arith.constant 0 : index
    %c132 = arith.constant 132 : index
    %c0_283 = arith.constant 0 : index
    %296 = vector.load %arg1[%c0_282, %c132, %c0_283] : memref<1x196x128xbf16, #tpu.memory_space<vmem>>, vector<1x64x128xbf16>
    %297 = vector.shape_cast %296 : vector<1x64x128xbf16> to vector<64x128xbf16>
    %c24_284 = arith.constant 24 : index
    %c0_285 = arith.constant 0 : index
    %c0_286 = arith.constant 0 : index
    %298 = vector.load %arg2[%c24_284, %c0_285, %c0_286] : memref<25x128x128xbf16, #tpu.memory_space<vmem>>, vector<1x128x128xbf16>
    %299 = vector.shape_cast %298 : vector<1x128x128xbf16> to vector<128x128xbf16>
    %cst_287 = arith.constant dense<0.000000e+00> : vector<64x128xf32>
    %300 = tpu.matmul %297, %299, %cst_287 {dimension_numbers = #tpu.dot_dimension_numbers<[1], [0], [0], [1], [0, 0, 1, 1], [], []>} : vector<64x128xbf16>, vector<128x128xbf16>, vector<64x128xf32> -> vector<64x128xf32>
    %301 = arith.addf %295, %300 : vector<64x128xf32>
    %302 = vector.broadcast %0 : vector<1x128xf32> to vector<64x128xf32>
    %303 = arith.addf %301, %302 : vector<64x128xf32>
    %c72_288 = arith.constant 72 : index
    %c0_289 = arith.constant 0 : index
    %304 = vector.load %arg5[%c72_288, %c0_289] : memref<144x128xf32, #tpu.memory_space<vmem>>, vector<64x128xf32>
    tpu.vector_store %arg5[%c72_288, %c0_289], %303 {strides = array<i32>} : memref<144x128xf32, #tpu.memory_space<vmem>>, vector<64x128xf32>,
    %c0_290 = arith.constant 0 : index
    %c0_291 = arith.constant 0 : index
    %305 = vector.load %arg5[%c0_290, %c0_291] : memref<144x128xf32, #tpu.memory_space<vmem>>, vector<11x128xf32>
    %c14_292 = arith.constant 14 : index
    %c0_293 = arith.constant 0 : index
    %306 = vector.load %arg5[%c14_292, %c0_293] : memref<144x128xf32, #tpu.memory_space<vmem>>, vector<11x128xf32>
    %307 = arith.maximumf %305, %306 : vector<11x128xf32>
    %308 = vector.extract_strided_slice %307 {offsets = [0, 0], sizes = [10, 128], strides = [1, 1]} : vector<11x128xf32> to vector<10x128xf32>
    %309 = vector.extract_strided_slice %307 {offsets = [1, 0], sizes = [10, 128], strides = [1, 1]} : vector<11x128xf32> to vector<10x128xf32>
    %310 = arith.maximumf %308, %309 : vector<10x128xf32>
    %c0_294 = arith.constant 0 : index
    %c0_295 = arith.constant 0 : index
    %311 = vector.load %arg6[%c0_294, %c0_295] : memref<50x128xf32, #tpu.memory_space<vmem>>, vector<10x128xf32>
    tpu.vector_store %arg6[%c0_294, %c0_295], %310 {strides = array<i32>} : memref<50x128xf32, #tpu.memory_space<vmem>>, vector<10x128xf32>,
    %c28_296 = arith.constant 28 : index
    %c0_297 = arith.constant 0 : index
    %312 = vector.load %arg5[%c28_296, %c0_297] : memref<144x128xf32, #tpu.memory_space<vmem>>, vector<11x128xf32>
    %c42_298 = arith.constant 42 : index
    %c0_299 = arith.constant 0 : index
    %313 = vector.load %arg5[%c42_298, %c0_299] : memref<144x128xf32, #tpu.memory_space<vmem>>, vector<11x128xf32>
    %314 = arith.maximumf %312, %313 : vector<11x128xf32>
    %315 = vector.extract_strided_slice %314 {offsets = [0, 0], sizes = [10, 128], strides = [1, 1]} : vector<11x128xf32> to vector<10x128xf32>
    %316 = vector.extract_strided_slice %314 {offsets = [1, 0], sizes = [10, 128], strides = [1, 1]} : vector<11x128xf32> to vector<10x128xf32>
    %317 = arith.maximumf %315, %316 : vector<10x128xf32>
    %c10_300 = arith.constant 10 : index
    %c0_301 = arith.constant 0 : index
    %318 = vector.load %arg6[%c10_300, %c0_301] : memref<50x128xf32, #tpu.memory_space<vmem>>, vector<10x128xf32>
    tpu.vector_store %arg6[%c10_300, %c0_301], %317 {strides = array<i32>} : memref<50x128xf32, #tpu.memory_space<vmem>>, vector<10x128xf32>,
    %c56_302 = arith.constant 56 : index
    %c0_303 = arith.constant 0 : index
    %319 = vector.load %arg5[%c56_302, %c0_303] : memref<144x128xf32, #tpu.memory_space<vmem>>, vector<11x128xf32>
    %c70 = arith.constant 70 : index
    %c0_304 = arith.constant 0 : index
    %320 = vector.load %arg5[%c70, %c0_304] : memref<144x128xf32, #tpu.memory_space<vmem>>, vector<11x128xf32>
    %321 = arith.maximumf %319, %320 : vector<11x128xf32>
    %322 = vector.extract_strided_slice %321 {offsets = [0, 0], sizes = [10, 128], strides = [1, 1]} : vector<11x128xf32> to vector<10x128xf32>
    %323 = vector.extract_strided_slice %321 {offsets = [1, 0], sizes = [10, 128], strides = [1, 1]} : vector<11x128xf32> to vector<10x128xf32>
    %324 = arith.maximumf %322, %323 : vector<10x128xf32>
    %c20_305 = arith.constant 20 : index
    %c0_306 = arith.constant 0 : index
    %325 = vector.load %arg6[%c20_305, %c0_306] : memref<50x128xf32, #tpu.memory_space<vmem>>, vector<10x128xf32>
    tpu.vector_store %arg6[%c20_305, %c0_306], %324 {strides = array<i32>} : memref<50x128xf32, #tpu.memory_space<vmem>>, vector<10x128xf32>,
    %c84 = arith.constant 84 : index
    %c0_307 = arith.constant 0 : index
    %326 = vector.load %arg5[%c84, %c0_307] : memref<144x128xf32, #tpu.memory_space<vmem>>, vector<11x128xf32>
    %c98 = arith.constant 98 : index
    %c0_308 = arith.constant 0 : index
    %327 = vector.load %arg5[%c98, %c0_308] : memref<144x128xf32, #tpu.memory_space<vmem>>, vector<11x128xf32>
    %328 = arith.maximumf %326, %327 : vector<11x128xf32>
    %329 = vector.extract_strided_slice %328 {offsets = [0, 0], sizes = [10, 128], strides = [1, 1]} : vector<11x128xf32> to vector<10x128xf32>
    %330 = vector.extract_strided_slice %328 {offsets = [1, 0], sizes = [10, 128], strides = [1, 1]} : vector<11x128xf32> to vector<10x128xf32>
    %331 = arith.maximumf %329, %330 : vector<10x128xf32>
    %c30_309 = arith.constant 30 : index
    %c0_310 = arith.constant 0 : index
    %332 = vector.load %arg6[%c30_309, %c0_310] : memref<50x128xf32, #tpu.memory_space<vmem>>, vector<10x128xf32>
    tpu.vector_store %arg6[%c30_309, %c0_310], %331 {strides = array<i32>} : memref<50x128xf32, #tpu.memory_space<vmem>>, vector<10x128xf32>,
    %c112 = arith.constant 112 : index
    %c0_311 = arith.constant 0 : index
    %333 = vector.load %arg5[%c112, %c0_311] : memref<144x128xf32, #tpu.memory_space<vmem>>, vector<11x128xf32>
    %c126 = arith.constant 126 : index
    %c0_312 = arith.constant 0 : index
    %334 = vector.load %arg5[%c126, %c0_312] : memref<144x128xf32, #tpu.memory_space<vmem>>, vector<11x128xf32>
    %335 = arith.maximumf %333, %334 : vector<11x128xf32>
    %336 = vector.extract_strided_slice %335 {offsets = [0, 0], sizes = [10, 128], strides = [1, 1]} : vector<11x128xf32> to vector<10x128xf32>
    %337 = vector.extract_strided_slice %335 {offsets = [1, 0], sizes = [10, 128], strides = [1, 1]} : vector<11x128xf32> to vector<10x128xf32>
    %338 = arith.maximumf %336, %337 : vector<10x128xf32>
    %c40 = arith.constant 40 : index
    %c0_313 = arith.constant 0 : index
    %339 = vector.load %arg6[%c40, %c0_313] : memref<50x128xf32, #tpu.memory_space<vmem>>, vector<10x128xf32>
    tpu.vector_store %arg6[%c40, %c0_313], %338 {strides = array<i32>} : memref<50x128xf32, #tpu.memory_space<vmem>>, vector<10x128xf32>,
    %c0_314 = arith.constant 0 : index
    %c0_315 = arith.constant 0 : index
    %340 = tpu.strided_load %arg6[%c0_314, %c0_315] {strides = array<i32: 2, 1>} : memref<50x128xf32, #tpu.memory_space<vmem>>, vector<25x128xf32>
    %cst_316 = arith.constant 0.000000e+00 : f32
    %341 = vector.broadcast %cst_316 : f32 to vector<25x128xf32>
    %342 = arith.maximumf %340, %341 : vector<25x128xf32>
    %343 = arith.truncf %342 : vector<25x128xf32> to vector<25x128xbf16>
    %c0_317 = arith.constant 0 : index
    %c0_318 = arith.constant 0 : index
    %c0_319 = arith.constant 0 : index
    %344 = vector.load %arg4[%c0_317, %c0_318, %c0_319] : memref<1x25x128xbf16, #tpu.memory_space<vmem>>, vector<1x25x128xbf16>
    %345 = vector.shape_cast %344 : vector<1x25x128xbf16> to vector<25x128xbf16>
    %346 = vector.shape_cast %343 : vector<25x128xbf16> to vector<1x25x128xbf16>
    tpu.vector_store %arg4[%c0_317, %c0_318, %c0_319], %346 {strides = array<i32>} : memref<1x25x128xbf16, #tpu.memory_space<vmem>>, vector<1x25x128xbf16>,
    return
  }
  func.func @transform_0(%arg0: i32) -> (i32, i32, i32) {
    %c0_i32 = arith.constant 0 : i32
    %c0_i32_0 = arith.constant 0 : i32
    %c0_i32_1 = arith.constant 0 : i32
    return %arg0, %c0_i32, %c0_i32_0 : i32, i32, i32
  }
  func.func @transform_1(%arg0: i32) -> (i32, i32, i32) {
    %c0_i32 = arith.constant 0 : i32
    %c0_i32_0 = arith.constant 0 : i32
    %c0_i32_1 = arith.constant 0 : i32
    %c0_i32_2 = arith.constant 0 : i32
    return %c0_i32, %c0_i32_0, %c0_i32_1 : i32, i32, i32
  }
  func.func @transform_2(%arg0: i32) -> (i32, i32) {
    %c0_i32 = arith.constant 0 : i32
    %c0_i32_0 = arith.constant 0 : i32
    %c0_i32_1 = arith.constant 0 : i32
    return %c0_i32, %c0_i32_0 : i32, i32
  }
  func.func @transform_3(%arg0: i32) -> (i32, i32, i32) {
    %c0_i32 = arith.constant 0 : i32
    %c0_i32_0 = arith.constant 0 : i32
    %c0_i32_1 = arith.constant 0 : i32
    return %arg0, %c0_i32, %c0_i32_0 : i32, i32, i32
  }
}

module attributes {stable_mosaic.version = 11 : i64} {
  func.func @_fc_stack_kernel(%arg0: i32, %arg1: memref<8x3200xbf16, #tpu.memory_space<vmem>>, %arg2: memref<3200x128xbf16, #tpu.memory_space<vmem>>, %arg3: memref<1x128xf32, #tpu.memory_space<vmem>>, %arg4: memref<128x128xbf16, #tpu.memory_space<vmem>>, %arg5: memref<1x128xf32, #tpu.memory_space<vmem>>, %arg6: memref<128x128xbf16, #tpu.memory_space<vmem>>, %arg7: memref<1x128xf32, #tpu.memory_space<vmem>>, %arg8: memref<8x128xf32, #tpu.memory_space<vmem>>) attributes {dimension_semantics = [#tpu.dimension_semantics<parallel>], iteration_bounds = array<i64: 1>, scalar_prefetch = 0 : i64, scratch_operands = 0 : i64, tpu.core_type = #tpu.core_type<tc>, window_params = [{transform_indices = @transform_0, window_bounds = array<i64: 8, 3200>}, {pipeline_mode = #tpu.pipeline_mode<synchronous>, transform_indices = @transform_1, window_bounds = array<i64: 3200, 128>}, {pipeline_mode = #tpu.pipeline_mode<synchronous>, transform_indices = @transform_2, window_bounds = array<i64: 1, 128>}, {pipeline_mode = #tpu.pipeline_mode<synchronous>, transform_indices = @transform_3, window_bounds = array<i64: 128, 128>}, {pipeline_mode = #tpu.pipeline_mode<synchronous>, transform_indices = @transform_4, window_bounds = array<i64: 1, 128>}, {pipeline_mode = #tpu.pipeline_mode<synchronous>, transform_indices = @transform_5, window_bounds = array<i64: 128, 128>}, {pipeline_mode = #tpu.pipeline_mode<synchronous>, transform_indices = @transform_6, window_bounds = array<i64: 1, 128>}, {transform_indices = @transform_7, window_bounds = array<i64: 8, 128>}]} {
    %c0 = arith.constant 0 : index
    %c0_0 = arith.constant 0 : index
    %0 = vector.load %arg1[%c0, %c0_0] : memref<8x3200xbf16, #tpu.memory_space<vmem>>, vector<8x3200xbf16>
    %c0_1 = arith.constant 0 : index
    %c0_2 = arith.constant 0 : index
    %1 = vector.load %arg2[%c0_1, %c0_2] : memref<3200x128xbf16, #tpu.memory_space<vmem>>, vector<3200x128xbf16>
    %cst = arith.constant dense<0.000000e+00> : vector<8x128xf32>
    %2 = tpu.matmul %0, %1, %cst {dimension_numbers = #tpu.dot_dimension_numbers<[1], [0], [0], [1], [0, 0, 1, 1], [], []>} : vector<8x3200xbf16>, vector<3200x128xbf16>, vector<8x128xf32> -> vector<8x128xf32>
    %c0_3 = arith.constant 0 : index
    %c0_4 = arith.constant 0 : index
    %3 = vector.load %arg3[%c0_3, %c0_4] : memref<1x128xf32, #tpu.memory_space<vmem>>, vector<1x128xf32>
    %4 = vector.broadcast %3 : vector<1x128xf32> to vector<8x128xf32>
    %5 = arith.addf %2, %4 : vector<8x128xf32>
    %cst_5 = arith.constant 0.000000e+00 : f32
    %6 = vector.broadcast %cst_5 : f32 to vector<8x128xf32>
    %7 = arith.maximumf %5, %6 : vector<8x128xf32>
    %8 = arith.truncf %7 : vector<8x128xf32> to vector<8x128xbf16>
    %c0_6 = arith.constant 0 : index
    %c0_7 = arith.constant 0 : index
    %9 = vector.load %arg4[%c0_6, %c0_7] : memref<128x128xbf16, #tpu.memory_space<vmem>>, vector<128x128xbf16>
    %cst_8 = arith.constant dense<0.000000e+00> : vector<8x128xf32>
    %10 = tpu.matmul %8, %9, %cst_8 {dimension_numbers = #tpu.dot_dimension_numbers<[1], [0], [0], [1], [0, 0, 1, 1], [], []>} : vector<8x128xbf16>, vector<128x128xbf16>, vector<8x128xf32> -> vector<8x128xf32>
    %c0_9 = arith.constant 0 : index
    %c0_10 = arith.constant 0 : index
    %11 = vector.load %arg5[%c0_9, %c0_10] : memref<1x128xf32, #tpu.memory_space<vmem>>, vector<1x128xf32>
    %12 = vector.broadcast %11 : vector<1x128xf32> to vector<8x128xf32>
    %13 = arith.addf %10, %12 : vector<8x128xf32>
    %cst_11 = arith.constant 0.000000e+00 : f32
    %14 = vector.broadcast %cst_11 : f32 to vector<8x128xf32>
    %15 = arith.maximumf %13, %14 : vector<8x128xf32>
    %16 = arith.truncf %15 : vector<8x128xf32> to vector<8x128xbf16>
    %c0_12 = arith.constant 0 : index
    %c0_13 = arith.constant 0 : index
    %17 = vector.load %arg6[%c0_12, %c0_13] : memref<128x128xbf16, #tpu.memory_space<vmem>>, vector<128x128xbf16>
    %cst_14 = arith.constant dense<0.000000e+00> : vector<8x128xf32>
    %18 = tpu.matmul %16, %17, %cst_14 {dimension_numbers = #tpu.dot_dimension_numbers<[1], [0], [0], [1], [0, 0, 1, 1], [], []>} : vector<8x128xbf16>, vector<128x128xbf16>, vector<8x128xf32> -> vector<8x128xf32>
    %c0_15 = arith.constant 0 : index
    %c0_16 = arith.constant 0 : index
    %19 = vector.load %arg7[%c0_15, %c0_16] : memref<1x128xf32, #tpu.memory_space<vmem>>, vector<1x128xf32>
    %20 = vector.broadcast %19 : vector<1x128xf32> to vector<8x128xf32>
    %21 = arith.addf %18, %20 : vector<8x128xf32>
    %c0_17 = arith.constant 0 : index
    %c0_18 = arith.constant 0 : index
    %22 = vector.load %arg8[%c0_17, %c0_18] : memref<8x128xf32, #tpu.memory_space<vmem>>, vector<8x128xf32>
    tpu.vector_store %arg8[%c0_17, %c0_18], %21 {strides = array<i32>} : memref<8x128xf32, #tpu.memory_space<vmem>>, vector<8x128xf32>,
    return
  }
  func.func @transform_0(%arg0: i32) -> (i32, i32) {
    %c0_i32 = arith.constant 0 : i32
    %c0_i32_0 = arith.constant 0 : i32
    return %arg0, %c0_i32 : i32, i32
  }
  func.func @transform_1(%arg0: i32) -> (i32, i32) {
    %c0_i32 = arith.constant 0 : i32
    %c0_i32_0 = arith.constant 0 : i32
    %c0_i32_1 = arith.constant 0 : i32
    return %c0_i32, %c0_i32_0 : i32, i32
  }
  func.func @transform_2(%arg0: i32) -> (i32, i32) {
    %c0_i32 = arith.constant 0 : i32
    %c0_i32_0 = arith.constant 0 : i32
    %c0_i32_1 = arith.constant 0 : i32
    return %c0_i32, %c0_i32_0 : i32, i32
  }
  func.func @transform_3(%arg0: i32) -> (i32, i32) {
    %c0_i32 = arith.constant 0 : i32
    %c0_i32_0 = arith.constant 0 : i32
    %c0_i32_1 = arith.constant 0 : i32
    return %c0_i32, %c0_i32_0 : i32, i32
  }
  func.func @transform_4(%arg0: i32) -> (i32, i32) {
    %c0_i32 = arith.constant 0 : i32
    %c0_i32_0 = arith.constant 0 : i32
    %c0_i32_1 = arith.constant 0 : i32
    return %c0_i32, %c0_i32_0 : i32, i32
  }
  func.func @transform_5(%arg0: i32) -> (i32, i32) {
    %c0_i32 = arith.constant 0 : i32
    %c0_i32_0 = arith.constant 0 : i32
    %c0_i32_1 = arith.constant 0 : i32
    return %c0_i32, %c0_i32_0 : i32, i32
  }
  func.func @transform_6(%arg0: i32) -> (i32, i32) {
    %c0_i32 = arith.constant 0 : i32
    %c0_i32_0 = arith.constant 0 : i32
    %c0_i32_1 = arith.constant 0 : i32
    return %c0_i32, %c0_i32_0 : i32, i32
  }
  func.func @transform_7(%arg0: i32) -> (i32, i32) {
    %c0_i32 = arith.constant 0 : i32
    %c0_i32_0 = arith.constant 0 : i32
    return %arg0, %c0_i32 : i32, i32
  }
}

</mosaic_0001>

<bundles_post_ra>
// kernel: cnn_cifar_forward.3
= control target key start
LH: loop header
LB: loop body
LE: loop exit
PB: predicated region body
PF: predicated region fallthrough
CT: control target
= control target key end

     0   :  { %s2235_s12 = smov 0   ;;  %s2975_s0 = inlined_call_operand.vmem [shape: bf16[2,784,128], index: 0, kind: input, shape index: {}]   ;;  %s2976_s1 = inlined_call_operand.vmem [shape: bf16[128,128], index: 1, kind: input, shape index: {}]   ;;  %s2977_s2 = inlined_call_operand.vmem [shape: f32[1,128], index: 2, kind: input, shape index: {}]   ;;  %s2978_s3 = inlined_call_operand.vmem [shape: bf16[2,196,128], index: 3, kind: output, shape index: {}]  }
   0x1 LB: > { %s1849_s13 = sadd.s32 4294967295, %s2213_s12   ;;  %p1853_p0 = scmp.ge.s32.totalorder %s2213_s12, 1  ;;  %s2213_s12 = sphi %s2235_s12, %s13_s12  }
   0x2   : > { %p137_p1 = scmp.lt.s32.totalorder %s2213_s12, 3 }
   0x4   : > { %p138_p2 = pnand %p1853_p0, %p137_p1 }
   0x5   : > { %p161_p3 = scmp.lt.s32.totalorder (!%p138_p2), %s1849_s13, 1 }
   0x6   : > { %141 = sbr.rel (%p138_p2) target bundleno = 417 (0x1a1), region = 32 }
   0xb   : > { %v2246_v0 = vld [vmem:[%s2976_s1 + $0x38] sm:$0xff]  ;;  %v2253_v1 = vld [vmem:[%s2976_s1 + $0x30] sm:$0xff]  ;;  %v2262_v2 = vld [vmem:[%s2976_s1 + $0x28] sm:$0xff]  ;;  %s2980_s13 = smov (!%p161_p3, %s1849_s13), 1  ;;  %vm300_vm0 = vcmask 1043456   ;;  %vm320_vm1 = vcmask 1046528  }
   0xc   : > { %268 = vmatpush.bf16.msra.mxu0 %v2246_v0  ;;  %2179 = vmatpush.bf16.msra.mxu2 %v2246_v0  ;;  %v2271_v3 = vld [vmem:[%s2976_s1 + $0x20] sm:$0xff]  ;;  %v2280_v4 = vld [vmem:[%s2976_s1 + $0x18] sm:$0xff]  ;;  %v2291_v5 = vld [vmem:[%s2976_s1 + $0x10] sm:$0xff]  ;;  %s2195_s28 = smul.u32 392, %s2980_s13  ;;  %vm334_vm2 = vcmask 1042432  }
   0xd   : > { %373 = vmatpush.bf16.msra.mxu1 %v2246_v0  ;;  %2187 = vmatpush.bf16.msra.mxu3 %v2246_v0  ;;  %v2304_v6 = vld [vmem:[%s2976_s1 + $0x8] sm:$0xff]  ;;  %v2314_v7 = vld [vmem:[%s2976_s1] sm:$0xff]  ;;  %s2196_s9 = smul.u32 100, %s2980_s13 }
   0xe   : > { %s2319_s6 = scalar_lea.vmem %s2975_s0, %s2195_s28 }
   0xf   : > { %v2066_v8 = vld [vmem:[%s2319_s6] sm:$0xff]  ;;  %v2068_v9 = vld [vmem:[%s2319_s6 + $0x10] sm:$0xff]  ;;  %v194_v12 = vld [vmem:[%s2319_s6 + $0x18] sm:$0xf]  ;;  %s2509_s14 = scalar_lea.vmem %s2978_s3, %s2196_s9 }
  0x10   : > { %269 = vmatpush.bf16.msra.mxu0 %v2253_v1  ;;  %2180 = vmatpush.bf16.msra.mxu2 %v2253_v1  ;;  %v2069_v10 = vld [vmem:[%s2319_s6 + $0x1c] sm:$0xff]  ;;  %v2071_v11 = vld [vmem:[%s2319_s6 + $0x2c] sm:$0xff]  ;;  %v350_v13 = vld [vmem:[%s2319_s6 + $0x34] sm:$0xf]  ;;  %v211_v14 = vunpack.c.l.b16 %v194_v12 }
  0x11   : > { %374 = vmatpush.bf16.msra.mxu1 %v2253_v1  ;;  %2188 = vmatpush.bf16.msra.mxu3 %v2253_v1  ;;  %v364_v15 = vunpack.c.l.b16 %v350_v13  ;;  %v2067_v16 = vld [vmem:[%s2319_s6 + $0x8] sm:$0xff]  ;;  %v2072_v20 = vld [vmem:[%s2319_s6 + $0x38] sm:$0xff]  ;;  %v2078_v22 = vld [vmem:[%s2319_s6 + $0x70] sm:$0xff] }
  0x12   : > { %v215_v17 = vpack.c.b16 %v211_v14, %v211_v14  ;;  %v2070_v18 = vld [vmem:[%s2319_s6 + $0x24] sm:$0xff]  ;;  %v2075_v21 = vld [vmem:[%s2319_s6 + $0x54] sm:$0xff]  ;;  %v2081_v23 = vld [vmem:[%s2319_s6 + $0x8c] sm:$0xff] }
  0x13   : > { %v368_v19 = vpack.c.b16 %v364_v15, %v364_v15  ;;  %v2073_v24 = vld [vmem:[%s2319_s6 + $0x40] sm:$0xff]  ;;  %v2079_v26 = vld [vmem:[%s2319_s6 + $0x78] sm:$0xff]  ;;  %v2074_v28 = vld [vmem:[%s2319_s6 + $0x48] sm:$0xff] }
  0x14   : > { %270 = vmatpush.bf16.msra.mxu0 %v2262_v2  ;;  %2181 = vmatpush.bf16.msra.mxu2 %v2262_v2  ;;  %v2076_v25 = vld [vmem:[%s2319_s6 + $0x5c] sm:$0xff]  ;;  %v2082_v27 = vld [vmem:[%s2319_s6 + $0x94] sm:$0xff]  ;;  %v2077_v29 = vld [vmem:[%s2319_s6 + $0x64] sm:$0xff] }
  0x15   : > { %375 = vmatpush.bf16.msra.mxu1 %v2262_v2  ;;  %2189 = vmatpush.bf16.msra.mxu3 %v2262_v2  ;;  %v2080_v30 = vld [vmem:[%s2319_s6 + $0x80] sm:$0xff]  ;;  %v452_v32 = vld [vmem:[%s2319_s6 + $0x50] sm:$0xf]  ;;  %v554_v33 = vld [vmem:[%s2319_s6 + $0x6c] sm:$0xf] }
  0x16   : > { %v2083_v31 = vld [vmem:[%s2319_s6 + $0x9c] sm:$0xff]  ;;  %v656_v34 = vld [vmem:[%s2319_s6 + $0x88] sm:$0xf]  ;;  %v758_v35 = vld [vmem:[%s2319_s6 + $0xa4] sm:$0xf]  ;;  %v466_v36 = vunpack.c.l.b16 %v452_v32  ;;  %v568_v37 = vunpack.c.l.b16 %v554_v33 }
  0x17   : > { %v670_v38 = vunpack.c.l.b16 %v656_v34  ;;  %v772_v39 = vunpack.c.l.b16 %v758_v35  ;;  %v2084_v44 = vld [vmem:[%s2319_s6 + $0xa8] sm:$0xff]  ;;  %v2090_v46 = vld [vmem:[%s2319_s6 + $0xe0] sm:$0xff]  ;;  %v2085_v48 = vld [vmem:[%s2319_s6 + $0xb0] sm:$0xff] }
  0x18   : > { %271 = vmatpush.bf16.msra.mxu0 %v2271_v3  ;;  %2182 = vmatpush.bf16.msra.mxu2 %v2271_v3  ;;  %v470_v40 = vpack.c.b16 %v466_v36, %v466_v36  ;;  %v572_v41 = vpack.c.b16 %v568_v37, %v568_v37  ;;  %v2087_v45 = vld [vmem:[%s2319_s6 + $0xc4] sm:$0xff]  ;;  %v2093_v47 = vld [vmem:[%s2319_s6 + $0xfc] sm:$0xff]  ;;  %v2088_v49 = vld [vmem:[%s2319_s6 + $0xcc] sm:$0xff] }
  0x19   : > { %376 = vmatpush.bf16.msra.mxu1 %v2271_v3  ;;  %2190 = vmatpush.bf16.msra.mxu3 %v2271_v3  ;;  %v674_v42 = vpack.c.b16 %v670_v38, %v670_v38  ;;  %v776_v43 = vpack.c.b16 %v772_v39, %v772_v39  ;;  %v2091_v50 = vld [vmem:[%s2319_s6 + $0xe8] sm:$0xff]  ;;  %v2086_v52 = vld [vmem:[%s2319_s6 + $0xb8] sm:$0xff]  ;;  %v2092_v55 = vld [vmem:[%s2319_s6 + $0xf0] sm:$0xff] }
  0x1a   : > { %v2094_v51 = vld [vmem:[%s2319_s6 + $0x104] sm:$0xff]  ;;  %v2089_v54 = vld [vmem:[%s2319_s6 + $0xd4] sm:$0xff]  ;;  %v2095_v57 = vld [vmem:[%s2319_s6 + $0x10c] sm:$0xff] }
  0x1b   : > { %v860_v61 = vld [vmem:[%s2319_s6 + $0xc0] sm:$0xf]  ;;  %v962_v63 = vld [vmem:[%s2319_s6 + $0xdc] sm:$0xf] }
  0x1c   : > { %272 = vmatpush.bf16.msra.mxu0 %v2280_v4  ;;  %2183 = vmatpush.bf16.msra.mxu2 %v2280_v4 }
  0x1d   : > { %377 = vmatpush.bf16.msra.mxu1 %v2280_v4  ;;  %2191 = vmatpush.bf16.msra.mxu3 %v2280_v4 }
  0x20   : > { %273 = vmatpush.bf16.msra.mxu0 %v2291_v5  ;;  %2184 = vmatpush.bf16.msra.mxu2 %v2291_v5 }
  0x21   : > { %378 = vmatpush.bf16.msra.mxu1 %v2291_v5  ;;  %2192 = vmatpush.bf16.msra.mxu3 %v2291_v5 }
  0x24   : > { %274 = vmatpush.bf16.msra.mxu0 %v2304_v6  ;;  %2185 = vmatpush.bf16.msra.mxu2 %v2304_v6 }
  0x25   : > { %379 = vmatpush.bf16.msra.mxu1 %v2304_v6  ;;  %2193 = vmatpush.bf16.msra.mxu3 %v2304_v6 }
  0x28   : > { %275 = vmatpush.bf16.msra.mxu0 %v2314_v7  ;;  %2186 = vmatpush.bf16.msra.mxu2 %v2314_v7 }
  0x29   : > { %380 = vmatpush.bf16.msra.mxu1 %v2314_v7  ;;  %2194 = vmatpush.bf16.msra.mxu3 %v2314_v7 }
  0x2b   : > { %276 = vmatmul.bf16.vlgmr.msra.gmra.mxu0 %v2066_v8  ;;  %286 = vmatmul.bf16.vlgmr.msra.gmra.mxu2 %v2068_v9 }
  0x2c   : > { %475 = vmatpush.bf16.msrb.mxu2 %v2246_v0  ;;  %381 = vmatmul.bf16.vlgmr.msra.gmra.mxu1 %v2069_v10 }
  0x2d   : > { %577 = vmatpush.bf16.msrb.mxu3 %v2246_v0  ;;  %679 = vmatpush.bf16.msrb.mxu0 %v2246_v0 }
  0x2e   : > { %391 = vmatmul.bf16.vlgmr.msra.gmra.mxu3 %v2071_v11  ;;  %781 = vmatpush.bf16.msrb.mxu1 %v2246_v0 }
  0x30   : > { %476 = vmatpush.bf16.msrb.mxu2 %v2253_v1 }
  0x31   : > { %578 = vmatpush.bf16.msrb.mxu3 %v2253_v1  ;;  %680 = vmatpush.bf16.msrb.mxu0 %v2253_v1 }
  0x32   : > { %782 = vmatpush.bf16.msrb.mxu1 %v2253_v1 }
  0x34   : > { %477 = vmatpush.bf16.msrb.mxu2 %v2262_v2 }
  0x35   : > { %579 = vmatpush.bf16.msrb.mxu3 %v2262_v2  ;;  %681 = vmatpush.bf16.msrb.mxu0 %v2262_v2 }
  0x36   : > { %783 = vmatpush.bf16.msrb.mxu1 %v2262_v2 }
  0x38   : > { %478 = vmatpush.bf16.msrb.mxu2 %v2271_v3 }
  0x39   : > { %580 = vmatpush.bf16.msrb.mxu3 %v2271_v3  ;;  %682 = vmatpush.bf16.msrb.mxu0 %v2271_v3 }
  0x3a   : > { %784 = vmatpush.bf16.msrb.mxu1 %v2271_v3 }
  0x3b   : > { %281 = vmatmul.bf16.gmra.mxu0 %v2067_v16  ;;  %291 = vmatmul.bf16.gmra.mxu2 %v215_v17 }
  0x3c   : > { %479 = vmatpush.bf16.msrb.mxu2 %v2280_v4  ;;  %386 = vmatmul.bf16.gmra.mxu1 %v2070_v18 }
  0x3d   : > { %581 = vmatpush.bf16.msrb.mxu3 %v2280_v4  ;;  %683 = vmatpush.bf16.msrb.mxu0 %v2280_v4 }
  0x3e   : > { %396 = vmatmul.bf16.gmra.mxu3 %v368_v19  ;;  %785 = vmatpush.bf16.msrb.mxu1 %v2280_v4 }
  0x40   : > { %480 = vmatpush.bf16.msrb.mxu2 %v2291_v5 }
  0x41   : > { %582 = vmatpush.bf16.msrb.mxu3 %v2291_v5  ;;  %684 = vmatpush.bf16.msrb.mxu0 %v2291_v5 }
  0x42   : > { %786 = vmatpush.bf16.msrb.mxu1 %v2291_v5 }
  0x44   : > { %481 = vmatpush.bf16.msrb.mxu2 %v2304_v6 }
  0x45   : > { %583 = vmatpush.bf16.msrb.mxu3 %v2304_v6  ;;  %685 = vmatpush.bf16.msrb.mxu0 %v2304_v6 }
  0x46   : > { %787 = vmatpush.bf16.msrb.mxu1 %v2304_v6 }
  0x48   : > { %482 = vmatpush.bf16.msrb.mxu2 %v2314_v7 }
  0x49   : > { %584 = vmatpush.bf16.msrb.mxu3 %v2314_v7  ;;  %686 = vmatpush.bf16.msrb.mxu0 %v2314_v7 }
  0x4a   : > { %788 = vmatpush.bf16.msrb.mxu1 %v2314_v7 }
  0x4b   : > { %483 = vmatmul.bf16.vlgmr.msrb.gmra.mxu2 %v2072_v20 }
  0x4c   : > { %883 = vmatpush.bf16.msra.mxu2 %v2246_v0  ;;  %687 = vmatmul.bf16.vlgmr.msrb.gmra.mxu0 %v2078_v22 }
  0x4d   : > { %985 = vmatpush.bf16.msra.mxu3 %v2246_v0  ;;  %1087 = vmatpush.bf16.msra.mxu0 %v2246_v0 }
  0x4e   : > { %1189 = vmatpush.bf16.msra.mxu1 %v2246_v0  ;;  %585 = vmatmul.bf16.vlgmr.msrb.gmra.mxu3 %v2075_v21 }
  0x4f   : > { %789 = vmatmul.bf16.vlgmr.msrb.gmra.mxu1 %v2081_v23 }
  0x50   : > { %884 = vmatpush.bf16.msra.mxu2 %v2253_v1 }
  0x51   : > { %986 = vmatpush.bf16.msra.mxu3 %v2253_v1  ;;  %1088 = vmatpush.bf16.msra.mxu0 %v2253_v1 }
  0x52   : > { %1190 = vmatpush.bf16.msra.mxu1 %v2253_v1 }
  0x54   : > { %885 = vmatpush.bf16.msra.mxu2 %v2262_v2 }
  0x55   : > { %987 = vmatpush.bf16.msra.mxu3 %v2262_v2  ;;  %1089 = vmatpush.bf16.msra.mxu0 %v2262_v2 }
  0x56   : > { %1191 = vmatpush.bf16.msra.mxu1 %v2262_v2 }
  0x58   : > { %886 = vmatpush.bf16.msra.mxu2 %v2271_v3 }
  0x59   : > { %988 = vmatpush.bf16.msra.mxu3 %v2271_v3  ;;  %1090 = vmatpush.bf16.msra.mxu0 %v2271_v3 }
  0x5a   : > { %1192 = vmatpush.bf16.msra.mxu1 %v2271_v3 }
  0x5b   : > { %488 = vmatmul.bf16.gmra.mxu2 %v2073_v24 }
  0x5c   : > { %887 = vmatpush.bf16.msra.mxu2 %v2280_v4  ;;  %692 = vmatmul.bf16.gmra.mxu0 %v2079_v26 }
  0x5d   : > { %989 = vmatpush.bf16.msra.mxu3 %v2280_v4  ;;  %1091 = vmatpush.bf16.msra.mxu0 %v2280_v4 }
  0x5e   : > { %1193 = vmatpush.bf16.msra.mxu1 %v2280_v4  ;;  %590 = vmatmul.bf16.gmra.mxu3 %v2076_v25 }
  0x5f   : > { %794 = vmatmul.bf16.gmra.mxu1 %v2082_v27 }
  0x60   : > { %888 = vmatpush.bf16.msra.mxu2 %v2291_v5 }
  0x61   : > { %990 = vmatpush.bf16.msra.mxu3 %v2291_v5  ;;  %1092 = vmatpush.bf16.msra.mxu0 %v2291_v5 }
  0x62   : > { %1194 = vmatpush.bf16.msra.mxu1 %v2291_v5 }
  0x64   : > { %889 = vmatpush.bf16.msra.mxu2 %v2304_v6 }
  0x65   : > { %991 = vmatpush.bf16.msra.mxu3 %v2304_v6  ;;  %1093 = vmatpush.bf16.msra.mxu0 %v2304_v6 }
  0x66   : > { %1195 = vmatpush.bf16.msra.mxu1 %v2304_v6 }
  0x68   : > { %890 = vmatpush.bf16.msra.mxu2 %v2314_v7 }
  0x69   : > { %992 = vmatpush.bf16.msra.mxu3 %v2314_v7  ;;  %1094 = vmatpush.bf16.msra.mxu0 %v2314_v7 }
  0x6a   : > { %1196 = vmatpush.bf16.msra.mxu1 %v2314_v7 }
  0x6b   : > { %493 = vmatmul.bf16.gmra.mxu2 %v2074_v28 }
  0x6c   : > { %1291 = vmatpush.bf16.msrb.mxu2 %v2246_v0  ;;  %697 = vmatmul.bf16.gmra.mxu0 %v2080_v30 }
  0x6d   : > { %1393 = vmatpush.bf16.msrb.mxu3 %v2246_v0  ;;  %1495 = vmatpush.bf16.msrb.mxu0 %v2246_v0 }
  0x6e   : > { %1597 = vmatpush.bf16.msrb.mxu1 %v2246_v0  ;;  %595 = vmatmul.bf16.gmra.mxu3 %v2077_v29  ;;  %v1064_v0 = vld [vmem:[%s2319_s6 + $0xf8] sm:$0xf] }
  0x6f   : > { %799 = vmatmul.bf16.gmra.mxu1 %v2083_v31 }
  0x70   : > { %1292 = vmatpush.bf16.msrb.mxu2 %v2253_v1 }
  0x71   : > { %1394 = vmatpush.bf16.msrb.mxu3 %v2253_v1  ;;  %1496 = vmatpush.bf16.msrb.mxu0 %v2253_v1 }
  0x72   : > { %1598 = vmatpush.bf16.msrb.mxu1 %v2253_v1  ;;  %v1166_v1 = vld [vmem:[%s2319_s6 + $0x114] sm:$0xf] }
  0x74   : > { %1293 = vmatpush.bf16.msrb.mxu2 %v2262_v2 }
  0x75   : > { %1395 = vmatpush.bf16.msrb.mxu3 %v2262_v2  ;;  %1497 = vmatpush.bf16.msrb.mxu0 %v2262_v2 }
  0x76   : > { %1599 = vmatpush.bf16.msrb.mxu1 %v2262_v2  ;;  %v874_v2 = vunpack.c.l.b16 %v860_v61 }
  0x78   : > { %1294 = vmatpush.bf16.msrb.mxu2 %v2271_v3  ;;  %v878_v10 = vpack.c.b16 %v874_v2, %v874_v2 }
  0x79   : > { %1396 = vmatpush.bf16.msrb.mxu3 %v2271_v3  ;;  %1498 = vmatpush.bf16.msrb.mxu0 %v2271_v3 }
  0x7a   : > { %1600 = vmatpush.bf16.msrb.mxu1 %v2271_v3  ;;  %v2466_v3 = vld [vmem:[%s2977_s2] ss:$0 sm:$0xff] }
  0x7b   : > { %498 = vmatmul.bf16.gmra.mxu2 %v470_v40 }
  0x7c   : > { %1295 = vmatpush.bf16.msrb.mxu2 %v2280_v4  ;;  %702 = vmatmul.bf16.gmra.mxu0 %v674_v42 }
  0x7d   : > { %1397 = vmatpush.bf16.msrb.mxu3 %v2280_v4  ;;  %1499 = vmatpush.bf16.msrb.mxu0 %v2280_v4 }
  0x7e   : > { %1601 = vmatpush.bf16.msrb.mxu1 %v2280_v4  ;;  %600 = vmatmul.bf16.gmra.mxu3 %v572_v41  ;;  %v976_v4 = vunpack.c.l.b16 %v962_v63  ;;  %v2096_v63 = vld [vmem:[%s2319_s6 + $0x118] sm:$0xff] }
  0x7f   : > { %804 = vmatmul.bf16.gmra.mxu1 %v776_v43 }
  0x80   : > { %1296 = vmatpush.bf16.msrb.mxu2 %v2291_v5  ;;  %v980_v14 = vpack.c.b16 %v976_v4, %v976_v4 }
  0x81   : > { %1398 = vmatpush.bf16.msrb.mxu3 %v2291_v5  ;;  %1500 = vmatpush.bf16.msrb.mxu0 %v2291_v5 }
  0x82   : > { %1602 = vmatpush.bf16.msrb.mxu1 %v2291_v5  ;;  %v1078_v5 = vunpack.c.l.b16 %v1064_v0 }
  0x84   : > { %1297 = vmatpush.bf16.msrb.mxu2 %v2304_v6  ;;  %v1082_v15 = vpack.c.b16 %v1078_v5, %v1078_v5 }
  0x85   : > { %1399 = vmatpush.bf16.msrb.mxu3 %v2304_v6  ;;  %1501 = vmatpush.bf16.msrb.mxu0 %v2304_v6 }
  0x86   : > { %1603 = vmatpush.bf16.msrb.mxu1 %v2304_v6  ;;  %v1180_v6 = vunpack.c.l.b16 %v1166_v1 }
  0x88   : > { %1298 = vmatpush.bf16.msrb.mxu2 %v2314_v7  ;;  %v1184_v17 = vpack.c.b16 %v1180_v6, %v1180_v6 }
  0x89   : > { %1400 = vmatpush.bf16.msrb.mxu3 %v2314_v7  ;;  %1502 = vmatpush.bf16.msrb.mxu0 %v2314_v7 }
  0x8a   : > { %1604 = vmatpush.bf16.msrb.mxu1 %v2314_v7 }
  0x8b   : > { %891 = vmatmul.bf16.vlgmr.msra.gmra.mxu2 %v2084_v44 }
  0x8c   : > { %1095 = vmatmul.bf16.vlgmr.msra.gmra.mxu0 %v2090_v46 }
  0x8e   : > { %993 = vmatmul.bf16.vlgmr.msra.gmra.mxu3 %v2087_v45 }
  0x8f   : > { %1197 = vmatmul.bf16.vlgmr.msra.gmra.mxu1 %v2093_v47 }
  0x9b   : > { %896 = vmatmul.bf16.gmra.mxu2 %v2085_v48 }
  0x9c   : > { %1100 = vmatmul.bf16.gmra.mxu0 %v2091_v50 }
  0x9e   : > { %998 = vmatmul.bf16.gmra.mxu3 %v2088_v49 }
  0x9f   : > { %1202 = vmatmul.bf16.gmra.mxu1 %v2094_v51 }
  0xa8   : > { %v277_v53 = vpop.f32.mrf.mxu0 }
  0xa9   : > { %v382_v56 = vpop.f32.mrf.mxu1  ;;  %v278_v28 = vadd.f32 %v2466_v3, %v277_v53 }
  0xaa   : > { %v383_v29 = vadd.f32 %v2466_v3, %v382_v56 }
  0xab   : > { %901 = vmatmul.bf16.gmra.mxu2 %v2086_v52 }
  0xac   : > { %1105 = vmatmul.bf16.gmra.mxu0 %v2092_v55 }
  0xae   : > { %1003 = vmatmul.bf16.gmra.mxu3 %v2089_v54  ;;  %v287_v58 = vpop.f32.mrf.mxu2 }
  0xaf   : > { %1207 = vmatmul.bf16.gmra.mxu1 %v2095_v57  ;;  %v288_v11 = vadd.f32 %v2466_v3, %v287_v58 }
  0xb0   : > { %v279_v60 = vpop.f32.mrf.mxu0 }
  0xb1   : > { %v392_v59 = vpop.f32.mrf.mxu3  ;;  %v384_v62 = vpop.f32.mrf.mxu1  ;;  %v302_v20 = vrot.slane %v288_v11, 4  ;;  %v280_v25 = vadd.f32 %v2466_v3, %v279_v60  ;;  %v2102_v11 = vld [vmem:[%s2319_s6 + $0x150] sm:$0xff] }
  0xb2   : > { %v393_v18 = vadd.f32 %v2466_v3, %v392_v59  ;;  %v385_v33 = vadd.f32 %v2466_v3, %v384_v62 }
  0xb4   : > { %v406_v22 = vrot.slane %v393_v18, 4 }
  0xb6   : > { %v289_v7 = vpop.f32.mrf.mxu2 }
  0xb7   : > { %v290_v8 = vadd.f32 %v2466_v3, %v289_v7 }
  0xb8   : > { %v282_v13 = vpop.f32.mrf.mxu0 }
  0xb9   : > { %v394_v9 = vpop.f32.mrf.mxu3  ;;  %v387_v16 = vpop.f32.mrf.mxu1  ;;  %v304_v19 = vrot.slane %v290_v8, 4  ;;  %v283_v38 = vadd.f32 %v2466_v3, %v282_v13 }
  0xba   : > { %v395_v12 = vadd.f32 %v2466_v3, %v394_v9  ;;  %v388_v39 = vadd.f32 %v2466_v3, %v387_v16 }
  0xbb   : > { %906 = vmatmul.bf16.gmra.mxu2 %v878_v10  ;;  %v305_v23 = vsel %vm300_vm0, %v302_v20, %v304_v19  ;;  %v2099_v10 = vld [vmem:[%s2319_s6 + $0x134] sm:$0xff] }
  0xbc   : > { %v408_v21 = vrot.slane %v395_v12, 4  ;;  %1110 = vmatmul.bf16.gmra.mxu0 %v1082_v15  ;;  %v313_v34 = vmax.f32 %v280_v25, %v305_v23 }
  0xbe   : > { %1008 = vmatmul.bf16.gmra.mxu3 %v980_v14  ;;  %v292_v24 = vpop.f32.mrf.mxu2  ;;  %v409_v30 = vsel %vm300_vm0, %v406_v22, %v408_v21  ;;  %v322_v50 = vrot.slane %v313_v34, 1 }
  0xbf   : > { %1212 = vmatmul.bf16.gmra.mxu1 %v1184_v17  ;;  %v293_v26 = vadd.f32 %v2466_v3, %v292_v24  ;;  %v417_v42 = vmax.f32 %v385_v33, %v409_v30  ;;  %v2105_v17 = vld [vmem:[%s2319_s6 + $0x16c] sm:$0xff] }
  0xc0   : > { %v284_v32 = vpop.f32.mrf.mxu0 }
  0xc1   : > { %v397_v27 = vpop.f32.mrf.mxu3  ;;  %v306_v35 = vrot.slane %v293_v26, 4  ;;  %v285_v36 = vadd.f32 %v2466_v3, %v284_v32  ;;  %v389_v37 = vpop.f32.mrf.mxu1  ;;  %v425_v59 = vrot.slane %v417_v42, 1 }
  0xc2   : > { %v398_v31 = vadd.f32 %v2466_v3, %v397_v27  ;;  %v390_v41 = vadd.f32 %v2466_v3, %v389_v37 }
  0xc3   : > { %v307_v43 = vsel %vm300_vm0, %v304_v19, %v306_v35  ;;  %v301_v44 = vrot.slane %v285_v36, 4  ;;  %v315_v45 = vmax.f32 %v285_v36, %v306_v35  ;;  %v2097_v35 = vld [vmem:[%s2319_s6 + $0x120] sm:$0xff] }
  0xc4   : > { %v410_v40 = vrot.slane %v398_v31, 4  ;;  %v314_v46 = vmax.f32 %v283_v38, %v307_v43  ;;  %v405_v48 = vrot.slane %v390_v41, 4  ;;  %v2100_v38 = vld [vmem:[%s2319_s6 + $0x13c] sm:$0xff] }
  0xc5   : > { %v303_v52 = vsel %vm300_vm0, %v301_v44, %v302_v20  ;;  %v326_v53 = vrot.slane %v315_v45, 1 }
  0xc6   : > { %v411_v47 = vsel %vm300_vm0, %v408_v21, %v410_v40  ;;  %v419_v49 = vmax.f32 %v390_v41, %v410_v40  ;;  %v324_v54 = vrot.slane %v314_v46, 1  ;;  %v312_v55 = vmax.f32 %v278_v28, %v303_v52  ;;  %v294_v58 = vpop.f32.mrf.mxu2  ;;  %v2104_v52 = vld [vmem:[%s2319_s6 + $0x160] sm:$0xff] }
  0xc7   : > { %v418_v51 = vmax.f32 %v388_v39, %v411_v47  ;;  %v407_v56 = vsel %vm300_vm0, %v405_v48, %v406_v22  ;;  %v2103_v39 = vld [vmem:[%s2319_s6 + $0x158] sm:$0xff] }
  0xc8   : > { %v429_v57 = vrot.slane %v419_v49, 1  ;;  %v416_v61 = vmax.f32 %v383_v29, %v407_v56  ;;  %v325_v0 = vsel %vm320_vm1, %v322_v50, %v324_v54  ;;  %v321_v1 = vrot.slane %v312_v55, 1 }
  0xc9   : > { %v427_v60 = vrot.slane %v418_v51, 1  ;;  %v399_v62 = vpop.f32.mrf.mxu3  ;;  %v327_v2 = vsel %vm320_vm1, %v324_v54, %v326_v53  ;;  %v332_v4 = vrot.slane %v312_v55, 5  ;;  %v337_v5 = vmax.f32 %v313_v34, %v325_v0  ;;  %v2492_v9 = vpop.f32.mrf.mxu0 }
  0xca   : > { %v338_v7 = vmax.f32 %v314_v46, %v327_v2  ;;  %v424_v8 = vrot.slane %v416_v61, 1  ;;  %v323_v13 = vsel %vm320_vm1, %v321_v1, %v322_v50  ;;  %v435_v21 = vrot.slane %v416_v61, 5 }
  0xcb   : > { %v428_v6 = vsel %vm320_vm1, %v425_v59, %v427_v60  ;;  %v335_v14 = vsel %vm334_vm2, %v326_v53, %v332_v4  ;;  %v430_v15 = vsel %vm320_vm1, %v427_v60, %v429_v57  ;;  %341 = vst [vmem:[#allocation2 + $0x8] sm:$0xff] %v337_v5  ;;  %v336_v18 = vmax.f32 %v312_v55, %v323_v13  ;;  %v2107_v55 = vld [vmem:[%s2319_s6 + $0x17c] sm:$0xff]  ;;  %v1268_v4 = vld [vmem:[%s2319_s6 + $0x130] sm:$0xf]  ;;  %v1370_v5 = vld [vmem:[%s2319_s6 + $0x14c] sm:$0xf] }
  0xcc   : > { %v439_v12 = vmax.f32 %v417_v42, %v428_v6  ;;  %v2499_v16 = vpop.f32.mrf.mxu1  ;;  %v339_v19 = vmax.f32 %v315_v45, %v335_v14  ;;  %v426_v20 = vsel %vm320_vm1, %v424_v8, %v425_v59  ;;  %1299 = vmatmul.bf16.vlgmr.msrb.gmra.mxu2 %v2096_v63  ;;  %v437_v23 = vsel %vm334_vm2, %v429_v57, %v435_v21  ;;  %v2106_v42 = vld [vmem:[%s2319_s6 + $0x174] sm:$0xff]  ;;  %v1574_v21 = vld [vmem:[%s2319_s6 + $0x184] sm:$0xf] }
  0xcd   : > { %v438_v22 = vmax.f32 %v416_v61, %v426_v20  ;;  %340 = vst [vmem:[#allocation2] sm:$0xff] %v336_v18  ;;  %v440_v24 = vmax.f32 %v418_v51, %v430_v15  ;;  %1503 = vmatmul.bf16.vlgmr.msrb.gmra.mxu0 %v2102_v11  ;;  %v441_v25 = vmax.f32 %v419_v49, %v437_v23  ;;  %v2098_v49 = vld [vmem:[%s2319_s6 + $0x128] sm:$0xff]  ;;  %v1384_v20 = vunpack.c.l.b16 %v1370_v5 }
  0xce   : > { %443 = vst [vmem:[#allocation2 + $0x24] sm:$0xff] %v439_v12  ;;  %1401 = vmatmul.bf16.vlgmr.msrb.gmra.mxu3 %v2099_v10  ;;  %v484_v26 = vpop.f32.mrf.mxu2  ;;  %v2101_v51 = vld [vmem:[%s2319_s6 + $0x144] sm:$0xff]  ;;  %v689_v59 = vadd.f32 %v2466_v3, %v2492_v9  ;;  %v791_v60 = vadd.f32 %v2466_v3, %v2499_v16 }
  0xcf   : > { %342 = vst [vmem:[#allocation2 + $0x10] sm:$0xff] %v338_v7  ;;  %1605 = vmatmul.bf16.vlgmr.msrb.gmra.mxu1 %v2105_v17  ;;  %v485_v62 = vadd.f32 %v2466_v3, %v484_v26  ;;  %v1472_v11 = vld [vmem:[%s2319_s6 + $0x168] sm:$0xf] }
  0xd0   : > { %343 = vst [vmem:[#allocation2 + $0x18] sm:$0xf] %v339_v19  ;;  %v1282_v19 = vunpack.c.l.b16 %v1268_v4  ;;  %v1486_v26 = vunpack.c.l.b16 %v1472_v11 }
  0xd1   : > { %v586_v27 = vpop.f32.mrf.mxu3  ;;  %442 = vst [vmem:[#allocation2 + $0x1c] sm:$0xff] %v438_v22  ;;  %v690_v28 = vpop.f32.mrf.mxu0 }
  0xd2   : > { %444 = vst [vmem:[#allocation2 + $0x2c] sm:$0xff] %v440_v24  ;;  %v587_v63 = vadd.f32 %v2466_v3, %v586_v27  ;;  %v691_v0 = vadd.f32 %v2466_v3, %v690_v28 }
  0xd3   : > { %445 = vst [vmem:[#allocation2 + $0x34] sm:$0xf] %v441_v25 }
  0xd4   : > { %v792_v29 = vpop.f32.mrf.mxu1  ;;  %v1670_v30 = vld [vmem:[#allocation2] ss:$2 sm:$0xff] }
  0xd5   : > { %v1719_v31 = vmax.f32 %v1670_v30, 0.0  ;;  %v793_v6 = vadd.f32 %v2466_v3, %v792_v29 }
  0xd6   : > { %v486_v32 = vpop.f32.mrf.mxu2 }
  0xd7   : > { %v2542_v7 = vadd.f32 %v2466_v3, %v486_v32 }
  0xd8   : > { %v1672_v33 = vld [vmem:[#allocation2 + $0x10] ss:$2 sm:$0xff] }
  0xd9   : > { %v588_v34 = vpop.f32.mrf.mxu3  ;;  %v1720_v36 = vmax.f32 %v1672_v33, 0.0  ;;  %v693_v37 = vpop.f32.mrf.mxu0 }
  0xda   : > { %v589_v12 = vadd.f32 %v2466_v3, %v588_v34  ;;  %v2563_v27 = vadd.f32 %v2466_v3, %v693_v37  ;;  %v1588_v34 = vunpack.c.l.b16 %v1574_v21  ;;  %v1286_v37 = vpack.c.b16 %v1282_v19, %v1282_v19 }
  0xdb   : > { %v2111_v40 = vpack.c.bf16 %v1720_v36, %v1719_v31 }
  0xdc   : > { %v795_v41 = vpop.f32.mrf.mxu1  ;;  %1304 = vmatmul.bf16.gmra.mxu2 %v2097_v35 }
  0xdd   : > { %2112 = vst [vmem:[%s2509_s14] sm:$0xff] %v2111_v40   ;;  %1508 = vmatmul.bf16.gmra.mxu0 %v2103_v39  ;;  %v2566_v28 = vadd.f32 %v2466_v3, %v795_v41 }
  0xde   : > { %1406 = vmatmul.bf16.gmra.mxu3 %v2100_v38  ;;  %v2515_v43 = vpop.f32.mrf.mxu2 }
  0xdf   : > { %1610 = vmatmul.bf16.gmra.mxu1 %v2106_v42  ;;  %v1388_v42 = vpack.c.b16 %v1384_v20, %v1384_v20 }
  0xe1   : > { %v2517_v44 = vpop.f32.mrf.mxu3  ;;  %v695_v45 = vpop.f32.mrf.mxu0 }
  0xe2   : > { %v2525_v56 = vadd.f32 %v2466_v3, %v695_v45  ;;  %v1490_v45 = vpack.c.b16 %v1486_v26, %v1486_v26 }
  0xe4   : > { %v797_v46 = vpop.f32.mrf.mxu1  ;;  %v711_v8 = vrot.slane %v2525_v56, 4 }
  0xe5   : > { %v2529_v58 = vadd.f32 %v2466_v3, %v797_v46 }
  0xe6   : > { %v491_v47 = vpop.f32.mrf.mxu2 }
  0xe7   : > { %v813_v13 = vrot.slane %v2529_v58, 4  ;;  %v2550_v14 = vadd.f32 %v2466_v3, %v491_v47 }
  0xe9   : > { %v593_v48 = vpop.f32.mrf.mxu3  ;;  %v698_v50 = vpop.f32.mrf.mxu0  ;;  %v507_v31 = vrot.slane %v2550_v14, 4 }
  0xea   : > { %v699_v53 = vadd.f32 %v2466_v3, %v698_v50  ;;  %v2554_v16 = vadd.f32 %v2466_v3, %v593_v48 }
  0xec   : > { %v800_v54 = vpop.f32.mrf.mxu1  ;;  %1309 = vmatmul.bf16.gmra.mxu2 %v2098_v49  ;;  %v712_v61 = vrot.slane %v699_v53, 4  ;;  %v609_v35 = vrot.slane %v2554_v16, 4 }
  0xed   : > { %v801_v57 = vadd.f32 %v2466_v3, %v800_v54  ;;  %1513 = vmatmul.bf16.gmra.mxu0 %v2104_v52  ;;  %v1592_v54 = vpack.c.b16 %v1588_v34, %v1588_v34 }
  0xee   : > { %1411 = vmatmul.bf16.gmra.mxu3 %v2101_v51  ;;  %v494_v2 = vpop.f32.mrf.mxu2  ;;  %v713_v17 = vsel %vm300_vm0, %v711_v8, %v712_v61 }
  0xef   : > { %v814_v1 = vrot.slane %v801_v57, 4  ;;  %1615 = vmatmul.bf16.gmra.mxu1 %v2107_v55  ;;  %v495_v9 = vadd.f32 %v2466_v3, %v494_v2  ;;  %v2570_v32 = vmax.f32 %v689_v59, %v713_v17 }
  0xf1   : > { %v596_v10 = vpop.f32.mrf.mxu3  ;;  %v700_v18 = vpop.f32.mrf.mxu0  ;;  %v815_v22 = vsel %vm300_vm0, %v813_v13, %v814_v1  ;;  %v508_v23 = vrot.slane %v495_v9, 4  ;;  %v730_v51 = vrot.slane %v2570_v32, 1  ;;  %v741_v21 = vrot.slane %v2570_v32, 5 }
  0xf2   : > { %v597_v15 = vadd.f32 %v2466_v3, %v596_v10  ;;  %v2560_v24 = vadd.f32 %v2466_v3, %v700_v18  ;;  %v2574_v36 = vmax.f32 %v791_v60, %v815_v22 }
  0xf3   : > { %v509_v39 = vsel %vm300_vm0, %v507_v31, %v508_v23 }
  0xf4   : > { %v802_v25 = vpop.f32.mrf.mxu1  ;;  %v610_v29 = vrot.slane %v597_v15, 4  ;;  %v714_v33 = vrot.slane %v2560_v24, 4  ;;  %v832_v55 = vrot.slane %v2574_v36, 1  ;;  %v2592_v57 = vmax.f32 %v485_v62, %v509_v39 }
  0xf5   : > { %v803_v30 = vadd.f32 %v2466_v3, %v802_v25 }
  0xf6   : > { %v715_v40 = vsel %vm300_vm0, %v712_v61, %v714_v33  ;;  %v496_v41 = vpop.f32.mrf.mxu2  ;;  %v611_v46 = vsel %vm300_vm0, %v609_v35, %v610_v29  ;;  %v526_v19 = vrot.slane %v2592_v57, 1 }
  0xf7   : > { %v816_v38 = vrot.slane %v803_v30, 4  ;;  %v2579_v47 = vmax.f32 %v691_v0, %v715_v40  ;;  %v2583_v49 = vadd.f32 %v2466_v3, %v496_v41  ;;  %v2596_v0 = vmax.f32 %v587_v63, %v611_v46 }
  0xf9   : > { %v817_v48 = vsel %vm300_vm0, %v814_v1, %v816_v38  ;;  %v598_v50 = vpop.f32.mrf.mxu3  ;;  %v731_v59 = vrot.slane %v2579_v47, 1  ;;  %v510_v60 = vrot.slane %v2583_v49, 4  ;;  %v703_v61 = vpop.f32.mrf.mxu0  ;;  %v628_v20 = vrot.slane %v2596_v0, 1 }
  0xfa   : > { %v2586_v52 = vmax.f32 %v793_v6, %v817_v48  ;;  %v2589_v53 = vadd.f32 %v2466_v3, %v598_v50  ;;  %v704_v4 = vadd.f32 %v2466_v3, %v703_v61  ;;  %v2603_v6 = vadd.f32 %v2466_v3, %v2515_v43 }
  0xfb   : > { %v732_v62 = vsel %vm320_vm1, %v730_v51, %v731_v59  ;;  %v511_v8 = vsel %vm300_vm0, %v508_v23, %v510_v60 }
  0xfc   : > { %v833_v1 = vrot.slane %v2586_v52, 1  ;;  %v612_v2 = vrot.slane %v2589_v53, 4  ;;  %v805_v5 = vpop.f32.mrf.mxu1  ;;  %1314 = vmatmul.bf16.gmra.mxu2 %v1286_v37  ;;  %v744_v9 = vmax.f32 %v2570_v32, %v732_v62  ;;  %v2613_v11 = vmax.f32 %v2542_v7, %v511_v8  ;;  %v1674_v8 = vld [vmem:[#allocation2 + $0x20] ss:$2 sm:$0xff] }
  0xfd   : > { %v806_v63 = vadd.f32 %v2466_v3, %v805_v5  ;;  %v716_v17 = vrot.slane %v704_v4, 4  ;;  %1518 = vmatmul.bf16.gmra.mxu0 %v1490_v45 }
  0xfe   : > { %v834_v10 = vsel %vm320_vm1, %v832_v55, %v833_v1  ;;  %v613_v43 = vsel %vm300_vm0, %v610_v29, %v612_v2  ;;  %1416 = vmatmul.bf16.gmra.mxu3 %v1388_v42  ;;  %748 = vst [vmem:[#allocation2 + $0x70] sm:$0xff] %v744_v9  ;;  %v527_v7 = vrot.slane %v2613_v11, 1  ;;  %v499_v22 = vpop.f32.mrf.mxu2 }
  0xff   : > { %v846_v13 = vmax.f32 %v2574_v36, %v834_v10  ;;  %v2619_v15 = vmax.f32 %v589_v12, %v613_v43  ;;  %v818_v18 = vrot.slane %v806_v63, 4  ;;  %1620 = vmatmul.bf16.gmra.mxu1 %v1592_v54  ;;  %v717_v12 = vsel %vm300_vm0, %v714_v33, %v716_v17 }
 0x100   : > { %v725_v24 = vmax.f32 %v2525_v56, %v716_v17  ;;  %v528_v29 = vsel %vm320_vm1, %v526_v19, %v527_v7  ;;  %v724_v30 = vmax.f32 %v2563_v27, %v717_v12  ;;  %v500_v35 = vadd.f32 %v2466_v3, %v499_v22 }
 0x101   : > { %850 = vst [vmem:[#allocation2 + $0x8c] sm:$0xff] %v846_v13  ;;  %v629_v23 = vrot.slane %v2619_v15, 1  ;;  %v819_v25 = vsel %vm300_vm0, %v816_v38, %v818_v18  ;;  %v601_v26 = vpop.f32.mrf.mxu3  ;;  %v827_v32 = vmax.f32 %v2529_v58, %v818_v18  ;;  %v540_v34 = vmax.f32 %v2592_v57, %v528_v29  ;;  %v705_v38 = vpop.f32.mrf.mxu0 }
 0x102   : > { %v826_v31 = vmax.f32 %v2566_v28, %v819_v25  ;;  %v735_v56 = vrot.slane %v725_v24, 1  ;;  %v733_v39 = vrot.slane %v724_v30, 1  ;;  %v843_v58 = vrot.slane %v2574_v36, 5 }
 0x103   : > { %v630_v33 = vsel %vm320_vm1, %v628_v20, %v629_v23  ;;  %v837_v41 = vrot.slane %v827_v32, 1  ;;  %544 = vst [vmem:[#allocation2 + $0x38] sm:$0xff] %v540_v34  ;;  %v512_v42 = vrot.slane %v500_v35, 4  ;;  %v602_v45 = vadd.f32 %v2466_v3, %v601_v26 }
 0x104   : > { %v642_v37 = vmax.f32 %v2596_v0, %v630_v33  ;;  %v835_v40 = vrot.slane %v826_v31, 1  ;;  %v807_v27 = vpop.f32.mrf.mxu1  ;;  %v743_v28 = vsel %vm334_vm2, %v735_v56, %v741_v21  ;;  %v734_v46 = vsel %vm320_vm1, %v731_v59, %v733_v39 }
 0x105   : > { %v736_v48 = vsel %vm320_vm1, %v733_v39, %v735_v56  ;;  %v747_v50 = vmax.f32 %v725_v24, %v743_v28  ;;  %v745_v54 = vmax.f32 %v2579_v47, %v734_v46  ;;  %v845_v4 = vsel %vm334_vm2, %v837_v41, %v843_v58 }
 0x106   : > { %646 = vst [vmem:[#allocation2 + $0x54] sm:$0xff] %v642_v37  ;;  %v836_v51 = vsel %vm320_vm1, %v833_v1, %v835_v40  ;;  %v746_v55 = vmax.f32 %v724_v30, %v736_v48  ;;  %v838_v61 = vsel %vm320_vm1, %v835_v40, %v837_v41  ;;  %v513_v59 = vsel %vm300_vm0, %v510_v60, %v512_v42  ;;  %v501_v62 = vpop.f32.mrf.mxu2 }
 0x107   : > { %751 = vst [vmem:[#allocation2 + $0x88] sm:$0xf] %v747_v50  ;;  %v847_v36 = vmax.f32 %v2586_v52, %v836_v51  ;;  %v848_v5 = vmax.f32 %v826_v31, %v838_v61  ;;  %v849_v63 = vmax.f32 %v827_v32, %v845_v4  ;;  %v520_v1 = vmax.f32 %v2603_v6, %v513_v59 }
 0x108   : > { %749 = vst [vmem:[#allocation2 + $0x78] sm:$0xff] %v745_v54  ;;  %v521_v47 = vmax.f32 %v2550_v14, %v512_v42  ;;  %v614_v9 = vrot.slane %v602_v45, 4  ;;  %v592_v43 = vadd.f32 %v2466_v3, %v2517_v44  ;;  %v537_v52 = vrot.slane %v2592_v57, 5 }
 0x109   : > { %v603_v10 = vpop.f32.mrf.mxu3  ;;  %750 = vst [vmem:[#allocation2 + $0x80] sm:$0xff] %v746_v55  ;;  %v529_v49 = vrot.slane %v520_v1, 1  ;;  %v2663_v6 = vpop.f32.mrf.mxu0  ;;  %v1721_v14 = vmax.f32 %v1674_v8, 0.0  ;;  %v639_v26 = vrot.slane %v2596_v0, 5 }
 0x10a   : > { %851 = vst [vmem:[#allocation2 + $0x94] sm:$0xff] %v847_v36  ;;  %v531_v13 = vrot.slane %v521_v47, 1  ;;  %v615_v60 = vsel %vm300_vm0, %v612_v2, %v614_v9  ;;  %v623_v17 = vmax.f32 %v2554_v16, %v614_v9  ;;  %v1676_v18 = vld [vmem:[#allocation2 + $0x30] ss:$2 sm:$0xff] }
 0x10b   : > { %852 = vst [vmem:[#allocation2 + $0x9c] sm:$0xff] %v848_v5  ;;  %v622_v19 = vmax.f32 %v592_v43, %v615_v60  ;;  %v1722_v44 = vmax.f32 %v1676_v18, 0.0  ;;  %v530_v57 = vsel %vm320_vm1, %v527_v7, %v529_v49 }
 0x10c   : > { %v2665_v20 = vpop.f32.mrf.mxu1  ;;  %853 = vst [vmem:[#allocation2 + $0xa4] sm:$0xf] %v849_v63  ;;  %v532_v53 = vsel %vm320_vm1, %v529_v49, %v531_v13  ;;  %v539_v2 = vsel %vm334_vm2, %v531_v13, %v537_v52  ;;  %v541_v16 = vmax.f32 %v2613_v11, %v530_v57  ;;  %v633_v25 = vrot.slane %v623_v17, 1 }
 0x10d   : > { %v542_v21 = vmax.f32 %v520_v1, %v532_v53  ;;  %v631_v22 = vrot.slane %v622_v19, 1  ;;  %v2116_v12 = vpack.c.bf16 %v1722_v44, %v1721_v14  ;;  %v543_v24 = vmax.f32 %v521_v47, %v539_v2 }
 0x10e   : > { %545 = vst [vmem:[#allocation2 + $0x40] sm:$0xff] %v541_v16  ;;  %v2677_v30 = vpop.f32.mrf.mxu2  ;;  %v641_v11 = vsel %vm334_vm2, %v633_v25, %v639_v26  ;;  %v1097_v44 = vadd.f32 %v2466_v3, %v2663_v6  ;;  %v1199_v57 = vadd.f32 %v2466_v3, %v2665_v20 }
 0x10f   : > { %v632_v29 = vsel %vm320_vm1, %v629_v23, %v631_v22  ;;  %2168 = vst [vmem:[%s2509_s14 + $0x8] sm:$0xff] %v2116_v12   ;;  %v634_v31 = vsel %vm320_vm1, %v631_v22, %v633_v25  ;;  %v645_v56 = vmax.f32 %v623_v17, %v641_v11  ;;  %v1684_v58 = vld [vmem:[#allocation2 + $0x70] ss:$2 sm:$0xff] }
 0x110   : > { %v1686_v7 = vld [vmem:[#allocation2 + $0x80] ss:$2 sm:$0xff]  ;;  %v643_v32 = vmax.f32 %v2619_v15, %v632_v29  ;;  %546 = vst [vmem:[#allocation2 + $0x48] sm:$0xff] %v542_v21  ;;  %v644_v0 = vmax.f32 %v622_v19, %v634_v31  ;;  %v1726_v51 = vmax.f32 %v1684_v58, 0.0  ;;  %v893_v21 = vadd.f32 %v2466_v3, %v2677_v30 }
 0x111   : > { %v994_v34 = vpop.f32.mrf.mxu3  ;;  %v1727_v33 = vmax.f32 %v1686_v7, 0.0  ;;  %547 = vst [vmem:[#allocation2 + $0x50] sm:$0xf] %v543_v24  ;;  %v1098_v38 = vpop.f32.mrf.mxu0 }
 0x112   : > { %v1688_v35 = vld [vmem:[#allocation2 + $0x90] ss:$2 sm:$0xff]  ;;  %647 = vst [vmem:[#allocation2 + $0x5c] sm:$0xff] %v643_v32  ;;  %v995_v6 = vadd.f32 %v2466_v3, %v994_v34  ;;  %v1099_v26 = vadd.f32 %v2466_v3, %v1098_v38 }
 0x113   : > { %v1728_v23 = vmax.f32 %v1688_v35, 0.0  ;;  %648 = vst [vmem:[#allocation2 + $0x64] sm:$0xff] %v644_v0 }
 0x114   : > { %v1200_v37 = vpop.f32.mrf.mxu1  ;;  %649 = vst [vmem:[#allocation2 + $0x6c] sm:$0xf] %v645_v56 }
 0x115   : > { %v2131_v39 = vpack.c.bf16 %v1728_v23, %v1727_v33  ;;  %v1201_v7 = vadd.f32 %v2466_v3, %v1200_v37 }
 0x116   : > { %v894_v40 = vpop.f32.mrf.mxu2 }
 0x117   : > { %2171 = vst [vmem:[%s2509_s14 + $0x20] sm:$0xff] %v2131_v39   ;;  %v1678_v41 = vld [vmem:[#allocation2 + $0x40] ss:$2 sm:$0xff]  ;;  %v895_v32 = vadd.f32 %v2466_v3, %v894_v40 }
 0x118   : > { %v1723_v27 = vmax.f32 %v1678_v41, 0.0 }
 0x119   : > { %v996_v15 = vpop.f32.mrf.mxu3  ;;  %v1680_v28 = vld [vmem:[#allocation2 + $0x50] ss:$2 sm:$0xff]  ;;  %v1101_v42 = vpop.f32.mrf.mxu0 }
 0x11a   : > { %v1724_v45 = vmax.f32 %v1680_v28, 0.0  ;;  %v997_v34 = vadd.f32 %v2466_v3, %v996_v15  ;;  %v1102_v35 = vadd.f32 %v2466_v3, %v1101_v42 }
 0x11b   : > { %v1682_v48 = vld [vmem:[#allocation2 + $0x60] ss:$2 sm:$0xff] }
 0x11c   : > { %v1203_v46 = vpop.f32.mrf.mxu1  ;;  %v1725_v50 = vmax.f32 %v1682_v48, 0.0  ;;  %v2121_v54 = vpack.c.bf16 %v1724_v45, %v1723_v27 }
 0x11d   : > { %v1204_v58 = vadd.f32 %v2466_v3, %v1203_v46 }
 0x11e   : > { %2169 = vst [vmem:[%s2509_s14 + $0x10] sm:$0xff] %v2121_v54   ;;  %v2126_v55 = vpack.c.bf16 %v1726_v51, %v1725_v50  ;;  %v2685_v61 = vpop.f32.mrf.mxu2 }
 0x120   : > { %2170 = vst [vmem:[%s2509_s14 + $0x18] sm:$0xff] %v2126_v55  }
 0x121   : > { %v2687_v4 = vpop.f32.mrf.mxu3  ;;  %v1103_v36 = vpop.f32.mrf.mxu0 }
 0x122   : > { %v2692_v47 = vadd.f32 %v2466_v3, %v1103_v36 }
 0x124   : > { %v1205_v5 = vpop.f32.mrf.mxu1  ;;  %v1119_v13 = vrot.slane %v2692_v47, 4 }
 0x125   : > { %v2696_v10 = vadd.f32 %v2466_v3, %v1205_v5 }
 0x126   : > { %v899_v59 = vpop.f32.mrf.mxu2 }
 0x127   : > { %v1221_v14 = vrot.slane %v2696_v10, 4  ;;  %v2702_v18 = vadd.f32 %v2466_v3, %v899_v59 }
 0x129   : > { %v1001_v62 = vpop.f32.mrf.mxu3  ;;  %v1106_v8 = vpop.f32.mrf.mxu0  ;;  %v915_v31 = vrot.slane %v2702_v18, 4 }
 0x12a   : > { %v1107_v63 = vadd.f32 %v2466_v3, %v1106_v8  ;;  %v2710_v53 = vadd.f32 %v2466_v3, %v1001_v62  ;;  %v898_v8 = vadd.f32 %v2466_v3, %v2685_v61 }
 0x12c   : > { %v1208_v1 = vpop.f32.mrf.mxu1  ;;  %v1120_v43 = vrot.slane %v1107_v63, 4  ;;  %v1017_v33 = vrot.slane %v2710_v53, 4 }
 0x12d   : > { %v1209_v9 = vadd.f32 %v2466_v3, %v1208_v1 }
 0x12e   : > { %v902_v49 = vpop.f32.mrf.mxu2  ;;  %v1121_v2 = vsel %vm300_vm0, %v1119_v13, %v1120_v43 }
 0x12f   : > { %v1222_v52 = vrot.slane %v1209_v9, 4  ;;  %v903_v60 = vadd.f32 %v2466_v3, %v902_v49  ;;  %v2722_v11 = vmax.f32 %v1097_v44, %v1121_v2 }
 0x131   : > { %v1004_v17 = vpop.f32.mrf.mxu3  ;;  %v1108_v16 = vpop.f32.mrf.mxu0  ;;  %v1223_v22 = vsel %vm300_vm0, %v1221_v14, %v1222_v52  ;;  %v916_v12 = vrot.slane %v903_v60, 4  ;;  %v1138_v15 = vrot.slane %v2722_v11, 1  ;;  %v1149_v2 = vrot.slane %v2722_v11, 5 }
 0x132   : > { %v1005_v19 = vadd.f32 %v2466_v3, %v1004_v17  ;;  %v1109_v24 = vadd.f32 %v2466_v3, %v1108_v16  ;;  %v2726_v0 = vmax.f32 %v1199_v57, %v1223_v22 }
 0x133   : > { %v917_v38 = vsel %vm300_vm0, %v915_v31, %v916_v12 }
 0x134   : > { %v1210_v25 = vpop.f32.mrf.mxu1  ;;  %v1018_v20 = vrot.slane %v1005_v19, 4  ;;  %v1122_v30 = vrot.slane %v1109_v24, 4  ;;  %v1240_v48 = vrot.slane %v2726_v0, 1  ;;  %v2747_v50 = vmax.f32 %v893_v21, %v917_v38 }
 0x135   : > { %v1211_v29 = vadd.f32 %v2466_v3, %v1210_v25 }
 0x136   : > { %v1123_v23 = vsel %vm300_vm0, %v1120_v43, %v1122_v30  ;;  %v904_v37 = vpop.f32.mrf.mxu2  ;;  %v1019_v39 = vsel %vm300_vm0, %v1017_v33, %v1018_v20  ;;  %v934_v19 = vrot.slane %v2747_v50, 1 }
 0x137   : > { %v1224_v56 = vrot.slane %v1211_v29, 4  ;;  %v2733_v41 = vmax.f32 %v1099_v26, %v1123_v23  ;;  %v2737_v27 = vadd.f32 %v2466_v3, %v904_v37  ;;  %v2751_v36 = vmax.f32 %v995_v6, %v1019_v39 }
 0x139   : > { %v1225_v40 = vsel %vm300_vm0, %v1222_v52, %v1224_v56  ;;  %v1006_v28 = vpop.f32.mrf.mxu3  ;;  %v1139_v51 = vrot.slane %v2733_v41, 1  ;;  %v918_v54 = vrot.slane %v2737_v27, 4  ;;  %v1111_v55 = vpop.f32.mrf.mxu0  ;;  %v1036_v44 = vrot.slane %v2751_v36, 1 }
 0x13a   : > { %v2741_v42 = vmax.f32 %v1201_v7, %v1225_v40  ;;  %v2744_v45 = vadd.f32 %v2466_v3, %v1006_v28  ;;  %v1112_v59 = vadd.f32 %v2466_v3, %v1111_v55 }
 0x13b   : > { %v1140_v63 = vsel %vm320_vm1, %v1138_v15, %v1139_v51  ;;  %v919_v1 = vsel %vm300_vm0, %v916_v12, %v918_v54 }
 0x13c   : > { %v1241_v46 = vrot.slane %v2741_v42, 1  ;;  %v1020_v5 = vrot.slane %v2744_v45, 4  ;;  %v1213_v62 = vpop.f32.mrf.mxu1  ;;  %v1152_v43 = vmax.f32 %v2722_v11, %v1140_v63  ;;  %v2765_v49 = vmax.f32 %v895_v32, %v919_v1 }
 0x13d   : > { %v1214_v9 = vadd.f32 %v2466_v3, %v1213_v62  ;;  %v1124_v17 = vrot.slane %v1112_v59, 4 }
 0x13e   : > { %v1242_v52 = vsel %vm320_vm1, %v1240_v48, %v1241_v46  ;;  %v1021_v13 = vsel %vm300_vm0, %v1018_v20, %v1020_v5  ;;  %1156 = vst [vmem:[#allocation2 + $0xe0] sm:$0xff] %v1152_v43  ;;  %v935_v57 = vrot.slane %v2765_v49, 1  ;;  %v907_v16 = vpop.f32.mrf.mxu2 }
 0x13f   : > { %v1254_v61 = vmax.f32 %v2726_v0, %v1242_v52  ;;  %v2771_v60 = vmax.f32 %v997_v34, %v1021_v13  ;;  %v1226_v14 = vrot.slane %v1214_v9, 4  ;;  %v1125_v22 = vsel %vm300_vm0, %v1122_v30, %v1124_v17 }
 0x140   : > { %v1133_v12 = vmax.f32 %v2692_v47, %v1124_v17  ;;  %v936_v6 = vsel %vm320_vm1, %v934_v19, %v935_v57  ;;  %v1132_v26 = vmax.f32 %v1102_v35, %v1125_v22  ;;  %v908_v30 = vadd.f32 %v2466_v3, %v907_v16 }
 0x141   : > { %1258 = vst [vmem:[#allocation2 + $0xfc] sm:$0xff] %v1254_v61  ;;  %v1037_v21 = vrot.slane %v2771_v60, 1  ;;  %v1227_v24 = vsel %vm300_vm0, %v1224_v56, %v1226_v14  ;;  %v1009_v25 = vpop.f32.mrf.mxu3  ;;  %v1235_v29 = vmax.f32 %v2696_v10, %v1226_v14  ;;  %v948_v7 = vmax.f32 %v2747_v50, %v936_v6  ;;  %v1113_v32 = vpop.f32.mrf.mxu0 }
 0x142   : > { %v1234_v20 = vmax.f32 %v1204_v58, %v1227_v24  ;;  %v1143_v11 = vrot.slane %v1133_v12, 1  ;;  %v1141_v33 = vrot.slane %v1132_v26, 1  ;;  %v1251_v10 = vrot.slane %v2726_v0, 5 }
 0x143   : > { %v1038_v31 = vsel %vm320_vm1, %v1036_v44, %v1037_v21  ;;  %v1245_v34 = vrot.slane %v1235_v29, 1  ;;  %952 = vst [vmem:[#allocation2 + $0xa8] sm:$0xff] %v948_v7  ;;  %v920_v23 = vrot.slane %v908_v30, 4  ;;  %v1010_v37 = vadd.f32 %v2466_v3, %v1009_v25 }
 0x144   : > { %v1050_v47 = vmax.f32 %v2751_v36, %v1038_v31  ;;  %v1243_v56 = vrot.slane %v1234_v20, 1  ;;  %v1215_v38 = vpop.f32.mrf.mxu1  ;;  %v1151_v35 = vsel %vm334_vm2, %v1143_v11, %v1149_v2  ;;  %v1142_v39 = vsel %vm320_vm1, %v1139_v51, %v1141_v33 }
 0x145   : > { %v1144_v40 = vsel %vm320_vm1, %v1141_v33, %v1143_v11  ;;  %v1155_v28 = vmax.f32 %v1133_v12, %v1151_v35  ;;  %v1153_v15 = vmax.f32 %v2733_v41, %v1142_v39  ;;  %v1253_v59 = vsel %vm334_vm2, %v1245_v34, %v1251_v10 }
 0x146   : > { %1054 = vst [vmem:[#allocation2 + $0xc4] sm:$0xff] %v1050_v47  ;;  %v1244_v58 = vsel %vm320_vm1, %v1241_v46, %v1243_v56  ;;  %v1154_v48 = vmax.f32 %v1132_v26, %v1144_v40  ;;  %v1246_v55 = vsel %vm320_vm1, %v1243_v56, %v1245_v34  ;;  %v921_v51 = vsel %vm300_vm0, %v918_v54, %v920_v23  ;;  %v909_v63 = vpop.f32.mrf.mxu2 }
 0x147   : > { %1159 = vst [vmem:[#allocation2 + $0xf8] sm:$0xf] %v1155_v28  ;;  %v1255_v0 = vmax.f32 %v2741_v42, %v1244_v58  ;;  %v1256_v62 = vmax.f32 %v1234_v20, %v1246_v55  ;;  %v1257_v1 = vmax.f32 %v1235_v29, %v1253_v59  ;;  %v928_v9 = vmax.f32 %v898_v8, %v921_v51  ;;  %v2833_v59 = vld [vmem:[%s2977_s2] ss:$0 sm:$0xff] }
 0x148   : > { %1157 = vst [vmem:[#allocation2 + $0xe8] sm:$0xff] %v1153_v15  ;;  %v929_v46 = vmax.f32 %v2702_v18, %v920_v23  ;;  %v1022_v41 = vrot.slane %v1010_v37, 4  ;;  %v1000_v52 = vadd.f32 %v2466_v3, %v2687_v4  ;;  %v945_v13 = vrot.slane %v2747_v50, 5 }
 0x149   : > { %v1011_v43 = vpop.f32.mrf.mxu3  ;;  %1158 = vst [vmem:[#allocation2 + $0xf0] sm:$0xff] %v1154_v48  ;;  %v937_v42 = vrot.slane %v928_v9, 1 }
 0x14a   : > { %1259 = vst [vmem:[#allocation2 + $0x104] sm:$0xff] %v1255_v0  ;;  %v939_v61 = vrot.slane %v929_v46, 1  ;;  %v1023_v27 = vsel %vm300_vm0, %v1020_v5, %v1022_v41  ;;  %v1031_v54 = vmax.f32 %v2710_v53, %v1022_v41  ;;  %v2810_v18 = vpop.f32.mrf.mxu0  ;;  %v1047_v53 = vrot.slane %v2751_v36, 5  ;;  %v1690_v31 = vld [vmem:[#allocation2 + $0xa0] ss:$2 sm:$0xff] }
 0x14b   : > { %1260 = vst [vmem:[#allocation2 + $0x10c] sm:$0xff] %v1256_v62  ;;  %v1030_v8 = vmax.f32 %v1000_v52, %v1023_v27  ;;  %v938_v17 = vsel %vm320_vm1, %v935_v57, %v937_v42  ;;  %v1729_v32 = vmax.f32 %v1690_v31, 0.0 }
 0x14c   : > { %1261 = vst [vmem:[#allocation2 + $0x114] sm:$0xf] %v1257_v1  ;;  %v940_v3 = vsel %vm320_vm1, %v937_v42, %v939_v61  ;;  %v947_v4 = vsel %vm334_vm2, %v939_v61, %v945_v13  ;;  %v2815_v50 = vpop.f32.mrf.mxu1  ;;  %v949_v14 = vmax.f32 %v2765_v49, %v938_v17  ;;  %v1041_v44 = vrot.slane %v1031_v54, 1 }
 0x14d   : > { %v950_v45 = vmax.f32 %v928_v9, %v940_v3  ;;  %v951_v19 = vmax.f32 %v929_v46, %v947_v4  ;;  %v1039_v5 = vrot.slane %v1030_v8, 1  ;;  %v1505_v42 = vadd.f32 %v2833_v59, %v2810_v18 }
 0x14e   : > { %953 = vst [vmem:[#allocation2 + $0xb0] sm:$0xff] %v949_v14  ;;  %v1049_v49 = vsel %vm334_vm2, %v1041_v44, %v1047_v53  ;;  %v1607_v4 = vadd.f32 %v2833_v59, %v2815_v50 }
 0x14f   : > { %v1698_v2 = vld [vmem:[#allocation2 + $0xe0] ss:$2 sm:$0xff]  ;;  %v1040_v57 = vsel %vm320_vm1, %v1037_v21, %v1039_v5  ;;  %v1300_v16 = vpop.f32.mrf.mxu2  ;;  %954 = vst [vmem:[#allocation2 + $0xb8] sm:$0xff] %v950_v45  ;;  %v1042_v24 = vsel %vm320_vm1, %v1039_v5, %v1041_v44  ;;  %v1053_v26 = vmax.f32 %v1031_v54, %v1049_v49 }
 0x150   : > { %v1700_v22 = vld [vmem:[#allocation2 + $0xf0] ss:$2 sm:$0xff]  ;;  %v1733_v12 = vmax.f32 %v1698_v2, 0.0  ;;  %v1051_v25 = vmax.f32 %v2771_v60, %v1040_v57  ;;  %955 = vst [vmem:[#allocation2 + $0xc0] sm:$0xf] %v951_v19  ;;  %v1052_v36 = vmax.f32 %v1030_v8, %v1042_v24  ;;  %v1301_v14 = vadd.f32 %v2833_v59, %v1300_v16 }
 0x151   : > { %v1734_v6 = vmax.f32 %v1700_v22, 0.0  ;;  %v1402_v20 = vpop.f32.mrf.mxu3  ;;  %1057 = vst [vmem:[#allocation2 + $0xdc] sm:$0xf] %v1053_v26 }
 0x152   : > { %1055 = vst [vmem:[#allocation2 + $0xcc] sm:$0xff] %v1051_v25  ;;  %v1506_v21 = vpop.f32.mrf.mxu0  ;;  %v1403_v45 = vadd.f32 %v2833_v59, %v1402_v20 }
 0x153   : > { %v2146_v29 = vpack.c.bf16 %v1734_v6, %v1733_v12  ;;  %1056 = vst [vmem:[#allocation2 + $0xd4] sm:$0xff] %v1052_v36  ;;  %v1507_v18 = vadd.f32 %v2833_v59, %v1506_v21 }
 0x154   : > { %v1608_v7 = vpop.f32.mrf.mxu1 }
 0x155   : > { %2174 = vst [vmem:[%s2509_s14 + $0x38] sm:$0xff] %v2146_v29   ;;  %v1609_v22 = vadd.f32 %v2833_v59, %v1608_v7 }
 0x156   : > { %v1692_v11 = vld [vmem:[#allocation2 + $0xb0] ss:$2 sm:$0xff] }
 0x157   : > { %v1302_v30 = vpop.f32.mrf.mxu2  ;;  %v1730_v47 = vmax.f32 %v1692_v11, 0.0 }
 0x158   : > { %v1303_v12 = vadd.f32 %v2833_v59, %v1302_v30 }
 0x159   : > { %v1694_v60 = vld [vmem:[#allocation2 + $0xc0] ss:$2 sm:$0xff]  ;;  %v1404_v33 = vpop.f32.mrf.mxu3  ;;  %v2136_v56 = vpack.c.bf16 %v1730_v47, %v1729_v32 }
 0x15a   : > { %v1731_v34 = vmax.f32 %v1694_v60, 0.0  ;;  %v1696_v38 = vld [vmem:[#allocation2 + $0xd0] ss:$2 sm:$0xff]  ;;  %v1509_v35 = vpop.f32.mrf.mxu0  ;;  %v1405_v24 = vadd.f32 %v2833_v59, %v1404_v33 }
 0x15b   : > { %2172 = vst [vmem:[%s2509_s14 + $0x28] sm:$0xff] %v2136_v56   ;;  %v1732_v10 = vmax.f32 %v1696_v38, 0.0  ;;  %v1510_v36 = vadd.f32 %v2833_v59, %v1509_v35 }
 0x15c   : > { %v1611_v23 = vpop.f32.mrf.mxu1 }
 0x15d   : > { %v2141_v37 = vpack.c.bf16 %v1732_v10, %v1731_v34  ;;  %v1612_v26 = vadd.f32 %v2833_v59, %v1611_v23 }
 0x15f   : > { %v1305_v39 = vpop.f32.mrf.mxu2  ;;  %2173 = vst [vmem:[%s2509_s14 + $0x30] sm:$0xff] %v2141_v37  }
 0x160   : > { %v2877_v7 = vadd.f32 %v2833_v59, %v1305_v39 }
 0x161   : > { %v2828_v40 = vpop.f32.mrf.mxu3 }
 0x162   : > { %v1511_v28 = vpop.f32.mrf.mxu0 }
 0x163   : > { %v2836_v0 = vadd.f32 %v2833_v59, %v1511_v28 }
 0x164   : > { %v1613_v58 = vpop.f32.mrf.mxu1 }
 0x165   : > { %v2840_v63 = vadd.f32 %v2833_v59, %v1613_v58  ;;  %v1527_v41 = vrot.slane %v2836_v0, 4 }
 0x167   : > { %v1307_v15 = vpop.f32.mrf.mxu2  ;;  %v1629_v61 = vrot.slane %v2840_v63, 4 }
 0x168   : > { %v2845_v43 = vadd.f32 %v2833_v59, %v1307_v15 }
 0x169   : > { %v1409_v48 = vpop.f32.mrf.mxu3 }
 0x16a   : > { %v1514_v55 = vpop.f32.mrf.mxu0  ;;  %v2852_v54 = vadd.f32 %v2833_v59, %v1409_v48  ;;  %v1323_v5 = vrot.slane %v2845_v43, 4 }
 0x16b   : > { %v1515_v62 = vadd.f32 %v2833_v59, %v1514_v55 }
 0x16c   : > { %v1616_v51 = vpop.f32.mrf.mxu1  ;;  %v1425_v49 = vrot.slane %v2852_v54, 4 }
 0x16d   : > { %v1617_v1 = vadd.f32 %v2833_v59, %v1616_v51  ;;  %v1528_v9 = vrot.slane %v1515_v62, 4 }
 0x16f   : > { %v1310_v46 = vpop.f32.mrf.mxu2  ;;  %v1630_v52 = vrot.slane %v1617_v1, 4  ;;  %v1529_v8 = vsel %vm300_vm0, %v1527_v41, %v1528_v9 }
 0x170   : > { %v1311_v13 = vadd.f32 %v2833_v59, %v1310_v46  ;;  %v2866_v50 = vmax.f32 %v1505_v42, %v1529_v8 }
 0x171   : > { %v1412_v27 = vpop.f32.mrf.mxu3  ;;  %v1631_v44 = vsel %vm300_vm0, %v1629_v61, %v1630_v52 }
 0x172   : > { %v1324_v17 = vrot.slane %v1311_v13, 4  ;;  %v1413_v3 = vadd.f32 %v2833_v59, %v1412_v27  ;;  %v1516_v19 = vpop.f32.mrf.mxu0  ;;  %v2874_v20 = vmax.f32 %v1607_v4, %v1631_v44  ;;  %v1546_v32 = vrot.slane %v2866_v50, 1 }
 0x173   : > { %v1517_v2 = vadd.f32 %v2833_v59, %v1516_v19  ;;  %v1557_v10 = vrot.slane %v2866_v50, 5 }
 0x174   : > { %v1426_v53 = vrot.slane %v1413_v3, 4  ;;  %v1618_v57 = vpop.f32.mrf.mxu1  ;;  %v1325_v25 = vsel %vm300_vm0, %v1323_v5, %v1324_v17  ;;  %v1648_v23 = vrot.slane %v2874_v20, 1  ;;  %v1659_v58 = vrot.slane %v2874_v20, 5 }
 0x175   : > { %v1619_v16 = vadd.f32 %v2833_v59, %v1618_v57  ;;  %v1530_v6 = vrot.slane %v1517_v2, 4  ;;  %v2885_v47 = vmax.f32 %v1301_v14, %v1325_v25 }
 0x176   : > { %v1427_v31 = vsel %vm300_vm0, %v1425_v49, %v1426_v53 }
 0x177   : > { %v1632_v29 = vrot.slane %v1619_v16, 4  ;;  %v1312_v21 = vpop.f32.mrf.mxu2  ;;  %v1531_v11 = vsel %vm300_vm0, %v1528_v9, %v1530_v6  ;;  %v2898_v37 = vmax.f32 %v1403_v45, %v1427_v31  ;;  %v1342_v1 = vrot.slane %v2885_v47, 1 }
 0x178   : > { %v2882_v30 = vadd.f32 %v2833_v59, %v1312_v21  ;;  %v2887_v60 = vmax.f32 %v1507_v18, %v1531_v11 }
 0x179   : > { %v1633_v33 = vsel %vm300_vm0, %v1630_v52, %v1632_v29  ;;  %v1414_v56 = vpop.f32.mrf.mxu3  ;;  %v1444_v14 = vrot.slane %v2898_v37, 1 }
 0x17a   : > { %v2890_v34 = vmax.f32 %v1609_v22, %v1633_v33  ;;  %v1326_v38 = vrot.slane %v2882_v30, 4  ;;  %v2894_v35 = vadd.f32 %v2833_v59, %v1414_v56  ;;  %v1547_v39 = vrot.slane %v2887_v60, 1  ;;  %v1519_v28 = vpop.f32.mrf.mxu0 }
 0x17b   : > { %v1520_v62 = vadd.f32 %v2833_v59, %v1519_v28 }
 0x17c   : > { %v1649_v15 = vrot.slane %v2890_v34, 1  ;;  %v1327_v48 = vsel %vm300_vm0, %v1324_v17, %v1326_v38  ;;  %v1428_v55 = vrot.slane %v2894_v35, 4  ;;  %v1621_v51 = vpop.f32.mrf.mxu1  ;;  %v1548_v9 = vsel %vm320_vm1, %v1546_v32, %v1547_v39 }
 0x17d   : > { %v2908_v46 = vmax.f32 %v1303_v12, %v1327_v48  ;;  %v1622_v41 = vadd.f32 %v2833_v59, %v1621_v51  ;;  %v1560_v52 = vmax.f32 %v2866_v50, %v1548_v9  ;;  %v1532_v61 = vrot.slane %v1520_v62, 4  ;;  %v1702_v51 = vld [vmem:[#allocation2 + $0x100] ss:$2 sm:$0xff] }
 0x17e   : > { %v1650_v13 = vsel %vm320_vm1, %v1648_v23, %v1649_v15  ;;  %v1429_v42 = vsel %vm300_vm0, %v1426_v53, %v1428_v55 }
 0x17f   : > { %v1662_v27 = vmax.f32 %v2874_v20, %v1650_v13  ;;  %v1343_v8 = vrot.slane %v2908_v46, 1  ;;  %v2918_v17 = vmax.f32 %v1405_v24, %v1429_v42  ;;  %v1634_v3 = vrot.slane %v1622_v41, 4  ;;  %v1315_v4 = vpop.f32.mrf.mxu2  ;;  %1564 = vst [vmem:[#allocation2 + $0x150] sm:$0xff] %v1560_v52 }
 0x180   : > { %v1533_v45 = vsel %vm300_vm0, %v1530_v6, %v1532_v61  ;;  %v1541_v18 = vmax.f32 %v2836_v0, %v1532_v61  ;;  %v1316_v19 = vadd.f32 %v2833_v59, %v1315_v4  ;;  %v1735_v13 = vmax.f32 %v1702_v51, 0.0 }
 0x181   : > { %1666 = vst [vmem:[#allocation2 + $0x16c] sm:$0xff] %v1662_v27  ;;  %v1344_v5 = vsel %vm320_vm1, %v1342_v1, %v1343_v8  ;;  %v1445_v44 = vrot.slane %v2918_v17, 1  ;;  %v1540_v53 = vmax.f32 %v1510_v36, %v1533_v45  ;;  %v1635_v2 = vsel %vm300_vm0, %v1632_v29, %v1634_v3  ;;  %v1417_v57 = vpop.f32.mrf.mxu3 }
 0x182   : > { %v1356_v22 = vmax.f32 %v2885_v47, %v1344_v5  ;;  %v1551_v12 = vrot.slane %v1541_v18, 1  ;;  %v1642_v50 = vmax.f32 %v1612_v26, %v1635_v2  ;;  %v1643_v16 = vmax.f32 %v2840_v63, %v1634_v3  ;;  %v1521_v6 = vpop.f32.mrf.mxu0 }
 0x183   : > { %v1446_v0 = vsel %vm320_vm1, %v1444_v14, %v1445_v44  ;;  %v1549_v24 = vrot.slane %v1540_v53, 1  ;;  %v1328_v49 = vrot.slane %v1316_v19, 4  ;;  %v1418_v25 = vadd.f32 %v2833_v59, %v1417_v57 }
 0x184   : > { %1360 = vst [vmem:[#allocation2 + $0x118] sm:$0xff] %v1356_v22  ;;  %v1458_v36 = vmax.f32 %v2898_v37, %v1446_v0  ;;  %v1559_v20 = vsel %vm334_vm2, %v1551_v12, %v1557_v10  ;;  %v1651_v29 = vrot.slane %v1642_v50, 1  ;;  %v1653_v21 = vrot.slane %v1643_v16, 1  ;;  %v1623_v31 = vpop.f32.mrf.mxu1 }
 0x185   : > { %v1550_v26 = vsel %vm320_vm1, %v1547_v39, %v1549_v24  ;;  %v1552_v63 = vsel %vm320_vm1, %v1549_v24, %v1551_v12  ;;  %v1563_v11 = vmax.f32 %v1541_v18, %v1559_v20  ;;  %v1329_v30 = vsel %vm300_vm0, %v1326_v38, %v1328_v49 }
 0x186   : > { %1462 = vst [vmem:[#allocation2 + $0x134] sm:$0xff] %v1458_v36  ;;  %v1561_v32 = vmax.f32 %v2887_v60, %v1550_v26  ;;  %v1562_v33 = vmax.f32 %v1540_v53, %v1552_v63  ;;  %v1652_v56 = vsel %vm320_vm1, %v1649_v15, %v1651_v29  ;;  %v1654_v23 = vsel %vm320_vm1, %v1651_v29, %v1653_v21 }
 0x187   : > { %1567 = vst [vmem:[#allocation2 + $0x168] sm:$0xf] %v1563_v11  ;;  %v1661_v10 = vsel %vm334_vm2, %v1653_v21, %v1659_v58  ;;  %v1663_v28 = vmax.f32 %v2890_v34, %v1652_v56  ;;  %v1664_v48 = vmax.f32 %v1642_v50, %v1654_v23  ;;  %v1336_v39 = vmax.f32 %v2877_v7, %v1329_v30  ;;  %v1317_v62 = vpop.f32.mrf.mxu2 }
 0x188   : > { %1565 = vst [vmem:[#allocation2 + $0x158] sm:$0xff] %v1561_v32  ;;  %v1665_v38 = vmax.f32 %v1643_v16, %v1661_v10  ;;  %v1337_v1 = vmax.f32 %v2845_v43, %v1328_v49  ;;  %v1430_v60 = vrot.slane %v1418_v25, 4  ;;  %v1408_v15 = vadd.f32 %v2833_v59, %v2828_v40 }
 0x189   : > { %1566 = vst [vmem:[#allocation2 + $0x160] sm:$0xff] %v1562_v33  ;;  %v1345_v9 = vrot.slane %v1336_v39, 1  ;;  %v1419_v41 = vpop.f32.mrf.mxu3  ;;  %v1353_v34 = vrot.slane %v2885_v47, 5  ;;  %v1455_v43 = vrot.slane %v2898_v37, 5 }
 0x18a   : > { %1667 = vst [vmem:[#allocation2 + $0x174] sm:$0xff] %v1663_v28  ;;  %v1347_v58 = vrot.slane %v1337_v1, 1  ;;  %v1431_v7 = vsel %vm300_vm0, %v1428_v55, %v1430_v60  ;;  %v1439_v52 = vmax.f32 %v2852_v54, %v1430_v60 }
 0x18b   : > { %v1704_v42 = vld [vmem:[#allocation2 + $0x110] ss:$2 sm:$0xff]  ;;  %1668 = vst [vmem:[#allocation2 + $0x17c] sm:$0xff] %v1664_v48  ;;  %v1346_v40 = vsel %vm320_vm1, %v1343_v8, %v1345_v9  ;;  %v1438_v59 = vmax.f32 %v1408_v15, %v1431_v7 }
 0x18c   : > { %v1736_v61 = vmax.f32 %v1704_v42, 0.0  ;;  %1669 = vst [vmem:[#allocation2 + $0x184] sm:$0xf] %v1665_v38  ;;  %v1348_v47 = vsel %vm320_vm1, %v1345_v9, %v1347_v58  ;;  %v1355_v35 = vsel %vm334_vm2, %v1347_v58, %v1353_v34  ;;  %v1357_v55 = vmax.f32 %v2908_v46, %v1346_v40 }
 0x18d   : > { %v1358_v54 = vmax.f32 %v1336_v39, %v1348_v47  ;;  %v1359_v27 = vmax.f32 %v1337_v1, %v1355_v35  ;;  %v1447_v3 = vrot.slane %v1438_v59, 1  ;;  %v1449_v4 = vrot.slane %v1439_v52, 1 }
 0x18e   : > { %v2151_v14 = vpack.c.bf16 %v1736_v61, %v1735_v13  ;;  %1361 = vst [vmem:[#allocation2 + $0x120] sm:$0xff] %v1357_v55 }
 0x18f   : > { %1362 = vst [vmem:[#allocation2 + $0x128] sm:$0xff] %v1358_v54  ;;  %v1448_v37 = vsel %vm320_vm1, %v1445_v44, %v1447_v3  ;;  %v1450_v8 = vsel %vm320_vm1, %v1447_v3, %v1449_v4  ;;  %v1457_v45 = vsel %vm334_vm2, %v1449_v4, %v1455_v43  ;;  %v1712_v24 = vld [vmem:[#allocation2 + $0x150] ss:$2 sm:$0xff] }
 0x190   : > { %2175 = vst [vmem:[%s2509_s14 + $0x40] sm:$0xff] %v2151_v14   ;;  %v1714_v18 = vld [vmem:[#allocation2 + $0x160] ss:$2 sm:$0xff]  ;;  %v1459_v46 = vmax.f32 %v2918_v17, %v1448_v37  ;;  %v1460_v19 = vmax.f32 %v1438_v59, %v1450_v8  ;;  %v1461_v5 = vmax.f32 %v1439_v52, %v1457_v45  ;;  %v1740_v36 = vmax.f32 %v1712_v24, 0.0 }
 0x191   : > { %v1741_v53 = vmax.f32 %v1714_v18, 0.0  ;;  %1363 = vst [vmem:[#allocation2 + $0x130] sm:$0xf] %v1359_v27 }
 0x192   : > { %v1716_v2 = vld [vmem:[#allocation2 + $0x170] ss:$2 sm:$0xff]  ;;  %1463 = vst [vmem:[#allocation2 + $0x13c] sm:$0xff] %v1459_v46 }
 0x193   : > { %v1718_v57 = vld [vmem:[#allocation2 + $0x180] ss:$2 sm:$0xf]  ;;  %v1742_v22 = vmax.f32 %v1716_v2, 0.0  ;;  %1464 = vst [vmem:[#allocation2 + $0x144] sm:$0xff] %v1460_v19 }
 0x194   : > { %v1743_v44 = vmax.f32 %v1718_v57, 0.0  ;;  %1465 = vst [vmem:[#allocation2 + $0x14c] sm:$0xf] %v1461_v5 }
 0x195   : > { %v2166_v12 = vpack.c.bf16 %v1742_v22, %v1741_v53 }
 0x196   : > { %v1768_v50 = vpack.c.bf16 %v1743_v44, %v1743_v44  ;;  %v1706_v16 = vld [vmem:[#allocation2 + $0x120] ss:$2 sm:$0xff] }
 0x197   : > { %2178 = vst [vmem:[%s2509_s14 + $0x58] sm:$0xff] %v2166_v12   ;;  %v1737_v17 = vmax.f32 %v1706_v16, 0.0 }
 0x198   : > { %1793 = vst [vmem:[%s2509_s14 + $0x60] sm:$0x3] %v1768_v50 }
 0x199   : > { %v1708_v0 = vld [vmem:[#allocation2 + $0x130] ss:$2 sm:$0xff] }
 0x19a   : > { %v1738_v49 = vmax.f32 %v1708_v0, 0.0 }
 0x19b   : > { %v1710_v25 = vld [vmem:[#allocation2 + $0x140] ss:$2 sm:$0xff] }
 0x19c   : > { %v1739_v6 = vmax.f32 %v1710_v25, 0.0  ;;  %v2156_v20 = vpack.c.bf16 %v1738_v49, %v1737_v17 }
 0x19e   : > { %2176 = vst [vmem:[%s2509_s14 + $0x48] sm:$0xff] %v2156_v20   ;;  %v2161_v29 = vpack.c.bf16 %v1740_v36, %v1739_v6 }
 0x1a0   : > { %2177 = vst [vmem:[%s2509_s14 + $0x50] sm:$0xff] %v2161_v29  }
 0x1a1 PF: > { %s13_s12 = sadd.s32 1, %s2213_s12  }
 0x1a2   : > { %p10_p4 = scmp.ge.s32.totalorder %s13_s12, 4  }
 0x1a4   :  { %12 = sbr.rel (!%p10_p4) target bundleno = 1 (0x1), region = 86 }

// kernel: cnn_cifar_forward.5
= control target key start
LH: loop header
LB: loop body
LE: loop exit
PB: predicated region body
PF: predicated region fallthrough
CT: control target
= control target key end

     0   :  { %s4049_s1 = inlined_call_operand.vmem [shape: bf16[3200,128], index: 1, kind: input, shape index: {}]   ;;  %s4050_s0 = inlined_call_operand.vmem [shape: bf16[8,3200], index: 0, kind: input, shape index: {}]   ;;  %s4051_s2 = inlined_call_operand.vmem [shape: f32[1,128], index: 2, kind: input, shape index: {}]   ;;  %s4052_s4 = inlined_call_operand.vmem [shape: f32[1,128], index: 4, kind: input, shape index: {}]   ;;  %s4053_s3 = inlined_call_operand.vmem [shape: bf16[128,128], index: 3, kind: input, shape index: {}]   ;;  %s4054_s5 = inlined_call_operand.vmem [shape: bf16[128,128], index: 5, kind: input, shape index: {}]   ;;  %s4055_s6 = inlined_call_operand.vmem [shape: f32[1,128], index: 6, kind: input, shape index: {}]   ;;  %s4056_s7 = inlined_call_operand.vmem [shape: f32[8,128], index: 7, kind: output, shape index: {}]  }
   0x1   :  { %v3098_v0 = vld [vmem:[%s4049_s1 + $0x38] sm:$0xff]  ;;  %v3097_v4 = vld [vmem:[%s4049_s1 + $0x30] sm:$0xff]  ;;  %v3096_v8 = vld [vmem:[%s4049_s1 + $0x28] sm:$0xff] }
   0x2   :  { %v3114_v1 = vld [vmem:[%s4049_s1 + $0xb8] sm:$0xff]  ;;  %1731 = vmatpush.bf16.msra.mxu0 %v3098_v0  ;;  %v3113_v5 = vld [vmem:[%s4049_s1 + $0xb0] sm:$0xff]  ;;  %v3112_v9 = vld [vmem:[%s4049_s1 + $0xa8] sm:$0xff] }
   0x3   :  { %v3106_v2 = vld [vmem:[%s4049_s1 + $0x78] sm:$0xff]  ;;  %1757 = vmatpush.bf16.msra.mxu2 %v3114_v1  ;;  %v3105_v6 = vld [vmem:[%s4049_s1 + $0x70] sm:$0xff]  ;;  %v3104_v10 = vld [vmem:[%s4049_s1 + $0x68] sm:$0xff] }
   0x4   :  { %v3122_v3 = vld [vmem:[%s4049_s1 + $0xf8] sm:$0xff]  ;;  %1744 = vmatpush.bf16.msra.mxu1 %v3106_v2  ;;  %v3121_v7 = vld [vmem:[%s4049_s1 + $0xf0] sm:$0xff]  ;;  %v3120_v11 = vld [vmem:[%s4049_s1 + $0xe8] sm:$0xff] }
   0x5   :  { %1770 = vmatpush.bf16.msra.mxu3 %v3122_v3  ;;  %v3095_v12 = vld [vmem:[%s4049_s1 + $0x20] sm:$0xff]  ;;  %v3094_v16 = vld [vmem:[%s4049_s1 + $0x18] sm:$0xff]  ;;  %v3093_v20 = vld [vmem:[%s4049_s1 + $0x10] sm:$0xff] }
   0x6   :  { %1732 = vmatpush.bf16.msra.mxu0 %v3097_v4  ;;  %v3111_v13 = vld [vmem:[%s4049_s1 + $0xa0] sm:$0xff]  ;;  %v3110_v17 = vld [vmem:[%s4049_s1 + $0x98] sm:$0xff]  ;;  %v3109_v21 = vld [vmem:[%s4049_s1 + $0x90] sm:$0xff] }
   0x7   :  { %1758 = vmatpush.bf16.msra.mxu2 %v3113_v5  ;;  %v3103_v14 = vld [vmem:[%s4049_s1 + $0x60] sm:$0xff]  ;;  %v3102_v18 = vld [vmem:[%s4049_s1 + $0x58] sm:$0xff]  ;;  %v3101_v22 = vld [vmem:[%s4049_s1 + $0x50] sm:$0xff] }
   0x8   :  { %1745 = vmatpush.bf16.msra.mxu1 %v3105_v6  ;;  %v3119_v15 = vld [vmem:[%s4049_s1 + $0xe0] sm:$0xff]  ;;  %v3118_v19 = vld [vmem:[%s4049_s1 + $0xd8] sm:$0xff]  ;;  %v3117_v23 = vld [vmem:[%s4049_s1 + $0xd0] sm:$0xff] }
   0x9   :  { %1771 = vmatpush.bf16.msra.mxu3 %v3121_v7  ;;  %v3092_v24 = vld [vmem:[%s4049_s1 + $0x8] sm:$0xff]  ;;  %v26_v29 = vld [vmem:[%s4050_s0] sm:$0xff]  ;;  %v3130_v34 = vld [vmem:[%s4049_s1 + $0x138] sm:$0xff] }
   0xa   :  { %1733 = vmatpush.bf16.msra.mxu0 %v3096_v8  ;;  %v3108_v25 = vld [vmem:[%s4049_s1 + $0x88] sm:$0xff]  ;;  %v3091_v30 = vld [vmem:[%s4049_s1] sm:$0xff]  ;;  %v456_v33 = vunpack.c.l.b16 %v26_v29  ;;  %v3146_v35 = vld [vmem:[%s4049_s1 + $0x1b8] sm:$0xff]  ;;  %v457_v39 = vunpack.c.h.b16 %v26_v29 }
   0xb   :  { %1759 = vmatpush.bf16.msra.mxu2 %v3112_v9  ;;  %v3100_v26 = vld [vmem:[%s4049_s1 + $0x48] sm:$0xff]  ;;  %v3107_v31 = vld [vmem:[%s4049_s1 + $0x80] sm:$0xff]  ;;  %v3138_v40 = vld [vmem:[%s4049_s1 + $0x178] sm:$0xff] }
   0xc   :  { %1746 = vmatpush.bf16.msra.mxu1 %v3104_v10  ;;  %v3116_v27 = vld [vmem:[%s4049_s1 + $0xc8] sm:$0xff]  ;;  %v3099_v36 = vld [vmem:[%s4049_s1 + $0x40] sm:$0xff]  ;;  %v3154_v41 = vld [vmem:[%s4049_s1 + $0x1f8] sm:$0xff]  ;;  %v481_v43 = vpack.c.b16 %v456_v33, %v456_v33  ;;  %v482_v47 = vpack.c.b16 %v457_v39, %v457_v39 }
   0xd   :  { %1772 = vmatpush.bf16.msra.mxu3 %v3120_v11  ;;  %v27_v28 = vld [vmem:[%s4050_s0 + $0x8] sm:$0xff]  ;;  %v3115_v37 = vld [vmem:[%s4049_s1 + $0xc0] sm:$0xff]  ;;  %v3129_v44 = vld [vmem:[%s4049_s1 + $0x130] sm:$0xff] }
   0xe   :  { %1734 = vmatpush.bf16.msra.mxu0 %v3095_v12  ;;  %v458_v32 = vunpack.c.l.b16 %v27_v28  ;;  %v459_v38 = vunpack.c.h.b16 %v27_v28  ;;  %v3145_v45 = vld [vmem:[%s4049_s1 + $0x1b0] sm:$0xff]  ;;  %v3128_v50 = vld [vmem:[%s4049_s1 + $0x128] sm:$0xff]  ;;  %v3127_v54 = vld [vmem:[%s4049_s1 + $0x120] sm:$0xff] }
   0xf   :  { %1760 = vmatpush.bf16.msra.mxu2 %v3111_v13  ;;  %v3137_v48 = vld [vmem:[%s4049_s1 + $0x170] sm:$0xff]  ;;  %v3144_v51 = vld [vmem:[%s4049_s1 + $0x1a8] sm:$0xff]  ;;  %v3143_v55 = vld [vmem:[%s4049_s1 + $0x1a0] sm:$0xff] }
  0x10   :  { %1747 = vmatpush.bf16.msra.mxu1 %v3103_v14  ;;  %v483_v42 = vpack.c.b16 %v458_v32, %v458_v32  ;;  %v484_v46 = vpack.c.b16 %v459_v38, %v459_v38  ;;  %v3153_v49 = vld [vmem:[%s4049_s1 + $0x1f0] sm:$0xff]  ;;  %v3136_v52 = vld [vmem:[%s4049_s1 + $0x168] sm:$0xff]  ;;  %v3135_v56 = vld [vmem:[%s4049_s1 + $0x160] sm:$0xff] }
  0x11   :  { %1773 = vmatpush.bf16.msra.mxu3 %v3119_v15  ;;  %v3152_v53 = vld [vmem:[%s4049_s1 + $0x1e8] sm:$0xff]  ;;  %v3151_v57 = vld [vmem:[%s4049_s1 + $0x1e0] sm:$0xff]  ;;  %v3126_v58 = vld [vmem:[%s4049_s1 + $0x118] sm:$0xff] }
  0x12   :  { %1735 = vmatpush.bf16.msra.mxu0 %v3094_v16  ;;  %v3142_v59 = vld [vmem:[%s4049_s1 + $0x198] sm:$0xff]  ;;  %v3125_v62 = vld [vmem:[%s4049_s1 + $0x110] sm:$0xff]  ;;  %v3124_v2 = vld [vmem:[%s4049_s1 + $0x108] sm:$0xff] }
  0x13   :  { %1761 = vmatpush.bf16.msra.mxu2 %v3110_v17  ;;  %v3134_v60 = vld [vmem:[%s4049_s1 + $0x158] sm:$0xff]  ;;  %v3141_v63 = vld [vmem:[%s4049_s1 + $0x190] sm:$0xff]  ;;  %v3140_v3 = vld [vmem:[%s4049_s1 + $0x188] sm:$0xff] }
  0x14   :  { %1748 = vmatpush.bf16.msra.mxu1 %v3102_v18  ;;  %v3150_v61 = vld [vmem:[%s4049_s1 + $0x1d8] sm:$0xff]  ;;  %v3133_v0 = vld [vmem:[%s4049_s1 + $0x150] sm:$0xff]  ;;  %v3132_v6 = vld [vmem:[%s4049_s1 + $0x148] sm:$0xff] }
  0x15   :  { %1774 = vmatpush.bf16.msra.mxu3 %v3118_v19  ;;  %v3149_v1 = vld [vmem:[%s4049_s1 + $0x1d0] sm:$0xff]  ;;  %v29_v4 = vld [vmem:[%s4050_s0 + $0x18] sm:$0xff]  ;;  %v3148_v7 = vld [vmem:[%s4049_s1 + $0x1c8] sm:$0xff] }
  0x16   :  { %1736 = vmatpush.bf16.msra.mxu0 %v3093_v20  ;;  %v28_v5 = vld [vmem:[%s4050_s0 + $0x10] sm:$0xff]  ;;  %v3123_v8 = vld [vmem:[%s4049_s1 + $0x100] sm:$0xff]  ;;  %v462_v10 = vunpack.c.l.b16 %v29_v4  ;;  %v3162_v12 = vld [vmem:[%s4049_s1 + $0x238] sm:$0xff]  ;;  %v463_v16 = vunpack.c.h.b16 %v29_v4 }
  0x17   :  { %1762 = vmatpush.bf16.msra.mxu2 %v3109_v21  ;;  %v3139_v9 = vld [vmem:[%s4049_s1 + $0x180] sm:$0xff]  ;;  %v460_v11 = vunpack.c.l.b16 %v28_v5  ;;  %v3178_v13 = vld [vmem:[%s4049_s1 + $0x2b8] sm:$0xff]  ;;  %v461_v17 = vunpack.c.h.b16 %v28_v5  ;;  %v3160_v28 = vld [vmem:[%s4049_s1 + $0x228] sm:$0xff] }
  0x18   :  { %1749 = vmatpush.bf16.msra.mxu1 %v3101_v22  ;;  %v3131_v14 = vld [vmem:[%s4049_s1 + $0x140] sm:$0xff]  ;;  %v3170_v18 = vld [vmem:[%s4049_s1 + $0x278] sm:$0xff]  ;;  %v487_v20 = vpack.c.b16 %v462_v10, %v462_v10  ;;  %v3161_v22 = vld [vmem:[%s4049_s1 + $0x230] sm:$0xff] }
  0x19   :  { %1775 = vmatpush.bf16.msra.mxu3 %v3117_v23  ;;  %v3147_v15 = vld [vmem:[%s4049_s1 + $0x1c0] sm:$0xff]  ;;  %v3186_v19 = vld [vmem:[%s4049_s1 + $0x2f8] sm:$0xff]  ;;  %v485_v21 = vpack.c.b16 %v460_v11, %v460_v11  ;;  %v3177_v23 = vld [vmem:[%s4049_s1 + $0x2b0] sm:$0xff] }
  0x1a   :  { %1737 = vmatpush.bf16.msra.mxu0 %v3092_v24  ;;  %v488_v24 = vpack.c.b16 %v463_v16, %v463_v16  ;;  %v3176_v29 = vld [vmem:[%s4049_s1 + $0x2a8] sm:$0xff]  ;;  %v3159_v32 = vld [vmem:[%s4049_s1 + $0x220] sm:$0xff]  ;;  %v3166_v38 = vld [vmem:[%s4049_s1 + $0x258] sm:$0xff] }
  0x1b   :  { %1763 = vmatpush.bf16.msra.mxu2 %v3108_v25  ;;  %v486_v25 = vpack.c.b16 %v461_v17, %v461_v17  ;;  %v3175_v33 = vld [vmem:[%s4049_s1 + $0x2a0] sm:$0xff]  ;;  %v3182_v39 = vld [vmem:[%s4049_s1 + $0x2d8] sm:$0xff]  ;;  %v3201_v4 = vld [vmem:[%s4049_s1 + $0x370] sm:$0xff] }
  0x1c   :  { %1750 = vmatpush.bf16.msra.mxu1 %v3100_v26  ;;  %v3169_v26 = vld [vmem:[%s4049_s1 + $0x270] sm:$0xff]  ;;  %v3191_v10 = vld [vmem:[%s4049_s1 + $0x320] sm:$0xff]  ;;  %v3198_v16 = vld [vmem:[%s4049_s1 + $0x358] sm:$0xff] }
  0x1d   :  { %1776 = vmatpush.bf16.msra.mxu3 %v3116_v27  ;;  %v3185_v27 = vld [vmem:[%s4049_s1 + $0x2f0] sm:$0xff]  ;;  %v3207_v11 = vld [vmem:[%s4049_s1 + $0x3a0] sm:$0xff]  ;;  %v3214_v17 = vld [vmem:[%s4049_s1 + $0x3d8] sm:$0xff] }
  0x1e   :  { %1738 = vmatpush.bf16.msra.mxu0 %v3091_v30  ;;  %v3168_v30 = vld [vmem:[%s4049_s1 + $0x268] sm:$0xff]  ;;  %v3217_v5 = vld [vmem:[%s4049_s1 + $0x3f0] sm:$0xff] }
  0x1f   :  { %1764 = vmatpush.bf16.msra.mxu2 %v3107_v31  ;;  %v3184_v31 = vld [vmem:[%s4049_s1 + $0x2e8] sm:$0xff] }
  0x20   :  { %1751 = vmatpush.bf16.msra.mxu1 %v3099_v36  ;;  %v3158_v36 = vld [vmem:[%s4049_s1 + $0x218] sm:$0xff] }
  0x21   :  { %1777 = vmatpush.bf16.msra.mxu3 %v3115_v37  ;;  %1739 = vmatmul.bf16.vlgmr.msra.gmra.mxu0 %v481_v43  ;;  %v3174_v37 = vld [vmem:[%s4049_s1 + $0x298] sm:$0xff]  ;;  %v3181_v43 = vld [vmem:[%s4049_s1 + $0x2d0] sm:$0xff] }
  0x22   :  { %1783 = vmatpush.bf16.msrb.mxu0 %v3130_v34  ;;  %1765 = vmatmul.bf16.vlgmr.msra.gmra.mxu2 %v483_v42  ;;  %v3167_v34 = vld [vmem:[%s4049_s1 + $0x260] sm:$0xff]  ;;  %v3165_v42 = vld [vmem:[%s4049_s1 + $0x250] sm:$0xff] }
  0x23   :  { %1809 = vmatpush.bf16.msrb.mxu2 %v3146_v35  ;;  %1752 = vmatmul.bf16.vlgmr.msra.gmra.mxu1 %v482_v47  ;;  %v3183_v35 = vld [vmem:[%s4049_s1 + $0x2e0] sm:$0xff]  ;;  %v31_v47 = vld [vmem:[%s4050_s0 + $0x28] sm:$0xff] }
  0x24   :  { %1796 = vmatpush.bf16.msrb.mxu1 %v3138_v40  ;;  %1778 = vmatmul.bf16.vlgmr.msra.gmra.mxu3 %v484_v46  ;;  %v3157_v40 = vld [vmem:[%s4049_s1 + $0x210] sm:$0xff]  ;;  %v30_v46 = vld [vmem:[%s4050_s0 + $0x20] sm:$0xff] }
  0x25   :  { %1822 = vmatpush.bf16.msrb.mxu3 %v3154_v41  ;;  %v3173_v41 = vld [vmem:[%s4049_s1 + $0x290] sm:$0xff] }
  0x26   :  { %1784 = vmatpush.bf16.msrb.mxu0 %v3129_v44  ;;  %v3156_v44 = vld [vmem:[%s4049_s1 + $0x208] sm:$0xff] }
  0x27   :  { %1810 = vmatpush.bf16.msrb.mxu2 %v3145_v45  ;;  %v3172_v45 = vld [vmem:[%s4049_s1 + $0x288] sm:$0xff] }
  0x28   :  { %1797 = vmatpush.bf16.msrb.mxu1 %v3137_v48  ;;  %v3164_v48 = vld [vmem:[%s4049_s1 + $0x248] sm:$0xff] }
  0x29   :  { %1823 = vmatpush.bf16.msrb.mxu3 %v3153_v49  ;;  %v3180_v49 = vld [vmem:[%s4049_s1 + $0x2c8] sm:$0xff] }
  0x2a   :  { %1785 = vmatpush.bf16.msrb.mxu0 %v3128_v50  ;;  %v464_v50 = vunpack.c.l.b16 %v30_v46 }
  0x2b   :  { %1811 = vmatpush.bf16.msrb.mxu2 %v3144_v51  ;;  %v466_v51 = vunpack.c.l.b16 %v31_v47 }
  0x2c   :  { %1798 = vmatpush.bf16.msrb.mxu1 %v3136_v52  ;;  %v3155_v52 = vld [vmem:[%s4049_s1 + $0x200] sm:$0xff] }
  0x2d   :  { %1824 = vmatpush.bf16.msrb.mxu3 %v3152_v53  ;;  %v3171_v53 = vld [vmem:[%s4049_s1 + $0x280] sm:$0xff] }
  0x2e   :  { %1786 = vmatpush.bf16.msrb.mxu0 %v3127_v54  ;;  %v3194_v54 = vld [vmem:[%s4049_s1 + $0x338] sm:$0xff] }
  0x2f   :  { %1812 = vmatpush.bf16.msrb.mxu2 %v3143_v55  ;;  %v3210_v55 = vld [vmem:[%s4049_s1 + $0x3b8] sm:$0xff] }
  0x30   :  { %1799 = vmatpush.bf16.msrb.mxu1 %v3135_v56  ;;  %v465_v56 = vunpack.c.h.b16 %v30_v46  ;;  %v3233_v46 = vld [vmem:[%s4049_s1 + $0x470] sm:$0xff] }
  0x31   :  { %1825 = vmatpush.bf16.msrb.mxu3 %v3151_v57  ;;  %v467_v57 = vunpack.c.h.b16 %v31_v47  ;;  %v3249_v47 = vld [vmem:[%s4049_s1 + $0x4f0] sm:$0xff] }
  0x32   :  { %1787 = vmatpush.bf16.msrb.mxu0 %v3126_v58  ;;  %v3163_v58 = vld [vmem:[%s4049_s1 + $0x240] sm:$0xff] }
  0x33   :  { %1813 = vmatpush.bf16.msrb.mxu2 %v3142_v59  ;;  %v3179_v59 = vld [vmem:[%s4049_s1 + $0x2c0] sm:$0xff] }
  0x34   :  { %1800 = vmatpush.bf16.msrb.mxu1 %v3134_v60  ;;  %v489_v60 = vpack.c.b16 %v464_v50, %v464_v50  ;;  %v3232_v50 = vld [vmem:[%s4049_s1 + $0x468] sm:$0xff] }
  0x35   :  { %1826 = vmatpush.bf16.msrb.mxu3 %v3150_v61  ;;  %v491_v61 = vpack.c.b16 %v466_v51, %v466_v51  ;;  %v3248_v51 = vld [vmem:[%s4049_s1 + $0x4e8] sm:$0xff] }
  0x36   :  { %1788 = vmatpush.bf16.msrb.mxu0 %v3125_v62  ;;  %v3202_v62 = vld [vmem:[%s4049_s1 + $0x378] sm:$0xff] }
  0x37   :  { %1814 = vmatpush.bf16.msrb.mxu2 %v3141_v63  ;;  %v3218_v63 = vld [vmem:[%s4049_s1 + $0x3f8] sm:$0xff] }
  0x38   :  { %1801 = vmatpush.bf16.msrb.mxu1 %v3133_v0  ;;  %v490_v0 = vpack.c.b16 %v465_v56, %v465_v56  ;;  %v3222_v56 = vld [vmem:[%s4049_s1 + $0x418] sm:$0xff] }
  0x39   :  { %1827 = vmatpush.bf16.msrb.mxu3 %v3149_v1  ;;  %v492_v1 = vpack.c.b16 %v467_v57, %v467_v57  ;;  %v3238_v57 = vld [vmem:[%s4049_s1 + $0x498] sm:$0xff] }
  0x3a   :  { %1789 = vmatpush.bf16.msrb.mxu0 %v3124_v2  ;;  %v3193_v2 = vld [vmem:[%s4049_s1 + $0x330] sm:$0xff] }
  0x3b   :  { %1815 = vmatpush.bf16.msrb.mxu2 %v3140_v3  ;;  %v3209_v3 = vld [vmem:[%s4049_s1 + $0x3b0] sm:$0xff] }
  0x3c   :  { %1802 = vmatpush.bf16.msrb.mxu1 %v3132_v6  ;;  %v3192_v6 = vld [vmem:[%s4049_s1 + $0x328] sm:$0xff] }
  0x3d   :  { %1828 = vmatpush.bf16.msrb.mxu3 %v3148_v7  ;;  %v3208_v7 = vld [vmem:[%s4049_s1 + $0x3a8] sm:$0xff] }
  0x3e   :  { %1790 = vmatpush.bf16.msrb.mxu0 %v3123_v8  ;;  %v3200_v8 = vld [vmem:[%s4049_s1 + $0x368] sm:$0xff] }
  0x3f   :  { %1816 = vmatpush.bf16.msrb.mxu2 %v3139_v9  ;;  %v3216_v9 = vld [vmem:[%s4049_s1 + $0x3e8] sm:$0xff] }
  0x40   :  { %1803 = vmatpush.bf16.msrb.mxu1 %v3131_v14  ;;  %v3190_v14 = vld [vmem:[%s4049_s1 + $0x318] sm:$0xff] }
  0x41   :  { %1829 = vmatpush.bf16.msrb.mxu3 %v3147_v15  ;;  %1791 = vmatmul.bf16.vlgmr.msrb.gmra.mxu0 %v485_v21  ;;  %v3206_v15 = vld [vmem:[%s4049_s1 + $0x398] sm:$0xff]  ;;  %v3213_v21 = vld [vmem:[%s4049_s1 + $0x3d0] sm:$0xff] }
  0x42   :  { %1835 = vmatpush.bf16.msra.mxu0 %v3162_v12  ;;  %1817 = vmatmul.bf16.vlgmr.msrb.gmra.mxu2 %v487_v20  ;;  %v3199_v12 = vld [vmem:[%s4049_s1 + $0x360] sm:$0xff]  ;;  %v3197_v20 = vld [vmem:[%s4049_s1 + $0x350] sm:$0xff] }
  0x43   :  { %1861 = vmatpush.bf16.msra.mxu2 %v3178_v13  ;;  %1804 = vmatmul.bf16.vlgmr.msrb.gmra.mxu1 %v486_v25  ;;  %v3215_v13 = vld [vmem:[%s4049_s1 + $0x3e0] sm:$0xff]  ;;  %v33_v25 = vld [vmem:[%s4050_s0 + $0x38] sm:$0xff] }
  0x44   :  { %1848 = vmatpush.bf16.msra.mxu1 %v3170_v18  ;;  %1830 = vmatmul.bf16.vlgmr.msrb.gmra.mxu3 %v488_v24  ;;  %v3189_v18 = vld [vmem:[%s4049_s1 + $0x310] sm:$0xff] }
  0x45   :  { %1874 = vmatpush.bf16.msra.mxu3 %v3186_v19  ;;  %v3205_v19 = vld [vmem:[%s4049_s1 + $0x390] sm:$0xff] }
  0x46   :  { %1836 = vmatpush.bf16.msra.mxu0 %v3161_v22  ;;  %v3188_v22 = vld [vmem:[%s4049_s1 + $0x308] sm:$0xff]  ;;  %v32_v24 = vld [vmem:[%s4050_s0 + $0x30] sm:$0xff] }
  0x47   :  { %1862 = vmatpush.bf16.msra.mxu2 %v3177_v23  ;;  %v3204_v23 = vld [vmem:[%s4049_s1 + $0x388] sm:$0xff] }
  0x48   :  { %1849 = vmatpush.bf16.msra.mxu1 %v3169_v26  ;;  %v3196_v26 = vld [vmem:[%s4049_s1 + $0x348] sm:$0xff] }
  0x49   :  { %1875 = vmatpush.bf16.msra.mxu3 %v3185_v27  ;;  %v3212_v27 = vld [vmem:[%s4049_s1 + $0x3c8] sm:$0xff] }
  0x4a   :  { %1837 = vmatpush.bf16.msra.mxu0 %v3160_v28  ;;  %v468_v28 = vunpack.c.l.b16 %v32_v24 }
  0x4b   :  { %1863 = vmatpush.bf16.msra.mxu2 %v3176_v29  ;;  %v470_v29 = vunpack.c.l.b16 %v33_v25 }
  0x4c   :  { %1850 = vmatpush.bf16.msra.mxu1 %v3168_v30  ;;  %v3187_v30 = vld [vmem:[%s4049_s1 + $0x300] sm:$0xff] }
  0x4d   :  { %1876 = vmatpush.bf16.msra.mxu3 %v3184_v31  ;;  %v3203_v31 = vld [vmem:[%s4049_s1 + $0x380] sm:$0xff] }
  0x4e   :  { %1838 = vmatpush.bf16.msra.mxu0 %v3159_v32  ;;  %v3226_v32 = vld [vmem:[%s4049_s1 + $0x438] sm:$0xff] }
  0x4f   :  { %1864 = vmatpush.bf16.msra.mxu2 %v3175_v33  ;;  %v3242_v33 = vld [vmem:[%s4049_s1 + $0x4b8] sm:$0xff] }
  0x50   :  { %1851 = vmatpush.bf16.msra.mxu1 %v3167_v34  ;;  %v469_v34 = vunpack.c.h.b16 %v32_v24  ;;  %v3265_v24 = vld [vmem:[%s4049_s1 + $0x570] sm:$0xff] }
  0x51   :  { %1877 = vmatpush.bf16.msra.mxu3 %v3183_v35  ;;  %v471_v35 = vunpack.c.h.b16 %v33_v25  ;;  %v3281_v25 = vld [vmem:[%s4049_s1 + $0x5f0] sm:$0xff] }
  0x52   :  { %1839 = vmatpush.bf16.msra.mxu0 %v3158_v36  ;;  %v3195_v36 = vld [vmem:[%s4049_s1 + $0x340] sm:$0xff] }
  0x53   :  { %1865 = vmatpush.bf16.msra.mxu2 %v3174_v37  ;;  %v3211_v37 = vld [vmem:[%s4049_s1 + $0x3c0] sm:$0xff] }
  0x54   :  { %1852 = vmatpush.bf16.msra.mxu1 %v3166_v38  ;;  %v493_v38 = vpack.c.b16 %v468_v28, %v468_v28  ;;  %v3264_v28 = vld [vmem:[%s4049_s1 + $0x568] sm:$0xff] }
  0x55   :  { %1878 = vmatpush.bf16.msra.mxu3 %v3182_v39  ;;  %v495_v39 = vpack.c.b16 %v470_v29, %v470_v29  ;;  %v3280_v29 = vld [vmem:[%s4049_s1 + $0x5e8] sm:$0xff] }
  0x56   :  { %1840 = vmatpush.bf16.msra.mxu0 %v3157_v40  ;;  %v3234_v40 = vld [vmem:[%s4049_s1 + $0x478] sm:$0xff] }
  0x57   :  { %1866 = vmatpush.bf16.msra.mxu2 %v3173_v41  ;;  %v3250_v41 = vld [vmem:[%s4049_s1 + $0x4f8] sm:$0xff] }
  0x58   :  { %1853 = vmatpush.bf16.msra.mxu1 %v3165_v42  ;;  %v494_v42 = vpack.c.b16 %v469_v34, %v469_v34  ;;  %v3263_v34 = vld [vmem:[%s4049_s1 + $0x560] sm:$0xff] }
  0x59   :  { %1879 = vmatpush.bf16.msra.mxu3 %v3181_v43  ;;  %v496_v43 = vpack.c.b16 %v471_v35, %v471_v35  ;;  %v3279_v35 = vld [vmem:[%s4049_s1 + $0x5e0] sm:$0xff] }
  0x5a   :  { %1841 = vmatpush.bf16.msra.mxu0 %v3156_v44  ;;  %v3225_v44 = vld [vmem:[%s4049_s1 + $0x430] sm:$0xff] }
  0x5b   :  { %1867 = vmatpush.bf16.msra.mxu2 %v3172_v45  ;;  %v3241_v45 = vld [vmem:[%s4049_s1 + $0x4b0] sm:$0xff] }
  0x5c   :  { %1854 = vmatpush.bf16.msra.mxu1 %v3164_v48  ;;  %v3224_v48 = vld [vmem:[%s4049_s1 + $0x428] sm:$0xff] }
  0x5d   :  { %1880 = vmatpush.bf16.msra.mxu3 %v3180_v49  ;;  %v3240_v49 = vld [vmem:[%s4049_s1 + $0x4a8] sm:$0xff] }
  0x5e   :  { %1842 = vmatpush.bf16.msra.mxu0 %v3155_v52  ;;  %v3223_v52 = vld [vmem:[%s4049_s1 + $0x420] sm:$0xff] }
  0x5f   :  { %1868 = vmatpush.bf16.msra.mxu2 %v3171_v53  ;;  %v3239_v53 = vld [vmem:[%s4049_s1 + $0x4a0] sm:$0xff] }
  0x60   :  { %1855 = vmatpush.bf16.msra.mxu1 %v3163_v58  ;;  %v3230_v58 = vld [vmem:[%s4049_s1 + $0x458] sm:$0xff] }
  0x61   :  { %1881 = vmatpush.bf16.msra.mxu3 %v3179_v59  ;;  %1843 = vmatmul.bf16.vlgmr.msra.gmra.mxu0 %v489_v60  ;;  %v3246_v59 = vld [vmem:[%s4049_s1 + $0x4d8] sm:$0xff]  ;;  %v3221_v60 = vld [vmem:[%s4049_s1 + $0x410] sm:$0xff] }
  0x62   :  { %1887 = vmatpush.bf16.msrb.mxu0 %v3194_v54  ;;  %1869 = vmatmul.bf16.vlgmr.msra.gmra.mxu2 %v491_v61  ;;  %v3231_v54 = vld [vmem:[%s4049_s1 + $0x460] sm:$0xff]  ;;  %v3237_v61 = vld [vmem:[%s4049_s1 + $0x490] sm:$0xff] }
  0x63   :  { %1913 = vmatpush.bf16.msrb.mxu2 %v3210_v55  ;;  %1856 = vmatmul.bf16.vlgmr.msra.gmra.mxu1 %v490_v0  ;;  %v3247_v55 = vld [vmem:[%s4049_s1 + $0x4e0] sm:$0xff]  ;;  %v3220_v0 = vld [vmem:[%s4049_s1 + $0x408] sm:$0xff] }
  0x64   :  { %1900 = vmatpush.bf16.msrb.mxu1 %v3202_v62  ;;  %1882 = vmatmul.bf16.vlgmr.msra.gmra.mxu3 %v492_v1  ;;  %v3229_v62 = vld [vmem:[%s4049_s1 + $0x450] sm:$0xff]  ;;  %v3236_v1 = vld [vmem:[%s4049_s1 + $0x488] sm:$0xff] }
  0x65   :  { %1926 = vmatpush.bf16.msrb.mxu3 %v3218_v63  ;;  %v3245_v63 = vld [vmem:[%s4049_s1 + $0x4d0] sm:$0xff] }
  0x66   :  { %1888 = vmatpush.bf16.msrb.mxu0 %v3193_v2  ;;  %v34_v2 = vld [vmem:[%s4050_s0 + $0x40] sm:$0xff] }
  0x67   :  { %1914 = vmatpush.bf16.msrb.mxu2 %v3209_v3  ;;  %v35_v3 = vld [vmem:[%s4050_s0 + $0x48] sm:$0xff] }
  0x68   :  { %1901 = vmatpush.bf16.msrb.mxu1 %v3201_v4  ;;  %v3228_v4 = vld [vmem:[%s4049_s1 + $0x448] sm:$0xff] }
  0x69   :  { %1927 = vmatpush.bf16.msrb.mxu3 %v3217_v5  ;;  %v3244_v5 = vld [vmem:[%s4049_s1 + $0x4c8] sm:$0xff] }
  0x6a   :  { %1889 = vmatpush.bf16.msrb.mxu0 %v3192_v6  ;;  %v472_v6 = vunpack.c.l.b16 %v34_v2 }
  0x6b   :  { %1915 = vmatpush.bf16.msrb.mxu2 %v3208_v7  ;;  %v474_v7 = vunpack.c.l.b16 %v35_v3 }
  0x6c   :  { %1902 = vmatpush.bf16.msrb.mxu1 %v3200_v8  ;;  %v3219_v8 = vld [vmem:[%s4049_s1 + $0x400] sm:$0xff] }
  0x6d   :  { %1928 = vmatpush.bf16.msrb.mxu3 %v3216_v9  ;;  %v3235_v9 = vld [vmem:[%s4049_s1 + $0x480] sm:$0xff] }
  0x6e   :  { %1890 = vmatpush.bf16.msrb.mxu0 %v3191_v10  ;;  %v3258_v10 = vld [vmem:[%s4049_s1 + $0x538] sm:$0xff] }
  0x6f   :  { %1916 = vmatpush.bf16.msrb.mxu2 %v3207_v11  ;;  %v3274_v11 = vld [vmem:[%s4049_s1 + $0x5b8] sm:$0xff] }
  0x70   :  { %1903 = vmatpush.bf16.msrb.mxu1 %v3199_v12  ;;  %v473_v12 = vunpack.c.h.b16 %v34_v2 }
  0x71   :  { %1929 = vmatpush.bf16.msrb.mxu3 %v3215_v13  ;;  %v475_v13 = vunpack.c.h.b16 %v35_v3 }
  0x72   :  { %1891 = vmatpush.bf16.msrb.mxu0 %v3190_v14  ;;  %v3227_v14 = vld [vmem:[%s4049_s1 + $0x440] sm:$0xff] }
  0x73   :  { %1917 = vmatpush.bf16.msrb.mxu2 %v3206_v15  ;;  %v3243_v15 = vld [vmem:[%s4049_s1 + $0x4c0] sm:$0xff] }
  0x74   :  { %1904 = vmatpush.bf16.msrb.mxu1 %v3198_v16  ;;  %v497_v16 = vpack.c.b16 %v472_v6, %v472_v6 }
  0x75   :  { %1930 = vmatpush.bf16.msrb.mxu3 %v3214_v17  ;;  %v499_v17 = vpack.c.b16 %v474_v7, %v474_v7 }
  0x76   :  { %1892 = vmatpush.bf16.msrb.mxu0 %v3189_v18  ;;  %v3266_v18 = vld [vmem:[%s4049_s1 + $0x578] sm:$0xff] }
  0x77   :  { %1918 = vmatpush.bf16.msrb.mxu2 %v3205_v19  ;;  %v3282_v19 = vld [vmem:[%s4049_s1 + $0x5f8] sm:$0xff] }
  0x78   :  { %1905 = vmatpush.bf16.msrb.mxu1 %v3197_v20  ;;  %v498_v20 = vpack.c.b16 %v473_v12, %v473_v12  ;;  %v3287_v12 = vld [vmem:[%s4049_s1 + $0x620] sm:$0xff] }
  0x79   :  { %1931 = vmatpush.bf16.msrb.mxu3 %v3213_v21  ;;  %v500_v21 = vpack.c.b16 %v475_v13, %v475_v13 }
  0x7a   :  { %1893 = vmatpush.bf16.msrb.mxu0 %v3188_v22  ;;  %v3257_v22 = vld [vmem:[%s4049_s1 + $0x530] sm:$0xff] }
  0x7b   :  { %1919 = vmatpush.bf16.msrb.mxu2 %v3204_v23  ;;  %v3273_v23 = vld [vmem:[%s4049_s1 + $0x5b0] sm:$0xff] }
  0x7c   :  { %1906 = vmatpush.bf16.msrb.mxu1 %v3196_v26  ;;  %v3256_v26 = vld [vmem:[%s4049_s1 + $0x528] sm:$0xff] }
  0x7d   :  { %1932 = vmatpush.bf16.msrb.mxu3 %v3212_v27  ;;  %v3272_v27 = vld [vmem:[%s4049_s1 + $0x5a8] sm:$0xff] }
  0x7e   :  { %1894 = vmatpush.bf16.msrb.mxu0 %v3187_v30  ;;  %v3307_v30 = vld [vmem:[%s4051_s2] ss:$0 sm:$0xff] }
  0x7f   :  { %1920 = vmatpush.bf16.msrb.mxu2 %v3203_v31  ;;  %v3255_v31 = vld [vmem:[%s4049_s1 + $0x520] sm:$0xff] }
  0x80   :  { %1907 = vmatpush.bf16.msrb.mxu1 %v3195_v36 }
  0x81   :  { %1933 = vmatpush.bf16.msrb.mxu3 %v3211_v37  ;;  %1895 = vmatmul.bf16.vlgmr.msrb.gmra.mxu0 %v493_v38  ;;  %v3254_v38 = vld [vmem:[%s4049_s1 + $0x518] sm:$0xff] }
  0x82   :  { %1939 = vmatpush.bf16.msra.mxu0 %v3226_v32  ;;  %1921 = vmatmul.bf16.vlgmr.msrb.gmra.mxu2 %v495_v39  ;;  %v3271_v32 = vld [vmem:[%s4049_s1 + $0x5a0] sm:$0xff]  ;;  %v3270_v39 = vld [vmem:[%s4049_s1 + $0x598] sm:$0xff] }
  0x83   :  { %1965 = vmatpush.bf16.msra.mxu2 %v3242_v33  ;;  %1908 = vmatmul.bf16.vlgmr.msrb.gmra.mxu1 %v494_v42  ;;  %v3278_v42 = vld [vmem:[%s4049_s1 + $0x5d8] sm:$0xff] }
  0x84   :  { %1952 = vmatpush.bf16.msra.mxu1 %v3234_v40  ;;  %1934 = vmatmul.bf16.vlgmr.msrb.gmra.mxu3 %v496_v43 }
  0x85   :  { %1978 = vmatpush.bf16.msra.mxu3 %v3250_v41  ;;  %v3262_v41 = vld [vmem:[%s4049_s1 + $0x558] sm:$0xff] }
  0x86   :  { %1940 = vmatpush.bf16.msra.mxu0 %v3225_v44  ;;  %v3253_v44 = vld [vmem:[%s4049_s1 + $0x510] sm:$0xff] }
  0x87   :  { %1966 = vmatpush.bf16.msra.mxu2 %v3241_v45  ;;  %v3269_v45 = vld [vmem:[%s4049_s1 + $0x590] sm:$0xff] }
  0x88   :  { %1953 = vmatpush.bf16.msra.mxu1 %v3233_v46 }
  0x89   :  { %1979 = vmatpush.bf16.msra.mxu3 %v3249_v47 }
  0x8a   :  { %1941 = vmatpush.bf16.msra.mxu0 %v3224_v48 }
  0x8b   :  { %1967 = vmatpush.bf16.msra.mxu2 %v3240_v49  ;;  %v3261_v49 = vld [vmem:[%s4049_s1 + $0x550] sm:$0xff] }
  0x8c   :  { %1954 = vmatpush.bf16.msra.mxu1 %v3232_v50  ;;  %v3277_v50 = vld [vmem:[%s4049_s1 + $0x5d0] sm:$0xff] }
  0x8d   :  { %1980 = vmatpush.bf16.msra.mxu3 %v3248_v51 }
  0x8e   :  { %1942 = vmatpush.bf16.msra.mxu0 %v3223_v52  ;;  %v3252_v52 = vld [vmem:[%s4049_s1 + $0x508] sm:$0xff] }
  0x8f   :  { %1968 = vmatpush.bf16.msra.mxu2 %v3239_v53 }
  0x90   :  { %1955 = vmatpush.bf16.msra.mxu1 %v3231_v54  ;;  %v3268_v54 = vld [vmem:[%s4049_s1 + $0x588] sm:$0xff] }
  0x91   :  { %1981 = vmatpush.bf16.msra.mxu3 %v3247_v55  ;;  %v36_v55 = vld [vmem:[%s4050_s0 + $0x50] sm:$0xff] }
  0x92   :  { %1943 = vmatpush.bf16.msra.mxu0 %v3222_v56  ;;  %v37_v56 = vld [vmem:[%s4050_s0 + $0x58] sm:$0xff] }
  0x93   :  { %1969 = vmatpush.bf16.msra.mxu2 %v3238_v57  ;;  %v3260_v57 = vld [vmem:[%s4049_s1 + $0x548] sm:$0xff]  ;;  %v479_v2 = vunpack.c.h.b16 %v37_v56 }
  0x94   :  { %1956 = vmatpush.bf16.msra.mxu1 %v3230_v58  ;;  %v3276_v58 = vld [vmem:[%s4049_s1 + $0x5c8] sm:$0xff] }
  0x95   :  { %1982 = vmatpush.bf16.msra.mxu3 %v3246_v59  ;;  %v476_v59 = vunpack.c.l.b16 %v36_v55 }
  0x96   :  { %1944 = vmatpush.bf16.msra.mxu0 %v3221_v60  ;;  %v478_v60 = vunpack.c.l.b16 %v37_v56 }
  0x97   :  { %1970 = vmatpush.bf16.msra.mxu2 %v3237_v61  ;;  %v501_v6 = vpack.c.b16 %v476_v59, %v476_v59 }
  0x98   :  { %1957 = vmatpush.bf16.msra.mxu1 %v3229_v62  ;;  %v3251_v62 = vld [vmem:[%s4049_s1 + $0x500] sm:$0xff]  ;;  %v503_v7 = vpack.c.b16 %v478_v60, %v478_v60  ;;  %v3297_v60 = vld [vmem:[%s4053_s3 + $0x30] sm:$0xff] }
  0x99   :  { %1983 = vmatpush.bf16.msra.mxu3 %v3245_v63  ;;  %v3267_v63 = vld [vmem:[%s4049_s1 + $0x580] sm:$0xff] }
  0x9a   :  { %1945 = vmatpush.bf16.msra.mxu0 %v3220_v0  ;;  %v3290_v0 = vld [vmem:[%s4049_s1 + $0x638] sm:$0xff] }
  0x9b   :  { %1971 = vmatpush.bf16.msra.mxu2 %v3236_v1  ;;  %v477_v1 = vunpack.c.h.b16 %v36_v55 }
  0x9c   :  { %1958 = vmatpush.bf16.msra.mxu1 %v3228_v4  ;;  %v3259_v4 = vld [vmem:[%s4049_s1 + $0x540] sm:$0xff] }
  0x9d   :  { %1984 = vmatpush.bf16.msra.mxu3 %v3244_v5  ;;  %v3275_v5 = vld [vmem:[%s4049_s1 + $0x5c0] sm:$0xff] }
  0x9e   :  { %1946 = vmatpush.bf16.msra.mxu0 %v3219_v8  ;;  %v1740_v33 = vpop.f32.mrf.mxu0  ;;  %v502_v8 = vpack.c.b16 %v477_v1, %v477_v1  ;;  %v3295_v1 = vld [vmem:[%s4053_s3 + $0x20] sm:$0xff] }
  0x9f   :  { %1972 = vmatpush.bf16.msra.mxu2 %v3235_v9  ;;  %v1741_v36 = vadd.f32 %v3307_v30, %v1740_v33  ;;  %v504_v9 = vpack.c.b16 %v479_v2, %v479_v2 }
  0xa0   :  { %1959 = vmatpush.bf16.msra.mxu1 %v3227_v14  ;;  %v1753_v37 = vpop.f32.mrf.mxu1 }
  0xa1   :  { %1985 = vmatpush.bf16.msra.mxu3 %v3243_v15  ;;  %1947 = vmatmul.bf16.vlgmr.msra.gmra.mxu0 %v497_v16  ;;  %v1754_v40 = vadd.f32 %v1753_v37, %v1741_v36 }
  0xa2   :  { %1991 = vmatpush.bf16.msrb.mxu0 %v3258_v10  ;;  %1973 = vmatmul.bf16.vlgmr.msra.gmra.mxu2 %v499_v17  ;;  %v3289_v10 = vld [vmem:[%s4049_s1 + $0x630] sm:$0xff]  ;;  %v3286_v17 = vld [vmem:[%s4049_s1 + $0x618] sm:$0xff] }
  0xa3   :  { %2017 = vmatpush.bf16.msrb.mxu2 %v3274_v11  ;;  %1960 = vmatmul.bf16.vlgmr.msra.gmra.mxu1 %v498_v20  ;;  %v3288_v11 = vld [vmem:[%s4049_s1 + $0x628] sm:$0xff]  ;;  %v3285_v20 = vld [vmem:[%s4049_s1 + $0x610] sm:$0xff] }
  0xa4   :  { %2004 = vmatpush.bf16.msrb.mxu1 %v3266_v18  ;;  %1986 = vmatmul.bf16.vlgmr.msra.gmra.mxu3 %v500_v21 }
  0xa5   :  { %2030 = vmatpush.bf16.msrb.mxu3 %v3282_v19  ;;  %v1766_v43 = vpop.f32.mrf.mxu2 }
  0xa6   :  { %1992 = vmatpush.bf16.msrb.mxu0 %v3257_v22  ;;  %v1767_v46 = vadd.f32 %v1766_v43, %v1754_v40  ;;  %v1742_v48 = vpop.f32.mrf.mxu0 }
  0xa7   :  { %2018 = vmatpush.bf16.msrb.mxu2 %v3273_v23  ;;  %v1779_v47 = vpop.f32.mrf.mxu3 }
  0xa8   :  { %2005 = vmatpush.bf16.msrb.mxu1 %v3265_v24  ;;  %v1780_v51 = vadd.f32 %v1779_v47, %v1767_v46  ;;  %v1755_v53 = vpop.f32.mrf.mxu1 }
  0xa9   :  { %2031 = vmatpush.bf16.msrb.mxu3 %v3281_v25  ;;  %v3284_v25 = vld [vmem:[%s4049_s1 + $0x608] sm:$0xff] }
  0xaa   :  { %1993 = vmatpush.bf16.msrb.mxu0 %v3256_v26  ;;  %v38_v26 = vld [vmem:[%s4050_s0 + $0x60] sm:$0xf] }
  0xab   :  { %2019 = vmatpush.bf16.msrb.mxu2 %v3272_v27 }
  0xac   :  { %2006 = vmatpush.bf16.msrb.mxu1 %v3264_v28  ;;  %v480_v28 = vunpack.c.l.b16 %v38_v26 }
  0xad   :  { %2032 = vmatpush.bf16.msrb.mxu3 %v3280_v29  ;;  %v1768_v61 = vpop.f32.mrf.mxu2  ;;  %v3283_v29 = vld [vmem:[%s4049_s1 + $0x600] sm:$0xff] }
  0xae   :  { %1994 = vmatpush.bf16.msrb.mxu0 %v3255_v31  ;;  %v505_v31 = vpack.c.b16 %v480_v28, %v480_v28 }
  0xaf   :  { %2020 = vmatpush.bf16.msrb.mxu2 %v3271_v32  ;;  %v1781_v3 = vpop.f32.mrf.mxu3 }
  0xb0   :  { %2007 = vmatpush.bf16.msrb.mxu1 %v3263_v34 }
  0xb1   :  { %2033 = vmatpush.bf16.msrb.mxu3 %v3279_v35 }
  0xb2   :  { %1995 = vmatpush.bf16.msrb.mxu0 %v3254_v38 }
  0xb3   :  { %2021 = vmatpush.bf16.msrb.mxu2 %v3270_v39 }
  0xb4   :  { %2008 = vmatpush.bf16.msrb.mxu1 %v3262_v41 }
  0xb5   :  { %2034 = vmatpush.bf16.msrb.mxu3 %v3278_v42 }
  0xb6   :  { %1996 = vmatpush.bf16.msrb.mxu0 %v3253_v44 }
  0xb7   :  { %2022 = vmatpush.bf16.msrb.mxu2 %v3269_v45 }
  0xb8   :  { %2009 = vmatpush.bf16.msrb.mxu1 %v3261_v49 }
  0xb9   :  { %2035 = vmatpush.bf16.msrb.mxu3 %v3277_v50 }
  0xba   :  { %1997 = vmatpush.bf16.msrb.mxu0 %v3252_v52 }
  0xbb   :  { %2023 = vmatpush.bf16.msrb.mxu2 %v3268_v54 }
  0xbc   :  { %2010 = vmatpush.bf16.msrb.mxu1 %v3260_v57  ;;  %v3298_v57 = vld [vmem:[%s4053_s3 + $0x38] sm:$0xff] }
  0xbd   :  { %2036 = vmatpush.bf16.msrb.mxu3 %v3276_v58 }
  0xbe   :  { %1998 = vmatpush.bf16.msrb.mxu0 %v3251_v62  ;;  %v1792_v13 = vpop.f32.mrf.mxu0 }
  0xbf   :  { %2024 = vmatpush.bf16.msrb.mxu2 %v3267_v63  ;;  %v1793_v14 = vadd.f32 %v1792_v13, %v1780_v51  ;;  %v3296_v63 = vld [vmem:[%s4053_s3 + $0x28] sm:$0xff] }
  0xc0   :  { %2011 = vmatpush.bf16.msrb.mxu1 %v3259_v4  ;;  %v1805_v15 = vpop.f32.mrf.mxu1  ;;  %v3294_v4 = vld [vmem:[%s4053_s3 + $0x18] sm:$0xff] }
  0xc1   :  { %2037 = vmatpush.bf16.msrb.mxu3 %v3275_v5  ;;  %1999 = vmatmul.bf16.vlgmr.msrb.gmra.mxu0 %v501_v6  ;;  %v1806_v16 = vadd.f32 %v1805_v15, %v1793_v14  ;;  %v3293_v5 = vld [vmem:[%s4053_s3 + $0x10] sm:$0xff]  ;;  %v3292_v6 = vld [vmem:[%s4053_s3 + $0x8] sm:$0xff] }
  0xc2   :  { %2043 = vmatpush.bf16.msra.mxu0 %v3290_v0  ;;  %2025 = vmatmul.bf16.vlgmr.msrb.gmra.mxu2 %v503_v7  ;;  %v3305_v15 = vld [vmem:[%s4054_s5 + $0x30] sm:$0xff] }
  0xc3   :  { %2012 = vmatmul.bf16.vlgmr.msrb.gmra.mxu1 %v502_v8  ;;  %v3291_v8 = vld [vmem:[%s4053_s3] sm:$0xff] }
  0xc4   :  { %2038 = vmatmul.bf16.vlgmr.msrb.gmra.mxu3 %v504_v9  ;;  %2126 = vmatpush.bf16.msra.mxu1 %v3298_v57 }
  0xc5   :  { %v1818_v18 = vpop.f32.mrf.mxu2 }
  0xc6   :  { %2044 = vmatpush.bf16.msra.mxu0 %v3289_v10  ;;  %v1819_v19 = vadd.f32 %v1818_v18, %v1806_v16  ;;  %v1794_v22 = vpop.f32.mrf.mxu0  ;;  %v3304_v18 = vld [vmem:[%s4054_s5 + $0x28] sm:$0xff] }
  0xc7   :  { %v1831_v21 = vpop.f32.mrf.mxu3  ;;  %v3303_v22 = vld [vmem:[%s4054_s5 + $0x20] sm:$0xff] }
  0xc8   :  { %v1832_v23 = vadd.f32 %v1831_v21, %v1819_v19  ;;  %v1807_v24 = vpop.f32.mrf.mxu1  ;;  %2127 = vmatpush.bf16.msra.mxu1 %v3297_v60 }
  0xca   :  { %2045 = vmatpush.bf16.msra.mxu0 %v3288_v11  ;;  %v3306_v11 = vld [vmem:[%s4054_s5 + $0x38] sm:$0xff] }
  0xcb   :  { %2209 = vmatpush.bf16.msra.mxu2 %v3306_v11 }
  0xcc   :  { %2128 = vmatpush.bf16.msra.mxu1 %v3296_v63 }
  0xcd   :  { %v1820_v27 = vpop.f32.mrf.mxu2 }
  0xce   :  { %2046 = vmatpush.bf16.msra.mxu0 %v3287_v12  ;;  %v3301_v27 = vld [vmem:[%s4054_s5 + $0x10] sm:$0xff] }
  0xcf   :  { %v1833_v30 = vpop.f32.mrf.mxu3  ;;  %2210 = vmatpush.bf16.msra.mxu2 %v3305_v15 }
  0xd0   :  { %2129 = vmatpush.bf16.msra.mxu1 %v3295_v1 }
  0xd2   :  { %2047 = vmatpush.bf16.msra.mxu0 %v3286_v17 }
  0xd3   :  { %2211 = vmatpush.bf16.msra.mxu2 %v3304_v18 }
  0xd4   :  { %2130 = vmatpush.bf16.msra.mxu1 %v3294_v4 }
  0xd6   :  { %2048 = vmatpush.bf16.msra.mxu0 %v3285_v20 }
  0xd7   :  { %2212 = vmatpush.bf16.msra.mxu2 %v3303_v22 }
  0xd8   :  { %2131 = vmatpush.bf16.msra.mxu1 %v3293_v5 }
  0xda   :  { %2049 = vmatpush.bf16.msra.mxu0 %v3284_v25  ;;  %v3302_v25 = vld [vmem:[%s4054_s5 + $0x18] sm:$0xff] }
  0xdb   :  { %2213 = vmatpush.bf16.msra.mxu2 %v3302_v25 }
  0xdc   :  { %2132 = vmatpush.bf16.msra.mxu1 %v3292_v6 }
  0xde   :  { %2050 = vmatpush.bf16.msra.mxu0 %v3283_v29  ;;  %v1844_v32 = vpop.f32.mrf.mxu0 }
  0xdf   :  { %v1845_v33 = vadd.f32 %v1844_v32, %v1832_v23  ;;  %2214 = vmatpush.bf16.msra.mxu2 %v3301_v27 }
  0xe0   :  { %v1857_v34 = vpop.f32.mrf.mxu1  ;;  %2133 = vmatpush.bf16.msra.mxu1 %v3291_v8 }
  0xe1   :  { %2051 = vmatmul.bf16.vlgmr.msra.gmra.mxu0 %v505_v31  ;;  %v1858_v35 = vadd.f32 %v1857_v34, %v1845_v33 }
  0xe5   :  { %v1870_v36 = vpop.f32.mrf.mxu2 }
  0xe6   :  { %v1871_v37 = vadd.f32 %v1870_v36, %v1858_v35  ;;  %v1846_v39 = vpop.f32.mrf.mxu0  ;;  %v3300_v35 = vld [vmem:[%s4054_s5 + $0x8] sm:$0xff]  ;;  %v3299_v36 = vld [vmem:[%s4054_s5] sm:$0xff] }
  0xe7   :  { %v1883_v38 = vpop.f32.mrf.mxu3  ;;  %2215 = vmatpush.bf16.msra.mxu2 %v3300_v35 }
  0xe8   :  { %v1884_v40 = vadd.f32 %v1883_v38, %v1871_v37  ;;  %v1859_v41 = vpop.f32.mrf.mxu1  ;;  %v3308_v37 = vld [vmem:[%s4052_s4] ss:$0 sm:$0xff] }
  0xeb   :  { %2216 = vmatpush.bf16.msra.mxu2 %v3299_v36 }
  0xed   :  { %v1872_v42 = vpop.f32.mrf.mxu2 }
  0xef   :  { %v1885_v43 = vpop.f32.mrf.mxu3 }
  0xf0   :  { %v3309_v43 = vld [vmem:[%s4055_s6] ss:$0 sm:$0xff] }
  0xfe   :  { %v1896_v44 = vpop.f32.mrf.mxu0 }
  0xff   :  { %v1897_v45 = vadd.f32 %v1896_v44, %v1884_v40 }
 0x100   :  { %v1909_v46 = vpop.f32.mrf.mxu1 }
 0x101   :  { %v1910_v47 = vadd.f32 %v1909_v46, %v1897_v45 }
 0x105   :  { %v1922_v48 = vpop.f32.mrf.mxu2 }
 0x106   :  { %v1923_v49 = vadd.f32 %v1922_v48, %v1910_v47  ;;  %v1898_v51 = vpop.f32.mrf.mxu0 }
 0x107   :  { %v1935_v50 = vpop.f32.mrf.mxu3 }
 0x108   :  { %v1936_v52 = vadd.f32 %v1935_v50, %v1923_v49  ;;  %v1911_v53 = vpop.f32.mrf.mxu1 }
 0x10d   :  { %v1924_v54 = vpop.f32.mrf.mxu2 }
 0x10f   :  { %v1937_v55 = vpop.f32.mrf.mxu3 }
 0x11e   :  { %v1948_v56 = vpop.f32.mrf.mxu0 }
 0x11f   :  { %v1949_v12 = vadd.f32 %v1948_v56, %v1936_v52 }
 0x120   :  { %v1961_v58 = vpop.f32.mrf.mxu1 }
 0x121   :  { %v1962_v17 = vadd.f32 %v1961_v58, %v1949_v12 }
 0x125   :  { %v1974_v59 = vpop.f32.mrf.mxu2 }
 0x126   :  { %v1950_v62 = vpop.f32.mrf.mxu0  ;;  %v1975_v19 = vadd.f32 %v1974_v59, %v1962_v17 }
 0x127   :  { %v1987_v61 = vpop.f32.mrf.mxu3 }
 0x128   :  { %v1963_v0 = vpop.f32.mrf.mxu1  ;;  %v1988_v23 = vadd.f32 %v1987_v61, %v1975_v19 }
 0x12d   :  { %v1976_v2 = vpop.f32.mrf.mxu2 }
 0x12f   :  { %v1989_v3 = vpop.f32.mrf.mxu3 }
 0x13e   :  { %v2000_v7 = vpop.f32.mrf.mxu0 }
 0x13f   :  { %v2001_v24 = vadd.f32 %v2000_v7, %v1988_v23 }
 0x140   :  { %v2013_v9 = vpop.f32.mrf.mxu1 }
 0x141   :  { %v2014_v26 = vadd.f32 %v2013_v9, %v2001_v24 }
 0x145   :  { %v2026_v10 = vpop.f32.mrf.mxu2 }
 0x146   :  { %v2002_v14 = vpop.f32.mrf.mxu0  ;;  %v2027_v28 = vadd.f32 %v2026_v10, %v2014_v26 }
 0x147   :  { %v2039_v13 = vpop.f32.mrf.mxu3 }
 0x148   :  { %v2015_v16 = vpop.f32.mrf.mxu1  ;;  %v2040_v29 = vadd.f32 %v2039_v13, %v2027_v28 }
 0x14d   :  { %v2028_v20 = vpop.f32.mrf.mxu2 }
 0x14f   :  { %v2041_v21 = vpop.f32.mrf.mxu3 }
 0x15e   :  { %v2052_v30 = vpop.f32.mrf.mxu0 }
 0x15f   :  { %v2053_v31 = vadd.f32 %v2052_v30, %v2040_v29 }
 0x161   :  { %v2056_v32 = vmax.f32 %v2053_v31, 0.0 }
 0x163   :  { %v2057_v33 = vpack.c.bf16 %v2056_v32, %v2056_v32 }
 0x165   :  { %2134 = vmatmul.bf16.vlgmr.msra.gmra.mxu1 %v2057_v33 }
 0x166   :  { %v2054_v34 = vpop.f32.mrf.mxu0 }
 0x1e2   :  { %v2135_v38 = vpop.f32.mrf.mxu1 }
 0x1e3   :  { %v2136_v39 = vadd.f32 %v3308_v37, %v2135_v38 }
 0x1e5   :  { %v2139_v40 = vmax.f32 %v2136_v39, 0.0 }
 0x1e7   :  { %v2140_v41 = vpack.c.bf16 %v2139_v40, %v2139_v40 }
 0x1e9   :  { %2217 = vmatmul.bf16.vlgmr.msra.gmra.mxu2 %v2140_v41 }
 0x1ea   :  { %v2137_v42 = vpop.f32.mrf.mxu1 }
 0x26c   :  { %v2218_v44 = vpop.f32.mrf.mxu2 }
 0x26d   :  { %v2219_v45 = vadd.f32 %v3309_v43, %v2218_v44 }
 0x26f   :  { %2222 = vst [vmem:[%s4056_s7] sm:$0xff] %v2219_v45 }
 0x274   :  { %v2220_v46 = vpop.f32.mrf.mxu2 }

// kernel: cnn_cifar_forward.4
= control target key start
LH: loop header
LB: loop body
LE: loop exit
PB: predicated region body
PF: predicated region fallthrough
CT: control target
= control target key end

     0   :  { %s10458_s12 = smov 0   ;;  %s13140_s0 = inlined_call_operand.vmem [shape: bf16[2,196,128], index: 0, kind: input, shape index: {}]   ;;  %s13141_s1 = inlined_call_operand.vmem [shape: bf16[25,128,128], index: 1, kind: input, shape index: {}]   ;;  %s13142_s2 = inlined_call_operand.vmem [shape: f32[1,128], index: 2, kind: input, shape index: {}]   ;;  %s13143_s3 = inlined_call_operand.vmem [shape: bf16[2,25,128], index: 3, kind: output, shape index: {}]  }
   0x1 LB: > { %s7291_s13 = sadd.s32 4294967295, %s10436_s12   ;;  %p7295_p0 = scmp.ge.s32.totalorder %s10436_s12, 1  ;;  %s10436_s12 = sphi %s10458_s12, %s13_s12  }
   0x2   : > { %p137_p1 = scmp.lt.s32.totalorder %s10436_s12, 3 }
   0x4   : > { %p138_p2 = pnand %p7295_p0, %p137_p1 }
   0x5   : > { %p161_p3 = scmp.lt.s32.totalorder (!%p138_p2), %s7291_s13, 1 }
   0x6   : > { %141 = sbr.rel (%p138_p2) target bundleno = 1110 (0x456), region = 32 }
   0xb   : > { %v9820_v0 = vld [vmem:[%s13141_s1 + $0x78] sm:$0xff]  ;;  %v9819_v4 = vld [vmem:[%s13141_s1 + $0x70] sm:$0xff]  ;;  %s13145_s13 = smov (!%p161_p3, %s7291_s13), 1  ;;  %v9818_v8 = vld [vmem:[%s13141_s1 + $0x68] sm:$0xff]  ;;  %vm240_vm0 = vsmask.f32 7424 }
   0xc   : > { %v9812_v1 = vld [vmem:[%s13141_s1 + $0x38] sm:$0xff]  ;;  %333 = vmatpush.bf16.msra.mxu0 %v9820_v0  ;;  %v9811_v5 = vld [vmem:[%s13141_s1 + $0x30] sm:$0xff]  ;;  %s10418_s30 = smul.u32 100, %s13145_s13  ;;  %v9810_v9 = vld [vmem:[%s13141_s1 + $0x28] sm:$0xff]  ;;  %vm474_vm1 = vcmask 1046528   ;;  %vm746_vm3 = vcmask 1045504  }
   0xd   : > { %v9828_v2 = vld [vmem:[%s13141_s1 + $0xb8] sm:$0xff]  ;;  %420 = vmatpush.bf16.msra.mxu1 %v9812_v1  ;;  %v9827_v6 = vld [vmem:[%s13141_s1 + $0xb0] sm:$0xff]  ;;  %v9826_v10 = vld [vmem:[%s13141_s1 + $0xa8] sm:$0xff]  ;;  %vm600_vm2 = vsmask.f32 6400  ;;  %vm903_vm4 = vcmask 1044480  }
   0xe   : > { %v9836_v3 = vld [vmem:[%s13141_s1 + $0xf8] sm:$0xff]  ;;  %537 = vmatpush.bf16.msra.mxu2 %v9828_v2  ;;  %v9835_v7 = vld [vmem:[%s13141_s1 + $0xf0] sm:$0xff]  ;;  %v9834_v11 = vld [vmem:[%s13141_s1 + $0xe8] sm:$0xff]  ;;  %s10508_s16 = scalar_lea.vmem %s13140_s0, %s10418_s30  ;;  %vm1029_vm5 = vsmask.f32 4352  ;;  %s9801_s28 = sshll.u32 %s13145_s13, 4 }
   0xf   : > { %683 = vmatpush.bf16.msra.mxu3 %v9836_v3  ;;  %v9817_v12 = vld [vmem:[%s13141_s1 + $0x60] sm:$0xff]  ;;  %v9816_v20 = vld [vmem:[%s13141_s1 + $0x58] sm:$0xff]  ;;  %v10540_v24 = vld [vmem:[%s10508_s16 + $0x8] sm:$0xff]  ;;  %vm1774_vm6 = vsmask.f32 5376  ;;  %s170_s4 = scalar_lea.vmem %s13143_s3, %s9801_s28  ;;  %vm7230_vm7 = vcmask 1040384  }
  0x10   : > { %334 = vmatpush.bf16.msra.mxu0 %v9819_v4  ;;  %v9809_v13 = vld [vmem:[%s13141_s1 + $0x20] sm:$0xff]  ;;  %v9808_v21 = vld [vmem:[%s13141_s1 + $0x18] sm:$0xff]  ;;  %v9815_v26 = vld [vmem:[%s13141_s1 + $0x50] sm:$0xff]  ;;  %v249_v31 = vshll.u32 %v10540_v24, 16  ;;  %v253_v32 = vshrl.u32 %v10540_v24, 16  ;;  %v476_v52 = vrot.slane %v10540_v24, 1 }
  0x11   : > { %421 = vmatpush.bf16.msra.mxu1 %v9811_v5  ;;  %v10517_v14 = vld [vmem:[%s10508_s16] sm:$0xff]   ;;  %v9824_v22 = vld [vmem:[%s13141_s1 + $0x98] sm:$0xff]  ;;  %v9807_v27 = vld [vmem:[%s13141_s1 + $0x10] sm:$0xff]  ;;  %vm7231_vm8 = vsmask.f32 256 }
  0x12   : > { %538 = vmatpush.bf16.msra.mxu2 %v9827_v6  ;;  %v9825_v15 = vld [vmem:[%s13141_s1 + $0xa0] sm:$0xff]  ;;  %v10238_v17 = vunpack.c.h.b16 %v10517_v14  ;;  %v9832_v23 = vld [vmem:[%s13141_s1 + $0xd8] sm:$0xff]  ;;  %v244_v28 = vshll.u32 %v10517_v14, 16  ;;  %v9823_v29 = vld [vmem:[%s13141_s1 + $0x90] sm:$0xff]  ;;  %v242_v37 = vshrl.u32 %v10517_v14, 16  ;;  %v609_v43 = vrot.slane %v253_v32, 1 }
  0x13   : > { %684 = vmatpush.bf16.msra.mxu3 %v9835_v7  ;;  %v9833_v16 = vld [vmem:[%s13141_s1 + $0xe0] sm:$0xff]  ;;  %v9831_v30 = vld [vmem:[%s13141_s1 + $0xd0] sm:$0xff]  ;;  %v9814_v35 = vld [vmem:[%s13141_s1 + $0x48] sm:$0xff]  ;;  %v610_v44 = vrot.slane %v249_v31, 2  ;;  %v251_v48 = vrot.slane %v249_v31, 1 }
  0x14   : > { %335 = vmatpush.bf16.msra.mxu0 %v9818_v8  ;;  %v453_v18 = vld [vmem:[%s10508_s16] sm:$0xe]  ;;  %v9806_v36 = vld [vmem:[%s13141_s1 + $0x8] sm:$0xff]  ;;  %v246_v38 = vrot.slane %v244_v28, 1  ;;  %v9844_v55 = vld [vmem:[%s13141_s1 + $0x138] sm:$0xff] }
  0x15   : > { %422 = vmatpush.bf16.msra.mxu1 %v9810_v9  ;;  %v472_v19 = vunpack.c.l.b16 %v453_v18  ;;  %v9822_v39 = vld [vmem:[%s13141_s1 + $0x88] sm:$0xff]  ;;  %v9813_v45 = vld [vmem:[%s13141_s1 + $0x40] sm:$0xff]  ;;  %v611_v54 = vor.u32 %v610_v44, %v609_v43  ;;  %v9868_v56 = vld [vmem:[%s13141_s1 + $0x1f8] sm:$0xff] }
  0x16   : > { %539 = vmatpush.bf16.msra.mxu2 %v9826_v10  ;;  %v9830_v40 = vld [vmem:[%s13141_s1 + $0xc8] sm:$0xff]  ;;  %v9805_v46 = vld [vmem:[%s13141_s1] sm:$0xff]  ;;  %v247_v47 = vor.u32 %v246_v38, %v242_v37  ;;  %v9860_v60 = vld [vmem:[%s13141_s1 + $0x1b8] sm:$0xff] }
  0x17   : > { %685 = vmatpush.bf16.msra.mxu3 %v9834_v11  ;;  %v473_v25 = vpack.c.b16 %v10238_v17, %v472_v19  ;;  %v9821_v49 = vld [vmem:[%s13141_s1 + $0x80] sm:$0xff]  ;;  %v10600_v61 = vld [vmem:[%s10508_s16 + $0x10] sm:$0xff]  ;;  %v9852_v62 = vld [vmem:[%s13141_s1 + $0x178] sm:$0xff] }
  0x18   : > { %336 = vmatpush.bf16.msra.mxu0 %v9817_v12  ;;  %v9829_v50 = vld [vmem:[%s13141_s1 + $0xc0] sm:$0xff]  ;;  %v252_v57 = vsel %vm240_vm0, %v247_v47, %v251_v48  ;;  %v9843_v63 = vld [vmem:[%s13141_s1 + $0x130] sm:$0xff]  ;;  %v257_v1 = vshll.u32 %v10600_v61, 16  ;;  %v261_v2 = vshrl.u32 %v10600_v61, 16  ;;  %v9842_v5 = vld [vmem:[%s13141_s1 + $0x128] sm:$0xff] }
  0x19   : > { %423 = vmatpush.bf16.msra.mxu1 %v9809_v13  ;;  %v602_v33 = vshrl.u32 %v473_v25, 16  ;;  %v605_v34 = vshll.u32 %v473_v25, 16  ;;  %v475_v51 = vrot.slane %v473_v25, 1  ;;  %v9867_v0 = vld [vmem:[%s13141_s1 + $0x1f0] sm:$0xff]  ;;  %v9866_v6 = vld [vmem:[%s13141_s1 + $0x1e8] sm:$0xff]  ;;  %v9841_v11 = vld [vmem:[%s13141_s1 + $0x120] sm:$0xff]  ;;  %v255_v13 = vor.u32 %v253_v32, %v251_v48 }
  0x1a   : > { %540 = vmatpush.bf16.msra.mxu2 %v9825_v15  ;;  %v9859_v3 = vld [vmem:[%s13141_s1 + $0x1b0] sm:$0xff]  ;;  %v613_v7 = vrot.slane %v261_v2, 1  ;;  %v614_v8 = vrot.slane %v257_v1, 2  ;;  %v9858_v9 = vld [vmem:[%s13141_s1 + $0x1a8] sm:$0xff]  ;;  %v9865_v12 = vld [vmem:[%s13141_s1 + $0x1e0] sm:$0xff]  ;;  %v259_v15 = vrot.slane %v257_v1, 1 }
  0x1b   : > { %686 = vmatpush.bf16.msra.mxu3 %v9833_v16  ;;  %v604_v41 = vrot.slane %v602_v33, 1  ;;  %v607_v42 = vrot.slane %v605_v34, 2  ;;  %v477_v58 = vsel %vm474_vm1, %v475_v51, %v476_v52  ;;  %v9851_v4 = vld [vmem:[%s13141_s1 + $0x170] sm:$0xff]  ;;  %v9850_v10 = vld [vmem:[%s13141_s1 + $0x168] sm:$0xff]  ;;  %v478_v16 = vrot.slane %v10600_v61, 1  ;;  %v9857_v19 = vld [vmem:[%s13141_s1 + $0x1a0] sm:$0xff] }
  0x1c   : > { %337 = vmatpush.bf16.msra.mxu0 %v9816_v20  ;;  %v615_v18 = vor.u32 %v614_v8, %v613_v7  ;;  %v9840_v20 = vld [vmem:[%s13141_s1 + $0x118] sm:$0xff]  ;;  %v9839_v28 = vld [vmem:[%s13141_s1 + $0x110] sm:$0xff]  ;;  %v9838_v34 = vld [vmem:[%s13141_s1 + $0x108] sm:$0xff] }
  0x1d   : > { %424 = vmatpush.bf16.msra.mxu1 %v9808_v21  ;;  %v608_v53 = vor.u32 %v607_v42, %v604_v41  ;;  %v260_v21 = vsel %vm240_vm0, %v255_v13, %v259_v15  ;;  %v10651_v25 = vld [vmem:[%s10508_s16 + $0x18] sm:$0xff]  ;;  %v9863_v33 = vld [vmem:[%s13141_s1 + $0x1d0] sm:$0xff]  ;;  %v180_v37 = vld [vmem:[%s10508_s16 + $0x20] sm:$0xf] }
  0x1e   : > { %541 = vmatpush.bf16.msra.mxu2 %v9824_v22  ;;  %v479_v22 = vsel %vm474_vm1, %v476_v52, %v478_v16  ;;  %v9856_v31 = vld [vmem:[%s13141_s1 + $0x198] sm:$0xff]  ;;  %v579_v38 = vld [vmem:[%s10508_s16 + $0x24] sm:$0x3]  ;;  %v480_v41 = vrot.slane %v10651_v25, 1  ;;  %v10681_v44 = vunpack.c.l.b16 %v180_v37  ;;  %v9855_v52 = vld [vmem:[%s13141_s1 + $0x190] sm:$0xff] }
  0x1f   : > { %687 = vmatpush.bf16.msra.mxu3 %v9832_v23  ;;  %v612_v59 = vsel %vm600_vm2, %v608_v53, %v611_v54  ;;  %v616_v23 = vsel %vm600_vm2, %v611_v54, %v615_v18  ;;  %v9848_v32 = vld [vmem:[%s13141_s1 + $0x158] sm:$0xff]  ;;  %v197_v43 = vld [vmem:[%s10508_s16 + $0x24] sm:$0x1]  ;;  %v9847_v53 = vld [vmem:[%s13141_s1 + $0x150] sm:$0xff] }
  0x20   : > { %338 = vmatpush.bf16.msra.mxu0 %v9815_v26  ;;  %v9849_v26 = vld [vmem:[%s13141_s1 + $0x160] sm:$0xff]  ;;  %v234_v47 = vunpack.c.l.b16 %v197_v43  ;;  %v481_v48 = vsel %vm474_vm1, %v478_v16, %v480_v41  ;;  %v9862_v54 = vld [vmem:[%s13141_s1 + $0x1c8] sm:$0xff]  ;;  %v9904_v16 = vld [vmem:[%s13141_s1 + $0x2f8] sm:$0xff] }
  0x21   : > { %425 = vmatpush.bf16.msra.mxu1 %v9807_v27  ;;  %v9864_v27 = vld [vmem:[%s13141_s1 + $0x1d8] sm:$0xff]  ;;  %v9887_v37 = vld [vmem:[%s13141_s1 + $0x270] sm:$0xff]  ;;  %vm7232_vm9 = vmand %vm7230_vm7, %vm7231_vm8 }
  0x22   : > { %542 = vmatpush.bf16.msra.mxu2 %v9823_v29  ;;  %v265_v29 = vshll.u32 %v10651_v25, 16  ;;  %v239_v51 = vpack.c.b16 %v234_v47, %v10681_v44 }
  0x23   : > { %688 = vmatpush.bf16.msra.mxu3 %v9831_v30  ;;  %v269_v30 = vshrl.u32 %v10651_v25, 16 }
  0x24   : > { %339 = vmatpush.bf16.msra.mxu0 %v9814_v35 }
  0x25   : > { %426 = vmatpush.bf16.msra.mxu1 %v9806_v36  ;;  %v617_v35 = vrot.slane %v269_v30, 1  ;;  %v618_v36 = vrot.slane %v265_v29, 2 }
  0x26   : > { %543 = vmatpush.bf16.msra.mxu2 %v9822_v39  ;;  %v263_v39 = vor.u32 %v261_v2, %v259_v15  ;;  %v9880_v15 = vld [vmem:[%s13141_s1 + $0x238] sm:$0xff] }
  0x27   : > { %689 = vmatpush.bf16.msra.mxu3 %v9830_v40  ;;  %v267_v40 = vrot.slane %v265_v29, 1  ;;  %v619_v42 = vor.u32 %v618_v36, %v617_v35  ;;  %v9888_v29 = vld [vmem:[%s13141_s1 + $0x278] sm:$0xff]  ;;  %v9895_v36 = vld [vmem:[%s13141_s1 + $0x2b0] sm:$0xff] }
  0x28   : > { %340 = vmatpush.bf16.msra.mxu0 %v9813_v45  ;;  %v598_v45 = vunpack.c.l.b16 %v579_v38  ;;  %v9902_v38 = vld [vmem:[%s13141_s1 + $0x2e8] sm:$0xff] }
  0x29   : > { %427 = vmatpush.bf16.msra.mxu1 %v9805_v46  ;;  %v268_v46 = vsel %vm240_vm0, %v263_v39, %v267_v40  ;;  %v271_v7 = vor.u32 %v269_v30, %v267_v40  ;;  %v9903_v30 = vld [vmem:[%s13141_s1 + $0x2f0] sm:$0xff]  ;;  %v9877_v39 = vld [vmem:[%s13141_s1 + $0x220] sm:$0xff] }
  0x2a   : > { %544 = vmatpush.bf16.msra.mxu2 %v9821_v49  ;;  %v620_v49 = vsel %vm600_vm2, %v615_v18, %v619_v42  ;;  %v9896_v18 = vld [vmem:[%s13141_s1 + $0x2b8] sm:$0xff] }
  0x2b   : > { %690 = vmatpush.bf16.msra.mxu3 %v9829_v50  ;;  %341 = vmatmul.bf16.vlgmr.msra.gmra.mxu0 %v252_v57  ;;  %v10687_v50 = vpack.c.b16 %v598_v45, %v10681_v44  ;;  %v9837_v57 = vld [vmem:[%s13141_s1 + $0x100] sm:$0xff] }
  0x2c   : > { %809 = vmatpush.bf16.msrb.mxu0 %v9844_v55  ;;  %428 = vmatmul.bf16.vlgmr.msra.gmra.mxu1 %v10517_v14 }
  0x2d   : > { %545 = vmatmul.bf16.vlgmr.msra.gmra.mxu2 %v477_v58  ;;  %966 = vmatpush.bf16.msrb.mxu1 %v9852_v62  ;;  %v622_v55 = vshrl.u32 %v10687_v50, 16  ;;  %v9854_v58 = vld [vmem:[%s13141_s1 + $0x188] sm:$0xff]  ;;  %v725_v62 = vld [vmem:[%s10508_s16] sm:$0xc] }
  0x2e   : > { %691 = vmatmul.bf16.vlgmr.msra.gmra.mxu3 %v612_v59  ;;  %1127 = vmatpush.bf16.msrb.mxu2 %v9860_v60  ;;  %v9846_v59 = vld [vmem:[%s13141_s1 + $0x148] sm:$0xff]  ;;  %v9861_v60 = vld [vmem:[%s13141_s1 + $0x1c0] sm:$0xff] }
  0x2f   : > { %1244 = vmatpush.bf16.msrb.mxu3 %v9868_v56  ;;  %v625_v56 = vshll.u32 %v10687_v50, 16  ;;  %v624_v1 = vrot.slane %v622_v55, 1  ;;  %v9901_v55 = vld [vmem:[%s13141_s1 + $0x2e0] sm:$0xff] }
  0x30   : > { %810 = vmatpush.bf16.msrb.mxu0 %v9843_v63  ;;  %v273_v63 = vshll.u32 %v239_v51, 16 }
  0x31   : > { %967 = vmatpush.bf16.msrb.mxu1 %v9851_v4  ;;  %v627_v2 = vrot.slane %v625_v56, 2  ;;  %v9845_v4 = vld [vmem:[%s13141_s1 + $0x140] sm:$0xff] }
  0x32   : > { %1128 = vmatpush.bf16.msrb.mxu2 %v9859_v3  ;;  %v9853_v3 = vld [vmem:[%s13141_s1 + $0x180] sm:$0xff]  ;;  %v275_v8 = vrot.slane %v273_v63, 1  ;;  %v750_v63 = vrot.slane %v10600_v61, 2 }
  0x33   : > { %1245 = vmatpush.bf16.msrb.mxu3 %v9867_v0  ;;  %v744_v0 = vunpack.c.l.b16 %v725_v62 }
  0x34   : > { %811 = vmatpush.bf16.msrb.mxu0 %v9842_v5  ;;  %v276_v13 = vsel %vm240_vm0, %v271_v7, %v275_v8  ;;  %v10801_v7 = vld [vmem:[%s10508_s16 + $0x1c] sm:$0xff]  }
  0x35   : > { %968 = vmatpush.bf16.msrb.mxu1 %v9850_v10  ;;  %v745_v5 = vpack.c.b16 %v10238_v17, %v744_v0  ;;  %v482_v10 = vrot.slane %v239_v51, 1 }
  0x36   : > { %1129 = vmatpush.bf16.msrb.mxu2 %v9858_v9 }
  0x37   : > { %1246 = vmatpush.bf16.msrb.mxu3 %v9866_v6  ;;  %v748_v6 = vrot.slane %v10540_v24, 2  ;;  %v747_v9 = vrot.slane %v745_v5, 2  ;;  %v483_v14 = vsel %vm474_vm1, %v480_v41, %v482_v10  ;;  %v10798_v5 = vld [vmem:[%s10508_s16 + $0x10] sm:$0xff]  }
  0x38   : > { %812 = vmatpush.bf16.msrb.mxu0 %v9841_v11  ;;  %v628_v11 = vor.u32 %v627_v2, %v624_v1 }
  0x39   : > { %969 = vmatpush.bf16.msrb.mxu1 %v9849_v26  ;;  %v366_v26 = vpack.c.b16 %v10681_v44, %v10681_v44  ;;  %v751_v2 = vsel %vm746_vm3, %v748_v6, %v750_v63 }
  0x3a   : > { %1130 = vmatpush.bf16.msrb.mxu2 %v9857_v19  ;;  %v629_v17 = vsel %vm600_vm2, %v619_v42, %v628_v11  ;;  %v9879_v19 = vld [vmem:[%s13141_s1 + $0x230] sm:$0xff] }
  0x3b   : > { %1247 = vmatpush.bf16.msrb.mxu3 %v9865_v12  ;;  %346 = vmatmul.bf16.gmra.mxu0 %v260_v21  ;;  %v749_v12 = vsel %vm746_vm3, %v747_v9, %v748_v6  ;;  %v10349_v21 = vld [vmem:[%s10508_s16 + $0x4] sm:$0x8]  ;;  %v9875_v6 = vld [vmem:[%s13141_s1 + $0x210] sm:$0xff]  ;;  %v1060_v9 = vshll.u32 %v10801_v7, 16 }
  0x3c   : > { %813 = vmatpush.bf16.msrb.mxu0 %v9840_v20  ;;  %433 = vmatmul.bf16.gmra.mxu1 %v10540_v24  ;;  %v277_v20 = vshrl.u32 %v239_v51, 16  ;;  %v10772_v51 = vld [vmem:[%s10508_s16 + $0x8] sm:$0xff]   ;;  %v9885_v24 = vld [vmem:[%s13141_s1 + $0x260] sm:$0xff] }
  0x3d   : > { %550 = vmatmul.bf16.gmra.mxu2 %v479_v22  ;;  %970 = vmatpush.bf16.msrb.mxu1 %v9848_v32  ;;  %v10406_v22 = vld [vmem:[%s10508_s16 + $0x4] sm:$0xf0]  }
  0x3e   : > { %696 = vmatmul.bf16.gmra.mxu3 %v616_v23  ;;  %1131 = vmatpush.bf16.msrb.mxu2 %v9856_v31  ;;  %v279_v23 = vor.u32 %v277_v20, %v275_v8  ;;  %v9878_v31 = vld [vmem:[%s13141_s1 + $0x228] sm:$0xff]  ;;  %v1057_v8 = vshrl.u32 %v10801_v7, 16 }
  0x3f   : > { %1248 = vmatpush.bf16.msrb.mxu3 %v9864_v27  ;;  %v10408_v27 = vld [vmem:[%s10508_s16 + $0xc] sm:$0xff]  }
  0x40   : > { %814 = vmatpush.bf16.msrb.mxu0 %v9839_v28  ;;  %v10350_v28 = vor.u32 %v10406_v22, %v10349_v21  ;;  %v1042_v35 = vshll.u32 %v10408_v27, 16  ;;  %v905_v45 = vrot.slane %v10408_v27, 3 }
  0x41   : > { %971 = vmatpush.bf16.msrb.mxu1 %v9847_v53  ;;  %v9894_v53 = vld [vmem:[%s13141_s1 + $0x2a8] sm:$0xff] }
  0x42   : > { %1132 = vmatpush.bf16.msrb.mxu2 %v9855_v52  ;;  %v1031_v32 = vshrl.u32 %v10350_v28, 16  ;;  %v1044_v43 = vrot.slane %v1042_v35, 4  ;;  %v904_v44 = vrot.slane %v10350_v28, 3  ;;  %v10410_v52 = vld [vmem:[%s10508_s16 + $0x14] sm:$0xff]  }
  0x43   : > { %1249 = vmatpush.bf16.msrb.mxu3 %v9863_v33  ;;  %v1034_v33 = vshll.u32 %v10350_v28, 16  ;;  %v1048_v56 = vshrl.u32 %v10410_v52, 16  ;;  %v907_v0 = vrot.slane %v10410_v52, 3 }
  0x44   : > { %815 = vmatpush.bf16.msrb.mxu0 %v9838_v34  ;;  %v1039_v34 = vshrl.u32 %v10408_v27, 16  ;;  %v1033_v40 = vrot.slane %v1031_v32, 3  ;;  %v10310_v27 = vld [vmem:[%s10508_s16 + $0x18] sm:$0xff]  }
  0x45   : > { %972 = vmatpush.bf16.msrb.mxu1 %v9846_v59  ;;  %v1036_v41 = vrot.slane %v1034_v33, 4  ;;  %v9893_v59 = vld [vmem:[%s13141_s1 + $0x2a0] sm:$0xff] }
  0x46   : > { %1133 = vmatpush.bf16.msrb.mxu2 %v9854_v58  ;;  %v1041_v42 = vrot.slane %v1039_v34, 3  ;;  %v9876_v58 = vld [vmem:[%s13141_s1 + $0x218] sm:$0xff] }
  0x47   : > { %1250 = vmatpush.bf16.msrb.mxu3 %v9862_v54  ;;  %v9886_v54 = vld [vmem:[%s13141_s1 + $0x268] sm:$0xff] }
  0x48   : > { %816 = vmatpush.bf16.msrb.mxu0 %v9837_v57  ;;  %v1045_v47 = vor.u32 %v1044_v43, %v1041_v42  ;;  %v1051_v57 = vshll.u32 %v10410_v52, 16 }
  0x49   : > { %973 = vmatpush.bf16.msrb.mxu1 %v9845_v4 }
  0x4a   : > { %1134 = vmatpush.bf16.msrb.mxu2 %v9853_v3  ;;  %v1053_v62 = vrot.slane %v1051_v57, 4  ;;  %v908_v3 = vsel %vm903_vm4, %v905_v45, %v907_v0 }
  0x4b   : > { %351 = vmatmul.bf16.gmra.mxu0 %v268_v46  ;;  %1251 = vmatpush.bf16.msrb.mxu3 %v9861_v60  ;;  %v1037_v46 = vor.u32 %v1036_v41, %v1033_v40  ;;  %v1050_v60 = vrot.slane %v1048_v56, 3  ;;  %v9890_v40 = vld [vmem:[%s13141_s1 + $0x288] sm:$0xff]  ;;  %v754_v41 = vrot.slane %v10687_v50, 2 }
  0x4c   : > { %438 = vmatmul.bf16.gmra.mxu1 %v10600_v61  ;;  %1430 = vmatpush.bf16.msra.mxu0 %v9880_v15  ;;  %v9900_v61 = vld [vmem:[%s13141_s1 + $0x2d8] sm:$0xff]  ;;  %v9899_v15 = vld [vmem:[%s13141_s1 + $0x2d0] sm:$0xff] }
  0x4d   : > { %555 = vmatmul.bf16.gmra.mxu2 %v481_v48  ;;  %1555 = vmatpush.bf16.msra.mxu1 %v9888_v29  ;;  %v906_v48 = vsel %vm903_vm4, %v904_v44, %v905_v45  ;;  %v1054_v1 = vor.u32 %v1053_v62, %v1050_v60  ;;  %v860_v29 = vld [vmem:[%s10508_s16 + $0x28] sm:$0x7]  ;;  %v9889_v45 = vld [vmem:[%s13141_s1 + $0x280] sm:$0xff] }
  0x4e   : > { %701 = vmatmul.bf16.gmra.mxu3 %v620_v49  ;;  %1711 = vmatpush.bf16.msra.mxu2 %v9896_v18  ;;  %v1046_v49 = vsel %vm1029_vm5, %v1037_v46, %v1045_v47  ;;  %v909_v18 = vrot.slane %v10801_v7, 3  ;;  %v9882_v44 = vld [vmem:[%s13141_s1 + $0x248] sm:$0xff]  ;;  %v9897_v46 = vld [vmem:[%s13141_s1 + $0x2c0] sm:$0xff] }
  0x4f   : > { %1872 = vmatpush.bf16.msra.mxu3 %v9904_v16  ;;  %v1055_v4 = vsel %vm1029_vm5, %v1045_v47, %v1054_v1  ;;  %v752_v16 = vrot.slane %v10651_v25, 2 }
  0x50   : > { %1431 = vmatpush.bf16.msra.mxu0 %v9879_v19 }
  0x51   : > { %1556 = vmatpush.bf16.msra.mxu1 %v9887_v37  ;;  %v753_v22 = vsel %vm746_vm3, %v750_v63, %v752_v16  ;;  %v9883_v37 = vld [vmem:[%s13141_s1 + $0x250] sm:$0xff]  ;;  %v1597_v63 = vld [vmem:[%s10508_s16 + $0xc] sm:$0xc] }
  0x52   : > { %1712 = vmatpush.bf16.msra.mxu2 %v9895_v36 }
  0x53   : > { %1873 = vmatpush.bf16.msra.mxu3 %v9903_v30  ;;  %v897_v30 = vunpack.c.l.b16 %v860_v29  ;;  %v1339_v29 = vshrl.u32 %v10772_v51, 16 }
  0x54   : > { %1432 = vmatpush.bf16.msra.mxu0 %v9878_v31  ;;  %v9891_v31 = vld [vmem:[%s13141_s1 + $0x290] sm:$0xff] }
  0x55   : > { %1557 = vmatpush.bf16.msra.mxu1 %v9886_v54  ;;  %v9881_v54 = vld [vmem:[%s13141_s1 + $0x240] sm:$0xff] }
  0x56   : > { %1713 = vmatpush.bf16.msra.mxu2 %v9894_v53 }
  0x57   : > { %1874 = vmatpush.bf16.msra.mxu3 %v9902_v38  ;;  %v9898_v38 = vld [vmem:[%s13141_s1 + $0x2c8] sm:$0xff] }
  0x58   : > { %1433 = vmatpush.bf16.msra.mxu0 %v9877_v39  ;;  %v9873_v39 = vld [vmem:[%s13141_s1 + $0x200] sm:$0xff] }
  0x59   : > { %1558 = vmatpush.bf16.msra.mxu1 %v9885_v24 }
  0x5a   : > { %1714 = vmatpush.bf16.msra.mxu2 %v9893_v59 }
  0x5b   : > { %356 = vmatmul.bf16.gmra.mxu0 %v276_v13  ;;  %1875 = vmatpush.bf16.msra.mxu3 %v9901_v55  ;;  %v1008_v13 = vld [vmem:[%s10508_s16 + $0x28] sm:$0xf]  ;;  %v9912_v55 = vld [vmem:[%s13141_s1 + $0x338] sm:$0xff] }
  0x5c   : > { %443 = vmatmul.bf16.gmra.mxu1 %v10651_v25  ;;  %1434 = vmatpush.bf16.msra.mxu0 %v9876_v58  ;;  %v10828_v21 = vunpack.c.l.b16 %v1008_v13  ;;  %v9874_v25 = vld [vmem:[%s13141_s1 + $0x208] sm:$0xff] }
  0x5d   : > { %560 = vmatmul.bf16.gmra.mxu2 %v483_v14  ;;  %v9892_v14 = vld [vmem:[%s13141_s1 + $0x298] sm:$0xff] }
  0x5e   : > { %706 = vmatmul.bf16.gmra.mxu3 %v629_v17  ;;  %v9884_v17 = vld [vmem:[%s13141_s1 + $0x258] sm:$0xff]  ;;  %1715 = vmatpush.bf16.msra.mxu2 %v9892_v14 }
  0x5f   : > { %1876 = vmatpush.bf16.msra.mxu3 %v9900_v61  ;;  %1559 = vmatpush.bf16.msra.mxu1 %v9884_v17  ;;  %v9928_v14 = vld [vmem:[%s13141_s1 + $0x3b8] sm:$0xff]  ;;  %v1341_v17 = vshll.u32 %v10772_v51, 16 }
  0x60   : > { %1435 = vmatpush.bf16.msra.mxu0 %v9875_v6 }
  0x62   : > { %1716 = vmatpush.bf16.msra.mxu2 %v9891_v31 }
  0x63   : > { %1877 = vmatpush.bf16.msra.mxu3 %v9899_v15  ;;  %1560 = vmatpush.bf16.msra.mxu1 %v9883_v37  ;;  %v10897_v15 = vld [vmem:[%s10508_s16 + $0x10] sm:$0xff] }
  0x64   : > { %1436 = vmatpush.bf16.msra.mxu0 %v9874_v25  ;;  %v1343_v25 = vrot.slane %v1341_v17, 1  ;;  %v1350_v17 = vshrl.u32 %v10897_v15, 16 }
  0x66   : > { %1717 = vmatpush.bf16.msra.mxu2 %v9890_v40 }
  0x67   : > { %1878 = vmatpush.bf16.msra.mxu3 %v9898_v38  ;;  %1561 = vmatpush.bf16.msra.mxu1 %v9882_v44 }
  0x68   : > { %1437 = vmatpush.bf16.msra.mxu0 %v9873_v39 }
  0x6a   : > { %1718 = vmatpush.bf16.msra.mxu2 %v9889_v45  ;;  %v1494_v45 = vrot.slane %v10897_v15, 1 }
  0x6b   : > { %361 = vmatmul.bf16.gmra.mxu0 %v279_v23  ;;  %v910_v23 = vsel %vm903_vm4, %v907_v0, %v909_v18  ;;  %1879 = vmatpush.bf16.msra.mxu3 %v9897_v46 }
  0x6c   : > { %448 = vmatmul.bf16.gmra.mxu1 %v366_v26 }
  0x6d   : > { %565 = vmatmul.bf16.gmra.mxu2 %v482_v10  ;;  %v1059_v10 = vrot.slane %v1057_v8, 3  ;;  %1562 = vmatpush.bf16.msra.mxu1 %v9881_v54 }
  0x6e   : > { %711 = vmatmul.bf16.gmra.mxu3 %v628_v11  ;;  %v1062_v11 = vrot.slane %v1060_v9, 4  ;;  %v1190_v9 = vpack.c.b16 %v10828_v21, %v10828_v21 }
  0x70   : > { %v1063_v19 = vor.u32 %v1062_v11, %v1059_v10 }
  0x72   : > { %v1064_v26 = vsel %vm1029_vm5, %v1054_v1, %v1063_v19  ;;  %v9939_v1 = vld [vmem:[%s13141_s1 + $0x3f8] sm:$0xff] }
  0x7b   : > { %817 = vmatmul.bf16.vlgmr.msrb.gmra.mxu0 %v749_v12  ;;  %v10311_v12 = vld [vmem:[%s10508_s16 + $0x20] sm:$0xff]  }
  0x7c   : > { %974 = vmatmul.bf16.vlgmr.msrb.gmra.mxu1 %v906_v48  ;;  %v10254_v20 = vunpack.c.h.b16 %v10311_v12  ;;  %v755_v48 = vsel %vm746_vm3, %v752_v16, %v754_v41  ;;  %1997 = vmatpush.bf16.msrb.mxu0 %v9912_v55 }
  0x7d   : > { %1135 = vmatmul.bf16.vlgmr.msrb.gmra.mxu2 %v1046_v49 }
  0x7e   : > { %1252 = vmatmul.bf16.vlgmr.msrb.gmra.mxu3 %v10772_v51  ;;  %v1028_v28 = vpack.c.b16 %v10828_v21, %v10254_v20  ;;  %v902_v34 = vpack.c.b16 %v897_v30, %v10254_v20  ;;  %v9938_v20 = vld [vmem:[%s13141_s1 + $0x3f0] sm:$0xff]  ;;  %2259 = vmatpush.bf16.msrb.mxu2 %v9928_v14  ;;  %v9910_v51 = vld [vmem:[%s13141_s1 + $0x328] sm:$0xff] }
  0x7f   : > { %2415 = vmatpush.bf16.msrb.mxu3 %v9939_v1  ;;  %v9919_v1 = vld [vmem:[%s13141_s1 + $0x370] sm:$0xff] }
  0x80   : > { %v1066_v32 = vshrl.u32 %v1028_v28, 16  ;;  %v1069_v33 = vshll.u32 %v1028_v28, 16  ;;  %v911_v42 = vrot.slane %v902_v34, 3 }
  0x82   : > { %v1068_v35 = vrot.slane %v1066_v32, 3  ;;  %v1071_v36 = vrot.slane %v1069_v33, 4  ;;  %v912_v49 = vsel %vm903_vm4, %v909_v18, %v911_v42  ;;  %v1346_v33 = vshll.u32 %v10897_v15, 16  ;;  %v10998_v15 = vld [vmem:[%s10508_s16 + $0x20] sm:$0xff] }
  0x83   : > { %2416 = vmatpush.bf16.msrb.mxu3 %v9938_v20 }
  0x84   : > { %v1072_v43 = vor.u32 %v1071_v36, %v1068_v35 }
  0x86   : > { %v1073_v53 = vsel %vm1029_vm5, %v1063_v19, %v1072_v43  ;;  %v9920_v19 = vld [vmem:[%s13141_s1 + $0x378] sm:$0xff] }
  0x87   : > { %2142 = vmatpush.bf16.msrb.mxu1 %v9920_v19 }
  0x8b   : > { %822 = vmatmul.bf16.gmra.mxu0 %v751_v2  ;;  %v9911_v2 = vld [vmem:[%s13141_s1 + $0x330] sm:$0xff]  ;;  %2143 = vmatpush.bf16.msrb.mxu1 %v9919_v1 }
  0x8c   : > { %979 = vmatmul.bf16.gmra.mxu1 %v908_v3  ;;  %v10261_v3 = vunpack.c.l.b16 %v10798_v5  ;;  %1998 = vmatpush.bf16.msrb.mxu0 %v9911_v2  ;;  %v9937_v2 = vld [vmem:[%s13141_s1 + $0x3e8] sm:$0xff] }
  0x8d   : > { %1140 = vmatmul.bf16.gmra.mxu2 %v1055_v4  ;;  %v1634_v4 = vunpack.c.l.b16 %v1597_v63  ;;  %2417 = vmatpush.bf16.msrb.mxu3 %v9937_v2 }
  0x8e   : > { %1257 = vmatmul.bf16.gmra.mxu3 %v10798_v5 }
  0x8f   : > { %v1644_v10 = vpack.c.b16 %v10261_v3, %v1634_v4  ;;  %v9909_v4 = vld [vmem:[%s13141_s1 + $0x320] sm:$0xff] }
  0x90   : > { %1999 = vmatpush.bf16.msrb.mxu0 %v9910_v51 }
  0x91   : > { %v1776_v16 = vshrl.u32 %v1644_v10, 16  ;;  %v1779_v18 = vshll.u32 %v1644_v10, 16  ;;  %v1649_v46 = vrot.slane %v1644_v10, 2 }
  0x93   : > { %v1778_v34 = vrot.slane %v1776_v16, 2  ;;  %v1781_v37 = vrot.slane %v1779_v18, 3 }
  0x94   : > { %2000 = vmatpush.bf16.msrb.mxu0 %v9909_v4  ;;  %v11020_v4 = vld [vmem:[%s10508_s16 + $0x28] sm:$0xff]  }
  0x9b   : > { %827 = vmatmul.bf16.gmra.mxu0 %v753_v22 }
  0x9c   : > { %984 = vmatmul.bf16.gmra.mxu1 %v910_v23  ;;  %v10313_v23 = vld [vmem:[%s10508_s16 + $0x8] sm:$0xf0] }
  0x9d   : > { %1145 = vmatmul.bf16.gmra.mxu2 %v1064_v26  ;;  %v10314_v26 = vld [vmem:[%s10508_s16 + $0x8] sm:$0xe] }
  0x9e   : > { %1262 = vmatmul.bf16.gmra.mxu3 %v10310_v27  ;;  %v10315_v35 = vor.u32 %v10314_v26, %v10313_v23  ;;  %v9918_v26 = vld [vmem:[%s13141_s1 + $0x368] sm:$0xff] }
  0x9f   : > { %2144 = vmatpush.bf16.msrb.mxu1 %v9918_v26 }
  0xa0   : > { %v1493_v44 = vrot.slane %v10315_v35, 1  ;;  %v9925_v35 = vld [vmem:[%s13141_s1 + $0x3a0] sm:$0xff] }
  0xa8   : > { %v342_v47 = vpop.f32.mrf.mxu0 }
  0xa9   : > { %v429_v50 = vpop.f32.mrf.mxu1 }
  0xaa   : > { %v430_v52 = vadd.f32 %v429_v50, %v342_v47  ;;  %v1782_v50 = vor.u32 %v1781_v37, %v1778_v34 }
  0xab   : > { %832 = vmatmul.bf16.gmra.mxu0 %v755_v48 }
  0xac   : > { %989 = vmatmul.bf16.gmra.mxu1 %v912_v49 }
  0xad   : > { %1150 = vmatmul.bf16.gmra.mxu2 %v1073_v53 }
  0xae   : > { %1267 = vmatmul.bf16.gmra.mxu3 %v10311_v12  ;;  %v10888_v12 = vld [vmem:[%s10508_s16 + $0x14] sm:$0xff]  }
  0xaf   : > { %v1784_v21 = vshrl.u32 %v10888_v12, 16  ;;  %v1787_v22 = vshll.u32 %v10888_v12, 16  ;;  %v1650_v47 = vrot.slane %v10888_v12, 2 }
  0xb0   : > { %v546_v56 = vpop.f32.mrf.mxu2  ;;  %v344_v59 = vpop.f32.mrf.mxu0 }
  0xb1   : > { %v692_v57 = vpop.f32.mrf.mxu3  ;;  %v570_v58 = vadd.f32 %v546_v56, %v430_v52  ;;  %v431_v60 = vpop.f32.mrf.mxu1  ;;  %v1786_v38 = vrot.slane %v1784_v21, 2  ;;  %v1789_v39 = vrot.slane %v1787_v22, 3 }
  0xb2   : > { %v432_v62 = vadd.f32 %v431_v60, %v344_v59  ;;  %v1651_v59 = vsel %vm746_vm3, %v1649_v46, %v1650_v47 }
  0xb3   : > { %v10874_v0 = vadd.f32 %v692_v57, %v570_v58  ;;  %v1790_v48 = vor.u32 %v1789_v39, %v1786_v38  ;;  %v1495_v57 = vsel %vm474_vm1, %v1493_v44, %v1494_v45  ;;  %v10993_v44 = vld [vmem:[%s10508_s16 + $0x24] sm:$0xff]  }
  0xb5   : > { %v1791_v60 = vsel %vm1774_vm6, %v1782_v50, %v1790_v48  ;;  %v9907_v50 = vld [vmem:[%s13141_s1 + $0x310] sm:$0xff] }
  0xb8   : > { %v548_v7 = vpop.f32.mrf.mxu2  ;;  %v347_v6 = vpop.f32.mrf.mxu0 }
  0xb9   : > { %v694_v24 = vpop.f32.mrf.mxu3  ;;  %v571_v61 = vadd.f32 %v548_v7, %v432_v62  ;;  %v434_v8 = vpop.f32.mrf.mxu1  ;;  %v10934_v62 = vld [vmem:[%s10508_s16 + $0x1c] sm:$0xff]  }
  0xba   : > { %v435_v11 = vadd.f32 %v434_v8, %v347_v6  ;;  %v10948_v7 = vld [vmem:[%s10508_s16 + $0x18] sm:$0xff]  ;;  %v1796_v6 = vshll.u32 %v10934_v62, 16 }
  0xbb   : > { %v10890_v13 = vadd.f32 %v694_v24, %v571_v61  ;;  %837 = vmatmul.bf16.gmra.mxu0 %v754_v41  ;;  %v9927_v41 = vld [vmem:[%s13141_s1 + $0x3b0] sm:$0xff]  ;;  %v9926_v24 = vld [vmem:[%s13141_s1 + $0x3a8] sm:$0xff]  ;;  %v1793_v61 = vshrl.u32 %v10934_v62, 16  ;;  %v1354_v16 = vshll.u32 %v10948_v7, 16 }
  0xbc   : > { %994 = vmatmul.bf16.gmra.mxu1 %v911_v42  ;;  %v1344_v42 = vor.u32 %v1343_v25, %v1339_v29  ;;  %2260 = vmatpush.bf16.msrb.mxu2 %v9927_v41  ;;  %v1798_v20 = vrot.slane %v1796_v6, 3 }
  0xbd   : > { %1155 = vmatmul.bf16.gmra.mxu2 %v1072_v43  ;;  %v1348_v43 = vrot.slane %v1346_v33, 1  ;;  %v1795_v19 = vrot.slane %v1793_v61, 2  ;;  %v1356_v25 = vrot.slane %v1354_v16, 1  ;;  %v1654_v16 = vrot.slane %v10993_v44, 2 }
  0xbe   : > { %1272 = vmatmul.bf16.gmra.mxu3 %v1190_v9 }
  0xbf   : > { %v1349_v56 = vsel %vm240_vm0, %v1344_v42, %v1348_v43  ;;  %v1352_v29 = vor.u32 %v1350_v17, %v1348_v43  ;;  %v1498_v17 = vrot.slane %v10998_v15, 1 }
  0xc0   : > { %v551_v27 = vpop.f32.mrf.mxu2  ;;  %v349_v31 = vpop.f32.mrf.mxu0  ;;  %2261 = vmatpush.bf16.msrb.mxu2 %v9926_v24  ;;  %v1753_v24 = vld [vmem:[%s10508_s16 + $0x30] sm:$0x7] }
  0xc1   : > { %v697_v28 = vpop.f32.mrf.mxu3  ;;  %v572_v30 = vadd.f32 %v551_v27, %v435_v11  ;;  %v436_v32 = vpop.f32.mrf.mxu1  ;;  %v9936_v27 = vld [vmem:[%s13141_s1 + $0x3e0] sm:$0xff]  ;;  %v1357_v39 = vsel %vm240_vm0, %v1352_v29, %v1356_v25 }
  0xc2   : > { %v437_v36 = vadd.f32 %v436_v32, %v349_v31  ;;  %2418 = vmatpush.bf16.msrb.mxu3 %v9936_v27  ;;  %v1652_v31 = vrot.slane %v10934_v62, 2  ;;  %v10974_v32 = vor.u32 %v1798_v20, %v1795_v19  ;;  %v11037_v19 = vunpack.c.h.b16 %v11020_v4 }
  0xc3   : > { %v10915_v40 = vadd.f32 %v697_v28, %v572_v30  ;;  %v9908_v28 = vld [vmem:[%s13141_s1 + $0x318] sm:$0xff]  ;;  %v1496_v30 = vrot.slane %v10948_v7, 1  ;;  %v1772_v20 = vunpack.c.l.b16 %v1753_v24  ;;  %v9933_v24 = vld [vmem:[%s13141_s1 + $0x3c8] sm:$0xff] }
  0xc4   : > { %2001 = vmatpush.bf16.msrb.mxu0 %v9908_v28  ;;  %v1653_v42 = vsel %vm746_vm3, %v1650_v47, %v1652_v31  ;;  %v1800_v43 = vsel %vm1774_vm6, %v1790_v48, %v10974_v32  ;;  %2262 = vmatpush.bf16.msrb.mxu2 %v9925_v35  ;;  %v9935_v47 = vld [vmem:[%s13141_s1 + $0x3d8] sm:$0xff]  ;;  %v1802_v48 = vshrl.u32 %v10993_v44, 16 }
  0xc5   : > { %v1497_v51 = vsel %vm474_vm1, %v1494_v45, %v1496_v30  ;;  %v9917_v45 = vld [vmem:[%s13141_s1 + $0x360] sm:$0xff] }
  0xc6   : > { %2145 = vmatpush.bf16.msrb.mxu1 %v9917_v45  ;;  %2419 = vmatpush.bf16.msrb.mxu3 %v9935_v47 }
  0xc8   : > { %v553_v49 = vpop.f32.mrf.mxu2  ;;  %v352_v54 = vpop.f32.mrf.mxu0  ;;  %2002 = vmatpush.bf16.msrb.mxu0 %v9907_v50 }
  0xc9   : > { %v699_v52 = vpop.f32.mrf.mxu3  ;;  %v573_v53 = vadd.f32 %v553_v49, %v437_v36  ;;  %v439_v55 = vpop.f32.mrf.mxu1  ;;  %v1805_v49 = vshll.u32 %v10993_v44, 16 }
  0xca   : > { %v440_v58 = vadd.f32 %v439_v55, %v352_v54 }
  0xcb   : > { %v10936_v63 = vadd.f32 %v699_v52, %v573_v53  ;;  %1438 = vmatmul.bf16.vlgmr.msra.gmra.mxu0 %v1349_v56  ;;  %v1807_v1 = vrot.slane %v1805_v49, 3 }
  0xcc   : > { %1563 = vmatmul.bf16.vlgmr.msra.gmra.mxu1 %v1495_v57  ;;  %v1358_v57 = vshrl.u32 %v10948_v7, 16  ;;  %v1606_v7 = vld [vmem:[%s10508_s16 + $0x30] sm:$0x3] }
  0xcd   : > { %1719 = vmatmul.bf16.vlgmr.msra.gmra.mxu2 %v1651_v59 }
  0xce   : > { %1880 = vmatmul.bf16.vlgmr.msra.gmra.mxu3 %v1791_v60  ;;  %v1804_v60 = vrot.slane %v1802_v48, 2 }
  0xd0   : > { %v556_v8 = vpop.f32.mrf.mxu2  ;;  %v354_v11 = vpop.f32.mrf.mxu0 }
  0xd1   : > { %v702_v9 = vpop.f32.mrf.mxu3  ;;  %v574_v10 = vadd.f32 %v556_v8, %v440_v58  ;;  %v441_v14 = vpop.f32.mrf.mxu1  ;;  %v1362_v58 = vshll.u32 %v10998_v15, 16  ;;  %v9924_v8 = vld [vmem:[%s13141_s1 + $0x398] sm:$0xff] }
  0xd2   : > { %v442_v18 = vadd.f32 %v441_v14, %v354_v11  ;;  %v1360_v11 = vor.u32 %v1358_v57, %v1356_v25  ;;  %2263 = vmatpush.bf16.msrb.mxu2 %v9924_v8  ;;  %v9905_v8 = vld [vmem:[%s13141_s1 + $0x300] sm:$0xff] }
  0xd3   : > { %v10961_v23 = vadd.f32 %v702_v9, %v574_v10  ;;  %v9916_v9 = vld [vmem:[%s13141_s1 + $0x358] sm:$0xff]  ;;  %v9934_v10 = vld [vmem:[%s13141_s1 + $0x3d0] sm:$0xff]  ;;  %v1364_v14 = vrot.slane %v1362_v58, 1 }
  0xd4   : > { %2146 = vmatpush.bf16.msrb.mxu1 %v9916_v9  ;;  %2420 = vmatpush.bf16.msrb.mxu3 %v9934_v10  ;;  %v9922_v9 = vld [vmem:[%s13141_s1 + $0x388] sm:$0xff] }
  0xd8   : > { %v558_v33 = vpop.f32.mrf.mxu2  ;;  %v357_v37 = vpop.f32.mrf.mxu0  ;;  %2421 = vmatpush.bf16.msrb.mxu3 %v9933_v24 }
  0xd9   : > { %v704_v34 = vpop.f32.mrf.mxu3  ;;  %v575_v36 = vadd.f32 %v558_v33, %v442_v18  ;;  %v444_v38 = vpop.f32.mrf.mxu1  ;;  %v11034_v18 = vor.u32 %v1807_v1, %v1804_v60  ;;  %v1365_v33 = vsel %vm240_vm0, %v1360_v11, %v1364_v14  ;;  %v9915_v60 = vld [vmem:[%s13141_s1 + $0x350] sm:$0xff] }
  0xda   : > { %v445_v41 = vadd.f32 %v444_v38, %v357_v37  ;;  %v7709_v38 = vld [vmem:[%s10508_s16 + $0x28] sm:$0xf]  ;;  %2147 = vmatpush.bf16.msrb.mxu1 %v9915_v60 }
  0xdb   : > { %v10995_v46 = vadd.f32 %v704_v34, %v575_v36  ;;  %1443 = vmatmul.bf16.gmra.mxu0 %v1357_v39  ;;  %v1499_v34 = vsel %vm474_vm1, %v1496_v30, %v1498_v17  ;;  %v1655_v36 = vsel %vm746_vm3, %v1652_v31, %v1654_v16  ;;  %v1809_v37 = vsel %vm1774_vm6, %v10974_v32, %v11034_v18  ;;  %v9872_v39 = vld [vmem:[%s10508_s16 + $0x28] sm:$0x10]  ;;  %v9923_v32 = vld [vmem:[%s13141_s1 + $0x390] sm:$0xff] }
  0xdc   : > { %1568 = vmatmul.bf16.gmra.mxu1 %v1497_v51  ;;  %v11056_v51 = vpack.c.b16 %v1772_v20, %v11037_v19  ;;  %v9906_v30 = vld [vmem:[%s13141_s1 + $0x308] sm:$0xff]  ;;  %v11064_v31 = vor.u32 %v9872_v39, %v7709_v38  ;;  %2264 = vmatpush.bf16.msrb.mxu2 %v9923_v32 }
  0xdd   : > { %1724 = vmatmul.bf16.gmra.mxu2 %v1653_v42  ;;  %v1643_v42 = vunpack.c.l.b16 %v1606_v7  ;;  %2003 = vmatpush.bf16.msrb.mxu0 %v9906_v30  ;;  %v9913_v30 = vld [vmem:[%s13141_s1 + $0x340] sm:$0xff] }
  0xde   : > { %1885 = vmatmul.bf16.gmra.mxu3 %v1800_v43  ;;  %v1811_v43 = vshrl.u32 %v11056_v51, 16  ;;  %v1814_v45 = vshll.u32 %v11056_v51, 16  ;;  %v1500_v20 = vrot.slane %v11064_v31, 1 }
  0xdf   : > { %v11074_v57 = vpack.c.b16 %v1643_v42, %v11037_v19 }
  0xe0   : > { %v561_v52 = vpop.f32.mrf.mxu2  ;;  %v359_v55 = vpop.f32.mrf.mxu0  ;;  %v1813_v58 = vrot.slane %v1811_v43, 2  ;;  %2265 = vmatpush.bf16.msrb.mxu2 %v9922_v9  ;;  %v1914_v43 = vld [vmem:[%s10508_s16 + $0xc] sm:$0x8]  ;;  %v2301_v9 = vld [vmem:[%s10508_s16 + $0x14] sm:$0xe] }
  0xe1   : > { %v707_v53 = vpop.f32.mrf.mxu3  ;;  %v576_v54 = vadd.f32 %v561_v52, %v445_v41  ;;  %v446_v56 = vpop.f32.mrf.mxu1  ;;  %2004 = vmatpush.bf16.msrb.mxu0 %v9905_v8 }
  0xe2   : > { %v447_v59 = vadd.f32 %v446_v56, %v359_v55  ;;  %v1366_v55 = vshrl.u32 %v10998_v15, 16  ;;  %v1370_v56 = vshll.u32 %v11064_v31, 16 }
  0xe3   : > { %v11017_v2 = vadd.f32 %v707_v53, %v576_v54 }
  0xe4   : > { %v1368_v10 = vor.u32 %v1366_v55, %v1364_v14  ;;  %v1372_v11 = vrot.slane %v1370_v56, 1  ;;  %v9921_v14 = vld [vmem:[%s13141_s1 + $0x380] sm:$0xff]  ;;  %v9946_v55 = vld [vmem:[%s13141_s1 + $0x430] sm:$0xff] }
  0xe5   : > { %2266 = vmatpush.bf16.msrb.mxu2 %v9921_v14  ;;  %v2338_v14 = vunpack.c.l.b16 %v2301_v9 }
  0xe8   : > { %v563_v26 = vpop.f32.mrf.mxu2  ;;  %v362_v29 = vpop.f32.mrf.mxu0 }
  0xe9   : > { %v709_v27 = vpop.f32.mrf.mxu3  ;;  %v577_v28 = vadd.f32 %v563_v26, %v447_v59  ;;  %v449_v25 = vpop.f32.mrf.mxu1  ;;  %v1816_v59 = vrot.slane %v1814_v45, 3  ;;  %v1656_v26 = vrot.slane %v11074_v57, 2 }
  0xea   : > { %v450_v35 = vadd.f32 %v449_v25, %v362_v29 }
  0xeb   : > { %v11058_v41 = vadd.f32 %v709_v27, %v577_v28  ;;  %1448 = vmatmul.bf16.gmra.mxu0 %v1365_v33  ;;  %v1817_v27 = vor.u32 %v1816_v59, %v1813_v58  ;;  %v9914_v28 = vld [vmem:[%s13141_s1 + $0x348] sm:$0xff]  ;;  %v9932_v33 = vld [vmem:[%s13141_s1 + $0x3c0] sm:$0xff]  ;;  %v1657_v39 = vsel %vm746_vm3, %v1654_v16, %v1656_v26 }
  0xec   : > { %1573 = vmatmul.bf16.gmra.mxu1 %v1499_v34  ;;  %2422 = vmatpush.bf16.msrb.mxu3 %v9932_v33 }
  0xed   : > { %1729 = vmatmul.bf16.gmra.mxu2 %v1655_v36  ;;  %2148 = vmatpush.bf16.msrb.mxu1 %v9914_v28  ;;  %v1373_v36 = vsel %vm240_vm0, %v1368_v10, %v1372_v11  ;;  %v1818_v7 = vsel %vm1774_vm6, %v11034_v18, %v1817_v27  ;;  %v2302_v10 = vld [vmem:[%s10508_s16 + $0x18] sm:$0xf] }
  0xee   : > { %1890 = vmatmul.bf16.gmra.mxu3 %v1809_v37  ;;  %v1501_v37 = vsel %vm474_vm1, %v1498_v17, %v1500_v20  ;;  %v9963_v28 = vld [vmem:[%s13141_s1 + $0x4b8] sm:$0xff]  ;;  %v11144_v33 = vunpack.c.l.b16 %v2302_v10 }
  0xef   : > { %2845 = vmatpush.bf16.msra.mxu2 %v9963_v28 }
  0xf0   : > { %v566_v47 = vpop.f32.mrf.mxu2  ;;  %v364_v53 = vpop.f32.mrf.mxu0 }
  0xf1   : > { %v712_v50 = vpop.f32.mrf.mxu3  ;;  %v578_v52 = vadd.f32 %v566_v47, %v450_v35  ;;  %v451_v54 = vpop.f32.mrf.mxu1  ;;  %2149 = vmatpush.bf16.msrb.mxu1 %v9913_v30  ;;  %v1933_v53 = vunpack.c.l.b16 %v1914_v43  ;;  %v11152_v30 = vld [vmem:[%s10508_s16 + $0x1c] sm:$0xff] }
  0xf2   : > { %v9971_v54 = vld [vmem:[%s13141_s1 + $0x4f8] sm:$0xff]  ;;  %v2354_v43 = vrot.slane %v11152_v30, 1 }
  0xf3   : > { %v11079_v1 = vadd.f32 %v712_v50, %v578_v52  ;;  %v1374_v52 = vshrl.u32 %v11064_v31, 16  ;;  %2970 = vmatpush.bf16.msra.mxu3 %v9971_v54  ;;  %v1934_v58 = vpack.c.b16 %v10261_v3, %v1933_v53 }
  0xf5   : > { %v1376_v57 = vor.u32 %v1374_v52, %v1372_v11  ;;  %v2061_v11 = vshrl.u32 %v1934_v58, 16  ;;  %v2064_v3 = vshll.u32 %v1934_v58, 16 }
  0xf8   : > { %v568_v29 = vpop.f32.mrf.mxu2  ;;  %v818_v34 = vpop.f32.mrf.mxu0 }
  0xf9   : > { %v714_v25 = vpop.f32.mrf.mxu3  ;;  %v975_v35 = vpop.f32.mrf.mxu1  ;;  %v842_v38 = vadd.f32 %v818_v34, %v10874_v0  ;;  %v9947_v0 = vld [vmem:[%s13141_s1 + $0x438] sm:$0xff] }
  0xfa   : > { %2575 = vmatpush.bf16.msra.mxu0 %v9947_v0  ;;  %v9955_v25 = vld [vmem:[%s13141_s1 + $0x478] sm:$0xff] }
  0xfb   : > { %v999_v32 = vadd.f32 %v975_v35, %v842_v38  ;;  %1453 = vmatmul.bf16.gmra.mxu0 %v1373_v36  ;;  %2700 = vmatpush.bf16.msra.mxu1 %v9955_v25  ;;  %v2068_v38 = vrot.slane %v1784_v21, 3  ;;  %v9962_v21 = vld [vmem:[%s13141_s1 + $0x4b0] sm:$0xff]  ;;  %v11193_v25 = vld [vmem:[%s10508_s16 + $0x24] sm:$0xff] }
  0xfc   : > { %1578 = vmatmul.bf16.gmra.mxu1 %v1501_v37  ;;  %v2066_v37 = vrot.slane %v2064_v3, 4  ;;  %2846 = vmatpush.bf16.msra.mxu2 %v9962_v21 }
  0xfd   : > { %1734 = vmatmul.bf16.gmra.mxu2 %v1657_v39  ;;  %v2069_v39 = vrot.slane %v1787_v22, 4  ;;  %v1936_v22 = vrot.slane %v10888_v12, 3 }
  0xfe   : > { %1895 = vmatmul.bf16.gmra.mxu3 %v1818_v7  ;;  %2576 = vmatpush.bf16.msra.mxu0 %v9946_v55 }
 0x100   : > { %v1136_v15 = vpop.f32.mrf.mxu2  ;;  %v820_v18 = vpop.f32.mrf.mxu0 }
 0x101   : > { %v1253_v17 = vpop.f32.mrf.mxu3  ;;  %v1160_v16 = vadd.f32 %v1136_v15, %v999_v32  ;;  %v977_v42 = vpop.f32.mrf.mxu1  ;;  %v843_v45 = vadd.f32 %v820_v18, %v10890_v13  ;;  %v11155_v32 = vpack.c.b16 %v11144_v33, %v2338_v14  ;;  %v9945_v15 = vld [vmem:[%s13141_s1 + $0x428] sm:$0xff]  ;;  %v2070_v18 = vor.u32 %v2069_v39, %v2068_v38 }
 0x102   : > { %2577 = vmatpush.bf16.msra.mxu0 %v9945_v15  ;;  %v9953_v14 = vld [vmem:[%s13141_s1 + $0x468] sm:$0xff] }
 0x103   : > { %v11119_v47 = vadd.f32 %v1253_v17, %v1160_v16  ;;  %v1000_v50 = vadd.f32 %v977_v42, %v843_v45  ;;  %v1935_v16 = vrot.slane %v1934_v58, 3  ;;  %v2353_v42 = vrot.slane %v11155_v32, 1  ;;  %v9954_v58 = vld [vmem:[%s13141_s1 + $0x470] sm:$0xff] }
 0x104   : > { %2701 = vmatpush.bf16.msra.mxu1 %v9954_v58  ;;  %v9959_v58 = vld [vmem:[%s13141_s1 + $0x498] sm:$0xff] }
 0x105   : > { %v1937_v55 = vsel %vm903_vm4, %v1935_v16, %v1936_v22  ;;  %v2355_v12 = vsel %vm474_vm1, %v2353_v42, %v2354_v43 }
 0x108   : > { %v1138_v56 = vpop.f32.mrf.mxu2  ;;  %v823_v31 = vpop.f32.mrf.mxu0  ;;  %2702 = vmatpush.bf16.msra.mxu1 %v9953_v14  ;;  %v10318_v14 = vld [vmem:[%s10508_s16 + $0x20] sm:$0xff]  }
 0x109   : > { %v1255_v13 = vpop.f32.mrf.mxu3  ;;  %v1161_v59 = vadd.f32 %v1138_v56, %v1000_v50  ;;  %v980_v60 = vpop.f32.mrf.mxu1  ;;  %v844_v24 = vadd.f32 %v823_v31, %v10915_v40  ;;  %v9970_v40 = vld [vmem:[%s13141_s1 + $0x4f0] sm:$0xff]  ;;  %v9944_v31 = vld [vmem:[%s13141_s1 + $0x420] sm:$0xff] }
 0x10a   : > { %2971 = vmatpush.bf16.msra.mxu3 %v9970_v40  ;;  %2578 = vmatpush.bf16.msra.mxu0 %v9944_v31  ;;  %v9951_v31 = vld [vmem:[%s13141_s1 + $0x458] sm:$0xff] }
 0x10b   : > { %v11131_v8 = vadd.f32 %v1255_v13, %v1161_v59  ;;  %v1001_v29 = vadd.f32 %v980_v60, %v844_v24  ;;  %1458 = vmatmul.bf16.gmra.mxu0 %v1376_v57  ;;  %v9969_v59 = vld [vmem:[%s13141_s1 + $0x4e8] sm:$0xff] }
 0x10c   : > { %1583 = vmatmul.bf16.gmra.mxu1 %v1500_v20 }
 0x10d   : > { %1739 = vmatmul.bf16.gmra.mxu2 %v1656_v26  ;;  %v2063_v26 = vrot.slane %v2061_v11, 3  ;;  %v2072_v11 = vrot.slane %v1793_v61, 3  ;;  %v9943_v61 = vld [vmem:[%s13141_s1 + $0x418] sm:$0xff] }
 0x10e   : > { %1900 = vmatmul.bf16.gmra.mxu3 %v1817_v27  ;;  %2579 = vmatpush.bf16.msra.mxu0 %v9943_v61 }
 0x10f   : > { %2972 = vmatpush.bf16.msra.mxu3 %v9969_v59 }
 0x110   : > { %v1141_v20 = vpop.f32.mrf.mxu2  ;;  %v825_v35 = vpop.f32.mrf.mxu0 }
 0x111   : > { %v1258_v34 = vpop.f32.mrf.mxu3  ;;  %v1162_v27 = vadd.f32 %v1141_v20, %v1001_v29  ;;  %v982_v36 = vpop.f32.mrf.mxu1  ;;  %v845_v7 = vadd.f32 %v825_v35, %v10936_v63  ;;  %v2067_v63 = vor.u32 %v2066_v37, %v2063_v26  ;;  %v9968_v20 = vld [vmem:[%s13141_s1 + $0x4e0] sm:$0xff]  ;;  %v2356_v26 = vrot.slane %v11193_v25, 1 }
 0x113   : > { %v11157_v0 = vadd.f32 %v1258_v34, %v1162_v27  ;;  %v1002_v17 = vadd.f32 %v982_v36, %v845_v7  ;;  %v2071_v56 = vsel %vm1029_vm5, %v2067_v63, %v2070_v18  ;;  %2973 = vmatpush.bf16.msra.mxu3 %v9968_v20  ;;  %v9960_v36 = vld [vmem:[%s13141_s1 + $0x4a0] sm:$0xff]  ;;  %v2357_v21 = vsel %vm474_vm1, %v2354_v43, %v2356_v26 }
 0x118   : > { %v1143_v45 = vpop.f32.mrf.mxu2  ;;  %v828_v53 = vpop.f32.mrf.mxu0 }
 0x119   : > { %v1260_v50 = vpop.f32.mrf.mxu3  ;;  %v1163_v52 = vadd.f32 %v1143_v45, %v1002_v17  ;;  %v985_v54 = vpop.f32.mrf.mxu1  ;;  %v846_v13 = vadd.f32 %v828_v53, %v10961_v23  ;;  %v9961_v23 = vld [vmem:[%s13141_s1 + $0x4a8] sm:$0xff]  ;;  %v10317_v17 = vld [vmem:[%s10508_s16 + $0x18] sm:$0xff]   ;;  %v2076_v53 = vrot.slane %v1802_v48, 3  ;;  %v9966_v48 = vld [vmem:[%s13141_s1 + $0x4d0] sm:$0xff] }
 0x11a   : > { %2847 = vmatpush.bf16.msra.mxu2 %v9961_v23 }
 0x11b   : > { %v11172_v57 = vadd.f32 %v1260_v50, %v1163_v52  ;;  %v1003_v60 = vadd.f32 %v985_v54, %v846_v13  ;;  %2005 = vmatmul.bf16.vlgmr.msrb.gmra.mxu0 %v1937_v55  ;;  %v2077_v54 = vrot.slane %v1805_v49, 4  ;;  %v2309_v13 = vld [vmem:[%s10508_s16 + $0x30] sm:$0xff]   ;;  %v1940_v49 = vrot.slane %v10993_v44, 3 }
 0x11c   : > { %2150 = vmatmul.bf16.vlgmr.msrb.gmra.mxu1 %v2071_v56  ;;  %v11233_v56 = vld [vmem:[%s10508_s16 + $0x2c] sm:$0xff] }
 0x11d   : > { %2267 = vmatmul.bf16.vlgmr.msrb.gmra.mxu2 %v10798_v5  ;;  %v2073_v5 = vrot.slane %v1796_v6, 4  ;;  %v1938_v6 = vrot.slane %v10934_v62, 3  ;;  %v2358_v23 = vrot.slane %v11233_v56, 1 }
 0x11e   : > { %2423 = vmatmul.bf16.vlgmr.msrb.gmra.mxu3 %v2355_v12  ;;  %2848 = vmatpush.bf16.msra.mxu2 %v9960_v36 }
 0x11f   : > { %v1939_v7 = vsel %vm903_vm4, %v1936_v22, %v1938_v6  ;;  %v9952_v22 = vld [vmem:[%s13141_s1 + $0x460] sm:$0xff]  ;;  %v2359_v20 = vsel %vm474_vm1, %v2356_v26, %v2358_v23 }
 0x120   : > { %v1146_v24 = vpop.f32.mrf.mxu2  ;;  %v830_v28 = vpop.f32.mrf.mxu0  ;;  %2703 = vmatpush.bf16.msra.mxu1 %v9952_v22  ;;  %v9965_v22 = vld [vmem:[%s13141_s1 + $0x4c8] sm:$0xff] }
 0x121   : > { %v1263_v9 = vpop.f32.mrf.mxu3  ;;  %v1164_v10 = vadd.f32 %v1146_v24, %v1003_v60  ;;  %v987_v29 = vpop.f32.mrf.mxu1  ;;  %v847_v3 = vadd.f32 %v830_v28, %v10995_v46  ;;  %v2074_v46 = vor.u32 %v2073_v5, %v2072_v11  ;;  %v11248_v60 = vunpack.c.l.b16 %v2309_v13 }
 0x122   : > { %2849 = vmatpush.bf16.msra.mxu2 %v9959_v58  ;;  %v1941_v11 = vsel %vm903_vm4, %v1938_v6, %v1940_v49 }
 0x123   : > { %v11195_v40 = vadd.f32 %v1263_v9, %v1164_v10  ;;  %v1004_v34 = vadd.f32 %v987_v29, %v847_v3  ;;  %v2075_v15 = vsel %vm1029_vm5, %v2070_v18, %v2074_v46  ;;  %v9942_v18 = vld [vmem:[%s13141_s1 + $0x410] sm:$0xff]  ;;  %v2059_v44 = vpack.c.b16 %v11248_v60, %v11037_v19 }
 0x124   : > { %2580 = vmatpush.bf16.msra.mxu0 %v9942_v18  ;;  %2704 = vmatpush.bf16.msra.mxu1 %v9951_v31  ;;  %v9958_v19 = vld [vmem:[%s13141_s1 + $0x490] sm:$0xff]  ;;  %v9957_v18 = vld [vmem:[%s13141_s1 + $0x488] sm:$0xff] }
 0x125   : > { %v2081_v6 = vshrl.u32 %v2059_v44, 16 }
 0x126   : > { %2850 = vmatpush.bf16.msra.mxu2 %v9958_v19 }
 0x128   : > { %v1148_v27 = vpop.f32.mrf.mxu2  ;;  %v833_v38 = vpop.f32.mrf.mxu0 }
 0x129   : > { %v1265_v35 = vpop.f32.mrf.mxu3  ;;  %v1165_v37 = vadd.f32 %v1148_v27, %v1004_v34  ;;  %v990_v39 = vpop.f32.mrf.mxu1  ;;  %v848_v62 = vadd.f32 %v833_v38, %v11017_v2  ;;  %v9967_v2 = vld [vmem:[%s13141_s1 + $0x4d8] sm:$0xff]  ;;  %v9941_v27 = vld [vmem:[%s13141_s1 + $0x408] sm:$0xff] }
 0x12a   : > { %2974 = vmatpush.bf16.msra.mxu3 %v9967_v2  ;;  %v2310_v34 = vld [vmem:[%s10508_s16 + $0x38] sm:$0x1]  ;;  %2581 = vmatpush.bf16.msra.mxu0 %v9941_v27  ;;  %v9940_v2 = vld [vmem:[%s13141_s1 + $0x400] sm:$0xff] }
 0x12b   : > { %v11216_v16 = vadd.f32 %v1265_v35, %v1165_v37  ;;  %v1005_v63 = vadd.f32 %v990_v39, %v848_v62  ;;  %2010 = vmatmul.bf16.gmra.mxu0 %v1939_v7  ;;  %v2347_v26 = vunpack.c.l.b16 %v2310_v34  ;;  %2851 = vmatpush.bf16.msra.mxu2 %v9957_v18 }
 0x12c   : > { %2155 = vmatmul.bf16.gmra.mxu1 %v2075_v15  ;;  %v2083_v15 = vrot.slane %v2081_v6, 3  ;;  %v2205_v6 = vpack.c.b16 %v11248_v60, %v11248_v60  ;;  %v2487_v60 = vshrl.u32 %v11152_v30, 16 }
 0x12d   : > { %2272 = vmatmul.bf16.gmra.mxu2 %v10317_v17 }
 0x12e   : > { %2428 = vmatmul.bf16.gmra.mxu3 %v2357_v21  ;;  %v9950_v21 = vld [vmem:[%s13141_s1 + $0x450] sm:$0xff]  ;;  %2582 = vmatpush.bf16.msra.mxu0 %v9940_v2 }
 0x12f   : > { %2975 = vmatpush.bf16.msra.mxu3 %v9966_v48  ;;  %2705 = vmatpush.bf16.msra.mxu1 %v9950_v21  ;;  %v10009_v21 = vld [vmem:[%s13141_s1 + $0x5f0] sm:$0xff] }
 0x130   : > { %v1151_v42 = vpop.f32.mrf.mxu2  ;;  %v835_v50 = vpop.f32.mrf.mxu0 }
 0x131   : > { %v1268_v43 = vpop.f32.mrf.mxu3  ;;  %v1166_v45 = vadd.f32 %v1151_v42, %v1005_v63  ;;  %v992_v52 = vpop.f32.mrf.mxu1  ;;  %v849_v55 = vadd.f32 %v835_v50, %v11058_v41  ;;  %v2078_v41 = vor.u32 %v2077_v54, %v2076_v53  ;;  %v1942_v42 = vrot.slane %v11056_v51, 3  ;;  %v9949_v50 = vld [vmem:[%s13141_s1 + $0x448] sm:$0xff]  ;;  %v9956_v54 = vld [vmem:[%s13141_s1 + $0x480] sm:$0xff] }
 0x132   : > { %v9964_v51 = vld [vmem:[%s13141_s1 + $0x4c0] sm:$0xff]  ;;  %2852 = vmatpush.bf16.msra.mxu2 %v9956_v54 }
 0x133   : > { %v11236_v12 = vadd.f32 %v1268_v43, %v1166_v45  ;;  %v1006_v59 = vadd.f32 %v992_v52, %v849_v55  ;;  %v2079_v5 = vsel %vm1029_vm5, %v2074_v46, %v2078_v41  ;;  %v2084_v46 = vshll.u32 %v2059_v44, 16  ;;  %2976 = vmatpush.bf16.msra.mxu3 %v9965_v22  ;;  %2706 = vmatpush.bf16.msra.mxu1 %v9949_v50 }
 0x134   : > { %v1943_v58 = vsel %vm903_vm4, %v1940_v49, %v1942_v42  ;;  %v9983_v49 = vld [vmem:[%s13141_s1 + $0x538] sm:$0xff] }
 0x135   : > { %v2086_v62 = vrot.slane %v2084_v46, 4  ;;  %3114 = vmatpush.bf16.msrb.mxu0 %v9983_v49 }
 0x137   : > { %v2087_v43 = vor.u32 %v2086_v62, %v2083_v15  ;;  %2977 = vmatpush.bf16.msra.mxu3 %v9964_v51 }
 0x138   : > { %v1153_v24 = vpop.f32.mrf.mxu2  ;;  %v838_v28 = vpop.f32.mrf.mxu0 }
 0x139   : > { %v1270_v9 = vpop.f32.mrf.mxu3  ;;  %v1167_v10 = vadd.f32 %v1153_v24, %v1006_v59  ;;  %v995_v29 = vpop.f32.mrf.mxu1  ;;  %v850_v3 = vadd.f32 %v838_v28, %v11079_v1  ;;  %v11267_v1 = vunpack.c.h.b16 %v2309_v13  ;;  %v2088_v59 = vsel %vm1029_vm5, %v2078_v41, %v2087_v43  ;;  %v9948_v24 = vld [vmem:[%s13141_s1 + $0x440] sm:$0xff] }
 0x13a   : > { %2707 = vmatpush.bf16.msra.mxu1 %v9948_v24 }
 0x13b   : > { %v11258_v61 = vadd.f32 %v1270_v9, %v1167_v10  ;;  %v1007_v35 = vadd.f32 %v995_v29, %v850_v3  ;;  %2015 = vmatmul.bf16.gmra.mxu0 %v1941_v11  ;;  %v11270_v17 = vpack.c.b16 %v2347_v26, %v11267_v1  ;;  %v2617_v11 = vld [vmem:[%s10508_s16 + $0x14] sm:$0xc] }
 0x13c   : > { %2160 = vmatmul.bf16.gmra.mxu1 %v2079_v5  ;;  %v9982_v3 = vld [vmem:[%s13141_s1 + $0x530] sm:$0xff] }
 0x13d   : > { %2277 = vmatmul.bf16.gmra.mxu2 %v10318_v14  ;;  %v2360_v45 = vrot.slane %v11270_v17, 1  ;;  %v2636_v14 = vunpack.c.l.b16 %v2617_v11  ;;  %3115 = vmatpush.bf16.msrb.mxu0 %v9982_v3  ;;  %v9994_v17 = vld [vmem:[%s13141_s1 + $0x578] sm:$0xff] }
 0x13e   : > { %2433 = vmatmul.bf16.gmra.mxu3 %v2359_v20  ;;  %3300 = vmatpush.bf16.msrb.mxu1 %v9994_v17 }
 0x13f   : > { %v2361_v48 = vsel %vm474_vm1, %v2358_v23, %v2360_v45  ;;  %v2637_v46 = vpack.c.b16 %v11144_v33, %v2636_v14 }
 0x140   : > { %v1156_v36 = vpop.f32.mrf.mxu2  ;;  %v840_v39 = vpop.f32.mrf.mxu0 }
 0x141   : > { %v1273_v37 = vpop.f32.mrf.mxu3  ;;  %v1168_v38 = vadd.f32 %v1156_v36, %v1007_v35  ;;  %v997_v7 = vpop.f32.mrf.mxu1  ;;  %v2887_v36 = vld [vmem:[%s10508_s16 + $0x14] sm:$0x8]  ;;  %v2479_v39 = vshrl.u32 %v11155_v32, 16  ;;  %v2764_v15 = vshrl.u32 %v2637_v46, 16  ;;  %v2767_v62 = vshll.u32 %v2637_v46, 16 }
 0x142   : > { %v2482_v7 = vshll.u32 %v11155_v32, 16  ;;  %v2906_v22 = vunpack.c.l.b16 %v2887_v36 }
 0x143   : > { %v11275_v63 = vadd.f32 %v1273_v37, %v1168_v38  ;;  %v10002_v37 = vld [vmem:[%s13141_s1 + $0x5b8] sm:$0xff]  ;;  %v2481_v18 = vrot.slane %v2479_v39, 1  ;;  %v2766_v54 = vrot.slane %v2764_v15, 2  ;;  %v2769_v51 = vrot.slane %v2767_v62, 3 }
 0x144   : > { %3425 = vmatpush.bf16.msrb.mxu2 %v10002_v37  ;;  %v2499_v37 = vshll.u32 %v11193_v25, 16 }
 0x146   : > { %v2501_v17 = vrot.slane %v2499_v37, 2 }
 0x148   : > { %v1158_v52 = vpop.f32.mrf.mxu2  ;;  %v1439_v55 = vpop.f32.mrf.mxu0 }
 0x149   : > { %v1275_v53 = vpop.f32.mrf.mxu3  ;;  %v1564_v13 = vpop.f32.mrf.mxu1  ;;  %v1463_v31 = vadd.f32 %v1439_v55, %v11119_v47 }
 0x14b   : > { %v1588_v9 = vadd.f32 %v1564_v13, %v1463_v31  ;;  %2020 = vmatmul.bf16.gmra.mxu0 %v1943_v58  ;;  %v2771_v13 = vrot.slane %v2487_v60, 2 }
 0x14c   : > { %2165 = vmatmul.bf16.gmra.mxu1 %v2088_v59  ;;  %v2907_v59 = vpack.c.b16 %v11144_v33, %v2906_v22 }
 0x14d   : > { %2282 = vmatmul.bf16.gmra.mxu2 %v11020_v4  ;;  %v10010_v4 = vld [vmem:[%s13141_s1 + $0x5f8] sm:$0xff] }
 0x14e   : > { %2438 = vmatmul.bf16.gmra.mxu3 %v2361_v48  ;;  %v9981_v48 = vld [vmem:[%s13141_s1 + $0x528] sm:$0xff] }
 0x14f   : > { %3570 = vmatpush.bf16.msrb.mxu3 %v10010_v4  ;;  %3116 = vmatpush.bf16.msrb.mxu0 %v9981_v48 }
 0x150   : > { %v1720_v47 = vpop.f32.mrf.mxu2  ;;  %v1441_v10 = vpop.f32.mrf.mxu0 }
 0x151   : > { %v1881_v41 = vpop.f32.mrf.mxu3  ;;  %v1744_v23 = vadd.f32 %v1720_v47, %v1588_v9  ;;  %v1566_v28 = vpop.f32.mrf.mxu1  ;;  %v1464_v29 = vadd.f32 %v1441_v10, %v11131_v8  ;;  %v10001_v9 = vld [vmem:[%s13141_s1 + $0x5b0] sm:$0xff]  ;;  %v2908_v10 = vrot.slane %v2907_v59, 3 }
 0x152   : > { %3426 = vmatpush.bf16.msrb.mxu2 %v10001_v9 }
 0x153   : > { %v11310_v5 = vadd.f32 %v1881_v41, %v1744_v23  ;;  %v1589_v44 = vadd.f32 %v1566_v28, %v1464_v29  ;;  %3571 = vmatpush.bf16.msrb.mxu3 %v10009_v21  ;;  %v2638_v41 = vrot.slane %v2637_v46, 2  ;;  %v2770_v23 = vor.u32 %v2769_v51, %v2766_v54  ;;  %v10008_v46 = vld [vmem:[%s13141_s1 + $0x5e8] sm:$0xff] }
 0x154   : > { %v2909_v28 = vrot.slane %v11152_v30, 3 }
 0x157   : > { %3572 = vmatpush.bf16.msrb.mxu3 %v10008_v46  ;;  %v2742_v46 = vld [vmem:[%s10508_s16 + $0x38] sm:$0x7] }
 0x158   : > { %v1722_v20 = vpop.f32.mrf.mxu2  ;;  %v1444_v8 = vpop.f32.mrf.mxu0 }
 0x159   : > { %v1883_v34 = vpop.f32.mrf.mxu3  ;;  %v1745_v27 = vadd.f32 %v1722_v20, %v1589_v44  ;;  %v1569_v35 = vpop.f32.mrf.mxu1  ;;  %v1465_v19 = vadd.f32 %v1444_v8, %v11157_v0  ;;  %v2490_v0 = vshll.u32 %v11152_v30, 16  ;;  %v2910_v8 = vsel %vm903_vm4, %v2908_v10, %v2909_v28 }
 0x15b   : > { %v11322_v26 = vadd.f32 %v1883_v34, %v1745_v27  ;;  %v1590_v38 = vadd.f32 %v1569_v35, %v1465_v19  ;;  %2025 = vmatmul.bf16.gmra.mxu0 %v1942_v42  ;;  %v2484_v42 = vrot.slane %v2482_v7, 2  ;;  %v2492_v53 = vrot.slane %v2490_v0, 2  ;;  %v9980_v19 = vld [vmem:[%s13141_s1 + $0x520] sm:$0xff] }
 0x15c   : > { %2170 = vmatmul.bf16.gmra.mxu1 %v2087_v43  ;;  %v2489_v43 = vrot.slane %v2487_v60, 1  ;;  %v2772_v58 = vrot.slane %v2490_v0, 3  ;;  %3117 = vmatpush.bf16.msrb.mxu0 %v9980_v19  ;;  %v9998_v19 = vld [vmem:[%s13141_s1 + $0x598] sm:$0xff] }
 0x15d   : > { %2287 = vmatmul.bf16.gmra.mxu2 %v2205_v6  ;;  %v2485_v49 = vor.u32 %v2484_v42, %v2481_v18  ;;  %v9993_v6 = vld [vmem:[%s13141_s1 + $0x570] sm:$0xff]  ;;  %v9992_v18 = vld [vmem:[%s13141_s1 + $0x568] sm:$0xff]  ;;  %v10007_v42 = vld [vmem:[%s13141_s1 + $0x5e0] sm:$0xff] }
 0x15e   : > { %2443 = vmatmul.bf16.gmra.mxu3 %v2360_v45  ;;  %v11348_v47 = vor.u32 %v2492_v53, %v2489_v43  ;;  %v2773_v33 = vor.u32 %v2772_v58, %v2771_v13  ;;  %3301 = vmatpush.bf16.msrb.mxu1 %v9993_v6  ;;  %v9979_v43 = vld [vmem:[%s13141_s1 + $0x518] sm:$0xff]  ;;  %v2911_v53 = vrot.slane %v11193_v25, 3 }
 0x15f   : > { %3573 = vmatpush.bf16.msrb.mxu3 %v10007_v42 }
 0x160   : > { %v1725_v32 = vpop.f32.mrf.mxu2  ;;  %v1446_v50 = vpop.f32.mrf.mxu0  ;;  %v2494_v14 = vsel %vm600_vm2, %v2485_v49, %v11348_v47  ;;  %v2774_v27 = vsel %vm1774_vm6, %v2770_v23, %v2773_v33  ;;  %3118 = vmatpush.bf16.msrb.mxu0 %v9979_v43 }
 0x161   : > { %v1886_v2 = vpop.f32.mrf.mxu3  ;;  %v1746_v45 = vadd.f32 %v1725_v32, %v1590_v38  ;;  %v1571_v52 = vpop.f32.mrf.mxu1  ;;  %v1466_v55 = vadd.f32 %v1446_v50, %v11172_v57  ;;  %v2639_v57 = vrot.slane %v11152_v30, 2  ;;  %v10000_v38 = vld [vmem:[%s13141_s1 + $0x5a8] sm:$0xff]  ;;  %v2776_v32 = vrot.slane %v2499_v37, 3  ;;  %v10005_v37 = vld [vmem:[%s13141_s1 + $0x5d0] sm:$0xff] }
 0x162   : > { %3427 = vmatpush.bf16.msrb.mxu2 %v10000_v38  ;;  %3302 = vmatpush.bf16.msrb.mxu1 %v9992_v18  ;;  %v2505_v30 = vshrl.u32 %v11233_v56, 16  ;;  %v2643_v38 = vrot.slane %v11233_v56, 2 }
 0x163   : > { %v11340_v31 = vadd.f32 %v1886_v2, %v1746_v45  ;;  %v1591_v24 = vadd.f32 %v1571_v52, %v1466_v55  ;;  %v2640_v20 = vsel %vm746_vm3, %v2638_v41, %v2639_v57  ;;  %v9999_v55 = vld [vmem:[%s13141_s1 + $0x5a0] sm:$0xff]  ;;  %v2912_v41 = vsel %vm903_vm4, %v2909_v28, %v2911_v53 }
 0x166   : > { %3428 = vmatpush.bf16.msrb.mxu2 %v9999_v55 }
 0x168   : > { %v1727_v29 = vpop.f32.mrf.mxu2  ;;  %v1449_v4 = vpop.f32.mrf.mxu0 }
 0x169   : > { %v1888_v11 = vpop.f32.mrf.mxu3  ;;  %v1747_v44 = vadd.f32 %v1727_v29, %v1591_v24  ;;  %v1574_v3 = vpop.f32.mrf.mxu1  ;;  %v1467_v34 = vadd.f32 %v1449_v4, %v11195_v40  ;;  %v2496_v40 = vshrl.u32 %v11193_v25, 16 }
 0x16a   : > { %3429 = vmatpush.bf16.msrb.mxu2 %v9998_v19 }
 0x16b   : > { %v11360_v35 = vadd.f32 %v1888_v11, %v1747_v44  ;;  %v1592_v36 = vadd.f32 %v1574_v3, %v1467_v34  ;;  %2583 = vmatmul.bf16.vlgmr.msra.gmra.mxu0 %v2494_v14  ;;  %v2498_v62 = vrot.slane %v2496_v40, 1  ;;  %v2775_v22 = vrot.slane %v2496_v40, 2  ;;  %v9990_v40 = vld [vmem:[%s13141_s1 + $0x558] sm:$0xff] }
 0x16c   : > { %2708 = vmatmul.bf16.vlgmr.msra.gmra.mxu1 %v2640_v20  ;;  %v2507_v3 = vrot.slane %v2505_v30, 1  ;;  %v2779_v34 = vrot.slane %v2505_v30, 2  ;;  %v9989_v30 = vld [vmem:[%s13141_s1 + $0x550] sm:$0xff] }
 0x16d   : > { %2853 = vmatmul.bf16.vlgmr.msra.gmra.mxu2 %v2774_v27  ;;  %v11388_v50 = vor.u32 %v2501_v17, %v2498_v62  ;;  %v11391_v52 = vor.u32 %v2776_v32, %v2775_v22 }
 0x16e   : > { %2978 = vmatmul.bf16.vlgmr.msra.gmra.mxu3 %v2910_v8  ;;  %v2457_v8 = vld [vmem:[%s10508_s16 + $0x38] sm:$0x3] }
 0x16f   : > { %v2503_v48 = vsel %vm600_vm2, %v11348_v47, %v11388_v50  ;;  %v2778_v49 = vsel %vm1774_vm6, %v2773_v33, %v11391_v52  ;;  %v2508_v47 = vshll.u32 %v11233_v56, 16  ;;  %v9978_v33 = vld [vmem:[%s13141_s1 + $0x510] sm:$0xff] }
 0x170   : > { %v1730_v39 = vpop.f32.mrf.mxu2  ;;  %v1451_v0 = vpop.f32.mrf.mxu0  ;;  %3119 = vmatpush.bf16.msrb.mxu0 %v9978_v33  ;;  %v9996_v33 = vld [vmem:[%s13141_s1 + $0x588] sm:$0xff] }
 0x171   : > { %v1891_v7 = vpop.f32.mrf.mxu3  ;;  %v1748_v60 = vadd.f32 %v1730_v39, %v1592_v36  ;;  %v1576_v15 = vpop.f32.mrf.mxu1  ;;  %v1468_v21 = vadd.f32 %v1451_v0, %v11216_v16  ;;  %v2641_v16 = vrot.slane %v11193_v25, 2  ;;  %v2510_v14 = vrot.slane %v2508_v47, 2 }
 0x172   : > { %v2780_v27 = vrot.slane %v2508_v47, 3  ;;  %v2476_v39 = vunpack.c.l.b16 %v2457_v8  ;;  %v2761_v0 = vunpack.c.l.b16 %v2742_v46 }
 0x173   : > { %v11377_v2 = vadd.f32 %v1891_v7, %v1748_v60  ;;  %v1593_v45 = vadd.f32 %v1576_v15, %v1468_v21  ;;  %v2642_v24 = vsel %vm746_vm3, %v2639_v57, %v2641_v16  ;;  %v10006_v57 = vld [vmem:[%s13141_s1 + $0x5d8] sm:$0xff]  ;;  %v2913_v60 = vrot.slane %v11233_v56, 3 }
 0x174   : > { %3574 = vmatpush.bf16.msrb.mxu3 %v10006_v57  ;;  %v11441_v7 = vor.u32 %v2780_v27, %v2779_v34  ;;  %v2644_v18 = vsel %vm746_vm3, %v2641_v16, %v2643_v38  ;;  %v11453_v42 = vpack.c.b16 %v2476_v39, %v11267_v1  ;;  %v9977_v16 = vld [vmem:[%s13141_s1 + $0x508] sm:$0xff]  ;;  %v9976_v57 = vld [vmem:[%s13141_s1 + $0x500] sm:$0xff] }
 0x175   : > { %3120 = vmatpush.bf16.msrb.mxu0 %v9977_v16  ;;  %v10003_v34 = vld [vmem:[%s13141_s1 + $0x5c0] sm:$0xff] }
 0x176   : > { %v2517_v25 = vshll.u32 %v11453_v42, 16 }
 0x178   : > { %v1732_v54 = vpop.f32.mrf.mxu2  ;;  %v1454_v58 = vpop.f32.mrf.mxu0  ;;  %3575 = vmatpush.bf16.msrb.mxu3 %v10005_v37 }
 0x179   : > { %v1893_v51 = vpop.f32.mrf.mxu3  ;;  %v1749_v13 = vadd.f32 %v1732_v54, %v1593_v45  ;;  %v1579_v59 = vpop.f32.mrf.mxu1  ;;  %v1469_v9 = vadd.f32 %v1454_v58, %v11236_v12  ;;  %v9991_v12 = vld [vmem:[%s13141_s1 + $0x560] sm:$0xff]  ;;  %v2782_v45 = vsel %vm1774_vm6, %v11391_v52, %v11441_v7  ;;  %v11465_v54 = vpack.c.b16 %v2761_v0, %v11267_v1  ;;  %v9997_v1 = vld [vmem:[%s13141_s1 + $0x590] sm:$0xff]  ;;  %3121 = vmatpush.bf16.msrb.mxu0 %v9976_v57 }
 0x17a   : > { %3303 = vmatpush.bf16.msrb.mxu1 %v9991_v12  ;;  %v2514_v52 = vshrl.u32 %v11453_v42, 16  ;;  %3430 = vmatpush.bf16.msrb.mxu2 %v9997_v1  ;;  %v10004_v12 = vld [vmem:[%s13141_s1 + $0x5c8] sm:$0xff] }
 0x17b   : > { %v11411_v23 = vadd.f32 %v1893_v51, %v1749_v13  ;;  %v1594_v10 = vadd.f32 %v1579_v59, %v1469_v9  ;;  %2588 = vmatmul.bf16.gmra.mxu0 %v2503_v48  ;;  %v2787_v55 = vshll.u32 %v11465_v54, 16 }
 0x17c   : > { %2713 = vmatmul.bf16.gmra.mxu1 %v2642_v24  ;;  %v2516_v9 = vrot.slane %v2514_v52, 1  ;;  %3576 = vmatpush.bf16.msrb.mxu3 %v10004_v12 }
 0x17d   : > { %2858 = vmatmul.bf16.gmra.mxu2 %v2778_v49  ;;  %v2519_v49 = vrot.slane %v2517_v25, 2  ;;  %v11539_v25 = vld [vmem:[%s10508_s16 + $0x24] sm:$0xff] }
 0x17e   : > { %2983 = vmatmul.bf16.gmra.mxu3 %v2912_v41  ;;  %3304 = vmatpush.bf16.msrb.mxu1 %v9990_v40 }
 0x17f   : > { %3431 = vmatpush.bf16.msrb.mxu2 %v9996_v33 }
 0x180   : > { %v1735_v28 = vpop.f32.mrf.mxu2  ;;  %v1456_v44 = vpop.f32.mrf.mxu0  ;;  %3577 = vmatpush.bf16.msrb.mxu3 %v10003_v34 }
 0x181   : > { %v1896_v29 = vpop.f32.mrf.mxu3  ;;  %v1750_v11 = vadd.f32 %v1735_v28, %v1594_v10  ;;  %v1581_v4 = vpop.f32.mrf.mxu1  ;;  %v1470_v20 = vadd.f32 %v1456_v44, %v11258_v61  ;;  %v11438_v61 = vor.u32 %v2510_v14, %v2507_v3  ;;  %v2789_v10 = vrot.slane %v2787_v55, 3 }
 0x182   : > { %3305 = vmatpush.bf16.msrb.mxu1 %v9989_v30  ;;  %v2520_v28 = vor.u32 %v2519_v49, %v2516_v9  ;;  %v2915_v44 = vrot.slane %v11465_v54, 3 }
 0x183   : > { %v11426_v6 = vadd.f32 %v1896_v29, %v1750_v11  ;;  %v1595_v36 = vadd.f32 %v1581_v4, %v1470_v20  ;;  %v2512_v32 = vsel %vm600_vm2, %v11388_v50, %v11438_v61  ;;  %v2914_v50 = vsel %vm903_vm4, %v2911_v53, %v2913_v60  ;;  %v9988_v4 = vld [vmem:[%s13141_s1 + $0x548] sm:$0xff]  ;;  %v9995_v20 = vld [vmem:[%s13141_s1 + $0x580] sm:$0xff] }
 0x184   : > { %v2784_v53 = vshrl.u32 %v11465_v54, 16  ;;  %v2645_v29 = vrot.slane %v11453_v42, 2  ;;  %v2521_v46 = vsel %vm600_vm2, %v11438_v61, %v2520_v28  ;;  %v2916_v37 = vsel %vm903_vm4, %v2913_v60, %v2915_v44  ;;  %3432 = vmatpush.bf16.msrb.mxu2 %v9995_v20  ;;  %v9987_v61 = vld [vmem:[%s13141_s1 + $0x540] sm:$0xff]  ;;  %v11567_v20 = vld [vmem:[%s13141_s1 + $0x30] sm:$0xff] }
 0x186   : > { %v2786_v41 = vrot.slane %v2784_v53, 2  ;;  %3306 = vmatpush.bf16.msrb.mxu1 %v9988_v4  ;;  %v2646_v19 = vsel %vm746_vm3, %v2643_v38, %v2645_v29  ;;  %v11546_v53 = vld [vmem:[%s13141_s1 + $0x38] sm:$0xff] }
 0x188   : > { %v1737_v15 = vpop.f32.mrf.mxu2  ;;  %v1459_v21 = vpop.f32.mrf.mxu0  ;;  %v2790_v11 = vor.u32 %v2789_v10, %v2786_v41  ;;  %10397 = vmatpush.bf16.msra.mxu2 %v11546_v53 }
 0x189   : > { %v1898_v62 = vpop.f32.mrf.mxu3  ;;  %v1751_v17 = vadd.f32 %v1737_v15, %v1595_v36  ;;  %v1584_v22 = vpop.f32.mrf.mxu1  ;;  %v1471_v43 = vadd.f32 %v1459_v21, %v11275_v63 }
 0x18a   : > { %v2791_v40 = vsel %vm1774_vm6, %v11441_v7, %v2790_v11  ;;  %3307 = vmatpush.bf16.msrb.mxu1 %v9987_v61 }
 0x18b   : > { %v11467_v51 = vadd.f32 %v1898_v62, %v1751_v17  ;;  %v1596_v63 = vadd.f32 %v1584_v22, %v1471_v43  ;;  %2593 = vmatmul.bf16.gmra.mxu0 %v2512_v32  ;;  %v11523_v62 = vld [vmem:[%s10508_s16 + $0x1c] sm:$0xff]  }
 0x18c   : > { %2718 = vmatmul.bf16.gmra.mxu1 %v2644_v18  ;;  %v3342_v17 = vld [vmem:[%s10508_s16 + $0x1c] sm:$0xe]  ;;  %v10017_v18 = vld [vmem:[%s13141_s1 + $0x630] sm:$0xff]  ;;  %v3194_v42 = vunpack.c.h.b16 %v11523_v62  ;;  %v3209_v57 = vshrl.u32 %v11523_v62, 16  ;;  %10398 = vmatpush.bf16.msra.mxu2 %v11567_v20 }
 0x18d   : > { %2863 = vmatmul.bf16.gmra.mxu2 %v2782_v45  ;;  %v10037_v32 = vld [vmem:[%s13141_s1 + $0x78] sm:$0xff]  ;;  %v3361_v43 = vunpack.c.l.b16 %v3342_v17  ;;  %v10035_v17 = vld [vmem:[%s13141_s1 + $0x68] sm:$0xff] }
 0x18e   : > { %2988 = vmatmul.bf16.gmra.mxu3 %v2914_v50  ;;  %3910 = vmatpush.bf16.msra.mxu1 %v10037_v32 }
 0x18f   : > { %10389 = vmatpush.bf16.msra.mxu3 %v10037_v32 }
 0x190   : > { %v1740_v13 = vpop.f32.mrf.mxu2  ;;  %v1461_v48 = vpop.f32.mrf.mxu0 }
 0x191   : > { %v1901_v58 = vpop.f32.mrf.mxu3  ;;  %v1752_v59 = vadd.f32 %v1740_v13, %v1596_v63  ;;  %v1586_v24 = vpop.f32.mrf.mxu1  ;;  %v3362_v63 = vpack.c.b16 %v3194_v42, %v3361_v43  ;;  %v3220_v48 = vshrl.u32 %v11539_v25, 16 }
 0x193   : > { %v11482_v47 = vadd.f32 %v1901_v58, %v1752_v59  ;;  %v3489_v13 = vshrl.u32 %v3362_v63, 16  ;;  %v3211_v58 = vshll.u32 %v11523_v62, 16  ;;  %v3216_v59 = vshll.u32 %v11539_v25, 16 }
 0x194   : > { %v3492_v24 = vshll.u32 %v3362_v63, 16 }
 0x195   : > { %v3491_v12 = vrot.slane %v3489_v13, 1  ;;  %v3213_v33 = vrot.slane %v3211_v58, 1  ;;  %v10034_v58 = vld [vmem:[%s13141_s1 + $0x60] sm:$0xff] }
 0x197   : > { %v3214_v34 = vor.u32 %v3213_v33, %v3209_v57 }
 0x198   : > { %v1742_v3 = vpop.f32.mrf.mxu2  ;;  %v2006_v27 = vpop.f32.mrf.mxu0 }
 0x199   : > { %v1903_v14 = vpop.f32.mrf.mxu3  ;;  %v2151_v8 = vpop.f32.mrf.mxu1  ;;  %v2030_v36 = vadd.f32 %v2006_v27, %v11310_v5  ;;  %v10018_v5 = vld [vmem:[%s13141_s1 + $0x638] sm:$0xff]  ;;  %v10016_v3 = vld [vmem:[%s13141_s1 + $0x628] sm:$0xff]  ;;  %v3363_v27 = vrot.slane %v3362_v63, 1 }
 0x19a   : > { %3695 = vmatpush.bf16.msra.mxu0 %v10018_v5 }
 0x19b   : > { %v2175_v39 = vadd.f32 %v2151_v8, %v2030_v36  ;;  %2598 = vmatmul.bf16.gmra.mxu0 %v2521_v46  ;;  %v3364_v8 = vrot.slane %v11539_v25, 1 }
 0x19c   : > { %2723 = vmatmul.bf16.gmra.mxu1 %v2646_v19 }
 0x19d   : > { %2868 = vmatmul.bf16.gmra.mxu2 %v2791_v40 }
 0x19e   : > { %2993 = vmatmul.bf16.gmra.mxu3 %v2916_v37  ;;  %3696 = vmatpush.bf16.msra.mxu0 %v10017_v18  ;;  %v9972_v37 = vld [vmem:[%s10508_s16 + $0x1c] sm:$0xff] }
 0x1a0   : > { %v2268_v56 = vpop.f32.mrf.mxu2  ;;  %v2008_v60 = vpop.f32.mrf.mxu0 }
 0x1a1   : > { %v2424_v38 = vpop.f32.mrf.mxu3  ;;  %v2292_v7 = vadd.f32 %v2268_v56, %v2175_v39  ;;  %v2153_v0 = vpop.f32.mrf.mxu1  ;;  %v2031_v15 = vadd.f32 %v2008_v60, %v11322_v26 }
 0x1a2   : > { %3697 = vmatpush.bf16.msra.mxu0 %v10016_v3  ;;  %v11625_v3 = vld [vmem:[%s10508_s16 + $0x34] sm:$0xff] }
 0x1a3   : > { %v11526_v21 = vadd.f32 %v2424_v38, %v2292_v7  ;;  %v2176_v22 = vadd.f32 %v2153_v0, %v2031_v15  ;;  %v3365_v7 = vsel %vm474_vm1, %v3363_v27, %v3364_v8  ;;  %v11577_v0 = vld [vmem:[%s10508_s16 + $0x2c] sm:$0xff]  ;;  %v3232_v27 = vshll.u32 %v11625_v3, 16 }
 0x1a4   : > { %v3224_v18 = vshll.u32 %v11577_v0, 16  ;;  %v3228_v43 = vshrl.u32 %v11577_v0, 16 }
 0x1a8   : > { %v2270_v26 = vpop.f32.mrf.mxu2  ;;  %v2011_v54 = vpop.f32.mrf.mxu0 }
 0x1a9   : > { %v2426_v45 = vpop.f32.mrf.mxu3  ;;  %v2293_v50 = vadd.f32 %v2270_v26, %v2176_v22  ;;  %v2156_v16 = vpop.f32.mrf.mxu1  ;;  %v2032_v52 = vadd.f32 %v2011_v54, %v11340_v31  ;;  %v10036_v31 = vld [vmem:[%s13141_s1 + $0x70] sm:$0xff]  ;;  %v10015_v22 = vld [vmem:[%s13141_s1 + $0x620] sm:$0xff] }
 0x1aa   : > { %10390 = vmatpush.bf16.msra.mxu3 %v10036_v31  ;;  %3911 = vmatpush.bf16.msra.mxu1 %v10036_v31  ;;  %v10014_v31 = vld [vmem:[%s13141_s1 + $0x618] sm:$0xff] }
 0x1ab   : > { %v11541_v1 = vadd.f32 %v2426_v45, %v2293_v50  ;;  %v2177_v55 = vadd.f32 %v2156_v16, %v2032_v52  ;;  %2603 = vmatmul.bf16.gmra.mxu0 %v2520_v28  ;;  %v3500_v52 = vrot.slane %v3228_v43, 1 }
 0x1ac   : > { %2728 = vmatmul.bf16.gmra.mxu1 %v2645_v29  ;;  %v3494_v29 = vrot.slane %v3492_v24, 2  ;;  %3698 = vmatpush.bf16.msra.mxu0 %v10015_v22  ;;  %v10032_v22 = vld [vmem:[%s13141_s1 + $0x50] sm:$0xff] }
 0x1ad   : > { %2873 = vmatmul.bf16.gmra.mxu2 %v2790_v11  ;;  %v3496_v11 = vrot.slane %v3220_v48, 1 }
 0x1ae   : > { %2998 = vmatmul.bf16.gmra.mxu3 %v2915_v44  ;;  %v3497_v44 = vrot.slane %v3216_v59, 2  ;;  %v3495_v46 = vor.u32 %v3494_v29, %v3491_v12  ;;  %3912 = vmatpush.bf16.msra.mxu1 %v10035_v17  ;;  %v11615_v12 = vld [vmem:[%s13141_s1 + $0x20] sm:$0xff] }
 0x1af   : > { %10391 = vmatpush.bf16.msra.mxu3 %v10035_v17 }
 0x1b0   : > { %v2273_v9 = vpop.f32.mrf.mxu2  ;;  %v2013_v10 = vpop.f32.mrf.mxu0  ;;  %v3498_v19 = vor.u32 %v3497_v44, %v3496_v11  ;;  %3699 = vmatpush.bf16.msra.mxu0 %v10014_v31 }
 0x1b1   : > { %v2429_v49 = vpop.f32.mrf.mxu3  ;;  %v2294_v41 = vadd.f32 %v2273_v9, %v2177_v55  ;;  %v2158_v30 = vpop.f32.mrf.mxu1  ;;  %v2033_v28 = vadd.f32 %v2013_v10, %v11360_v35  ;;  %v3218_v35 = vrot.slane %v3216_v59, 1  ;;  %v3501_v55 = vrot.slane %v3224_v18, 2 }
 0x1b2   : > { %v3499_v60 = vsel %vm600_vm2, %v3495_v46, %v3498_v19  ;;  %v3366_v9 = vrot.slane %v11577_v0, 1  ;;  %3913 = vmatpush.bf16.msra.mxu1 %v10034_v58 }
 0x1b3   : > { %v11559_v4 = vadd.f32 %v2429_v49, %v2294_v41  ;;  %v2178_v14 = vadd.f32 %v2158_v30, %v2033_v28  ;;  %v3219_v56 = vsel %vm240_vm0, %v3214_v34, %v3218_v35  ;;  %v3222_v24 = vor.u32 %v3220_v48, %v3218_v35  ;;  %10392 = vmatpush.bf16.msra.mxu3 %v10034_v58  ;;  %v9973_v30 = vld [vmem:[%s10508_s16 + $0x24] sm:$0xff]  ;;  %v10013_v35 = vld [vmem:[%s13141_s1 + $0x610] sm:$0xff] }
 0x1b4   : > { %v11609_v49 = vor.u32 %v3501_v55, %v3500_v52  ;;  %v3367_v11 = vsel %vm474_vm1, %v3364_v8, %v3366_v9  ;;  %v3236_v8 = vshrl.u32 %v11625_v3, 16  ;;  %3700 = vmatpush.bf16.msra.mxu0 %v10013_v35  ;;  %v9974_v52 = vld [vmem:[%s10508_s16 + $0x2c] sm:$0xff] }
 0x1b6   : > { %v3503_v44 = vsel %vm600_vm2, %v3498_v19, %v11609_v49 }
 0x1b8   : > { %v2275_v36 = vpop.f32.mrf.mxu2  ;;  %v2016_v39 = vpop.f32.mrf.mxu0 }
 0x1b9   : > { %v2431_v40 = vpop.f32.mrf.mxu3  ;;  %v2295_v61 = vadd.f32 %v2275_v36, %v2178_v14  ;;  %v2161_v5 = vpop.f32.mrf.mxu1  ;;  %v2034_v38 = vadd.f32 %v2016_v39, %v11377_v2  ;;  %v11590_v2 = vld [vmem:[%s13141_s1 + $0x28] sm:$0xff]  ;;  %v3504_v39 = vrot.slane %v3236_v8, 1 }
 0x1ba   : > { %10399 = vmatpush.bf16.msra.mxu2 %v11590_v2 }
 0x1bb   : > { %v11579_v15 = vadd.f32 %v2431_v40, %v2295_v61  ;;  %v2179_v32 = vadd.f32 %v2161_v5, %v2034_v38  ;;  %3122 = vmatmul.bf16.vlgmr.msrb.gmra.mxu0 %v9972_v37  ;;  %v3505_v5 = vrot.slane %v3232_v27, 2  ;;  %v3164_v38 = vld [vmem:[%s10508_s16 + $0x3c] sm:$0xf] }
 0x1bc   : > { %3308 = vmatmul.bf16.vlgmr.msrb.gmra.mxu1 %v3219_v56 }
 0x1bd   : > { %3433 = vmatmul.bf16.vlgmr.msrb.gmra.mxu2 %v3365_v7  ;;  %v3467_v7 = vld [vmem:[%s10508_s16 + $0x40] sm:$0x3] }
 0x1be   : > { %3578 = vmatmul.bf16.vlgmr.msrb.gmra.mxu3 %v3499_v60  ;;  %10400 = vmatpush.bf16.msra.mxu2 %v11615_v12  ;;  %v11648_v60 = vld [vmem:[%s13141_s1 + $0x18] sm:$0xff] }
 0x1c0   : > { %v2278_v26 = vpop.f32.mrf.mxu2  ;;  %v2018_v54 = vpop.f32.mrf.mxu0 }
 0x1c1   : > { %v2434_v45 = vpop.f32.mrf.mxu3  ;;  %v2296_v50 = vadd.f32 %v2278_v26, %v2179_v32  ;;  %v2163_v16 = vpop.f32.mrf.mxu1  ;;  %v2035_v63 = vadd.f32 %v2018_v54, %v11411_v23  ;;  %v3226_v23 = vrot.slane %v3224_v18, 1  ;;  %v3234_v32 = vrot.slane %v3232_v27, 1 }
 0x1c2   : > { %10401 = vmatpush.bf16.msra.mxu2 %v11648_v60  ;;  %v3368_v18 = vrot.slane %v11625_v3, 1  ;;  %v11657_v26 = vor.u32 %v3505_v5, %v3504_v39  ;;  %v3486_v54 = vunpack.c.l.b16 %v3467_v7 }
 0x1c3   : > { %v11598_v13 = vadd.f32 %v2434_v45, %v2296_v50  ;;  %v2180_v59 = vadd.f32 %v2163_v16, %v2035_v63  ;;  %v3227_v28 = vsel %vm240_vm0, %v3222_v24, %v3226_v23  ;;  %v3165_v45 = vld [vmem:[%s10508_s16 + $0x40] sm:$0x1]  ;;  %v3201_v50 = vunpack.c.l.b16 %v3164_v38 }
 0x1c8   : > { %v2280_v41 = vpop.f32.mrf.mxu2  ;;  %v2021_v33 = vpop.f32.mrf.mxu0 }
 0x1c9   : > { %v2436_v10 = vpop.f32.mrf.mxu3  ;;  %v2297_v57 = vadd.f32 %v2280_v41, %v2180_v59  ;;  %v2166_v48 = vpop.f32.mrf.mxu1  ;;  %v2036_v29 = vadd.f32 %v2021_v33, %v11426_v6  ;;  %v10033_v6 = vld [vmem:[%s13141_s1 + $0x58] sm:$0xff]  ;;  %v3202_v59 = vunpack.c.l.b16 %v3165_v45  ;;  %v3507_v41 = vsel %vm600_vm2, %v11609_v49, %v11657_v26 }
 0x1ca   : > { %10393 = vmatpush.bf16.msra.mxu3 %v10033_v6  ;;  %3914 = vmatpush.bf16.msra.mxu1 %v10033_v6 }
 0x1cb   : > { %v11628_v14 = vadd.f32 %v2436_v10, %v2297_v57  ;;  %v2181_v34 = vadd.f32 %v2166_v48, %v2036_v29  ;;  %3127 = vmatmul.bf16.gmra.mxu0 %v9973_v30  ;;  %v11671_v10 = vpack.c.b16 %v3486_v54, %v3201_v50  ;;  %v10012_v57 = vld [vmem:[%s13141_s1 + $0x608] sm:$0xff] }
 0x1cc   : > { %3313 = vmatmul.bf16.gmra.mxu1 %v3227_v28  ;;  %3701 = vmatpush.bf16.msra.mxu0 %v10012_v57  ;;  %v10043_v57 = vld [vmem:[%s13141_s1 + $0xa8] sm:$0xff] }
 0x1cd   : > { %3438 = vmatmul.bf16.gmra.mxu2 %v3367_v11  ;;  %v3509_v49 = vshrl.u32 %v11671_v10, 16  ;;  %v3512_v48 = vshll.u32 %v11671_v10, 16 }
 0x1ce   : > { %3583 = vmatmul.bf16.gmra.mxu3 %v3503_v44  ;;  %3915 = vmatpush.bf16.msra.mxu1 %v10032_v22 }
 0x1cf   : > { %10394 = vmatpush.bf16.msra.mxu3 %v10032_v22  ;;  %v3511_v35 = vrot.slane %v3509_v49, 1  ;;  %v3514_v27 = vrot.slane %v3512_v48, 2  ;;  %v10030_v22 = vld [vmem:[%s13141_s1 + $0x40] sm:$0xff] }
 0x1d0   : > { %v2283_v46 = vpop.f32.mrf.mxu2  ;;  %v2023_v40 = vpop.f32.mrf.mxu0 }
 0x1d1   : > { %v2439_v19 = vpop.f32.mrf.mxu3  ;;  %v2298_v36 = vadd.f32 %v2283_v46, %v2181_v34  ;;  %v2168_v37 = vpop.f32.mrf.mxu1  ;;  %v2037_v61 = vadd.f32 %v2023_v40, %v11467_v51  ;;  %v3230_v51 = vor.u32 %v3228_v43, %v3226_v23  ;;  %v3369_v23 = vsel %vm474_vm1, %v3366_v9, %v3368_v18  ;;  %v11683_v9 = vld [vmem:[%s13141_s1 + $0x10] sm:$0xff]  ;;  %v11700_v40 = vld [vmem:[%s13141_s1 + $0x8] sm:$0xff] }
 0x1d2   : > { %10402 = vmatpush.bf16.msra.mxu2 %v11683_v9  ;;  %v11705_v5 = vor.u32 %v3514_v27, %v3511_v35 }
 0x1d3   : > { %v11641_v56 = vadd.f32 %v2439_v19, %v2298_v36  ;;  %v2182_v17 = vadd.f32 %v2168_v37, %v2037_v61  ;;  %v3235_v43 = vsel %vm240_vm0, %v3230_v51, %v3234_v32  ;;  %v10031_v19 = vld [vmem:[%s13141_s1 + $0x48] sm:$0xff]  ;;  %v10011_v36 = vld [vmem:[%s13141_s1 + $0x600] sm:$0xff]  ;;  %v3238_v37 = vor.u32 %v3236_v8, %v3234_v32 }
 0x1d4   : > { %10395 = vmatpush.bf16.msra.mxu3 %v10031_v19  ;;  %3702 = vmatpush.bf16.msra.mxu0 %v10011_v36  ;;  %v11716_v8 = vld [vmem:[%s13141_s1] sm:$0xff]  ;;  %v3516_v54 = vsel %vm600_vm2, %v11657_v26, %v11705_v5  ;;  %v11772_v36 = vld [vmem:[%s10508_s16 + $0x34] sm:$0xff] }
 0x1d5   : > { %3916 = vmatpush.bf16.msra.mxu1 %v10031_v19 }
 0x1d6   : > { %10403 = vmatpush.bf16.msra.mxu2 %v11700_v40 }
 0x1d8   : > { %v2285_v16 = vpop.f32.mrf.mxu2  ;;  %v2026_v58 = vpop.f32.mrf.mxu0  ;;  %3991 = vmatpush.bf16.msrb.mxu0 %v11546_v53  ;;  %10396 = vmatpush.bf16.msra.mxu3 %v10030_v22 }
 0x1d9   : > { %v2441_v63 = vpop.f32.mrf.mxu3  ;;  %v2299_v55 = vadd.f32 %v2285_v16, %v2182_v17  ;;  %v2171_v31 = vpop.f32.mrf.mxu1  ;;  %v2038_v24 = vadd.f32 %v2026_v58, %v11482_v47  ;;  %v11678_v47 = vpack.c.b16 %v3202_v59, %v3201_v50  ;;  %v9975_v17 = vld [vmem:[%s10508_s16 + $0x34] sm:$0xff]  ;;  %3917 = vmatpush.bf16.msra.mxu1 %v10030_v22  ;;  %v11743_v59 = vld [vmem:[%s10508_s16 + $0x24] sm:$0xff]  }
 0x1da   : > { %10404 = vmatpush.bf16.msra.mxu2 %v11716_v8  ;;  %v3809_v49 = vunpack.c.h.b16 %v11743_v59  ;;  %v3825_v22 = vshll.u32 %v11743_v59, 16 }
 0x1db   : > { %v11673_v30 = vadd.f32 %v2441_v63, %v2299_v55  ;;  %v2183_v33 = vadd.f32 %v2171_v31, %v2038_v24  ;;  %3132 = vmatmul.bf16.gmra.mxu0 %v9974_v52  ;;  %v3240_v6 = vshll.u32 %v11678_v47, 16  ;;  %v3370_v39 = vrot.slane %v11678_v47, 1  ;;  %v10061_v63 = vld [vmem:[%s13141_s1 + $0x138] sm:$0xff] }
 0x1dc   : > { %3318 = vmatmul.bf16.gmra.mxu1 %v3235_v43  ;;  %3992 = vmatpush.bf16.msrb.mxu0 %v11567_v20  ;;  %v10044_v20 = vld [vmem:[%s13141_s1 + $0xb0] sm:$0xff]  ;;  %v3020_v31 = vld [vmem:[%s10508_s16 + $0x3c] sm:$0xf] }
 0x1dd   : > { %3443 = vmatmul.bf16.gmra.mxu2 %v3369_v23  ;;  %v3242_v61 = vrot.slane %v3240_v6, 1  ;;  %v3371_v53 = vsel %vm474_vm1, %v3368_v18, %v3370_v39  ;;  %v3055_v23 = vunpack.c.l.b16 %v3020_v31  ;;  %v10056_v31 = vld [vmem:[%s13141_s1 + $0x110] sm:$0xff] }
 0x1de   : > { %3588 = vmatmul.bf16.gmra.mxu3 %v3507_v41  ;;  %4357 = vmatpush.bf16.msrb.mxu2 %v10061_v63  ;;  %v3244_v41 = vshrl.u32 %v11678_v47, 16 }
 0x1df   : > { %v3243_v45 = vsel %vm240_vm0, %v3238_v37, %v3242_v61 }
 0x1e0   : > { %v2288_v28 = vpop.f32.mrf.mxu2  ;;  %v2028_v44 = vpop.f32.mrf.mxu0  ;;  %3993 = vmatpush.bf16.msrb.mxu0 %v11590_v2 }
 0x1e1   : > { %v2444_v29 = vpop.f32.mrf.mxu3  ;;  %v2300_v11 = vadd.f32 %v2288_v28, %v2183_v33  ;;  %v2173_v34 = vpop.f32.mrf.mxu1  ;;  %v10060_v33 = vld [vmem:[%s13141_s1 + $0x130] sm:$0xff]  ;;  %v3060_v28 = vpack.c.b16 %v3055_v23, %v3055_v23 }
 0x1e2   : > { %4358 = vmatpush.bf16.msrb.mxu2 %v10060_v33  ;;  %v10052_v44 = vld [vmem:[%s13141_s1 + $0xf0] sm:$0xff]  ;;  %v10059_v34 = vld [vmem:[%s13141_s1 + $0x128] sm:$0xff] }
 0x1e3   : > { %v11689_v46 = vadd.f32 %v2444_v29, %v2300_v11  ;;  %v3246_v29 = vor.u32 %v3244_v41, %v3242_v61  ;;  %v10042_v11 = vld [vmem:[%s13141_s1 + $0xa0] sm:$0xff] }
 0x1e4   : > { %3994 = vmatpush.bf16.msrb.mxu0 %v11615_v12 }
 0x1e6   : > { %4359 = vmatpush.bf16.msrb.mxu2 %v10059_v34 }
 0x1e8   : > { %v2290_v38 = vpop.f32.mrf.mxu2  ;;  %v2584_v51 = vpop.f32.mrf.mxu0  ;;  %3995 = vmatpush.bf16.msrb.mxu0 %v11648_v60  ;;  %v3612_v60 = vld [vmem:[%s10508_s16 + $0x1c] sm:$0xc] }
 0x1e9   : > { %v2446_v7 = vpop.f32.mrf.mxu3  ;;  %v2709_v32 = vpop.f32.mrf.mxu1  ;;  %v2608_v50 = vadd.f32 %v2584_v51, %v11526_v21  ;;  %v10045_v21 = vld [vmem:[%s13141_s1 + $0xb8] sm:$0xff]  ;;  %v3631_v38 = vunpack.c.l.b16 %v3612_v60 }
 0x1ea   : > { %4101 = vmatpush.bf16.msrb.mxu3 %v10045_v21  ;;  %v10041_v7 = vld [vmem:[%s13141_s1 + $0x98] sm:$0xff]  ;;  %v3823_v21 = vshrl.u32 %v11743_v59, 16 }
 0x1eb   : > { %v2733_v16 = vadd.f32 %v2709_v32, %v2608_v50  ;;  %3137 = vmatmul.bf16.gmra.mxu0 %v9975_v17  ;;  %v10058_v17 = vld [vmem:[%s13141_s1 + $0x120] sm:$0xff]  ;;  %v3838_v32 = vshll.u32 %v11772_v36, 16  ;;  %v3632_v47 = vpack.c.b16 %v3194_v42, %v3631_v38 }
 0x1ec   : > { %3323 = vmatmul.bf16.gmra.mxu1 %v3243_v45  ;;  %3996 = vmatpush.bf16.msrb.mxu0 %v11683_v9  ;;  %v11790_v9 = vld [vmem:[%s10508_s16 + $0x2c] sm:$0xff]  ;;  %v11794_v51 = vld [vmem:[%s10508_s16 + $0x3c] sm:$0xff] }
 0x1ed   : > { %3448 = vmatmul.bf16.gmra.mxu2 %v3371_v53  ;;  %v10057_v53 = vld [vmem:[%s13141_s1 + $0x118] sm:$0xff]  ;;  %v3830_v62 = vshll.u32 %v11790_v9, 16  ;;  %v3846_v63 = vshll.u32 %v11794_v51, 16 }
 0x1ee   : > { %3593 = vmatmul.bf16.gmra.mxu3 %v3516_v54  ;;  %4360 = vmatpush.bf16.msrb.mxu2 %v10058_v17 }
 0x1ef   : > { %4102 = vmatpush.bf16.msrb.mxu3 %v10044_v20  ;;  %v3842_v20 = vshrl.u32 %v11772_v36, 16 }
 0x1f0   : > { %v2854_v18 = vpop.f32.mrf.mxu2  ;;  %v2586_v55 = vpop.f32.mrf.mxu0  ;;  %3997 = vmatpush.bf16.msrb.mxu0 %v11700_v40 }
 0x1f1   : > { %v2979_v26 = vpop.f32.mrf.mxu3  ;;  %v2878_v52 = vadd.f32 %v2854_v18, %v2733_v16  ;;  %v2711_v58 = vpop.f32.mrf.mxu1  ;;  %v2609_v43 = vadd.f32 %v2586_v55, %v11541_v1  ;;  %v10053_v1 = vld [vmem:[%s13141_s1 + $0xf8] sm:$0xff]  ;;  %v3827_v18 = vrot.slane %v3825_v22, 1 }
 0x1f2   : > { %4239 = vmatpush.bf16.msrb.mxu1 %v10053_v1  ;;  %4361 = vmatpush.bf16.msrb.mxu2 %v10057_v53  ;;  %v3782_v1 = vld [vmem:[%s10508_s16 + $0x44] sm:$0x1] }
 0x1f3   : > { %v11745_v2 = vadd.f32 %v2979_v26, %v2878_v52  ;;  %v2734_v24 = vadd.f32 %v2711_v58, %v2609_v43  ;;  %4103 = vmatpush.bf16.msrb.mxu3 %v10043_v57  ;;  %v11814_v26 = vrot.slane %v3838_v32, 1  ;;  %v10049_v58 = vld [vmem:[%s13141_s1 + $0xd8] sm:$0xff]  ;;  %v3633_v43 = vrot.slane %v3632_v47, 2 }
 0x1f4   : > { %3998 = vmatpush.bf16.msrb.mxu0 %v11716_v8  ;;  %v3828_v23 = vor.u32 %v3827_v18, %v3823_v21  ;;  %v3832_v8 = vrot.slane %v3830_v62, 1  ;;  %v3848_v57 = vrot.slane %v3846_v63, 1  ;;  %v10069_v21 = vld [vmem:[%s13141_s1 + $0x178] sm:$0xff] }
 0x1f5   : > { %v3844_v41 = vor.u32 %v3842_v20, %v11814_v26 }
 0x1f6   : > { %4240 = vmatpush.bf16.msrb.mxu1 %v10052_v44  ;;  %4362 = vmatpush.bf16.msrb.mxu2 %v10056_v31 }
 0x1f7   : > { %4104 = vmatpush.bf16.msrb.mxu3 %v10042_v11  ;;  %v3849_v60 = vsel %vm240_vm0, %v3844_v41, %v3848_v57 }
 0x1f8   : > { %v2856_v12 = vpop.f32.mrf.mxu2  ;;  %v2589_v35 = vpop.f32.mrf.mxu0 }
 0x1f9   : > { %v2981_v48 = vpop.f32.mrf.mxu3  ;;  %v2879_v6 = vadd.f32 %v2856_v12, %v2734_v24  ;;  %v2714_v27 = vpop.f32.mrf.mxu1  ;;  %v2610_v19 = vadd.f32 %v2589_v35, %v11559_v4  ;;  %v10051_v4 = vld [vmem:[%s13141_s1 + $0xe8] sm:$0xff]  ;;  %v3634_v24 = vrot.slane %v11539_v25, 2  ;;  %v3833_v35 = vsel %vm240_vm0, %v3828_v23, %v3832_v8 }
 0x1fa   : > { %4241 = vmatpush.bf16.msrb.mxu1 %v10051_v4  ;;  %v10054_v4 = vld [vmem:[%s13141_s1 + $0x100] sm:$0xff] }
 0x1fb   : > { %v11774_v37 = vadd.f32 %v2981_v48, %v2879_v6  ;;  %v2735_v61 = vadd.f32 %v2714_v27, %v2610_v19  ;;  %3142 = vmatmul.bf16.gmra.mxu0 %v3060_v28  ;;  %4105 = vmatpush.bf16.msrb.mxu3 %v10041_v7  ;;  %v10038_v48 = vld [vmem:[%s13141_s1 + $0x80] sm:$0xff]  ;;  %v10048_v28 = vld [vmem:[%s13141_s1 + $0xd0] sm:$0xff]  ;;  %v3635_v6 = vsel %vm746_vm3, %v3633_v43, %v3634_v24  ;;  %v3816_v19 = vunpack.c.l.b16 %v3782_v1  ;;  %v10047_v7 = vld [vmem:[%s13141_s1 + $0xc8] sm:$0xff] }
 0x1fc   : > { %3328 = vmatmul.bf16.gmra.mxu1 %v3246_v29  ;;  %v10055_v29 = vld [vmem:[%s13141_s1 + $0x108] sm:$0xff] }
 0x1fd   : > { %3453 = vmatmul.bf16.gmra.mxu2 %v3370_v39  ;;  %v10040_v39 = vld [vmem:[%s13141_s1 + $0x90] sm:$0xff] }
 0x1fe   : > { %3598 = vmatmul.bf16.gmra.mxu3 %v11705_v5  ;;  %v10050_v5 = vld [vmem:[%s13141_s1 + $0xe0] sm:$0xff]  ;;  %4363 = vmatpush.bf16.msrb.mxu2 %v10055_v29 }
 0x1ff   : > { %4106 = vmatpush.bf16.msrb.mxu3 %v10040_v39  ;;  %4242 = vmatpush.bf16.msrb.mxu1 %v10050_v5  ;;  %v3834_v5 = vshrl.u32 %v11790_v9, 16 }
 0x200   : > { %v2859_v45 = vpop.f32.mrf.mxu2  ;;  %v2591_v16 = vpop.f32.mrf.mxu0 }
 0x201   : > { %v2984_v50 = vpop.f32.mrf.mxu3  ;;  %v2880_v54 = vadd.f32 %v2859_v45, %v2735_v61  ;;  %v2716_v40 = vpop.f32.mrf.mxu1  ;;  %v2611_v42 = vadd.f32 %v2591_v16, %v11579_v15  ;;  %v10039_v15 = vld [vmem:[%s13141_s1 + $0x88] sm:$0xff]  ;;  %v10046_v45 = vld [vmem:[%s13141_s1 + $0xc0] sm:$0xff] }
 0x202   : > { %4364 = vmatpush.bf16.msrb.mxu2 %v10054_v4 }
 0x203   : > { %v11818_v52 = vadd.f32 %v2984_v50, %v2880_v54  ;;  %v2736_v55 = vadd.f32 %v2716_v40, %v2611_v42  ;;  %4107 = vmatpush.bf16.msrb.mxu3 %v10039_v15  ;;  %4243 = vmatpush.bf16.msrb.mxu1 %v10049_v58  ;;  %v3850_v54 = vshrl.u32 %v11794_v51, 16  ;;  %v4020_v42 = vld [vmem:[%s10508_s16 + $0x24] sm:$0xe]  ;;  %v3836_v15 = vor.u32 %v3834_v5, %v3832_v8 }
 0x204   : > { %v4038_v31 = vunpack.c.l.b16 %v4020_v42 }
 0x205   : > { %v3841_v8 = vsel %vm240_vm0, %v3836_v15, %v11814_v26  ;;  %v4297_v15 = vrot.slane %v11790_v9, 2 }
 0x207   : > { %4108 = vmatpush.bf16.msrb.mxu3 %v10038_v48  ;;  %4244 = vmatpush.bf16.msrb.mxu1 %v10048_v28  ;;  %v10096_v28 = vld [vmem:[%s13141_s1 + $0x238] sm:$0xff] }
 0x208   : > { %v2861_v33 = vpop.f32.mrf.mxu2  ;;  %v2594_v44 = vpop.f32.mrf.mxu0 }
 0x209   : > { %v2986_v12 = vpop.f32.mrf.mxu3  ;;  %v2881_v11 = vadd.f32 %v2861_v33, %v2736_v55  ;;  %v2719_v34 = vpop.f32.mrf.mxu1  ;;  %v2612_v27 = vadd.f32 %v2594_v44, %v11598_v13  ;;  %v11863_v13 = vpack.c.b16 %v3816_v19, %v3816_v19  ;;  %v3636_v55 = vrot.slane %v11577_v0, 2  ;;  %v4276_v44 = vld [vmem:[%s10508_s16 + $0x24] sm:$0xc] }
 0x20a   : > { %v10066_v0 = vld [vmem:[%s13141_s1 + $0x160] sm:$0xff] }
 0x20b   : > { %v11854_v61 = vadd.f32 %v2986_v12, %v2881_v11  ;;  %v2737_v38 = vadd.f32 %v2719_v34, %v2612_v27  ;;  %3703 = vmatmul.bf16.vlgmr.msra.gmra.mxu0 %v3635_v6  ;;  %4245 = vmatpush.bf16.msrb.mxu1 %v10047_v7  ;;  %v3854_v16 = vshll.u32 %v11863_v13, 16  ;;  %v3637_v12 = vsel %vm746_vm3, %v3634_v24, %v3636_v55  ;;  %v10068_v24 = vld [vmem:[%s13141_s1 + $0x170] sm:$0xff]  ;;  %v10085_v34 = vld [vmem:[%s13141_s1 + $0x1f8] sm:$0xff] }
 0x20c   : > { %3918 = vmatmul.bf16.vlgmr.msra.gmra.mxu1 %v3833_v35  ;;  %v4039_v11 = vpack.c.b16 %v3809_v49, %v4038_v31  ;;  %v4294_v6 = vunpack.c.l.b16 %v4276_v44 }
 0x20d   : > { %4009 = vmatmul.bf16.vlgmr.msra.gmra.mxu2 %v11772_v36  ;;  %v3856_v58 = vrot.slane %v3854_v16, 1 }
 0x20e   : > { %3928 = vmatmul.bf16.vlgmr.msra.gmra.mxu3 %v3849_v60  ;;  %v4159_v26 = vshrl.u32 %v4039_v11, 16  ;;  %4938 = vmatpush.bf16.msra.mxu2 %v10096_v28  ;;  %v4166_v60 = vrot.slane %v3834_v5, 1 }
 0x20f   : > { %4246 = vmatpush.bf16.msrb.mxu1 %v10046_v45  ;;  %4503 = vmatpush.bf16.msra.mxu3 %v10069_v21 }
 0x210   : > { %v2864_v17 = vpop.f32.mrf.mxu2  ;;  %v2596_v47 = vpop.f32.mrf.mxu0  ;;  %v4161_v4 = vrot.slane %v4159_v26, 1  ;;  %v4170_v26 = vrot.slane %v3842_v20, 1 }
 0x211   : > { %v2989_v22 = vpop.f32.mrf.mxu3  ;;  %v2882_v50 = vadd.f32 %v2864_v17, %v2737_v38  ;;  %v2721_v39 = vpop.f32.mrf.mxu1  ;;  %v2613_v53 = vadd.f32 %v2596_v47, %v11628_v14  ;;  %v3852_v14 = vor.u32 %v3850_v54, %v3848_v57 }
 0x213   : > { %v11872_v40 = vadd.f32 %v2989_v22, %v2882_v50  ;;  %v2738_v18 = vadd.f32 %v2721_v39, %v2613_v53  ;;  %v3857_v57 = vsel %vm240_vm0, %v3852_v14, %v3856_v58  ;;  %4504 = vmatpush.bf16.msra.mxu3 %v10068_v24  ;;  %4765 = vmatpush.bf16.msra.mxu1 %v10085_v34  ;;  %v4167_v22 = vrot.slane %v3830_v62, 2  ;;  %v10095_v39 = vld [vmem:[%s13141_s1 + $0x230] sm:$0xff]  ;;  %v10067_v53 = vld [vmem:[%s13141_s1 + $0x168] sm:$0xff]  ;;  %v10093_v34 = vld [vmem:[%s13141_s1 + $0x220] sm:$0xff] }
 0x214   : > { %v4295_v50 = vpack.c.b16 %v3809_v49, %v4294_v6  ;;  %v10084_v62 = vld [vmem:[%s13141_s1 + $0x1f0] sm:$0xff]  ;;  %4939 = vmatpush.bf16.msra.mxu2 %v10095_v39  ;;  %v4040_v49 = vrot.slane %v4039_v11, 1  ;;  %v10065_v6 = vld [vmem:[%s13141_s1 + $0x158] sm:$0xff] }
 0x215   : > { %v4168_v21 = vor.u32 %v4167_v22, %v4166_v60  ;;  %v4299_v60 = vrot.slane %v11772_v36, 2 }
 0x216   : > { %v4296_v42 = vrot.slane %v4295_v50, 2 }
 0x217   : > { %4505 = vmatpush.bf16.msra.mxu3 %v10067_v53  ;;  %4766 = vmatpush.bf16.msra.mxu1 %v10084_v62  ;;  %v4300_v39 = vsel %vm746_vm3, %v4297_v15, %v4299_v60  ;;  %v10077_v53 = vld [vmem:[%s13141_s1 + $0x1b8] sm:$0xff] }
 0x218   : > { %v2866_v43 = vpop.f32.mrf.mxu2  ;;  %v2599_v1 = vpop.f32.mrf.mxu0  ;;  %v10081_v62 = vld [vmem:[%s13141_s1 + $0x1d8] sm:$0xff]  ;;  %4656 = vmatpush.bf16.msra.mxu0 %v10077_v53  ;;  %v4802_v53 = vld [vmem:[%s10508_s16 + $0x2c] sm:$0xf] }
 0x219   : > { %v2991_v23 = vpop.f32.mrf.mxu3  ;;  %v2883_v41 = vadd.f32 %v2866_v43, %v2738_v18  ;;  %v2724_v33 = vpop.f32.mrf.mxu1  ;;  %v2614_v48 = vadd.f32 %v2599_v1, %v11641_v56  ;;  %v4162_v56 = vshll.u32 %v4039_v11, 16  ;;  %v4041_v18 = vrot.slane %v11790_v9, 1 }
 0x21b   : > { %v11893_v29 = vadd.f32 %v2991_v23, %v2883_v41  ;;  %v2739_v25 = vadd.f32 %v2724_v33, %v2614_v48  ;;  %3708 = vmatmul.bf16.gmra.mxu0 %v3637_v12  ;;  %v4164_v17 = vrot.slane %v4162_v56, 2  ;;  %v4042_v33 = vsel %vm474_vm1, %v4040_v49, %v4041_v18  ;;  %v10094_v48 = vld [vmem:[%s13141_s1 + $0x228] sm:$0xff]  ;;  %4506 = vmatpush.bf16.msra.mxu3 %v10066_v0  ;;  %v10074_v0 = vld [vmem:[%s13141_s1 + $0x1a0] sm:$0xff] }
 0x21c   : > { %3923 = vmatmul.bf16.gmra.mxu1 %v3841_v8  ;;  %v4298_v12 = vsel %vm746_vm3, %v4296_v42, %v4297_v15  ;;  %4940 = vmatpush.bf16.msra.mxu2 %v10094_v48  ;;  %v4171_v56 = vrot.slane %v3838_v32, 2  ;;  %v4043_v32 = vrot.slane %v11772_v36, 1  ;;  %v10092_v36 = vld [vmem:[%s13141_s1 + $0x218] sm:$0xff]  ;;  %v4174_v15 = vrot.slane %v3850_v54, 1  ;;  %v10075_v54 = vld [vmem:[%s13141_s1 + $0x1a8] sm:$0xff] }
 0x21d   : > { %4014 = vmatmul.bf16.gmra.mxu2 %v11794_v51  ;;  %v4165_v16 = vor.u32 %v4164_v17, %v4161_v4 }
 0x21e   : > { %3933 = vmatmul.bf16.gmra.mxu3 %v3857_v57  ;;  %v4172_v20 = vor.u32 %v4171_v56, %v4170_v26  ;;  %v4044_v50 = vsel %vm474_vm1, %v4041_v18, %v4043_v32 }
 0x21f   : > { %v4169_v41 = vsel %vm600_vm2, %v4165_v16, %v4168_v21  ;;  %4507 = vmatpush.bf16.msra.mxu3 %v10065_v6  ;;  %v10090_v6 = vld [vmem:[%s13141_s1 + $0x208] sm:$0xff] }
 0x220   : > { %v2869_v35 = vpop.f32.mrf.mxu2  ;;  %v2601_v38 = vpop.f32.mrf.mxu0  ;;  %4941 = vmatpush.bf16.msra.mxu2 %v10093_v34  ;;  %v4173_v22 = vsel %vm600_vm2, %v4168_v21, %v4172_v20  ;;  %v10076_v21 = vld [vmem:[%s13141_s1 + $0x1b0] sm:$0xff] }
 0x221   : > { %v2994_v27 = vpop.f32.mrf.mxu3  ;;  %v2884_v19 = vadd.f32 %v2869_v35, %v2739_v25  ;;  %v2726_v7 = vpop.f32.mrf.mxu1  ;;  %v2615_v45 = vadd.f32 %v2601_v38, %v11673_v30  ;;  %v3638_v30 = vrot.slane %v11625_v3, 2  ;;  %v10082_v35 = vld [vmem:[%s13141_s1 + $0x1e0] sm:$0xff]  ;;  %4657 = vmatpush.bf16.msra.mxu0 %v10076_v21  ;;  %v4047_v21 = vrot.slane %v11863_v13, 1 }
 0x223   : > { %v11910_v47 = vadd.f32 %v2994_v27, %v2884_v19  ;;  %v2740_v5 = vadd.f32 %v2726_v7, %v2615_v45  ;;  %v3639_v3 = vsel %vm746_vm3, %v3636_v55, %v3638_v30  ;;  %v3640_v27 = vrot.slane %v11671_v10, 2  ;;  %v10089_v10 = vld [vmem:[%s13141_s1 + $0x200] sm:$0xff] }
 0x224   : > { %4942 = vmatpush.bf16.msra.mxu2 %v10092_v36  ;;  %v10078_v36 = vld [vmem:[%s13141_s1 + $0x1c0] sm:$0xff] }
 0x225   : > { %v3641_v17 = vsel %vm746_vm3, %v3638_v30, %v3640_v27  ;;  %4658 = vmatpush.bf16.msra.mxu0 %v10075_v54 }
 0x228   : > { %v2871_v14 = vpop.f32.mrf.mxu2  ;;  %v2604_v43 = vpop.f32.mrf.mxu0 }
 0x229   : > { %v2996_v58 = vpop.f32.mrf.mxu3  ;;  %v2885_v31 = vadd.f32 %v2871_v14, %v2740_v5  ;;  %v2729_v23 = vpop.f32.mrf.mxu1  ;;  %v2616_v1 = vadd.f32 %v2604_v43, %v11689_v46  ;;  %v10083_v46 = vld [vmem:[%s13141_s1 + $0x1e8] sm:$0xff]  ;;  %v4175_v14 = vrot.slane %v3846_v63, 2  ;;  %4659 = vmatpush.bf16.msra.mxu0 %v10074_v0  ;;  %v10112_v0 = vld [vmem:[%s13141_s1 + $0x2b8] sm:$0xff] }
 0x22a   : > { %4767 = vmatpush.bf16.msra.mxu1 %v10083_v46  ;;  %v10062_v46 = vld [vmem:[%s13141_s1 + $0x140] sm:$0xff] }
 0x22b   : > { %v11931_v8 = vadd.f32 %v2996_v58, %v2885_v31  ;;  %v2741_v57 = vadd.f32 %v2729_v23, %v2616_v1  ;;  %3713 = vmatmul.bf16.gmra.mxu0 %v3639_v3  ;;  %v4138_v31 = vld [vmem:[%s10508_s16 + $0x44] sm:$0x3]  ;;  %v10091_v23 = vld [vmem:[%s13141_s1 + $0x210] sm:$0xff]  ;;  %v12002_v63 = vor.u32 %v4175_v14, %v4174_v15 }
 0x22c   : > { %4247 = vmatmul.bf16.vlgmr.msrb.gmra.mxu1 %v4169_v41  ;;  %v10063_v41 = vld [vmem:[%s13141_s1 + $0x148] sm:$0xff]  ;;  %v4156_v1 = vunpack.c.l.b16 %v4138_v31  ;;  %4943 = vmatpush.bf16.msra.mxu2 %v10091_v23 }
 0x22d   : > { %4365 = vmatmul.bf16.vlgmr.msrb.gmra.mxu2 %v4298_v12  ;;  %v4301_v12 = vrot.slane %v11794_v51, 2 }
 0x22e   : > { %4109 = vmatmul.bf16.vlgmr.msrb.gmra.mxu3 %v4042_v33  ;;  %4768 = vmatpush.bf16.msra.mxu1 %v10082_v35  ;;  %v4045_v33 = vrot.slane %v11794_v51, 1 }
 0x22f   : > { %v4302_v34 = vsel %vm746_vm3, %v4299_v60, %v4301_v12 }
 0x230   : > { %v2874_v55 = vpop.f32.mrf.mxu2  ;;  %v2606_v44 = vpop.f32.mrf.mxu0  ;;  %v4046_v56 = vsel %vm474_vm1, %v4043_v32, %v4045_v33  ;;  %4944 = vmatpush.bf16.msra.mxu2 %v10090_v6  ;;  %v4048_v54 = vsel %vm474_vm1, %v4045_v33, %v4047_v21  ;;  %v12094_v6 = vld [vmem:[%s10508_s16 + $0x30] sm:$0xff]  }
 0x231   : > { %v2999_v28 = vpop.f32.mrf.mxu3  ;;  %v2886_v11 = vadd.f32 %v2874_v55, %v2741_v57  ;;  %v2731_v25 = vpop.f32.mrf.mxu1  ;;  %v4177_v44 = vsel %vm600_vm2, %v4172_v20, %v12002_v63 }
 0x232   : > { %4769 = vmatpush.bf16.msra.mxu1 %v10081_v62  ;;  %v4157_v25 = vpack.c.b16 %v4156_v1, %v4156_v1  ;;  %v10071_v62 = vld [vmem:[%s13141_s1 + $0x188] sm:$0xff] }
 0x233   : > { %v11946_v24 = vadd.f32 %v2999_v28, %v2886_v11  ;;  %v4394_v1 = vld [vmem:[%s10508_s16 + $0x28] sm:$0x8] }
 0x234   : > { %v4179_v32 = vshrl.u32 %v4157_v25, 16  ;;  %v4182_v60 = vshll.u32 %v4157_v25, 16  ;;  %4945 = vmatpush.bf16.msra.mxu2 %v10089_v10  ;;  %v4428_v51 = vunpack.c.l.b16 %v4394_v1  ;;  %v10102_v10 = vld [vmem:[%s13141_s1 + $0x268] sm:$0xff] }
 0x238   : > { %v2876_v19 = vpop.f32.mrf.mxu2  ;;  %v3123_v7 = vpop.f32.mrf.mxu0 }
 0x239   : > { %v3001_v38 = vpop.f32.mrf.mxu3  ;;  %v3309_v4 = vpop.f32.mrf.mxu1  ;;  %v3147_v45 = vadd.f32 %v3123_v7, %v11745_v2  ;;  %v10064_v2 = vld [vmem:[%s13141_s1 + $0x150] sm:$0xff]  ;;  %v10079_v19 = vld [vmem:[%s13141_s1 + $0x1c8] sm:$0xff] }
 0x23a   : > { %4508 = vmatpush.bf16.msra.mxu3 %v10064_v2  ;;  %v10072_v7 = vld [vmem:[%s13141_s1 + $0x190] sm:$0xff] }
 0x23b   : > { %v3333_v5 = vadd.f32 %v3309_v4, %v3147_v45  ;;  %3718 = vmatmul.bf16.gmra.mxu0 %v3641_v17  ;;  %v4181_v45 = vrot.slane %v4179_v32, 1 }
 0x23c   : > { %4252 = vmatmul.bf16.gmra.mxu1 %v4173_v22 }
 0x23d   : > { %4370 = vmatmul.bf16.gmra.mxu2 %v4300_v39 }
 0x23e   : > { %4114 = vmatmul.bf16.gmra.mxu3 %v4044_v50  ;;  %v4184_v50 = vrot.slane %v4182_v60, 2 }
 0x23f   : > { %4509 = vmatpush.bf16.msra.mxu3 %v10063_v41 }
 0x240   : > { %v3434_v30 = vpop.f32.mrf.mxu2  ;;  %v3125_v18 = vpop.f32.mrf.mxu0 }
 0x241   : > { %v3579_v16 = vpop.f32.mrf.mxu3  ;;  %v3458_v49 = vadd.f32 %v3434_v30, %v3333_v5  ;;  %v3311_v42 = vpop.f32.mrf.mxu1  ;;  %v3148_v58 = vadd.f32 %v3125_v18, %v11774_v37  ;;  %v10080_v37 = vld [vmem:[%s13141_s1 + $0x1d0] sm:$0xff]  ;;  %v10104_v30 = vld [vmem:[%s13141_s1 + $0x278] sm:$0xff]  ;;  %v4836_v18 = vunpack.c.l.b16 %v4802_v53 }
 0x242   : > { %4770 = vmatpush.bf16.msra.mxu1 %v10080_v37 }
 0x243   : > { %v11988_v43 = vadd.f32 %v3579_v16, %v3458_v49  ;;  %v3334_v3 = vadd.f32 %v3311_v42, %v3148_v58  ;;  %4510 = vmatpush.bf16.msra.mxu3 %v10062_v46  ;;  %v12054_v16 = vld [vmem:[%s10508_s16 + $0x2c] sm:$0xff]   ;;  %v4303_v49 = vrot.slane %v4157_v25, 2  ;;  %v10070_v58 = vld [vmem:[%s13141_s1 + $0x180] sm:$0xff]  ;;  %v10120_v46 = vld [vmem:[%s13141_s1 + $0x2f8] sm:$0xff] }
 0x244   : > { %v4837_v42 = vunpack.c.h.b16 %v12054_v16  ;;  %v4429_v33 = vunpack.c.l.b16 %v12054_v16 }
 0x245   : > { %v4304_v37 = vsel %vm746_vm3, %v4301_v12, %v4303_v49  ;;  %v10103_v12 = vld [vmem:[%s13141_s1 + $0x270] sm:$0xff] }
 0x246   : > { %4771 = vmatpush.bf16.msra.mxu1 %v10079_v19  ;;  %v10127_v19 = vld [vmem:[%s13141_s1 + $0x330] sm:$0xff] }
 0x247   : > { %5056 = vmatpush.bf16.msrb.mxu3 %v10104_v30 }
 0x248   : > { %v3436_v48 = vpop.f32.mrf.mxu2  ;;  %v3128_v28 = vpop.f32.mrf.mxu0 }
 0x249   : > { %v3581_v57 = vpop.f32.mrf.mxu3  ;;  %v3459_v55 = vadd.f32 %v3436_v48, %v3334_v3  ;;  %v3314_v11 = vpop.f32.mrf.mxu1  ;;  %v3149_v26 = vadd.f32 %v3128_v28, %v11818_v52  ;;  %v10073_v52 = vld [vmem:[%s13141_s1 + $0x198] sm:$0xff]  ;;  %v4845_v48 = vpack.c.b16 %v4837_v42, %v4836_v18 }
 0x24a   : > { %4660 = vmatpush.bf16.msra.mxu0 %v10073_v52  ;;  %4772 = vmatpush.bf16.msra.mxu1 %v10078_v36 }
 0x24b   : > { %v12024_v35 = vadd.f32 %v3581_v57, %v3459_v55  ;;  %v3335_v20 = vadd.f32 %v3314_v11, %v3149_v26  ;;  %3723 = vmatmul.bf16.gmra.mxu0 %v3640_v27  ;;  %v4853_v55 = vshll.u32 %v4845_v48, 16  ;;  %5057 = vmatpush.bf16.msrb.mxu3 %v10103_v12 }
 0x24c   : > { %4257 = vmatmul.bf16.gmra.mxu1 %v4177_v44 }
 0x24d   : > { %4375 = vmatmul.bf16.gmra.mxu2 %v4302_v34  ;;  %v4855_v52 = vrot.slane %v4853_v55, 1 }
 0x24e   : > { %4119 = vmatmul.bf16.gmra.mxu3 %v4046_v56  ;;  %4661 = vmatpush.bf16.msra.mxu0 %v10072_v7  ;;  %v4437_v56 = vpack.c.b16 %v4429_v33, %v4428_v51  ;;  %v10119_v7 = vld [vmem:[%s13141_s1 + $0x2f0] sm:$0xff] }
 0x24f   : > { %5355 = vmatpush.bf16.msrb.mxu1 %v10120_v46  ;;  %5058 = vmatpush.bf16.msrb.mxu3 %v10102_v10 }
 0x250   : > { %v3439_v27 = vpop.f32.mrf.mxu2  ;;  %v3130_v17 = vpop.f32.mrf.mxu0 }
 0x251   : > { %v3584_v38 = vpop.f32.mrf.mxu3  ;;  %v3460_v4 = vadd.f32 %v3439_v27, %v3335_v20  ;;  %v3316_v22 = vpop.f32.mrf.mxu1  ;;  %v3150_v39 = vadd.f32 %v3130_v17, %v11854_v61  ;;  %v4185_v61 = vor.u32 %v4184_v50, %v4181_v45  ;;  %v4851_v20 = vshrl.u32 %v4845_v48, 16 }
 0x252   : > { %4662 = vmatpush.bf16.msra.mxu0 %v10071_v62  ;;  %v4443_v17 = vrot.slane %v12094_v6, 3 }
 0x253   : > { %v12044_v5 = vadd.f32 %v3584_v38, %v3460_v4  ;;  %v3336_v2 = vadd.f32 %v3316_v22, %v3150_v39  ;;  %v4186_v41 = vsel %vm600_vm2, %v12002_v63, %v4185_v61  ;;  %v10277_v38 = vunpack.c.l.b16 %v12094_v6  ;;  %5356 = vmatpush.bf16.msrb.mxu1 %v10119_v7 }
 0x254   : > { %v4442_v4 = vrot.slane %v4437_v56, 3  ;;  %v4856_v22 = vor.u32 %v4855_v52, %v4851_v20  ;;  %v10383_v20 = vld [vmem:[%s10508_s16 + $0x34] sm:$0xff]  }
 0x255   : > { %v4709_v36 = vpack.c.b16 %v10277_v38, %v4429_v33 }
 0x256   : > { %4663 = vmatpush.bf16.msra.mxu0 %v10070_v58  ;;  %v4444_v61 = vsel %vm903_vm4, %v4442_v4, %v4443_v17  ;;  %v4569_v58 = vshrl.u32 %v12094_v6, 16 }
 0x258   : > { %v3441_v15 = vpop.f32.mrf.mxu2  ;;  %v3133_v23 = vpop.f32.mrf.mxu0  ;;  %v4571_v51 = vrot.slane %v4569_v58, 3 }
 0x259   : > { %v3586_v14 = vpop.f32.mrf.mxu3  ;;  %v3461_v31 = vadd.f32 %v3441_v15, %v3336_v2  ;;  %v3319_v3 = vpop.f32.mrf.mxu1  ;;  %v3151_v13 = vadd.f32 %v3133_v23, %v11872_v40  ;;  %v10128_v40 = vld [vmem:[%s13141_s1 + $0x338] sm:$0xff]  ;;  %v4561_v15 = vshrl.u32 %v4437_v56, 16 }
 0x25a   : > { %5473 = vmatpush.bf16.msrb.mxu2 %v10128_v40  ;;  %v12122_v23 = vld [vmem:[%s10508_s16 + $0x3c] sm:$0xff] }
 0x25b   : > { %v12073_v57 = vadd.f32 %v3586_v14, %v3461_v31  ;;  %v3337_v63 = vadd.f32 %v3319_v3, %v3151_v13  ;;  %3999 = vmatmul.bf16.vlgmr.msrb.gmra.mxu0 %v11743_v59  ;;  %v12090_v59 = vld [vmem:[%s10508_s16 + $0x34] sm:$0xff]  ;;  %v4564_v14 = vshll.u32 %v4437_v56, 16  ;;  %v4572_v31 = vshll.u32 %v12094_v6, 16  ;;  %v10101_v3 = vld [vmem:[%s13141_s1 + $0x260] sm:$0xff] }
 0x25c   : > { %4262 = vmatmul.bf16.gmra.mxu1 %v4186_v41  ;;  %5202 = vmatpush.bf16.msrb.mxu0 %v10112_v0  ;;  %v4858_v32 = vshll.u32 %v12090_v59, 16  ;;  %v10118_v41 = vld [vmem:[%s13141_s1 + $0x2e8] sm:$0xff]  ;;  %v4862_v0 = vshrl.u32 %v12090_v59, 16  ;;  %v4866_v46 = vshll.u32 %v12122_v23, 16 }
 0x25d   : > { %4380 = vmatmul.bf16.gmra.mxu2 %v4304_v37  ;;  %v4563_v37 = vrot.slane %v4561_v15, 3  ;;  %5059 = vmatpush.bf16.msrb.mxu3 %v10101_v3  ;;  %v4574_v33 = vrot.slane %v4572_v31, 4  ;;  %v12185_v31 = vld [vmem:[%s10508_s16 + $0x40] sm:$0xff]  }
 0x25e   : > { %4124 = vmatmul.bf16.gmra.mxu3 %v4048_v54  ;;  %5474 = vmatpush.bf16.msrb.mxu2 %v10127_v19  ;;  %v4860_v45 = vrot.slane %v4858_v32, 1 }
 0x25f   : > { %5357 = vmatpush.bf16.msrb.mxu1 %v10118_v41  ;;  %v12196_v41 = vrot.slane %v12185_v31, 3 }
 0x260   : > { %v3444_v28 = vpop.f32.mrf.mxu2  ;;  %v3135_v25 = vpop.f32.mrf.mxu0  ;;  %v4861_v21 = vsel %vm240_vm0, %v4856_v22, %v4860_v45  ;;  %v4864_v56 = vor.u32 %v4862_v0, %v4860_v45  ;;  %v12160_v45 = vld [vmem:[%s10508_s16 + $0x44] sm:$0xff] }
 0x261   : > { %v3589_v11 = vpop.f32.mrf.mxu3  ;;  %v3462_v44 = vadd.f32 %v3444_v28, %v3337_v63  ;;  %v3321_v26 = vpop.f32.mrf.mxu1  ;;  %v3152_v34 = vadd.f32 %v3135_v25, %v11893_v29  ;;  %v10111_v29 = vld [vmem:[%s13141_s1 + $0x2b0] sm:$0xff]  ;;  %v4566_v63 = vrot.slane %v4564_v14, 4  ;;  %v12142_v28 = vld [vmem:[%s10508_s16 + $0x38] sm:$0xff]   ;;  %v12144_v25 = vor.u32 %v4574_v33, %v4571_v51  ;;  %v12212_v51 = vld [vmem:[%s13142_s2] ss:$0 sm:$0xff] }
 0x262   : > { %5203 = vmatpush.bf16.msrb.mxu0 %v10111_v29  ;;  %v4578_v22 = vshrl.u32 %v12142_v28, 16  ;;  %v4870_v14 = vshrl.u32 %v12122_v23, 16  ;;  %v4874_v58 = vshll.u32 %v12160_v45, 16  ;;  %v4810_v33 = vld [vmem:[%s10508_s16 + $0x4c] sm:$0x1] }
 0x263   : > { %v12097_v60 = vadd.f32 %v3589_v11, %v3462_v44  ;;  %v3338_v27 = vadd.f32 %v3321_v26, %v3152_v34  ;;  %v4567_v44 = vor.u32 %v4566_v63, %v4563_v37  ;;  %v12147_v26 = vrot.slane %v12142_v28, 3 }
 0x264   : > { %v4868_v34 = vrot.slane %v4866_v46, 1  ;;  %v12200_v37 = vrot.slane %v4874_v58, 1  ;;  %v10384_v46 = vld [vmem:[%s10508_s16 + $0x3c] sm:$0xff]   ;;  %v4844_v16 = vunpack.c.l.b16 %v4810_v33  ;;  %v4540_v58 = vld [vmem:[%s10508_s16 + $0x48] sm:$0xf]  ;;  %v10286_v33 = vunpack.c.h.b16 %v12185_v31 }
 0x265   : > { %v4576_v10 = vsel %vm1029_vm5, %v4567_v44, %v12144_v25  ;;  %v10097_v44 = vld [vmem:[%s13141_s1 + $0x240] sm:$0xff] }
 0x266   : > { %v4869_v38 = vsel %vm240_vm0, %v4864_v56, %v4868_v34 }
 0x268   : > { %v3446_v50 = vpop.f32.mrf.mxu2  ;;  %v3138_v2 = vpop.f32.mrf.mxu0 }
 0x269   : > { %v3591_v39 = vpop.f32.mrf.mxu3  ;;  %v3463_v53 = vadd.f32 %v3446_v50, %v3338_v27  ;;  %v3324_v62 = vpop.f32.mrf.mxu1  ;;  %v3153_v30 = vadd.f32 %v3138_v2, %v11910_v47  ;;  %v10126_v47 = vld [vmem:[%s13141_s1 + $0x328] sm:$0xff]  ;;  %v4446_v27 = vsel %vm903_vm4, %v4443_v17, %v12147_v26  ;;  %v10100_v50 = vld [vmem:[%s13141_s1 + $0x258] sm:$0xff]  ;;  %v10125_v17 = vld [vmem:[%s13141_s1 + $0x320] sm:$0xff] }
 0x26a   : > { %5475 = vmatpush.bf16.msrb.mxu2 %v10126_v47  ;;  %5060 = vmatpush.bf16.msrb.mxu3 %v10100_v50  ;;  %v10124_v47 = vld [vmem:[%s13141_s1 + $0x318] sm:$0xff] }
 0x26b   : > { %v12116_v49 = vadd.f32 %v3591_v39, %v3463_v53  ;;  %v3339_v18 = vadd.f32 %v3324_v62, %v3153_v30  ;;  %4004 = vmatmul.bf16.gmra.mxu0 %v11790_v9  ;;  %v10110_v9 = vld [vmem:[%s13141_s1 + $0x2a8] sm:$0xff]  ;;  %v10109_v39 = vld [vmem:[%s13141_s1 + $0x2a0] sm:$0xff]  ;;  %v4580_v62 = vrot.slane %v4578_v22, 3  ;;  %v10099_v30 = vld [vmem:[%s13141_s1 + $0x250] sm:$0xff] }
 0x26c   : > { %4773 = vmatmul.bf16.vlgmr.msra.gmra.mxu1 %v4709_v36  ;;  %5204 = vmatpush.bf16.msrb.mxu0 %v10110_v9  ;;  %v10117_v36 = vld [vmem:[%s13141_s1 + $0x2e0] sm:$0xff]  ;;  %v10098_v9 = vld [vmem:[%s13141_s1 + $0x248] sm:$0xff] }
 0x26d   : > { %4946 = vmatmul.bf16.vlgmr.msra.gmra.mxu2 %v4861_v21  ;;  %5358 = vmatpush.bf16.msrb.mxu1 %v10117_v36  ;;  %v10121_v36 = vld [vmem:[%s13141_s1 + $0x300] sm:$0xff] }
 0x26e   : > { %4511 = vmatmul.bf16.vlgmr.msra.gmra.mxu3 %v4444_v61  ;;  %5476 = vmatpush.bf16.msrb.mxu2 %v10125_v17  ;;  %v12256_v17 = vpack.c.b16 %v4844_v16, %v4844_v16 }
 0x26f   : > { %5061 = vmatpush.bf16.msrb.mxu3 %v10099_v30 }
 0x270   : > { %v3449_v13 = vpop.f32.mrf.mxu2  ;;  %v3140_v48 = vpop.f32.mrf.mxu0  ;;  %5205 = vmatpush.bf16.msrb.mxu0 %v10109_v39  ;;  %v10114_v39 = vld [vmem:[%s13141_s1 + $0x2c8] sm:$0xff] }
 0x271   : > { %v3594_v54 = vpop.f32.mrf.mxu3  ;;  %v3464_v1 = vadd.f32 %v3449_v13, %v3339_v18  ;;  %v3326_v40 = vpop.f32.mrf.mxu1  ;;  %v3154_v12 = vadd.f32 %v3140_v48, %v11931_v8  ;;  %v10116_v48 = vld [vmem:[%s13141_s1 + $0x2d8] sm:$0xff] }
 0x272   : > { %5477 = vmatpush.bf16.msrb.mxu2 %v10124_v47  ;;  %5359 = vmatpush.bf16.msrb.mxu1 %v10116_v48  ;;  %v10113_v48 = vld [vmem:[%s13141_s1 + $0x2c0] sm:$0xff] }
 0x273   : > { %v12139_v55 = vadd.f32 %v3594_v54, %v3464_v1  ;;  %v3340_v11 = vadd.f32 %v3326_v40, %v3154_v12  ;;  %v4872_v54 = vor.u32 %v4870_v14, %v4868_v34  ;;  %v4975_v1 = vld [vmem:[%s10508_s16 + $0x2c] sm:$0xe]  ;;  %v10123_v40 = vld [vmem:[%s13141_s1 + $0x310] sm:$0xff]  ;;  %5062 = vmatpush.bf16.msrb.mxu3 %v10098_v9  ;;  %v4878_v14 = vshrl.u32 %v12160_v45, 16 }
 0x274   : > { %v4993_v63 = vunpack.c.l.b16 %v4975_v1  ;;  %v5094_v1 = vld [vmem:[%s10508_s16 + $0x34] sm:$0xf] }
 0x276   : > { %5478 = vmatpush.bf16.msrb.mxu2 %v10123_v40  ;;  %v4994_v56 = vpack.c.b16 %v4837_v42, %v4993_v63  ;;  %v10115_v42 = vld [vmem:[%s13141_s1 + $0x2d0] sm:$0xff] }
 0x277   : > { %5063 = vmatpush.bf16.msrb.mxu3 %v10097_v44  ;;  %5360 = vmatpush.bf16.msrb.mxu1 %v10115_v42  ;;  %v5093_v40 = vld [vmem:[%s10508_s16 + $0x30] sm:$0xc] }
 0x278   : > { %v3451_v6 = vpop.f32.mrf.mxu2  ;;  %v3143_v32 = vpop.f32.mrf.mxu0 }
 0x279   : > { %v3596_v8 = vpop.f32.mrf.mxu3  ;;  %v3465_v52 = vadd.f32 %v3451_v6, %v3340_v11  ;;  %v3329_v19 = vpop.f32.mrf.mxu1  ;;  %v3155_v29 = vadd.f32 %v3143_v32, %v11946_v24  ;;  %v4581_v24 = vshll.u32 %v12142_v28, 16  ;;  %v10108_v11 = vld [vmem:[%s13141_s1 + $0x298] sm:$0xff]  ;;  %v12227_v6 = vsel %vm903_vm4, %v12147_v26, %v12196_v41 }
 0x27a   : > { %5206 = vmatpush.bf16.msrb.mxu0 %v10108_v11  ;;  %v5127_v11 = vunpack.c.l.b16 %v5093_v40  ;;  %v5270_v40 = vrot.slane %v4578_v22, 2 }
 0x27b   : > { %v12156_v7 = vadd.f32 %v3596_v8, %v3465_v52  ;;  %v3341_v4 = vadd.f32 %v3329_v19, %v3155_v29  ;;  %4664 = vmatmul.bf16.vlgmr.msra.gmra.mxu0 %v4576_v10  ;;  %v4583_v15 = vrot.slane %v4581_v24, 4  ;;  %v4877_v52 = vsel %vm240_vm0, %v4872_v54, %v12200_v37  ;;  %v10122_v19 = vld [vmem:[%s13141_s1 + $0x308] sm:$0xff]  ;;  %5361 = vmatpush.bf16.msrb.mxu1 %v10114_v39 }
 0x27c   : > { %4778 = vmatmul.bf16.gmra.mxu1 %v10383_v20  ;;  %v4995_v10 = vrot.slane %v4994_v56, 1  ;;  %v4402_v29 = vld [vmem:[%s10508_s16 + $0x48] sm:$0x7]  ;;  %5479 = vmatpush.bf16.msrb.mxu2 %v10122_v19  ;;  %v4882_v54 = vshll.u32 %v12256_v17, 16  ;;  %v4880_v56 = vor.u32 %v4878_v14, %v12200_v37 }
 0x27d   : > { %4951 = vmatmul.bf16.gmra.mxu2 %v4869_v38  ;;  %v12198_v13 = vor.u32 %v4583_v15, %v4580_v62  ;;  %v4587_v38 = vshrl.u32 %v12185_v31, 16  ;;  %v4436_v50 = vunpack.c.l.b16 %v4402_v29  ;;  %v10107_v62 = vld [vmem:[%s13141_s1 + $0x290] sm:$0xff] }
 0x27e   : > { %4516 = vmatmul.bf16.gmra.mxu3 %v4446_v27  ;;  %5207 = vmatpush.bf16.msrb.mxu0 %v10107_v62  ;;  %v4998_v62 = vrot.slane %v12122_v23, 1 }
 0x27f   : > { %v4585_v8 = vsel %vm1029_vm5, %v12144_v25, %v12198_v13  ;;  %v4996_v25 = vrot.slane %v12090_v59, 1  ;;  %v4441_v9 = vpack.c.b16 %v4436_v50, %v4436_v50  ;;  %5362 = vmatpush.bf16.msrb.mxu1 %v10113_v48 }
 0x280   : > { %v3454_v53 = vpop.f32.mrf.mxu2  ;;  %v3145_v21 = vpop.f32.mrf.mxu0  ;;  %5480 = vmatpush.bf16.msrb.mxu2 %v10121_v36 }
 0x281   : > { %v3599_v2 = vpop.f32.mrf.mxu3  ;;  %v3466_v61 = vadd.f32 %v3454_v53, %v3341_v4  ;;  %v3331_v18 = vpop.f32.mrf.mxu1  ;;  %v4590_v4 = vshll.u32 %v12185_v31, 16  ;;  %v4449_v44 = vrot.slane %v4441_v9, 3 }
 0x282   : > { %v4589_v18 = vrot.slane %v4587_v38, 3 }
 0x283   : > { %v12190_v3 = vadd.f32 %v3599_v2, %v3466_v61  ;;  %v4592_v15 = vrot.slane %v4590_v4, 4 }
 0x288   : > { %v3456_v12 = vpop.f32.mrf.mxu2  ;;  %v3704_v34 = vpop.f32.mrf.mxu0 }
 0x289   : > { %v3601_v0 = vpop.f32.mrf.mxu3  ;;  %v12232_v20 = vpop.f32.mrf.mxu1  ;;  %v3728_v32 = vadd.f32 %v3704_v34, %v11988_v43  ;;  %v12251_v43 = vsel %vm474_vm1, %v4995_v10, %v4996_v25  ;;  %v4558_v12 = vunpack.c.l.b16 %v4540_v58  ;;  %v4884_v34 = vrot.slane %v4882_v54, 1 }
 0x28a   : > { %v12289_v0 = vor.u32 %v4592_v15, %v4589_v18 }
 0x28b   : > { %v12246_v27 = vadd.f32 %v12212_v51, %v3728_v32  ;;  %4669 = vmatmul.bf16.gmra.mxu0 %v4585_v8  ;;  %v10105_v8 = vld [vmem:[%s13141_s1 + $0x280] sm:$0xff]  ;;  %v4559_v42 = vpack.c.b16 %v4558_v12, %v4558_v12  ;;  %v4712_v19 = vpack.c.b16 %v4558_v12, %v10286_v33 }
 0x28c   : > { %4783 = vmatmul.bf16.gmra.mxu1 %v10384_v46  ;;  %v12291_v46 = vunpack.c.l.b16 %v5094_v1  ;;  %v12305_v29 = vsel %vm1029_vm5, %v12198_v13, %v12289_v0 }
 0x28d   : > { %4956 = vmatmul.bf16.gmra.mxu2 %v4877_v52  ;;  %v10136_v52 = vld [vmem:[%s13141_s1 + $0x378] sm:$0xff]  ;;  %v4596_v15 = vshrl.u32 %v4559_v42, 16  ;;  %v4599_v14 = vshll.u32 %v4559_v42, 16 }
 0x28e   : > { %4521 = vmatmul.bf16.gmra.mxu3 %v12227_v6  ;;  %v12310_v39 = vpack.c.b16 %v12291_v46, %v5127_v11 }
 0x28f   : > { %5611 = vmatpush.bf16.msra.mxu3 %v10136_v52  ;;  %v4598_v1 = vrot.slane %v4596_v15, 3  ;;  %v4601_v48 = vrot.slane %v4599_v14, 4 }
 0x290   : > { %v4010_v2 = vpop.f32.mrf.mxu2  ;;  %v3706_v61 = vpop.f32.mrf.mxu0  ;;  %v5260_v58 = vshrl.u32 %v12310_v39, 16 }
 0x291   : > { %v3929_v53 = vpop.f32.mrf.mxu3  ;;  %v12269_v21 = vpop.f32.mrf.mxu1  ;;  %v3729_v47 = vadd.f32 %v3706_v61, %v12024_v35  ;;  %v10106_v35 = vld [vmem:[%s13141_s1 + $0x288] sm:$0xff]  ;;  %v5392_v61 = vld [vmem:[%s10508_s16 + $0x30] sm:$0x8] }
 0x292   : > { %v12267_v30 = vadd.f32 %v4010_v2, %v3929_v53  ;;  %5208 = vmatpush.bf16.msrb.mxu0 %v10106_v35  ;;  %v4450_v53 = vsel %vm903_vm4, %v12196_v41, %v4449_v44  ;;  %v4885_v2 = vsel %vm240_vm0, %v4880_v56, %v4884_v34  ;;  %v5410_v23 = vunpack.c.l.b16 %v5392_v61 }
 0x293   : > { %v3741_v63 = vadd.f32 %v12212_v51, %v3729_v47  ;;  %v5263_v47 = vshll.u32 %v12310_v39, 16  ;;  %v5262_v33 = vrot.slane %v5260_v58, 2  ;;  %v5273_v35 = vrot.slane %v4581_v24, 3 }
 0x294   : > { %v12337_v44 = vpack.c.b16 %v12291_v46, %v5410_v23  ;;  %v4602_v34 = vor.u32 %v4601_v48, %v4598_v1  ;;  %v5000_v61 = vrot.slane %v12160_v45, 1  ;;  %v5279_v48 = vrot.slane %v4587_v38, 2  ;;  %v10134_v38 = vld [vmem:[%s13141_s1 + $0x368] sm:$0xff]  ;;  %v10160_v45 = vld [vmem:[%s13141_s1 + $0x420] sm:$0xff] }
 0x295   : > { %3750 = vst [vmem:[#allocation2 + $0x8] sm:$0xff] %v3741_v63  ;;  %v5265_v12 = vrot.slane %v5263_v47, 3  ;;  %v12340_v22 = vor.u32 %v5273_v35, %v5270_v40 }
 0x296   : > { %5209 = vmatpush.bf16.msrb.mxu0 %v10105_v8  ;;  %v5412_v52 = vrot.slane %v12337_v44, 3  ;;  %v12360_v14 = vsel %vm474_vm1, %v4998_v62, %v5000_v61 }
 0x297   : > { %v5266_v8 = vor.u32 %v5265_v12, %v5262_v33  ;;  %v10163_v12 = vld [vmem:[%s13141_s1 + $0x438] sm:$0xff] }
 0x298   : > { %v4012_v16 = vpop.f32.mrf.mxu2  ;;  %v3709_v37 = vpop.f32.mrf.mxu0  ;;  %6019 = vmatpush.bf16.msra.mxu2 %v10163_v12  ;;  %v10152_v12 = vld [vmem:[%s13141_s1 + $0x3e0] sm:$0xff] }
 0x299   : > { %v3931_v32 = vpop.f32.mrf.mxu3  ;;  %v12307_v50 = vpop.f32.mrf.mxu1  ;;  %v3730_v36 = vadd.f32 %v3709_v37, %v12044_v5  ;;  %v12323_v5 = vsel %vm474_vm1, %v4996_v25, %v4998_v62 }
 0x29a   : > { %v12300_v10 = vadd.f32 %v4012_v16, %v3931_v32 }
 0x29b   : > { %v3742_v18 = vadd.f32 %v12212_v51, %v3730_v36  ;;  %4674 = vmatmul.bf16.gmra.mxu0 %v12305_v29  ;;  %v5275_v36 = vsel %vm1774_vm6, %v5266_v8, %v12340_v22  ;;  %v10155_v8 = vld [vmem:[%s13141_s1 + $0x3f8] sm:$0xff] }
 0x29c   : > { %4788 = vmatmul.bf16.gmra.mxu1 %v4712_v19  ;;  %v7127_v58 = vld [vmem:[#allocation2 + $0x8] sm:$0x7] }
 0x29d   : > { %4961 = vmatmul.bf16.gmra.mxu2 %v4885_v2  ;;  %3751 = vst [vmem:[#allocation2 + $0x10] sm:$0xff] %v3742_v18  ;;  %v5414_v2 = vsel %vm903_vm4, %v5412_v52, %v12147_v26  ;;  %v10162_v52 = vld [vmem:[%s13141_s1 + $0x430] sm:$0xff]  ;;  %5866 = vmatpush.bf16.msra.mxu1 %v10155_v8  ;;  %v10130_v8 = vld [vmem:[%s13141_s1 + $0x348] sm:$0xff] }
 0x29e   : > { %4526 = vmatmul.bf16.gmra.mxu3 %v4450_v53  ;;  %6020 = vmatpush.bf16.msra.mxu2 %v10162_v52 }
 0x2a0   : > { %v4015_v54 = vpop.f32.mrf.mxu2  ;;  %v3711_v59 = vpop.f32.mrf.mxu0 }
 0x2a1   : > { %v3934_v9 = vpop.f32.mrf.mxu3  ;;  %v12331_v25 = vpop.f32.mrf.mxu1  ;;  %v3731_v11 = vadd.f32 %v3711_v59, %v12073_v57  ;;  %v4603_v57 = vsel %vm1029_vm5, %v12289_v0, %v4602_v34 }
 0x2a2   : > { %v12329_v63 = vadd.f32 %v4015_v54, %v3934_v9  ;;  %v10135_v54 = vld [vmem:[%s13141_s1 + $0x370] sm:$0xff] }
 0x2a3   : > { %v3743_v56 = vadd.f32 %v12212_v51, %v3731_v11  ;;  %5612 = vmatpush.bf16.msra.mxu3 %v10135_v54  ;;  %v10153_v54 = vld [vmem:[%s13141_s1 + $0x3e8] sm:$0xff] }
 0x2a4   : > { %v7128_v42 = vld [vmem:[#allocation2 + $0xe] sm:$0xff] }
 0x2a5   : > { %3752 = vst [vmem:[#allocation2 + $0x18] sm:$0xff] %v3743_v56  ;;  %v7130_v18 = vmax.f32 %v12246_v27, %v7128_v42  ;;  %v5142_v56 = vrot.slane %v12142_v28, 2 }
 0x2a7   : > { %v7135_v26 = vrot.slane %v7130_v18, 1  ;;  %5613 = vmatpush.bf16.msra.mxu3 %v10134_v38  ;;  %v10140_v38 = vld [vmem:[%s13141_s1 + $0x398] sm:$0xff] }
 0x2a8   : > { %v4017_v16 = vpop.f32.mrf.mxu2  ;;  %v3714_v24 = vpop.f32.mrf.mxu0 }
 0x2a9   : > { %v3936_v32 = vpop.f32.mrf.mxu3  ;;  %v12347_v37 = vpop.f32.mrf.mxu1  ;;  %v3732_v53 = vadd.f32 %v3714_v24, %v12097_v60 }
 0x2aa   : > { %v12343_v19 = vadd.f32 %v4017_v16, %v3936_v32  ;;  %v10133_v32 = vld [vmem:[%s13141_s1 + $0x360] sm:$0xff] }
 0x2ab   : > { %v3744_v15 = vadd.f32 %v12212_v51, %v3732_v53  ;;  %4679 = vmatmul.bf16.gmra.mxu0 %v4603_v57  ;;  %5614 = vmatpush.bf16.msra.mxu3 %v10133_v32 }
 0x2ac   : > { %5363 = vmatmul.bf16.vlgmr.msrb.gmra.mxu1 %v5275_v36  ;;  %v7129_v47 = vld [vmem:[#allocation2 + $0x16] sm:$0x7] }
 0x2ad   : > { %5481 = vmatmul.bf16.vlgmr.msrb.gmra.mxu2 %v5414_v2  ;;  %v7131_v60 = vmax.f32 %v7127_v58, %v7129_v47  ;;  %3753 = vst [vmem:[#allocation2 + $0x20] sm:$0xff] %v3744_v15  ;;  %v10161_v15 = vld [vmem:[%s13141_s1 + $0x428] sm:$0xff]  ;;  %v5002_v47 = vrot.slane %v12256_v17, 1 }
 0x2ae   : > { %5064 = vmatmul.bf16.vlgmr.msrb.gmra.mxu3 %v12251_v43  ;;  %v5282_v43 = vrot.slane %v4590_v4, 3  ;;  %v5141_v4 = vrot.slane %v12310_v39, 2  ;;  %v10143_v39 = vld [vmem:[%s13141_s1 + $0x3b0] sm:$0xff]  ;;  %v12424_v58 = vld [vmem:[%s10508_s16 + $0x48] sm:$0xff]   ;;  %6021 = vmatpush.bf16.msra.mxu2 %v10161_v15  ;;  %v10151_v15 = vld [vmem:[%s13141_s1 + $0x3d8] sm:$0xff] }
 0x2af   : > { %v7136_v23 = vrot.slane %v7131_v60, 1  ;;  %v5286_v17 = vshrl.u32 %v12424_v58, 16 }
 0x2b0   : > { %v12365_v27 = vpop.f32.mrf.mxu2  ;;  %v3716_v1 = vpop.f32.mrf.mxu0  ;;  %v12390_v34 = vor.u32 %v5282_v43, %v5279_v48  ;;  %v5143_v57 = vsel %vm746_vm3, %v5141_v4, %v5142_v56 }
 0x2b1   : > { %v12363_v9 = vpop.f32.mrf.mxu3  ;;  %v12370_v62 = vpop.f32.mrf.mxu1  ;;  %v7137_v40 = vsel %vm474_vm1, %v7135_v26, %v7136_v23  ;;  %v7141_v59 = vmax.f32 %v7131_v60, %v7136_v23  ;;  %v3733_v33 = vadd.f32 %v3716_v1, %v12116_v49  ;;  %v10144_v49 = vld [vmem:[%s13141_s1 + $0x3b8] sm:$0xff]  ;;  %v12437_v26 = vsel %vm474_vm1, %v5000_v61, %v5002_v47  ;;  %v10158_v47 = vld [vmem:[%s13141_s1 + $0x410] sm:$0xff] }
 0x2b2   : > { %v7140_v35 = vmax.f32 %v7130_v18, %v7137_v40  ;;  %5720 = vmatpush.bf16.msra.mxu0 %v10144_v49  ;;  %v5284_v53 = vsel %vm1774_vm6, %v12340_v22, %v12390_v34  ;;  %v10154_v18 = vld [vmem:[%s13141_s1 + $0x3f0] sm:$0xff]  ;;  %v10142_v22 = vld [vmem:[%s13141_s1 + $0x3a8] sm:$0xff]  ;;  %v5289_v23 = vshll.u32 %v12424_v58, 16  ;;  %v5288_v40 = vrot.slane %v5286_v17, 2  ;;  %6022 = vmatpush.bf16.msra.mxu2 %v10160_v45 }
 0x2b3   : > { %7143 = vst [vmem:[#allocation3 + $0x8] sm:$0x3] %v7141_v59  ;;  %v3745_v11 = vadd.f32 %v12212_v51, %v3733_v33  ;;  %5867 = vmatpush.bf16.msra.mxu1 %v10154_v18  ;;  %v5144_v49 = vrot.slane %v12185_v31, 2 }
 0x2b4   : > { %7142 = vst [vmem:[#allocation3] sm:$0xff] %v7140_v35  ;;  %v5291_v59 = vrot.slane %v5289_v23, 3  ;;  %v10159_v35 = vld [vmem:[%s13141_s1 + $0x418] sm:$0xff]  ;;  %v7145_v52 = vld [vmem:[#allocation2 + $0x24] sm:$0x7] }
 0x2b5   : > { %3754 = vst [vmem:[#allocation2 + $0x28] sm:$0xff] %v3745_v11  ;;  %v5239_v11 = vld [vmem:[%s10508_s16 + $0x50] sm:$0x7]  ;;  %v7144_v4 = vld [vmem:[#allocation2 + $0x1c] sm:$0xff] }
 0x2b6   : > { %5721 = vmatpush.bf16.msra.mxu0 %v10143_v39  ;;  %6023 = vmatpush.bf16.msra.mxu2 %v10159_v35 }
 0x2b7   : > { %5868 = vmatpush.bf16.msra.mxu1 %v10153_v54 }
 0x2b8   : > { %v12406_v42 = vpop.f32.mrf.mxu2  ;;  %v3719_v24 = vpop.f32.mrf.mxu0 }
 0x2b9   : > { %v12404_v16 = vpop.f32.mrf.mxu3  ;;  %v12411_v36 = vpop.f32.mrf.mxu1  ;;  %v3734_v2 = vadd.f32 %v3719_v24, %v12139_v55  ;;  %v10132_v55 = vld [vmem:[%s13141_s1 + $0x358] sm:$0xff]  ;;  %v5417_v24 = vrot.slane %v12424_v58, 3 }
 0x2ba   : > { %5722 = vmatpush.bf16.msra.mxu0 %v10142_v22  ;;  %5615 = vmatpush.bf16.msra.mxu3 %v10132_v55  ;;  %v10139_v22 = vld [vmem:[%s13141_s1 + $0x390] sm:$0xff] }
 0x2bb   : > { %v3746_v60 = vadd.f32 %v12212_v51, %v3734_v2  ;;  %5210 = vmatmul.bf16.vlgmr.msrb.gmra.mxu0 %v5143_v57  ;;  %v12482_v57 = vor.u32 %v5291_v59, %v5288_v40  ;;  %5869 = vmatpush.bf16.msra.mxu1 %v10152_v12  ;;  %v5418_v59 = vsel %vm903_vm4, %v12196_v41, %v5417_v24  ;;  %v10157_v41 = vld [vmem:[%s13141_s1 + $0x408] sm:$0xff] }
 0x2bc   : > { %5368 = vmatmul.bf16.gmra.mxu1 %v5284_v53  ;;  %v5257_v53 = vunpack.c.l.b16 %v5239_v11  ;;  %6024 = vmatpush.bf16.msra.mxu2 %v10158_v47  ;;  %v10148_v47 = vld [vmem:[%s13141_s1 + $0x3c0] sm:$0xff] }
 0x2bd   : > { %5486 = vmatmul.bf16.gmra.mxu2 %v12227_v6  ;;  %3755 = vst [vmem:[#allocation2 + $0x30] sm:$0xff] %v3746_v60  ;;  %v10141_v6 = vld [vmem:[%s13141_s1 + $0x3a0] sm:$0xff] }
 0x2be   : > { %5069 = vmatmul.bf16.gmra.mxu3 %v12323_v5  ;;  %v10131_v5 = vld [vmem:[%s13141_s1 + $0x350] sm:$0xff]  ;;  %5723 = vmatpush.bf16.msra.mxu0 %v10141_v6  ;;  %v10129_v6 = vld [vmem:[%s13141_s1 + $0x340] sm:$0xff]  ;;  %v12512_v12 = vpack.c.b16 %v5257_v53, %v5257_v53 }
 0x2bf   : > { %5616 = vmatpush.bf16.msra.mxu3 %v10131_v5  ;;  %5870 = vmatpush.bf16.msra.mxu1 %v10151_v15 }
 0x2c0   : > { %v12457_v1 = vpop.f32.mrf.mxu2  ;;  %v3721_v48 = vpop.f32.mrf.mxu0  ;;  %6025 = vmatpush.bf16.msra.mxu2 %v10157_v41 }
 0x2c1   : > { %v12455_v61 = vpop.f32.mrf.mxu3  ;;  %v12459_v43 = vpop.f32.mrf.mxu1  ;;  %v3735_v33 = vadd.f32 %v3721_v48, %v12156_v7  ;;  %v5145_v48 = vsel %vm746_vm3, %v5142_v56, %v5144_v49  ;;  %v10150_v56 = vld [vmem:[%s13141_s1 + $0x3d0] sm:$0xff] }
 0x2c2   : > { %5724 = vmatpush.bf16.msra.mxu0 %v10140_v38 }
 0x2c3   : > { %v3747_v7 = vadd.f32 %v12212_v51, %v3735_v33  ;;  %5617 = vmatpush.bf16.msra.mxu3 %v10130_v8  ;;  %v5293_v33 = vsel %vm1774_vm6, %v12390_v34, %v12482_v57  ;;  %v10138_v8 = vld [vmem:[%s13141_s1 + $0x388] sm:$0xff]  ;;  %5871 = vmatpush.bf16.msra.mxu1 %v10150_v56 }
 0x2c4   : > { %v7146_v39 = vld [vmem:[#allocation2 + $0x2a] sm:$0xff]  ;;  %v7147_v32 = vld [vmem:[#allocation2 + $0x32] sm:$0x7] }
 0x2c5   : > { %v7148_v2 = vmax.f32 %v7144_v4, %v7146_v39  ;;  %v7149_v18 = vmax.f32 %v7145_v52, %v7147_v32  ;;  %3756 = vst [vmem:[#allocation2 + $0x38] sm:$0xff] %v3747_v7  ;;  %v5298_v7 = vshll.u32 %v12512_v12, 16 }
 0x2c6   : > { %5725 = vmatpush.bf16.msra.mxu0 %v10139_v22 }
 0x2c7   : > { %v7152_v55 = vrot.slane %v7148_v2, 1  ;;  %v7153_v60 = vrot.slane %v7149_v18, 1  ;;  %5618 = vmatpush.bf16.msra.mxu3 %v10129_v6  ;;  %v5300_v15 = vrot.slane %v5298_v7, 3  ;;  %v10137_v6 = vld [vmem:[%s13141_s1 + $0x380] sm:$0xff] }
 0x2c8   : > { %v12495_v45 = vpop.f32.mrf.mxu2  ;;  %v3724_v5 = vpop.f32.mrf.mxu0  ;;  %v12563_v7 = vld [vmem:[%s10508_s16 + $0x40] sm:$0xff] }
 0x2c9   : > { %v12493_v54 = vpop.f32.mrf.mxu3  ;;  %v4258_v40 = vpop.f32.mrf.mxu1  ;;  %v7154_v35 = vsel %vm474_vm1, %v7152_v55, %v7153_v60  ;;  %v7158_v11 = vmax.f32 %v7149_v18, %v7153_v60  ;;  %v3736_v38 = vadd.f32 %v3724_v5, %v12190_v3  ;;  %v5295_v3 = vshrl.u32 %v12512_v12, 16  ;;  %v5757_v55 = vld [vmem:[%s10508_s16 + $0x38] sm:$0xe]  ;;  %v5758_v60 = vld [vmem:[%s10508_s16 + $0x3c] sm:$0xf] }
 0x2ca   : > { %v7157_v4 = vmax.f32 %v7148_v2, %v7154_v35  ;;  %5726 = vmatpush.bf16.msra.mxu0 %v10138_v8  ;;  %v12551_v35 = vunpack.c.l.b16 %v5758_v60 }
 0x2cb   : > { %7160 = vst [vmem:[#allocation3 + $0x12] sm:$0x3] %v7158_v11  ;;  %v3748_v34 = vadd.f32 %v12212_v51, %v3736_v38  ;;  %5215 = vmatmul.bf16.gmra.mxu0 %v5145_v48  ;;  %v10149_v51 = vld [vmem:[%s13141_s1 + $0x3c8] sm:$0xff]  ;;  %v5297_v18 = vrot.slane %v5295_v3, 2  ;;  %v5146_v48 = vrot.slane %v12424_v58, 2 }
 0x2cc   : > { %5373 = vmatmul.bf16.gmra.mxu1 %v5293_v33  ;;  %7159 = vst [vmem:[#allocation3 + $0xa] sm:$0xff] %v7157_v4  ;;  %v5419_v33 = vrot.slane %v12512_v12, 3  ;;  %v5101_v3 = vld [vmem:[%s10508_s16 + $0x50] sm:$0x3] }
 0x2cd   : > { %5491 = vmatmul.bf16.gmra.mxu2 %v5418_v59  ;;  %3757 = vst [vmem:[#allocation2 + $0x40] sm:$0xff] %v3748_v34  ;;  %5872 = vmatpush.bf16.msra.mxu1 %v10149_v51  ;;  %v5301_v59 = vor.u32 %v5300_v15, %v5297_v18  ;;  %v5147_v4 = vsel %vm746_vm3, %v5144_v49, %v5146_v48  ;;  %v5135_v49 = vunpack.c.l.b16 %v5101_v3  ;;  %v5935_v18 = vshll.u32 %v12563_v7, 16 }
 0x2ce   : > { %5074 = vmatmul.bf16.gmra.mxu3 %v12360_v14  ;;  %v10156_v14 = vld [vmem:[%s13141_s1 + $0x400] sm:$0xff]  ;;  %5727 = vmatpush.bf16.msra.mxu0 %v10137_v6 }
 0x2cf   : > { %6026 = vmatpush.bf16.msra.mxu2 %v10156_v14  ;;  %v5302_v12 = vsel %vm1774_vm6, %v12482_v57, %v5301_v59  ;;  %v10199_v57 = vld [vmem:[%s13141_s1 + $0x538] sm:$0xff] }
 0x2d0   : > { %v4376_v39 = vpop.f32.mrf.mxu2  ;;  %v3726_v53 = vpop.f32.mrf.mxu0 }
 0x2d1   : > { %v4120_v52 = vpop.f32.mrf.mxu3  ;;  %v4260_v2 = vpop.f32.mrf.mxu1  ;;  %5873 = vmatpush.bf16.msra.mxu1 %v10148_v47  ;;  %v10187_v53 = vld [vmem:[%s13141_s1 + $0x4f8] sm:$0xff] }
 0x2d2   : > { %v4134_v32 = vadd.f32 %v4120_v52, %v12267_v30  ;;  %v10171_v30 = vld [vmem:[%s13141_s1 + $0x478] sm:$0xff] }
 0x2d3   : > { %6137 = vmatpush.bf16.msrb.mxu3 %v10171_v30  ;;  %6526 = vmatpush.bf16.msrb.mxu2 %v10199_v57 }
 0x2d4   : > { %v4272_v22 = vadd.f32 %v4258_v40, %v4134_v32  ;;  %v5791_v40 = vunpack.c.l.b16 %v5757_v55  ;;  %v10179_v32 = vld [vmem:[%s13141_s1 + $0x4b8] sm:$0xff] }
 0x2d5   : > { %6275 = vmatpush.bf16.msrb.mxu0 %v10179_v32  ;;  %6393 = vmatpush.bf16.msrb.mxu1 %v10187_v53 }
 0x2d6   : > { %v12547_v5 = vadd.f32 %v4376_v39, %v4272_v22  ;;  %v12570_v51 = vpack.c.b16 %v12551_v35, %v5791_v40  ;;  %v5932_v39 = vshrl.u32 %v12563_v7, 16  ;;  %v5140_v22 = vpack.c.b16 %v5135_v49, %v5135_v49 }
 0x2d8   : > { %v4378_v38 = vpop.f32.mrf.mxu2  ;;  %v4000_v41 = vpop.f32.mrf.mxu0 }
 0x2d9   : > { %v4122_v11 = vpop.f32.mrf.mxu3  ;;  %v4263_v34 = vpop.f32.mrf.mxu1  ;;  %v4001_v8 = vadd.f32 %v4000_v41, %v12232_v20  ;;  %v5531_v20 = vshrl.u32 %v12337_v44, 16 }
 0x2da   : > { %v4135_v56 = vadd.f32 %v4122_v11, %v12300_v10  ;;  %v5420_v10 = vsel %vm903_vm4, %v5417_v24, %v5419_v33  ;;  %v5534_v24 = vshll.u32 %v12337_v44, 16  ;;  %v5927_v44 = vshll.u32 %v12570_v51, 16 }
 0x2db   : > { %v4130_v31 = vadd.f32 %v12363_v9, %v4001_v8  ;;  %5220 = vmatmul.bf16.gmra.mxu0 %v5147_v4  ;;  %v10170_v9 = vld [vmem:[%s13141_s1 + $0x470] sm:$0xff]  ;;  %v5533_v30 = vrot.slane %v5531_v20, 3  ;;  %v5934_v33 = vrot.slane %v5932_v39, 1  ;;  %v5148_v4 = vrot.slane %v5140_v22, 2  ;;  %v10177_v22 = vld [vmem:[%s13141_s1 + $0x4a8] sm:$0xff] }
 0x2dc   : > { %v4273_v14 = vadd.f32 %v4260_v2, %v4135_v56  ;;  %5378 = vmatmul.bf16.gmra.mxu1 %v5302_v12  ;;  %v5924_v2 = vshrl.u32 %v12570_v51, 16  ;;  %6138 = vmatpush.bf16.msrb.mxu3 %v10170_v9  ;;  %v5536_v59 = vrot.slane %v5534_v24, 4  ;;  %v5937_v56 = vrot.slane %v5935_v18, 2  ;;  %v10169_v12 = vld [vmem:[%s13141_s1 + $0x468] sm:$0xff] }
 0x2dd   : > { %5496 = vmatmul.bf16.gmra.mxu2 %v5420_v10  ;;  %v10186_v10 = vld [vmem:[%s13141_s1 + $0x4f0] sm:$0xff]  ;;  %v5546_v24 = vrot.slane %v5286_v17, 3  ;;  %v5547_v9 = vrot.slane %v5289_v23, 4 }
 0x2de   : > { %v12576_v52 = vadd.f32 %v4378_v38, %v4273_v14  ;;  %5079 = vmatmul.bf16.gmra.mxu3 %v12437_v26  ;;  %v4268_v26 = vadd.f32 %v12347_v37, %v4130_v31  ;;  %v5926_v11 = vrot.slane %v5924_v2, 1  ;;  %v5929_v38 = vrot.slane %v5927_v44, 2  ;;  %6394 = vmatpush.bf16.msrb.mxu1 %v10186_v10  ;;  %v12642_v44 = vld [vmem:[%s10508_s16 + $0x48] sm:$0xff] }
 0x2df   : > { %v5537_v8 = vor.u32 %v5536_v59, %v5533_v30  ;;  %v12621_v31 = vor.u32 %v5937_v56, %v5934_v33 }
 0x2e0   : > { %v4381_v47 = vpop.f32.mrf.mxu2  ;;  %v12596_v55 = vadd.f32 %v12365_v27, %v4268_v26  ;;  %v4002_v6 = vpop.f32.mrf.mxu0  ;;  %v5930_v14 = vor.u32 %v5929_v38, %v5926_v11  ;;  %6139 = vmatpush.bf16.msrb.mxu3 %v10169_v12 }
 0x2e1   : > { %v4125_v15 = vpop.f32.mrf.mxu3  ;;  %v4265_v37 = vpop.f32.mrf.mxu1  ;;  %v4003_v40 = vadd.f32 %v4002_v6, %v12269_v21  ;;  %v10178_v21 = vld [vmem:[%s13141_s1 + $0x4b0] sm:$0xff]  ;;  %v5541_v17 = vsel %vm1029_vm5, %v5537_v8, %v12198_v13  ;;  %v10168_v13 = vld [vmem:[%s13141_s1 + $0x460] sm:$0xff]  ;;  %v5941_v6 = vshrl.u32 %v12642_v44, 16 }
 0x2e2   : > { %v4136_v60 = vadd.f32 %v4125_v15, %v12329_v63  ;;  %v10198_v63 = vld [vmem:[%s13141_s1 + $0x530] sm:$0xff]  ;;  %6276 = vmatpush.bf16.msrb.mxu0 %v10178_v21  ;;  %v5939_v23 = vsel %vm600_vm2, %v5930_v14, %v12621_v31 }
 0x2e3   : > { %v4131_v27 = vadd.f32 %v12404_v16, %v4003_v40  ;;  %v5806_v16 = vrot.slane %v12563_v7, 1  ;;  %6527 = vmatpush.bf16.msrb.mxu2 %v10198_v63  ;;  %v5808_v63 = vrot.slane %v12642_v44, 1 }
 0x2e4   : > { %v4274_v41 = vadd.f32 %v4263_v34, %v4136_v60  ;;  %v5805_v34 = vrot.slane %v12570_v51, 1  ;;  %6140 = vmatpush.bf16.msrb.mxu3 %v10168_v13  ;;  %v5903_v13 = vld [vmem:[%s10508_s16 + $0x58] sm:$0x3] }
 0x2e5   : > { %v4269_v49 = vadd.f32 %v12370_v62, %v4131_v27  ;;  %v5149_v62 = vsel %vm746_vm3, %v5146_v48, %v5148_v4  ;;  %v10289_v4 = vunpack.c.l.b16 %v12142_v28 }
 0x2e6   : > { %v12614_v3 = vadd.f32 %v4381_v47, %v4274_v41  ;;  %v5807_v2 = vsel %vm474_vm1, %v5805_v34, %v5806_v16  ;;  %v10197_v47 = vld [vmem:[%s13141_s1 + $0x528] sm:$0xff]  ;;  %6277 = vmatpush.bf16.msrb.mxu0 %v10177_v22 }
 0x2e7   : > { %v4387_v51 = vadd.f32 %v12406_v42, %v4269_v49  ;;  %6528 = vmatpush.bf16.msrb.mxu2 %v10197_v47  ;;  %v5664_v8 = vpack.c.b16 %v10289_v4, %v12291_v46  ;;  %v5510_v47 = vld [vmem:[%s10508_s16 + $0x50] sm:$0xf]  ;;  %v10164_v4 = vld [vmem:[%s13141_s1 + $0x440] sm:$0xff] }
 0x2e8   : > { %v4383_v20 = vpop.f32.mrf.mxu2  ;;  %v4005_v53 = vpop.f32.mrf.mxu0 }
 0x2e9   : > { %v4127_v57 = vpop.f32.mrf.mxu3  ;;  %v4774_v26 = vpop.f32.mrf.mxu1  ;;  %v4006_v42 = vadd.f32 %v4005_v53, %v12307_v50 }
 0x2ea   : > { %v4137_v32 = vadd.f32 %v4127_v57, %v12343_v19  ;;  %v12644_v19 = vor.u32 %v5547_v9, %v5546_v24  ;;  %v12700_v9 = vld [vmem:[%s10508_s16 + $0x50] sm:$0xff] }
 0x2eb   : > { %v4132_v48 = vadd.f32 %v12455_v61, %v4006_v42  ;;  %5225 = vmatmul.bf16.gmra.mxu0 %v5149_v62  ;;  %v10185_v61 = vld [vmem:[%s13141_s1 + $0x4e8] sm:$0xff]  ;;  %v5953_v53 = vshll.u32 %v12700_v9, 16 }
 0x2ec   : > { %v4275_v15 = vadd.f32 %v4265_v37, %v4137_v32  ;;  %5874 = vmatmul.bf16.vlgmr.msra.gmra.mxu1 %v5807_v2  ;;  %v5944_v37 = vshll.u32 %v12642_v44, 16  ;;  %v5950_v32 = vshrl.u32 %v12700_v9, 16 }
 0x2ed   : > { %6027 = vmatmul.bf16.vlgmr.msra.gmra.mxu2 %v5939_v23  ;;  %v4270_v60 = vadd.f32 %v12411_v36, %v4132_v48  ;;  %6395 = vmatpush.bf16.msrb.mxu1 %v10185_v61  ;;  %v5943_v36 = vrot.slane %v5941_v6, 1  ;;  %v5955_v48 = vrot.slane %v5953_v53, 2  ;;  %v10194_v61 = vld [vmem:[%s13141_s1 + $0x510] sm:$0xff] }
 0x2ee   : > { %v12650_v50 = vadd.f32 %v4383_v20, %v4275_v15  ;;  %5619 = vmatmul.bf16.vlgmr.msra.gmra.mxu3 %v5541_v17  ;;  %v5946_v41 = vrot.slane %v5944_v37, 2  ;;  %v5809_v20 = vsel %vm474_vm1, %v5806_v16, %v5808_v63  ;;  %v10166_v16 = vld [vmem:[%s13141_s1 + $0x450] sm:$0xff]  ;;  %v5952_v15 = vrot.slane %v5950_v32, 1 }
 0x2ef   : > { %v4388_v33 = vadd.f32 %v12457_v1, %v4270_v60  ;;  %v10196_v1 = vld [vmem:[%s13141_s1 + $0x520] sm:$0xff]  ;;  %v10165_v60 = vld [vmem:[%s13141_s1 + $0x448] sm:$0xff] }
 0x2f0   : > { %v4947_v59 = vpop.f32.mrf.mxu2  ;;  %v4007_v11 = vpop.f32.mrf.mxu0  ;;  %v12686_v12 = vor.u32 %v5946_v41, %v5943_v36  ;;  %6529 = vmatpush.bf16.msrb.mxu2 %v10196_v1  ;;  %v10387_v41 = vld [vmem:[%s10508_s16 + $0x3c] sm:$0xff]  }
 0x2f1   : > { %v4512_v30 = vpop.f32.mrf.mxu3  ;;  %v4776_v38 = vpop.f32.mrf.mxu1  ;;  %v4008_v56 = vadd.f32 %v4007_v11, %v12331_v25  ;;  %v10176_v25 = vld [vmem:[%s13141_s1 + $0x4a0] sm:$0xff]  ;;  %v12742_v11 = vor.u32 %v5955_v48, %v5952_v15 }
 0x2f2   : > { %v4532_v40 = vadd.f32 %v4512_v30, %v12596_v55  ;;  %v10167_v55 = vld [vmem:[%s13141_s1 + $0x458] sm:$0xff]  ;;  %6278 = vmatpush.bf16.msrb.mxu0 %v10176_v25  ;;  %v5948_v24 = vsel %vm600_vm2, %v12621_v31, %v12686_v12  ;;  %v10174_v30 = vld [vmem:[%s13141_s1 + $0x490] sm:$0xff] }
 0x2f3   : > { %v4133_v27 = vadd.f32 %v12493_v54, %v4008_v56  ;;  %v10184_v54 = vld [vmem:[%s13141_s1 + $0x4e0] sm:$0xff]  ;;  %6141 = vmatpush.bf16.msrb.mxu3 %v10167_v55  ;;  %v10175_v31 = vld [vmem:[%s13141_s1 + $0x498] sm:$0xff] }
 0x2f4   : > { %6396 = vmatpush.bf16.msrb.mxu1 %v10184_v54 }
 0x2f5   : > { %v4271_v28 = vadd.f32 %v12459_v43, %v4133_v27 }
 0x2f6   : > { %6279 = vmatpush.bf16.msrb.mxu0 %v10175_v31 }
 0x2f7   : > { %v4389_v10 = vadd.f32 %v12495_v45, %v4271_v28  ;;  %v10195_v45 = vld [vmem:[%s13141_s1 + $0x518] sm:$0xff]  ;;  %6142 = vmatpush.bf16.msrb.mxu3 %v10166_v16 }
 0x2f8   : > { %v4949_v34 = vpop.f32.mrf.mxu2  ;;  %v4665_v49 = vpop.f32.mrf.mxu0  ;;  %6530 = vmatpush.bf16.msrb.mxu2 %v10195_v45 }
 0x2f9   : > { %v4514_v21 = vpop.f32.mrf.mxu3  ;;  %v4779_v57 = vpop.f32.mrf.mxu1  ;;  %v4685_v43 = vadd.f32 %v4665_v49, %v4532_v40  ;;  %v10182_v40 = vld [vmem:[%s13141_s1 + $0x4d0] sm:$0xff] }
 0x2fa   : > { %v4533_v14 = vadd.f32 %v4514_v21, %v4387_v51  ;;  %v10183_v51 = vld [vmem:[%s13141_s1 + $0x4d8] sm:$0xff]  ;;  %6280 = vmatpush.bf16.msrb.mxu0 %v10174_v30 }
 0x2fb   : > { %v4794_v46 = vadd.f32 %v4774_v26, %v4685_v43  ;;  %5728 = vmatmul.bf16.vlgmr.msra.gmra.mxu0 %v5664_v8  ;;  %6397 = vmatpush.bf16.msrb.mxu1 %v10183_v51  ;;  %v5549_v8 = vsel %vm1029_vm5, %v12289_v0, %v12644_v19  ;;  %v10173_v0 = vld [vmem:[%s13141_s1 + $0x488] sm:$0xff] }
 0x2fc   : > { %5879 = vmatmul.bf16.gmra.mxu1 %v5809_v20  ;;  %6531 = vmatpush.bf16.msrb.mxu2 %v10194_v61 }
 0x2fd   : > { %6032 = vmatmul.bf16.gmra.mxu2 %v5948_v24  ;;  %6143 = vmatpush.bf16.msrb.mxu3 %v10165_v60  ;;  %v10210_v60 = vld [vmem:[%s13141_s1 + $0x578] sm:$0xff] }
 0x2fe   : > { %5624 = vmatmul.bf16.gmra.mxu3 %v12305_v29  ;;  %v12717_v29 = vadd.f32 %v4947_v59, %v4794_v46  ;;  %v5810_v59 = vrot.slane %v12700_v9, 1  ;;  %6281 = vmatpush.bf16.msrb.mxu0 %v10173_v0 }
 0x2ff   : > { %6398 = vmatpush.bf16.msrb.mxu1 %v10182_v40 }
 0x300   : > { %v4952_v26 = vpop.f32.mrf.mxu2  ;;  %v4667_v42 = vpop.f32.mrf.mxu0  ;;  %v5811_v54 = vsel %vm474_vm1, %v5808_v63, %v5810_v59  ;;  %v10193_v63 = vld [vmem:[%s13141_s1 + $0x508] sm:$0xff] }
 0x301   : > { %v4517_v62 = vpop.f32.mrf.mxu3  ;;  %v12719_v17 = vpop.f32.mrf.mxu1  ;;  %v4686_v23 = vadd.f32 %v4667_v42, %v4533_v14  ;;  %v5765_v14 = vld [vmem:[%s10508_s16 + $0x58] sm:$0x1]  ;;  %6144 = vmatpush.bf16.msrb.mxu3 %v10164_v4  ;;  %6532 = vmatpush.bf16.msrb.mxu2 %v10193_v63 }
 0x302   : > { %v4534_v2 = vadd.f32 %v4517_v62, %v4388_v33  ;;  %v12737_v33 = vunpack.c.l.b16 %v5510_v47  ;;  %v5799_v43 = vunpack.c.l.b16 %v5765_v14  ;;  %v6056_v14 = vld [vmem:[%s10508_s16 + $0x38] sm:$0xc] }
 0x303   : > { %v4795_v22 = vadd.f32 %v4776_v38, %v4686_v23  ;;  %v5921_v38 = vunpack.c.l.b16 %v5903_v13 }
 0x304   : > { %v5529_v28 = vpack.c.b16 %v12737_v33, %v12737_v33  ;;  %v5804_v15 = vpack.c.b16 %v5799_v43, %v5799_v43 }
 0x305   : > { %v12744_v56 = vadd.f32 %v4949_v34, %v4795_v22  ;;  %v5957_v34 = vsel %vm600_vm2, %v12686_v12, %v12742_v11  ;;  %v10181_v12 = vld [vmem:[%s13141_s1 + $0x4c8] sm:$0xff]  ;;  %6699 = vmatpush.bf16.msra.mxu3 %v10210_v60  ;;  %v10188_v60 = vld [vmem:[%s10508_s16 + $0x40] sm:$0xff] }
 0x306   : > { %v5551_v20 = vshrl.u32 %v5529_v28, 16  ;;  %v5554_v24 = vshll.u32 %v5529_v28, 16  ;;  %6399 = vmatpush.bf16.msrb.mxu1 %v10181_v12  ;;  %v5812_v30 = vrot.slane %v5804_v15, 1 }
 0x308   : > { %v4954_v27 = vpop.f32.mrf.mxu2  ;;  %v4670_v55 = vpop.f32.mrf.mxu0  ;;  %v5553_v23 = vrot.slane %v5551_v20, 3  ;;  %v5556_v47 = vrot.slane %v5554_v24, 4  ;;  %v5813_v28 = vsel %vm474_vm1, %v5810_v59, %v5812_v30  ;;  %v10209_v59 = vld [vmem:[%s13141_s1 + $0x570] sm:$0xff] }
 0x309   : > { %v4519_v36 = vpop.f32.mrf.mxu3  ;;  %v4784_v25 = vpop.f32.mrf.mxu1  ;;  %v4687_v21 = vadd.f32 %v4670_v55, %v4534_v2  ;;  %6700 = vmatpush.bf16.msra.mxu3 %v10209_v59  ;;  %v6203_v59 = vrot.slane %v5935_v18, 3  ;;  %v10223_v18 = vld [vmem:[%s13141_s1 + $0x5e0] sm:$0xff] }
 0x30a   : > { %v4535_v1 = vadd.f32 %v4519_v36, %v4389_v10  ;;  %v12763_v10 = vpack.c.b16 %v5921_v38, %v5921_v38  ;;  %v5557_v40 = vor.u32 %v5556_v47, %v5553_v23  ;;  %v10208_v23 = vld [vmem:[%s13141_s1 + $0x568] sm:$0xff] }
 0x30b   : > { %v4796_v49 = vadd.f32 %v4779_v57, %v4687_v21  ;;  %5733 = vmatmul.bf16.gmra.mxu0 %v10387_v41  ;;  %v10192_v57 = vld [vmem:[%s13141_s1 + $0x500] sm:$0xff] }
 0x30c   : > { %5884 = vmatmul.bf16.gmra.mxu1 %v5811_v54  ;;  %v5959_v46 = vshrl.u32 %v12763_v10, 16  ;;  %v5962_v45 = vshll.u32 %v12763_v10, 16  ;;  %6533 = vmatpush.bf16.msrb.mxu2 %v10192_v57 }
 0x30d   : > { %6037 = vmatmul.bf16.gmra.mxu2 %v5957_v34  ;;  %v12780_v16 = vadd.f32 %v4952_v26, %v4796_v49  ;;  %v10180_v26 = vld [vmem:[%s13141_s1 + $0x4c0] sm:$0xff]  ;;  %6701 = vmatpush.bf16.msra.mxu3 %v10208_v23 }
 0x30e   : > { %5629 = vmatmul.bf16.gmra.mxu3 %v5549_v8  ;;  %v5961_v13 = vrot.slane %v5959_v46, 1  ;;  %v5964_v22 = vrot.slane %v5962_v45, 2  ;;  %6400 = vmatpush.bf16.msrb.mxu1 %v10180_v26  ;;  %v5558_v8 = vsel %vm1029_vm5, %v12644_v19, %v5557_v40  ;;  %v10218_v19 = vld [vmem:[%s13141_s1 + $0x5b8] sm:$0xff] }
 0x310   : > { %v4957_v51 = vpop.f32.mrf.mxu2  ;;  %v4672_v2 = vpop.f32.mrf.mxu0  ;;  %v5965_v38 = vor.u32 %v5964_v22, %v5961_v13 }
 0x311   : > { %v4522_v31 = vpop.f32.mrf.mxu3  ;;  %v4786_v42 = vpop.f32.mrf.mxu1  ;;  %v4688_v48 = vadd.f32 %v4672_v2, %v4535_v1  ;;  %v10298_v2 = vunpack.c.h.b16 %v12424_v58  ;;  %v10225_v58 = vld [vmem:[%s13141_s1 + $0x5f0] sm:$0xff] }
 0x312   : > { %v4536_v62 = vadd.f32 %v4522_v31, %v12547_v5  ;;  %v10172_v5 = vld [vmem:[%s13141_s1 + $0x480] sm:$0xff]  ;;  %v5966_v34 = vsel %vm600_vm2, %v12742_v11, %v5965_v38  ;;  %v10226_v11 = vld [vmem:[%s13141_s1 + $0x5f8] sm:$0xff] }
 0x313   : > { %v4797_v61 = vadd.f32 %v12719_v17, %v4688_v48  ;;  %6282 = vmatpush.bf16.msrb.mxu0 %v10172_v5  ;;  %v10388_v17 = vld [vmem:[%s10508_s16 + $0x44] sm:$0xff]   ;;  %6955 = vmatpush.bf16.msra.mxu1 %v10226_v11  ;;  %v6333_v48 = vrot.slane %v12563_v7, 3  ;;  %v5667_v22 = vpack.c.b16 %v12737_v33, %v10298_v2 }
 0x315   : > { %v12793_v36 = vadd.f32 %v4954_v27, %v4797_v61  ;;  %v6312_v27 = vld [vmem:[%s10508_s16 + $0x38] sm:$0x8] }
 0x316   : > { %v6330_v49 = vunpack.c.l.b16 %v6312_v27 }
 0x317   : > { %6817 = vmatpush.bf16.msra.mxu0 %v10218_v19  ;;  %6956 = vmatpush.bf16.msra.mxu1 %v10225_v58 }
 0x318   : > { %v4959_v4 = vpop.f32.mrf.mxu2  ;;  %v4675_v55 = vpop.f32.mrf.mxu0  ;;  %v6331_v45 = vpack.c.b16 %v12551_v35, %v6330_v49  ;;  %v6202_v49 = vrot.slane %v5932_v39, 2 }
 0x319   : > { %v4524_v41 = vpop.f32.mrf.mxu3  ;;  %v4789_v54 = vpop.f32.mrf.mxu1  ;;  %v4689_v21 = vadd.f32 %v4675_v55, %v4536_v62  ;;  %v10216_v55 = vld [vmem:[%s13141_s1 + $0x5a8] sm:$0xff] }
 0x31a   : > { %v4537_v1 = vadd.f32 %v4524_v41, %v12576_v52  ;;  %v10234_v52 = vld [vmem:[%s13141_s1 + $0x638] sm:$0xff]  ;;  %v6332_v15 = vrot.slane %v6331_v45, 3  ;;  %v6204_v39 = vor.u32 %v6203_v59, %v6202_v49 }
 0x31b   : > { %v4798_v63 = vadd.f32 %v4784_v25, %v4689_v21  ;;  %5738 = vmatmul.bf16.gmra.mxu0 %v10388_v17  ;;  %v6074_v25 = vunpack.c.l.b16 %v6056_v14  ;;  %7073 = vmatpush.bf16.msra.mxu2 %v10234_v52  ;;  %v6174_v59 = vld [vmem:[%s10508_s16 + $0x58] sm:$0x7] }
 0x31c   : > { %5889 = vmatmul.bf16.gmra.mxu1 %v5813_v28  ;;  %v6334_v40 = vsel %vm903_vm4, %v6332_v15, %v6333_v48 }
 0x31d   : > { %6042 = vmatmul.bf16.gmra.mxu2 %v5966_v34  ;;  %v12818_v20 = vadd.f32 %v4957_v51, %v4798_v63  ;;  %v6075_v31 = vpack.c.b16 %v12551_v35, %v6074_v25  ;;  %v10233_v51 = vld [vmem:[%s13141_s1 + $0x630] sm:$0xff]  ;;  %v10231_v25 = vld [vmem:[%s13141_s1 + $0x620] sm:$0xff] }
 0x31e   : > { %5634 = vmatmul.bf16.gmra.mxu3 %v5558_v8 }
 0x31f   : > { %v6076_v35 = vrot.slane %v6075_v31, 2  ;;  %7074 = vmatpush.bf16.msra.mxu2 %v10233_v51  ;;  %v6198_v33 = vshll.u32 %v6075_v31, 16  ;;  %v10189_v51 = vld [vmem:[%s10508_s16 + $0x48] sm:$0xff] }
 0x320   : > { %v4962_v0 = vpop.f32.mrf.mxu2  ;;  %v4677_v24 = vpop.f32.mrf.mxu0 }
 0x321   : > { %v4527_v43 = vpop.f32.mrf.mxu3  ;;  %v4791_v46 = vpop.f32.mrf.mxu1  ;;  %v4690_v57 = vadd.f32 %v4677_v24, %v4537_v1  ;;  %v10207_v1 = vld [vmem:[%s13141_s1 + $0x560] sm:$0xff]  ;;  %v6200_v52 = vrot.slane %v6198_v33, 3  ;;  %v6079_v24 = vrot.slane %v12642_v44, 2 }
 0x322   : > { %v4538_v12 = vadd.f32 %v4527_v43, %v12614_v3  ;;  %v10217_v3 = vld [vmem:[%s13141_s1 + $0x5b0] sm:$0xff]  ;;  %6702 = vmatpush.bf16.msra.mxu3 %v10207_v1  ;;  %v10206_v43 = vld [vmem:[%s13141_s1 + $0x558] sm:$0xff] }
 0x323   : > { %v4799_v62 = vadd.f32 %v4786_v42, %v4690_v57  ;;  %v6077_v42 = vrot.slane %v12563_v7, 2  ;;  %6818 = vmatpush.bf16.msra.mxu0 %v10217_v3  ;;  %v10222_v7 = vld [vmem:[%s13141_s1 + $0x5d8] sm:$0xff] }
 0x325   : > { %v12838_v47 = vadd.f32 %v4959_v4, %v4799_v62  ;;  %v6078_v41 = vsel %vm746_vm3, %v6076_v35, %v6077_v42  ;;  %v6195_v4 = vshrl.u32 %v6075_v31, 16  ;;  %v6080_v58 = vsel %vm746_vm3, %v6077_v42, %v6079_v24 }
 0x326   : > { %6703 = vmatpush.bf16.msra.mxu3 %v10206_v43  ;;  %v10220_v43 = vld [vmem:[%s13141_s1 + $0x5c8] sm:$0xff] }
 0x327   : > { %6819 = vmatpush.bf16.msra.mxu0 %v10216_v55  ;;  %v6197_v34 = vrot.slane %v6195_v4, 2  ;;  %v10204_v4 = vld [vmem:[%s13141_s1 + $0x548] sm:$0xff] }
 0x328   : > { %v4964_v26 = vpop.f32.mrf.mxu2  ;;  %v4680_v5 = vpop.f32.mrf.mxu0 }
 0x329   : > { %v4529_v13 = vpop.f32.mrf.mxu3  ;;  %v5364_v30 = vpop.f32.mrf.mxu1  ;;  %v4691_v38 = vadd.f32 %v4680_v5, %v4538_v12  ;;  %v6335_v12 = vrot.slane %v12642_v44, 3  ;;  %v6337_v44 = vrot.slane %v12700_v9, 3 }
 0x32a   : > { %v4539_v61 = vadd.f32 %v4529_v13, %v12650_v50  ;;  %v10232_v50 = vld [vmem:[%s13141_s1 + $0x628] sm:$0xff]  ;;  %v10205_v13 = vld [vmem:[%s13141_s1 + $0x550] sm:$0xff] }
 0x32b   : > { %v4800_v17 = vadd.f32 %v4789_v54, %v4691_v38  ;;  %5743 = vmatmul.bf16.gmra.mxu0 %v5667_v22  ;;  %v10224_v54 = vld [vmem:[%s13141_s1 + $0x5e8] sm:$0xff]  ;;  %7075 = vmatpush.bf16.msra.mxu2 %v10232_v50  ;;  %v6336_v3 = vsel %vm903_vm4, %v6333_v48, %v6335_v12  ;;  %v10214_v48 = vld [vmem:[%s13141_s1 + $0x598] sm:$0xff] }
 0x32c   : > { %6401 = vmatmul.bf16.vlgmr.msrb.gmra.mxu1 %v6334_v40  ;;  %6704 = vmatpush.bf16.msra.mxu3 %v10205_v13  ;;  %v6207_v40 = vrot.slane %v5944_v37, 3  ;;  %v6081_v37 = vrot.slane %v12700_v9, 2 }
 0x32d   : > { %6534 = vmatmul.bf16.vlgmr.msrb.gmra.mxu2 %v10188_v60  ;;  %v12861_v28 = vadd.f32 %v4962_v0, %v4800_v17  ;;  %6957 = vmatpush.bf16.msra.mxu1 %v10224_v54  ;;  %v6201_v0 = vor.u32 %v6200_v52, %v6197_v34  ;;  %v10229_v17 = vld [vmem:[%s13141_s1 + $0x610] sm:$0xff]  ;;  %v10203_v54 = vld [vmem:[%s13141_s1 + $0x540] sm:$0xff] }
 0x32e   : > { %6145 = vmatmul.bf16.vlgmr.msrb.gmra.mxu3 %v6078_v41  ;;  %v6082_v49 = vsel %vm746_vm3, %v6079_v24, %v6081_v37 }
 0x32f   : > { %7076 = vmatpush.bf16.msra.mxu2 %v10231_v25  ;;  %v6205_v2 = vsel %vm1774_vm6, %v6201_v0, %v6204_v39  ;;  %v10212_v25 = vld [vmem:[%s13141_s1 + $0x588] sm:$0xff] }
 0x330   : > { %v5482_v8 = vpop.f32.mrf.mxu2  ;;  %v4682_v14 = vpop.f32.mrf.mxu0  ;;  %6705 = vmatpush.bf16.msra.mxu3 %v10204_v4  ;;  %v6992_v4 = vld [vmem:[%s10508_s16 + $0x40] sm:$0xc] }
 0x331   : > { %v5065_v21 = vpop.f32.mrf.mxu3  ;;  %v5366_v63 = vpop.f32.mrf.mxu1  ;;  %v4692_v19 = vadd.f32 %v4682_v14, %v4539_v61  ;;  %6958 = vmatpush.bf16.msra.mxu1 %v10223_v18  ;;  %v7010_v9 = vunpack.c.l.b16 %v6992_v4 }
 0x332   : > { %v5085_v27 = vadd.f32 %v5065_v21, %v12717_v29  ;;  %v10215_v29 = vld [vmem:[%s13141_s1 + $0x5a0] sm:$0xff] }
 0x333   : > { %v4801_v11 = vadd.f32 %v4791_v46, %v4692_v19  ;;  %6820 = vmatpush.bf16.msra.mxu0 %v10215_v29  ;;  %v10227_v29 = vld [vmem:[%s13141_s1 + $0x600] sm:$0xff] }
 0x334   : > { %6706 = vmatpush.bf16.msra.mxu3 %v10203_v54 }
 0x335   : > { %v12882_v46 = vadd.f32 %v4964_v26, %v4801_v11  ;;  %6959 = vmatpush.bf16.msra.mxu1 %v10222_v7  ;;  %v6192_v11 = vunpack.c.l.b16 %v6174_v59 }
 0x337   : > { %6821 = vmatpush.bf16.msra.mxu0 %v10214_v48 }
 0x338   : > { %v5484_v57 = vpop.f32.mrf.mxu2  ;;  %v5211_v62 = vpop.f32.mrf.mxu0 }
 0x339   : > { %v5067_v45 = vpop.f32.mrf.mxu3  ;;  %v5369_v23 = vpop.f32.mrf.mxu1  ;;  %v5231_v15 = vadd.f32 %v5211_v62, %v5085_v27  ;;  %v10190_v27 = vld [vmem:[%s10508_s16 + $0x50] sm:$0xff]  ;;  %v6193_v62 = vpack.c.b16 %v6192_v11, %v6192_v11 }
 0x33a   : > { %v5086_v31 = vadd.f32 %v5067_v45, %v12744_v56  ;;  %v10230_v56 = vld [vmem:[%s13141_s1 + $0x618] sm:$0xff] }
 0x33b   : > { %v5384_v35 = vadd.f32 %v5364_v30, %v5231_v15  ;;  %6283 = vmatmul.bf16.vlgmr.msrb.gmra.mxu0 %v6205_v2  ;;  %7077 = vmatpush.bf16.msra.mxu2 %v10230_v56  ;;  %v6206_v30 = vrot.slane %v5941_v6, 2  ;;  %v10221_v6 = vld [vmem:[%s13141_s1 + $0x5d0] sm:$0xff]  ;;  %v6736_v2 = vld [vmem:[%s10508_s16 + $0x40] sm:$0xe]  ;;  %v6083_v56 = vrot.slane %v12763_v10, 2 }
 0x33c   : > { %6406 = vmatmul.bf16.gmra.mxu1 %v6336_v3  ;;  %v10346_v3 = vld [vmem:[%s10508_s16 + $0x40] sm:$0xff]  }
 0x33d   : > { %6539 = vmatmul.bf16.gmra.mxu2 %v10189_v51  ;;  %v12905_v42 = vadd.f32 %v5482_v8, %v5384_v35  ;;  %v12921_v50 = vor.u32 %v6207_v40, %v6206_v30  ;;  %6960 = vmatpush.bf16.msra.mxu1 %v10221_v6 }
 0x33e   : > { %6150 = vmatmul.bf16.gmra.mxu3 %v6080_v58  ;;  %v6754_v58 = vunpack.c.l.b16 %v6736_v2 }
 0x33f   : > { %7078 = vmatpush.bf16.msra.mxu2 %v10229_v17  ;;  %v6209_v34 = vsel %vm1774_vm6, %v6204_v39, %v12921_v50  ;;  %v12987_v17 = vld [vmem:[%s10508_s16 + $0x48] sm:$0xff] }
 0x340   : > { %v5487_v26 = vpop.f32.mrf.mxu2  ;;  %v5213_v5 = vpop.f32.mrf.mxu0  ;;  %v6619_v54 = vshll.u32 %v12987_v17, 16 }
 0x341   : > { %v5070_v22 = vpop.f32.mrf.mxu3  ;;  %v5371_v60 = vpop.f32.mrf.mxu1  ;;  %v5232_v38 = vadd.f32 %v5213_v5, %v5086_v31  ;;  %6961 = vmatpush.bf16.msra.mxu1 %v10220_v43  ;;  %v6211_v31 = vrot.slane %v5953_v53, 3  ;;  %v6339_v53 = vrot.slane %v6193_v62, 3 }
 0x342   : > { %v5087_v61 = vadd.f32 %v5070_v22, %v12780_v16  ;;  %v10213_v16 = vld [vmem:[%s13141_s1 + $0x590] sm:$0xff]  ;;  %v6883_v11 = vrot.slane %v6619_v54, 2 }
 0x343   : > { %v5385_v41 = vadd.f32 %v5366_v63, %v5232_v38  ;;  %6822 = vmatpush.bf16.msra.mxu0 %v10213_v16  ;;  %v6338_v63 = vsel %vm903_vm4, %v6335_v12, %v6337_v44  ;;  %v6340_v10 = vsel %vm903_vm4, %v6337_v44, %v6339_v53  ;;  %v6084_v38 = vsel %vm746_vm3, %v6081_v37, %v6083_v56  ;;  %v13006_v56 = vld [vmem:[%s10508_s16 + $0x50] sm:$0xff] }
 0x344   : > { %v6218_v16 = vshll.u32 %v6193_v62, 16  ;;  %v6623_v44 = vshrl.u32 %v12987_v17, 16 }
 0x345   : > { %v12928_v33 = vadd.f32 %v5484_v57, %v5385_v41  ;;  %v6210_v57 = vrot.slane %v5950_v32, 2  ;;  %v10211_v32 = vld [vmem:[%s13141_s1 + $0x580] sm:$0xff]  ;;  %v6215_v41 = vshrl.u32 %v6193_v62, 16  ;;  %v7013_v62 = vrot.slane %v12987_v17, 2 }
 0x347   : > { %6823 = vmatpush.bf16.msra.mxu0 %v10212_v25  ;;  %v6212_v35 = vor.u32 %v6211_v31, %v6210_v57  ;;  %v6217_v37 = vrot.slane %v6215_v41, 2  ;;  %v6621_v57 = vrot.slane %v6619_v54, 1 }
 0x348   : > { %v5489_v55 = vpop.f32.mrf.mxu2  ;;  %v5216_v8 = vpop.f32.mrf.mxu0 }
 0x349   : > { %v5072_v1 = vpop.f32.mrf.mxu3  ;;  %v5374_v14 = vpop.f32.mrf.mxu1  ;;  %v5233_v52 = vadd.f32 %v5216_v8, %v5087_v61  ;;  %v6213_v5 = vsel %vm1774_vm6, %v12921_v50, %v6212_v35  ;;  %v6614_v50 = vshll.u32 %v10346_v3, 16 }
 0x34a   : > { %v5088_v21 = vadd.f32 %v5072_v1, %v12793_v36  ;;  %v10228_v36 = vld [vmem:[%s13141_s1 + $0x608] sm:$0xff] }
 0x34b   : > { %v5386_v19 = vadd.f32 %v5369_v23, %v5233_v52  ;;  %6288 = vmatmul.bf16.gmra.mxu0 %v6209_v34  ;;  %7079 = vmatpush.bf16.msra.mxu2 %v10228_v36  ;;  %v10219_v23 = vld [vmem:[%s13141_s1 + $0x5c0] sm:$0xff]  ;;  %v6220_v34 = vrot.slane %v6218_v16, 3 }
 0x34c   : > { %6411 = vmatmul.bf16.gmra.mxu1 %v6338_v63  ;;  %6824 = vmatpush.bf16.msra.mxu0 %v10211_v32 }
 0x34d   : > { %6544 = vmatmul.bf16.gmra.mxu2 %v10190_v27  ;;  %v12956_v0 = vadd.f32 %v5487_v26, %v5386_v19  ;;  %6962 = vmatpush.bf16.msra.mxu1 %v10219_v23  ;;  %v6612_v27 = vshrl.u32 %v10346_v3, 16  ;;  %v6882_v19 = vrot.slane %v6623_v44, 1 }
 0x34e   : > { %6155 = vmatmul.bf16.gmra.mxu3 %v6082_v49 }
 0x34f   : > { %7080 = vmatpush.bf16.msra.mxu2 %v10227_v29 }
 0x350   : > { %v5492_v12 = vpop.f32.mrf.mxu2  ;;  %v5218_v24 = vpop.f32.mrf.mxu0 }
 0x351   : > { %v5075_v39 = vpop.f32.mrf.mxu3  ;;  %v5376_v45 = vpop.f32.mrf.mxu1  ;;  %v5234_v51 = vadd.f32 %v5218_v24, %v5088_v21  ;;  %v6884_v24 = vor.u32 %v6883_v11, %v6882_v19 }
 0x352   : > { %v5089_v18 = vadd.f32 %v5075_v39, %v12818_v20  ;;  %v10302_v20 = vunpack.c.h.b16 %v10346_v3  ;;  %v6221_v39 = vor.u32 %v6220_v34, %v6217_v37 }
 0x353   : > { %v5387_v15 = vadd.f32 %v5371_v60, %v5234_v51  ;;  %v10191_v60 = vld [vmem:[%s10508_s16 + $0x58] sm:$0xff] }
 0x354   : > { %v12974_v22 = vpack.c.b16 %v10302_v20, %v6754_v58  ;;  %v7011_v43 = vpack.c.b16 %v10302_v20, %v7010_v9 }
 0x355   : > { %v12972_v13 = vadd.f32 %v5489_v55, %v5387_v15  ;;  %v6222_v15 = vsel %vm1774_vm6, %v6212_v35, %v6221_v39  ;;  %v6627_v35 = vshll.u32 %v13006_v56, 16 }
 0x356   : > { %v6875_v6 = vshrl.u32 %v12974_v22, 16  ;;  %v6878_v1 = vshll.u32 %v12974_v22, 16  ;;  %v7012_v31 = vrot.slane %v7011_v43, 2  ;;  %v6756_v4 = vrot.slane %v12974_v22, 1 }
 0x358   : > { %v5494_v7 = vpop.f32.mrf.mxu2  ;;  %v5221_v61 = vpop.f32.mrf.mxu0  ;;  %v6877_v63 = vrot.slane %v6875_v6, 1  ;;  %v6880_v36 = vrot.slane %v6878_v1, 2  ;;  %v7014_v53 = vsel %vm746_vm3, %v7012_v31, %v7013_v62  ;;  %v6629_v6 = vrot.slane %v6627_v35, 1 }
 0x359   : > { %v5077_v48 = vpop.f32.mrf.mxu3  ;;  %v5379_v30 = vpop.f32.mrf.mxu1  ;;  %v5235_v40 = vadd.f32 %v5221_v61, %v5089_v18  ;;  %v7015_v1 = vrot.slane %v13006_v56, 2 }
 0x35a   : > { %v5090_v26 = vadd.f32 %v5077_v48, %v12838_v47  ;;  %v6881_v18 = vor.u32 %v6880_v36, %v6877_v63 }
 0x35b   : > { %v5388_v47 = vadd.f32 %v5374_v14, %v5235_v40  ;;  %6293 = vmatmul.bf16.gmra.mxu0 %v6213_v5  ;;  %v6616_v14 = vrot.slane %v6614_v50, 1  ;;  %v6625_v50 = vor.u32 %v6623_v44, %v6621_v57  ;;  %v7016_v44 = vsel %vm746_vm3, %v7013_v62, %v7015_v1 }
 0x35c   : > { %6416 = vmatmul.bf16.gmra.mxu1 %v6340_v10 }
 0x35d   : > { %6549 = vmatmul.bf16.gmra.mxu2 %v10191_v60  ;;  %v12993_v55 = vadd.f32 %v5492_v12, %v5388_v47  ;;  %v6617_v12 = vor.u32 %v6616_v14, %v6612_v27  ;;  %v6757_v47 = vrot.slane %v12987_v17, 1  ;;  %v6630_v17 = vsel %vm240_vm0, %v6625_v50, %v6629_v6  ;;  %v13024_v14 = vld [vmem:[%s10508_s16 + $0x58] sm:$0xff] }
 0x35e   : > { %6160 = vmatmul.bf16.gmra.mxu3 %v6084_v38  ;;  %v6887_v38 = vrot.slane %v6627_v35, 2 }
 0x35f   : > { %v6622_v32 = vsel %vm240_vm0, %v6617_v12, %v6621_v57  ;;  %v6854_v12 = vld [vmem:[%s10508_s16 + $0x60] sm:$0x3] }
 0x360   : > { %v5497_v8 = vpop.f32.mrf.mxu2  ;;  %v5223_v49 = vpop.f32.mrf.mxu0  ;;  %v6872_v31 = vunpack.c.l.b16 %v6854_v12 }
 0x361   : > { %v5080_v21 = vpop.f32.mrf.mxu3  ;;  %v5381_v59 = vpop.f32.mrf.mxu1  ;;  %v5236_v25 = vadd.f32 %v5223_v49, %v5090_v26  ;;  %v6635_v49 = vshll.u32 %v13024_v14, 16 }
 0x362   : > { %v5091_v52 = vadd.f32 %v5080_v21, %v12861_v28 }
 0x363   : > { %v5389_v29 = vadd.f32 %v5376_v45, %v5236_v25  ;;  %v6885_v45 = vsel %vm600_vm2, %v6881_v18, %v6884_v24 }
 0x365   : > { %v12998_v2 = vadd.f32 %v5494_v7, %v5389_v29  ;;  %v6891_v29 = vrot.slane %v6635_v49, 2 }
 0x368   : > { %v5499_v51 = vpop.f32.mrf.mxu2  ;;  %v5226_v3 = vpop.f32.mrf.mxu0 }
 0x369   : > { %v5082_v28 = vpop.f32.mrf.mxu3  ;;  %v5875_v20 = vpop.f32.mrf.mxu1  ;;  %v5237_v58 = vadd.f32 %v5226_v3, %v5091_v52  ;;  %v6571_v3 = vld [vmem:[%s10508_s16 + $0x60] sm:$0x1] }
 0x36a   : > { %v5092_v23 = vadd.f32 %v5082_v28, %v12882_v46  ;;  %v6631_v46 = vshrl.u32 %v13006_v56, 16  ;;  %v6637_v28 = vrot.slane %v6635_v49, 1 }
 0x36b   : > { %v5390_v48 = vadd.f32 %v5379_v30, %v5237_v58  ;;  %6298 = vmatmul.bf16.gmra.mxu0 %v6222_v15 }
 0x36c   : > { %6963 = vmatmul.bf16.vlgmr.msra.gmra.mxu1 %v6885_v45  ;;  %v6886_v40 = vrot.slane %v6631_v46, 1  ;;  %v6633_v62 = vor.u32 %v6631_v46, %v6629_v6 }
 0x36d   : > { %7081 = vmatmul.bf16.vlgmr.msra.gmra.mxu2 %v7014_v53  ;;  %v13009_v7 = vadd.f32 %v5497_v8, %v5390_v48  ;;  %v6758_v8 = vsel %vm474_vm1, %v6756_v4, %v6757_v47 }
 0x36e   : > { %6707 = vmatmul.bf16.vlgmr.msra.gmra.mxu3 %v6622_v32  ;;  %v6888_v16 = vor.u32 %v6887_v38, %v6886_v40  ;;  %v6638_v46 = vsel %vm240_vm0, %v6633_v62, %v6637_v28 }
 0x370   : > { %v6028_v61 = vpop.f32.mrf.mxu2  ;;  %v5228_v60 = vpop.f32.mrf.mxu0  ;;  %v6889_v22 = vsel %vm600_vm2, %v6884_v24, %v6888_v16  ;;  %v6759_v24 = vrot.slane %v13006_v56, 1  ;;  %v6873_v56 = vpack.c.b16 %v6872_v31, %v6872_v31 }
 0x371   : > { %v5620_v26 = vpop.f32.mrf.mxu3  ;;  %v5877_v10 = vpop.f32.mrf.mxu1  ;;  %v5238_v41 = vadd.f32 %v5228_v60, %v5092_v23 }
 0x372   : > { %v5640_v5 = vadd.f32 %v5620_v26, %v12905_v42  ;;  %v6760_v58 = vsel %vm474_vm1, %v6757_v47, %v6759_v24  ;;  %v6605_v26 = vunpack.c.l.b16 %v6571_v3 }
 0x373   : > { %v5391_v30 = vadd.f32 %v5381_v59, %v5238_v41 }
 0x374   : > { %v6610_v60 = vpack.c.b16 %v6605_v26, %v6605_v26 }
 0x375   : > { %v13016_v9 = vadd.f32 %v5499_v51, %v5391_v30  ;;  %v7017_v51 = vrot.slane %v13024_v14, 2 }
 0x376   : > { %v6643_v6 = vshll.u32 %v6610_v60, 16 }
 0x377   : > { %v7018_v35 = vsel %vm746_vm3, %v7015_v1, %v7017_v51 }
 0x378   : > { %v6030_v42 = vpop.f32.mrf.mxu2  ;;  %v5729_v21 = vpop.f32.mrf.mxu0 }
 0x379   : > { %v5622_v37 = vpop.f32.mrf.mxu3  ;;  %v5880_v34 = vpop.f32.mrf.mxu1  ;;  %v5749_v27 = vadd.f32 %v5729_v21, %v5640_v5  ;;  %v6895_v5 = vshrl.u32 %v6873_v56, 16  ;;  %v6645_v21 = vrot.slane %v6643_v6, 1 }
 0x37a   : > { %v5641_v54 = vadd.f32 %v5622_v37, %v12928_v33  ;;  %v6639_v33 = vshrl.u32 %v13024_v14, 16  ;;  %v6761_v37 = vrot.slane %v13024_v14, 1 }
 0x37b   : > { %v5895_v63 = vadd.f32 %v5875_v20, %v5749_v27  ;;  %6825 = vmatmul.bf16.vlgmr.msra.gmra.mxu0 %v6758_v8  ;;  %v6897_v47 = vrot.slane %v6895_v5, 1  ;;  %v7019_v8 = vrot.slane %v6873_v56, 2 }
 0x37c   : > { %6968 = vmatmul.bf16.gmra.mxu1 %v6889_v22  ;;  %v6890_v43 = vrot.slane %v6639_v33, 1 }
 0x37d   : > { %7086 = vmatmul.bf16.gmra.mxu2 %v7016_v44  ;;  %v13027_v52 = vadd.f32 %v6028_v61, %v5895_v63  ;;  %v6762_v44 = vsel %vm474_vm1, %v6759_v24, %v6761_v37  ;;  %v7020_v14 = vsel %vm746_vm3, %v7017_v51, %v7019_v8 }
 0x37e   : > { %6712 = vmatmul.bf16.gmra.mxu3 %v6630_v17  ;;  %v6892_v57 = vor.u32 %v6891_v29, %v6890_v43 }
 0x380   : > { %v6033_v36 = vpop.f32.mrf.mxu2  ;;  %v5731_v11 = vpop.f32.mrf.mxu0  ;;  %v6893_v53 = vsel %vm600_vm2, %v6888_v16, %v6892_v57 }
 0x381   : > { %v5625_v59 = vpop.f32.mrf.mxu3  ;;  %v5882_v25 = vpop.f32.mrf.mxu1  ;;  %v5750_v39 = vadd.f32 %v5731_v11, %v5641_v54  ;;  %v6641_v54 = vor.u32 %v6639_v33, %v6637_v28 }
 0x382   : > { %v5642_v19 = vadd.f32 %v5625_v59, %v12956_v0 }
 0x383   : > { %v5896_v18 = vadd.f32 %v5877_v10, %v5750_v39 }
 0x385   : > { %v13034_v23 = vadd.f32 %v6030_v42, %v5896_v18  ;;  %v6763_v18 = vrot.slane %v6610_v60, 1 }
 0x387   : > { %v6764_v51 = vsel %vm474_vm1, %v6761_v37, %v6763_v18 }
 0x388   : > { %v6035_v0 = vpop.f32.mrf.mxu2  ;;  %v5734_v45 = vpop.f32.mrf.mxu0 }
 0x389   : > { %v5627_v15 = vpop.f32.mrf.mxu3  ;;  %v5885_v32 = vpop.f32.mrf.mxu1  ;;  %v5751_v48 = vadd.f32 %v5734_v45, %v5642_v19 }
 0x38a   : > { %v5643_v20 = vadd.f32 %v5627_v15, %v12972_v13  ;;  %v6898_v13 = vshll.u32 %v6873_v56, 16 }
 0x38b   : > { %v5897_v61 = vadd.f32 %v5880_v34, %v5751_v48  ;;  %6830 = vmatmul.bf16.gmra.mxu0 %v6760_v58 }
 0x38c   : > { %6973 = vmatmul.bf16.gmra.mxu1 %v6893_v53  ;;  %v6900_v16 = vrot.slane %v6898_v13, 2 }
 0x38d   : > { %7091 = vmatmul.bf16.gmra.mxu2 %v7018_v35  ;;  %v13042_v10 = vadd.f32 %v6033_v36, %v5897_v61  ;;  %v6646_v36 = vsel %vm240_vm0, %v6641_v54, %v6645_v21 }
 0x38e   : > { %6717 = vmatmul.bf16.gmra.mxu3 %v6638_v46  ;;  %v6901_v42 = vor.u32 %v6900_v16, %v6897_v47 }
 0x390   : > { %v6038_v38 = vpop.f32.mrf.mxu2  ;;  %v5736_v30 = vpop.f32.mrf.mxu0  ;;  %v6902_v49 = vsel %vm600_vm2, %v6892_v57, %v6901_v42 }
 0x391   : > { %v5630_v40 = vpop.f32.mrf.mxu3  ;;  %v5887_v4 = vpop.f32.mrf.mxu1  ;;  %v5752_v50 = vadd.f32 %v5736_v30, %v5643_v20 }
 0x392   : > { %v5644_v41 = vadd.f32 %v5630_v40, %v12993_v55 }
 0x393   : > { %v5898_v1 = vadd.f32 %v5882_v25, %v5752_v50 }
 0x395   : > { %v13046_v34 = vadd.f32 %v6035_v0, %v5898_v1 }
 0x398   : > { %v6040_v27 = vpop.f32.mrf.mxu2  ;;  %v5739_v55 = vpop.f32.mrf.mxu0 }
 0x399   : > { %v5632_v22 = vpop.f32.mrf.mxu3  ;;  %v5890_v63 = vpop.f32.mrf.mxu1  ;;  %v5753_v59 = vadd.f32 %v5739_v55, %v5644_v41 }
 0x39a   : > { %v5645_v17 = vadd.f32 %v5632_v22, %v12998_v2 }
 0x39b   : > { %v5899_v33 = vadd.f32 %v5885_v32, %v5753_v59  ;;  %6835 = vmatmul.bf16.gmra.mxu0 %v6762_v44 }
 0x39c   : > { %6978 = vmatmul.bf16.gmra.mxu1 %v6902_v49 }
 0x39d   : > { %7096 = vmatmul.bf16.gmra.mxu2 %v7020_v14  ;;  %v13053_v19 = vadd.f32 %v6038_v38, %v5899_v33 }
 0x39e   : > { %6722 = vmatmul.bf16.gmra.mxu3 %v6646_v36 }
 0x3a0   : > { %v6043_v2 = vpop.f32.mrf.mxu2  ;;  %v5741_v43 = vpop.f32.mrf.mxu0 }
 0x3a1   : > { %v5635_v11 = vpop.f32.mrf.mxu3  ;;  %v5892_v29 = vpop.f32.mrf.mxu1  ;;  %v5754_v39 = vadd.f32 %v5741_v43, %v5645_v17 }
 0x3a2   : > { %v5646_v25 = vadd.f32 %v5635_v11, %v13009_v7 }
 0x3a3   : > { %v5900_v12 = vadd.f32 %v5887_v4, %v5754_v39 }
 0x3a5   : > { %v13056_v24 = vadd.f32 %v6040_v27, %v5900_v12 }
 0x3a8   : > { %v6045_v31 = vpop.f32.mrf.mxu2  ;;  %v5744_v28 = vpop.f32.mrf.mxu0 }
 0x3a9   : > { %v5637_v57 = vpop.f32.mrf.mxu3  ;;  %v6402_v3 = vpop.f32.mrf.mxu1  ;;  %v5755_v15 = vadd.f32 %v5744_v28, %v5646_v25 }
 0x3aa   : > { %v5647_v62 = vadd.f32 %v5637_v57, %v13016_v9 }
 0x3ab   : > { %v5901_v0 = vadd.f32 %v5890_v63, %v5755_v15  ;;  %6840 = vmatmul.bf16.gmra.mxu0 %v6764_v51 }
 0x3ad   : > { %v13060_v20 = vadd.f32 %v6043_v2, %v5901_v0 }
 0x3b0   : > { %v6535_v45 = vpop.f32.mrf.mxu2  ;;  %v5746_v58 = vpop.f32.mrf.mxu0 }
 0x3b1   : > { %v6146_v7 = vpop.f32.mrf.mxu3  ;;  %v6404_v32 = vpop.f32.mrf.mxu1  ;;  %v5756_v53 = vadd.f32 %v5746_v58, %v5647_v62 }
 0x3b2   : > { %v6166_v44 = vadd.f32 %v6146_v7, %v13027_v52 }
 0x3b3   : > { %v5902_v56 = vadd.f32 %v5892_v29, %v5756_v53 }
 0x3b5   : > { %v13062_v48 = vadd.f32 %v6045_v31, %v5902_v56 }
 0x3b8   : > { %v6537_v35 = vpop.f32.mrf.mxu2  ;;  %v6284_v9 = vpop.f32.mrf.mxu0 }
 0x3b9   : > { %v6148_v46 = vpop.f32.mrf.mxu3  ;;  %v6407_v26 = vpop.f32.mrf.mxu1  ;;  %v6304_v49 = vadd.f32 %v6284_v9, %v6166_v44 }
 0x3ba   : > { %v6167_v11 = vadd.f32 %v6148_v46, %v13034_v23  ;;  %v13100_v23 = vld [vmem:[%s13142_s2] ss:$0 sm:$0xff] }
 0x3bb   : > { %v6422_v33 = vadd.f32 %v6402_v3, %v6304_v49 }
 0x3bd   : > { %v6555_v25 = vadd.f32 %v6535_v45, %v6422_v33 }
 0x3c0   : > { %v6540_v5 = vpop.f32.mrf.mxu2  ;;  %v6286_v13 = vpop.f32.mrf.mxu0 }
 0x3c1   : > { %v6151_v61 = vpop.f32.mrf.mxu3  ;;  %v6409_v60 = vpop.f32.mrf.mxu1  ;;  %v6305_v2 = vadd.f32 %v6286_v13, %v6167_v11 }
 0x3c2   : > { %v6168_v52 = vadd.f32 %v6151_v61, %v13042_v10 }
 0x3c3   : > { %v6423_v57 = vadd.f32 %v6404_v32, %v6305_v2 }
 0x3c5   : > { %v6556_v51 = vadd.f32 %v6537_v35, %v6423_v57 }
 0x3c8   : > { %v13064_v38 = vpop.f32.mrf.mxu2  ;;  %v6289_v41 = vpop.f32.mrf.mxu0 }
 0x3c9   : > { %v6153_v40 = vpop.f32.mrf.mxu3  ;;  %v13066_v30 = vpop.f32.mrf.mxu1  ;;  %v6306_v28 = vadd.f32 %v6289_v41, %v6168_v52 }
 0x3ca   : > { %v6169_v10 = vadd.f32 %v6153_v40, %v13046_v34 }
 0x3cb   : > { %v6424_v53 = vadd.f32 %v6407_v26, %v6306_v28 }
 0x3cd   : > { %v6557_v9 = vadd.f32 %v6540_v5, %v6424_v53  ;;  %v10429_v5 = vld [vmem:[#allocation2 + $0x38] sm:$0xff] }
 0x3d0   : > { %v13068_v47 = vpop.f32.mrf.mxu2  ;;  %v6291_v16 = vpop.f32.mrf.mxu0 }
 0x3d1   : > { %v6156_v4 = vpop.f32.mrf.mxu3  ;;  %v13070_v50 = vpop.f32.mrf.mxu1  ;;  %v6307_v35 = vadd.f32 %v6291_v16, %v6169_v10 }
 0x3d3   : > { %v6425_v49 = vadd.f32 %v6409_v60, %v6307_v35 }
 0x3d5   : > { %v6558_v34 = vadd.f32 %v13064_v38, %v6425_v49 }
 0x3d8   : > { %v13074_v1 = vpop.f32.mrf.mxu2  ;;  %v6294_v37 = vpop.f32.mrf.mxu0 }
 0x3d9   : > { %v13072_v6 = vpop.f32.mrf.mxu3  ;;  %v13076_v42 = vpop.f32.mrf.mxu1 }
 0x3e0   : > { %v13080_v21 = vpop.f32.mrf.mxu2  ;;  %v13082_v8 = vpop.f32.mrf.mxu0 }
 0x3e1   : > { %v13078_v54 = vpop.f32.mrf.mxu3  ;;  %v13084_v22 = vpop.f32.mrf.mxu1 }
 0x3e8   : > { %v13088_v17 = vpop.f32.mrf.mxu2  ;;  %v13090_v55 = vpop.f32.mrf.mxu0 }
 0x3e9   : > { %v13086_v27 = vpop.f32.mrf.mxu3  ;;  %v6964_v63 = vpop.f32.mrf.mxu1 }
 0x3f0   : > { %v7082_v36 = vpop.f32.mrf.mxu2  ;;  %v13093_v14 = vpop.f32.mrf.mxu0 }
 0x3f1   : > { %v6708_v59 = vpop.f32.mrf.mxu3  ;;  %v6966_v43 = vpop.f32.mrf.mxu1 }
 0x3f2   : > { %v6728_v29 = vadd.f32 %v6708_v59, %v6555_v25 }
 0x3f8   : > { %v6826_v12 = vpop.f32.mrf.mxu0  ;;  %v7084_v18 = vpop.f32.mrf.mxu2 }
 0x3f9   : > { %v6710_v39 = vpop.f32.mrf.mxu3  ;;  %v6846_v31 = vadd.f32 %v6826_v12, %v6728_v29  ;;  %v6969_v58 = vpop.f32.mrf.mxu1  ;;  %v7162_v12 = vld [vmem:[#allocation2 + $0x40] sm:$0x7] }
 0x3fa   : > { %v6729_v0 = vadd.f32 %v6710_v39, %v6556_v51 }
 0x3fb   : > { %v6984_v62 = vadd.f32 %v6964_v63, %v6846_v31 }
 0x3fd   : > { %v7102_v15 = vadd.f32 %v7082_v36, %v6984_v62  ;;  %v6170_v36 = vadd.f32 %v6156_v4, %v13053_v19 }
 0x3ff   : > { %v7110_v3 = vadd.f32 %v13100_v23, %v7102_v15  ;;  %v6308_v11 = vadd.f32 %v6294_v37, %v6170_v36  ;;  %v6171_v37 = vadd.f32 %v13072_v6, %v13056_v24 }
 0x400   : > { %v6828_v45 = vpop.f32.mrf.mxu0  ;;  %v7087_v56 = vpop.f32.mrf.mxu2 }
 0x401   : > { %v6713_v7 = vpop.f32.mrf.mxu3  ;;  %7118 = vst [vmem:[#allocation2 + $0x48] sm:$0xff] %v7110_v3  ;;  %v6847_v32 = vadd.f32 %v6828_v45, %v6729_v0  ;;  %v6971_v26 = vpop.f32.mrf.mxu1  ;;  %v6426_v60 = vadd.f32 %v13066_v30, %v6308_v11  ;;  %v6309_v51 = vadd.f32 %v13082_v8, %v6171_v37  ;;  %v6172_v8 = vadd.f32 %v13078_v54, %v13060_v20 }
 0x402   : > { %v6730_v13 = vadd.f32 %v6713_v7, %v6557_v9  ;;  %v6173_v20 = vadd.f32 %v13086_v27, %v13062_v48 }
 0x403   : > { %v6985_v46 = vadd.f32 %v6966_v43, %v6847_v32  ;;  %v6559_v62 = vadd.f32 %v13068_v47, %v6426_v60  ;;  %v6427_v53 = vadd.f32 %v13070_v50, %v6309_v51 }
 0x405   : > { %v7103_v61 = vadd.f32 %v7084_v18, %v6985_v46  ;;  %v6560_v10 = vadd.f32 %v13074_v1, %v6427_v53 }
 0x407   : > { %v7111_v41 = vadd.f32 %v13100_v23, %v7103_v61 }
 0x408   : > { %v6831_v63 = vpop.f32.mrf.mxu0  ;;  %v7163_v2 = vld [vmem:[#allocation2 + $0x46] sm:$0xff]  ;;  %v7089_v25 = vpop.f32.mrf.mxu2 }
 0x409   : > { %v6715_v44 = vpop.f32.mrf.mxu3  ;;  %7119 = vst [vmem:[#allocation2 + $0x50] sm:$0xff] %v7111_v41  ;;  %v6848_v59 = vadd.f32 %v6831_v63, %v6730_v13  ;;  %v7165_v16 = vmax.f32 %v10429_v5, %v7163_v2  ;;  %v6974_v28 = vpop.f32.mrf.mxu1 }
 0x40a   : > { %v6731_v43 = vadd.f32 %v6715_v44, %v6558_v34 }
 0x40b   : > { %v6986_v33 = vadd.f32 %v6969_v58, %v6848_v59  ;;  %v7169_v31 = vrot.slane %v7165_v16, 1 }
 0x40d   : > { %v7104_v40 = vadd.f32 %v7087_v56, %v6986_v33  ;;  %v6310_v56 = vadd.f32 %v13090_v55, %v6172_v8  ;;  %v6311_v55 = vadd.f32 %v13093_v14, %v6173_v20 }
 0x40f   : > { %v7112_v29 = vadd.f32 %v13100_v23, %v7104_v40  ;;  %v6428_v44 = vadd.f32 %v13076_v42, %v6310_v56  ;;  %v6429_v34 = vadd.f32 %v13084_v22, %v6311_v55 }
 0x410   : > { %v7164_v18 = vld [vmem:[#allocation2 + $0x4e] sm:$0x7]  ;;  %v6833_v57 = vpop.f32.mrf.mxu0  ;;  %v7092_v7 = vpop.f32.mrf.mxu2 }
 0x411   : > { %v6718_v39 = vpop.f32.mrf.mxu3  ;;  %v7166_v19 = vmax.f32 %v7162_v12, %v7164_v18  ;;  %7120 = vst [vmem:[#allocation2 + $0x58] sm:$0xff] %v7112_v29  ;;  %v6849_v4 = vadd.f32 %v6833_v57, %v6731_v43  ;;  %v6976_v35 = vpop.f32.mrf.mxu1  ;;  %v6561_v1 = vadd.f32 %v13080_v21, %v6428_v44  ;;  %v6562_v12 = vadd.f32 %v13088_v17, %v6429_v34 }
 0x412   : > { %v6732_v45 = vadd.f32 %v6718_v39, %v6559_v62 }
 0x413   : > { %v7170_v38 = vrot.slane %v7166_v19, 1  ;;  %v6987_v52 = vadd.f32 %v6971_v26, %v6849_v4 }
 0x415   : > { %v7171_v15 = vsel %vm474_vm1, %v7169_v31, %v7170_v38  ;;  %v7175_v0 = vmax.f32 %v7166_v19, %v7170_v38  ;;  %v7105_v30 = vadd.f32 %v7089_v25, %v6987_v52  ;;  %v7212_v52 = vld [vmem:[#allocation3] ss:$2 sm:$0xff] }
 0x416   : > { %v7174_v3 = vmax.f32 %v7165_v16, %v7171_v15  ;;  %v7219_v17 = vmax.f32 %v7212_v52, 0.0 }
 0x417   : > { %7177 = vst [vmem:[#allocation3 + $0x1c] sm:$0x3] %v7175_v0  ;;  %v7113_v58 = vadd.f32 %v13100_v23, %v7105_v30 }
 0x418   : > { %7176 = vst [vmem:[#allocation3 + $0x14] sm:$0xff] %v7174_v3  ;;  %v6836_v6 = vpop.f32.mrf.mxu0  ;;  %v7094_v13 = vpop.f32.mrf.mxu2  ;;  %v7178_v59 = vld [vmem:[#allocation2 + $0x54] sm:$0xff]  ;;  %v7179_v33 = vld [vmem:[#allocation2 + $0x5c] sm:$0x7] }
 0x419   : > { %v6720_v24 = vpop.f32.mrf.mxu3  ;;  %7121 = vst [vmem:[#allocation2 + $0x60] sm:$0xff] %v7113_v58  ;;  %v6850_v47 = vadd.f32 %v6836_v6, %v6732_v45  ;;  %v6979_v42 = vpop.f32.mrf.mxu1 }
 0x41a   : > { %v6733_v9 = vadd.f32 %v6720_v24, %v6560_v10 }
 0x41b   : > { %v6988_v32 = vadd.f32 %v6974_v28, %v6850_v47 }
 0x41d   : > { %v7106_v46 = vadd.f32 %v7092_v7, %v6988_v32 }
 0x41f   : > { %v7114_v61 = vadd.f32 %v13100_v23, %v7106_v46  ;;  %v7233_v46 = vld [vmem:[%s170_s4 + $0xc] sm:$0x1] }
 0x420   : > { %v6838_v41 = vpop.f32.mrf.mxu0  ;;  %v7097_v27 = vpop.f32.mrf.mxu2 }
 0x421   : > { %7122 = vst [vmem:[#allocation2 + $0x68] sm:$0xff] %v7114_v61  ;;  %v6851_v50 = vadd.f32 %v6838_v41, %v6733_v9  ;;  %v6723_v63 = vpop.f32.mrf.mxu3  ;;  %v6981_v37 = vpop.f32.mrf.mxu1 }
 0x422   : > { %v6734_v36 = vadd.f32 %v6723_v63, %v6561_v1 }
 0x423   : > { %v6989_v54 = vadd.f32 %v6976_v35, %v6851_v50 }
 0x425   : > { %v7107_v49 = vadd.f32 %v7094_v13, %v6989_v54 }
 0x427   : > { %v7115_v26 = vadd.f32 %v13100_v23, %v7107_v49 }
 0x428   : > { %v7180_v11 = vld [vmem:[#allocation2 + $0x62] sm:$0xff]  ;;  %v7181_v2 = vld [vmem:[#allocation2 + $0x6a] sm:$0x7]  ;;  %v6841_v25 = vpop.f32.mrf.mxu0  ;;  %v7099_v38 = vpop.f32.mrf.mxu2 }
 0x429   : > { %v7182_v40 = vmax.f32 %v7178_v59, %v7180_v11  ;;  %v7183_v5 = vmax.f32 %v7179_v33, %v7181_v2  ;;  %v6852_v48 = vadd.f32 %v6841_v25, %v6734_v36  ;;  %v6725_v21 = vpop.f32.mrf.mxu3 }
 0x42a   : > { %v6735_v57 = vadd.f32 %v6725_v21, %v6562_v12 }
 0x42b   : > { %v7186_v16 = vrot.slane %v7182_v40, 1  ;;  %v7187_v14 = vrot.slane %v7183_v5, 1  ;;  %v6990_v43 = vadd.f32 %v6979_v42, %v6852_v48 }
 0x42d   : > { %v7188_v29 = vsel %vm474_vm1, %v7186_v16, %v7187_v14  ;;  %v7192_v39 = vmax.f32 %v7183_v5, %v7187_v14  ;;  %v7108_v60 = vadd.f32 %v7097_v27, %v6990_v43 }
 0x42e   : > { %v7191_v18 = vmax.f32 %v7182_v40, %v7188_v29 }
 0x42f   : > { %7194 = vst [vmem:[#allocation3 + $0x26] sm:$0x3] %v7192_v39  ;;  %v7116_v22 = vadd.f32 %v13100_v23, %v7108_v60 }
 0x430   : > { %7193 = vst [vmem:[#allocation3 + $0x1e] sm:$0xff] %v7191_v18  ;;  %v6843_v19 = vpop.f32.mrf.mxu0 }
 0x431   : > { %7124 = vst [vmem:[#allocation2 + $0x78] sm:$0xff] %v7116_v22  ;;  %v6853_v4 = vadd.f32 %v6843_v19, %v6735_v57 }
 0x433   : > { %v6991_v31 = vadd.f32 %v6981_v37, %v6853_v4 }
 0x435   : > { %v7109_v62 = vadd.f32 %v7099_v38, %v6991_v31 }
 0x437   : > { %v7214_v28 = vld [vmem:[#allocation3 + $0x10] ss:$2 sm:$0xff]  ;;  %v7117_v51 = vadd.f32 %v13100_v23, %v7109_v62 }
 0x438   : > { %v7220_v15 = vmax.f32 %v7214_v28, 0.0  ;;  %v7196_v30 = vld [vmem:[#allocation2 + $0x78] sm:$0x7] }
 0x439   : > { %7125 = vst [vmem:[#allocation2 + $0x80] sm:$0xff] %v7117_v51 }
 0x43a   : > { %v10306_v0 = vpack.c.bf16 %v7220_v15, %v7219_v17 }
 0x43c   : > { %10307 = vst [vmem:[%s170_s4] sm:$0xff] %v10306_v0  }
 0x440   : > { %v7197_v3 = vld [vmem:[#allocation2 + $0x7e] sm:$0xff]  ;;  %v7198_v7 = vld [vmem:[#allocation2 + $0x86] sm:$0x7] }
 0x441   : > { %v7199_v45 = vmax.f32 %v7115_v26, %v7197_v3  ;;  %v7200_v58 = vmax.f32 %v7196_v30, %v7198_v7 }
 0x443   : > { %v7203_v24 = vrot.slane %v7199_v45, 1  ;;  %v7204_v6 = vrot.slane %v7200_v58, 1 }
 0x445   : > { %v7205_v53 = vsel %vm474_vm1, %v7203_v24, %v7204_v6  ;;  %v7209_v47 = vmax.f32 %v7200_v58, %v7204_v6 }
 0x446   : > { %v7208_v23 = vmax.f32 %v7199_v45, %v7205_v53 }
 0x447   : > { %7211 = vst [vmem:[#allocation3 + $0x30] sm:$0x3] %v7209_v47 }
 0x448   : > { %7210 = vst [vmem:[#allocation3 + $0x28] sm:$0xff] %v7208_v23 }
 0x44e   : > { %v7218_v8 = vld [vmem:[#allocation3 + $0x30] ss:$2 sm:$0x1] }
 0x44f   : > { %v7216_v32 = vld [vmem:[#allocation3 + $0x20] ss:$2 sm:$0xff]  ;;  %v7222_v56 = vmax.f32 %v7218_v8, 0.0 }
 0x450   : > { %v7221_v10 = vmax.f32 %v7216_v32, 0.0 }
 0x451   : > { %v7226_v35 = vpack.c.bf16 %v7222_v56, %v7222_v56 }
 0x452   : > { %v7225_v9 = vpack.c.bf16 %v7221_v10, %v7221_v10 }
 0x453   : > { %v7234_v61 = vsel %vm7232_vm9, %v7226_v35, %v7233_v46 }
 0x454   : > { %7229 = vst [vmem:[%s170_s4 + $0x8] sm:$0xf] %v7225_v9 }
 0x455   : > { %7235 = vst [vmem:[%s170_s4 + $0xc] sm:$0x1] %v7234_v61 }
 0x456 PF: > { %s13_s12 = sadd.s32 1, %s10436_s12  }
 0x457   : > { %p10_p4 = scmp.ge.s32.totalorder %s13_s12, 4  }
 0x459   :  { %12 = sbr.rel (!%p10_p4) target bundleno = 1 (0x1), region = 89 }

</bundles_post_ra>
